<compile_context>
chip_gen: v7x
topology: tpu7x:2x2x1
jax: 0.10.0
libtpu: 0.0.40
codegen_flags: <defaults>
</compile_context>

<pallas_src>
import jax
import jax.numpy as jnp
from jax.experimental import pallas as pl
from jax.experimental.pallas import tpu as pltpu

EPS = 1e-5                        # nn.BatchNorm1d default eps
_INV_SQRT2 = 0.7071067811865476


# ----------------------------------------------------------------------------
# Kernels
# ----------------------------------------------------------------------------
def _colstats_kernel(x_ref, pivot_ref, stats_ref):
    """Pass 1: per-tile shifted sum / sum-of-squares of x (pivot-centered)."""
    xc = x_ref[...] - pivot_ref[...]                          # (TN, D) f32
    s = jnp.sum(xc, axis=0, keepdims=True)                    # (1, D)
    ss = jnp.sum(xc * xc, axis=0, keepdims=True)              # (1, D)
    stats_ref[...] = jnp.concatenate([s, ss], axis=0)[None]   # (1, 2, D)


def _stage1_kernel(x_ref, st1_ref, w1_ref, b1_ref, h_ref, hstats_ref):
    """Pass 2: BN1 (folded scale/shift) -> Linear1 -> GELU; emit bf16 h + stats."""
    # BN1 normalize + affine, f32 elementwise (VPU).
    xn = x_ref[...] * st1_ref[0:1, :] + st1_ref[1:2, :]        # (TN, D) f32

    # Linear(dim -> hidden): bf16 operands on the MXU, f32 accumulation.
    h = jnp.dot(xn.astype(jnp.bfloat16), w1_ref[...],
                preferred_element_type=jnp.float32)            # (TN, H) f32
    h = h + b1_ref[...]

    # Exact erf GELU (PyTorch nn.GELU default), f32.
    # TODO(synk): on v6e the f32 erf polynomial is the VALU-binding slot at
    #             small matmul sizes; a bf16 or tanh-approx GELU would relieve
    #             it at a small accuracy / semantics cost.
    h = 0.5 * h * (1.0 + jax.lax.erf(h * jnp.float32(_INV_SQRT2)))

    # BN2 partial statistics from the f32 value (before the bf16 downcast).
    hs = jnp.sum(h, axis=0, keepdims=True)                     # (1, H)
    hss = jnp.sum(h * h, axis=0, keepdims=True)                # (1, H)
    hstats_ref[...] = jnp.concatenate([hs, hss], axis=0)[None]

    # bf16 intermediate halves the h HBM round-trip.
    h_ref[...] = h.astype(jnp.bfloat16)


def _stage2_kernel(h_ref, st2_ref, w2_ref, b2_ref, o_ref):
    """Pass 3: BN2 (folded scale/shift) -> Linear2."""
    hn = (h_ref[...].astype(jnp.float32) * st2_ref[0:1, :]
          + st2_ref[1:2, :])                                   # (TN, H) f32
    o = jnp.dot(hn.astype(jnp.bfloat16), w2_ref[...],
                preferred_element_type=jnp.float32)            # (TN, D) f32
    o_ref[...] = o + b2_ref[...]


# ----------------------------------------------------------------------------
# Budget / tiling helpers
# ----------------------------------------------------------------------------
def _vmem_limits():
    """Generation-aware VMEM limit (for the compiler) and tile-pick budget."""
    cap = 64 * 1024 * 1024                     # conservative default (v7x/TC)
    try:
        info = pltpu.get_tpu_info()
        cap = int(getattr(info, "vmem_capacity_bytes", cap))
    except Exception:
        pass
    limit = int(cap * 0.75)                    # headroom for compiler scratch
    budget = int(limit * 0.7)                  # headroom for spills / misc
    return limit, budget


def _pick_block_n(n, stream_bytes_per_row, resident_bytes, budget_bytes):
    """Largest batch tile (divides N) whose double-buffered streamed tiles plus
    resident weights/params fit the VMEM budget."""
    divisors = [c for c in (1024, 512, 256, 128, 64, 32, 16) if n % c == 0]
    for cand in divisors:
        if resident_bytes + 2 * cand * stream_bytes_per_row <= budget_bytes:
            return cand
    if divisors:
        return divisors[-1]
    return n                                    # grid=(1,) fallback


def _compiler_params(semantics, vmem_limit):
    return pltpu.CompilerParams(
        dimension_semantics=semantics,
        vmem_limit_bytes=vmem_limit,
    )


def _bn_scale_shift(s, ss, n, gamma, beta, pivot=None):
    """Fold (possibly pivot-shifted) batch stats + affine into scale/shift."""
    mean_c = s / n                                  # mean of (x - pivot)
    var = jnp.maximum(ss / n - mean_c * mean_c, 0.0)  # biased var, clamp >= 0
    mu = mean_c if pivot is None else mean_c + pivot
    scale = gamma * jax.lax.rsqrt(var + EPS)
    shift = beta - mu * scale
    return scale, shift


# ----------------------------------------------------------------------------
# pallas_call wrappers
# ----------------------------------------------------------------------------
def _column_stats(x, pivot, block_n, vmem_limit):
    n, d = x.shape
    g = n // block_n
    return pl.pallas_call(
        _colstats_kernel,
        out_shape=jax.ShapeDtypeStruct((g, 2, d), jnp.float32),
        grid_spec=pltpu.PrefetchScalarGridSpec(
            num_scalar_prefetch=0,
            grid=(g,),
            in_specs=[
                pl.BlockSpec((block_n, d), lambda i: (i, 0)),     # x (tiled)
                pl.BlockSpec((1, d), lambda i: (0, 0)),           # pivot
            ],
            out_specs=pl.BlockSpec((1, 2, d), lambda i: (i, 0, 0))),
        compiler_params=_compiler_params(("parallel",), vmem_limit),
        cost_estimate=pl.CostEstimate(
            flops=4 * n * d, transcendentals=0,
            bytes_accessed=n * d * 4 + d * 4 + g * 2 * d * 4),
    )(x, pivot)


def _stage1(x, st1, w1_bf16, b1, block_n, vmem_limit):
    n, d = x.shape
    h_dim = w1_bf16.shape[1]
    g = n // block_n
    return pl.pallas_call(
        _stage1_kernel,
        out_shape=(jax.ShapeDtypeStruct((n, h_dim), jnp.bfloat16),
                   jax.ShapeDtypeStruct((g, 2, h_dim), jnp.float32)),
        grid_spec=pltpu.PrefetchScalarGridSpec(
            num_scalar_prefetch=0,
            grid=(g,),
            in_specs=[
                pl.BlockSpec((block_n, d), lambda i: (i, 0)),      # x (tiled)
                pl.BlockSpec((2, d), lambda i: (0, 0)),            # scale/shift
                pl.BlockSpec((d, h_dim), lambda i: (0, 0)),        # w1 (resident)
                pl.BlockSpec((1, h_dim), lambda i: (0, 0)),        # b1
            ],
            out_specs=(
                pl.BlockSpec((block_n, h_dim), lambda i: (i, 0)),  # h bf16 (tiled)
                pl.BlockSpec((1, 2, h_dim), lambda i: (i, 0, 0)),  # partial stats
            )),
        compiler_params=_compiler_params(("parallel",), vmem_limit),
        cost_estimate=pl.CostEstimate(
            flops=2 * n * d * h_dim + 12 * n * h_dim,
            transcendentals=n * h_dim,
            bytes_accessed=(n * d * 4 + d * h_dim * 2 + n * h_dim * 2
                            + g * 2 * h_dim * 4 + 8 * d + 4 * h_dim)),
    )(x, st1, w1_bf16, b1)


def _stage2(h, st2, w2_bf16, b2, block_n, vmem_limit):
    n, h_dim = h.shape
    d = w2_bf16.shape[1]
    g = n // block_n
    return pl.pallas_call(
        _stage2_kernel,
        out_shape=jax.ShapeDtypeStruct((n, d), jnp.float32),
        grid_spec=pltpu.PrefetchScalarGridSpec(
            num_scalar_prefetch=0,
            grid=(g,),
            in_specs=[
                pl.BlockSpec((block_n, h_dim), lambda i: (i, 0)),  # h bf16 (tiled)
                pl.BlockSpec((2, h_dim), lambda i: (0, 0)),        # scale/shift
                pl.BlockSpec((h_dim, d), lambda i: (0, 0)),        # w2 (resident)
                pl.BlockSpec((1, d), lambda i: (0, 0)),            # b2
            ],
            out_specs=pl.BlockSpec((block_n, d), lambda i: (i, 0))),
        compiler_params=_compiler_params(("parallel",), vmem_limit),
        cost_estimate=pl.CostEstimate(
            flops=2 * n * h_dim * d + 2 * n * h_dim,
            transcendentals=0,
            bytes_accessed=(n * h_dim * 2 + h_dim * d * 2 + n * d * 4
                            + 8 * h_dim + 4 * d)),
    )(h, st2, w2_bf16, b2)


def feedforward(x, params):
    """x: (N, dim) f32.  params: dict of BN/Linear parameters (see make_params)."""
    n, d = x.shape
    h_dim = params["w1"].shape[1]
    vmem_limit, budget = _vmem_limits()

    # Weights in bf16 (MXU-native, halves weight HBM traffic); biases in f32.
    w1 = params["w1"].astype(jnp.bfloat16)
    w2 = params["w2"].astype(jnp.bfloat16)
    b1 = params["b1"].astype(jnp.float32)
    b2 = params["b2"].astype(jnp.float32)

    # ---- Pass 1: BN1 batch statistics of x (shifted sums, pivot = row 0). ----
    pivot = x[0:1, :]
    bn_stats = _pick_block_n(
        n, stream_bytes_per_row=d * 4, resident_bytes=4 * d * 4,
        budget_bytes=budget)
    stats1 = _column_stats(x, pivot, bn_stats, vmem_limit)
    tot1 = jnp.sum(stats1, axis=0)                         # (2, D)
    scale1, shift1 = _bn_scale_shift(tot1[0:1], tot1[1:2], n,
                                     params["bn1_gamma"], params["bn1_beta"],
                                     pivot=pivot)
    st1 = jnp.concatenate([scale1, shift1], axis=0)        # (2, D)

    # ---- Pass 2: BN1 -> Linear1 -> GELU, bf16 h + BN2 statistics. ----
    resident1 = d * h_dim * 2 + 2 * d * 4 + h_dim * 4      # w1 + st1 + b1
    stream1 = d * 4 + h_dim * 2                            # x in f32, h out bf16
    bn1 = _pick_block_n(n, stream1, resident1, budget)
    h, stats2 = _stage1(x, st1, w1, b1, bn1, vmem_limit)
    tot2 = jnp.sum(stats2, axis=0)                         # (2, H)
    scale2, shift2 = _bn_scale_shift(tot2[0:1], tot2[1:2], n,
                                     params["bn2_gamma"], params["bn2_beta"])
    st2 = jnp.concatenate([scale2, shift2], axis=0)        # (2, H)

    # ---- Pass 3: BN2 -> Linear2. ----
    resident2 = h_dim * d * 2 + 2 * h_dim * 4 + d * 4      # w2 + st2 + b2
    stream2 = h_dim * 2 + d * 4                            # h in bf16, out f32
    bn2 = _pick_block_n(n, stream2, resident2, budget)
    return _stage2(h, st2, w2, b2, bn2, vmem_limit)


# ----------------------------------------------------------------------------
# Parameters / reference / test
# ----------------------------------------------------------------------------
def make_params(key, dim, hidden_dim):
    """Deterministic synthetic parameter init (shapes match the nn.Module).
    Linear weights stored pre-transposed as (in_features, out_features)."""
    ks = jax.random.split(key, 6)
    w1 = (jax.random.normal(ks[0], (dim, hidden_dim), jnp.float32)
          / jnp.sqrt(dim).astype(jnp.float32))
    b1 = jax.random.normal(ks[1], (1, hidden_dim), jnp.float32) * 0.01
    w2 = (jax.random.normal(ks[2], (hidden_dim, dim), jnp.float32)
          / jnp.sqrt(hidden_dim).astype(jnp.float32))
    b2 = jax.random.normal(ks[3], (1, dim), jnp.float32) * 0.01
    bn1_gamma = 1.0 + 0.1 * jax.random.normal(ks[4], (1, dim), jnp.float32)
    bn1_beta = jnp.zeros((1, dim), jnp.float32)
    bn2_gamma = 1.0 + 0.1 * jax.random.normal(ks[5], (1, hidden_dim), jnp.float32)
    bn2_beta = jnp.zeros((1, hidden_dim), jnp.float32)
    return dict(w1=w1, b1=b1, w2=w2, b2=b2,
                bn1_gamma=bn1_gamma, bn1_beta=bn1_beta,
                bn2_gamma=bn2_gamma, bn2_beta=bn2_beta)


def feedforward_ref(x, p):
    """Pure-JAX f32 reference with PyTorch training-mode BN semantics."""
    mu1 = x.mean(0, keepdims=True)
    v1 = ((x - mu1) ** 2).mean(0, keepdims=True)
    xn = (x - mu1) / jnp.sqrt(v1 + EPS) * p["bn1_gamma"] + p["bn1_beta"]
    h = xn @ p["w1"] + p["b1"]
    h = jax.nn.gelu(h, approximate=False)
    mu2 = h.mean(0, keepdims=True)
    v2 = ((h - mu2) ** 2).mean(0, keepdims=True)
    hn = (h - mu2) / jnp.sqrt(v2 + EPS) * p["bn2_gamma"] + p["bn2_beta"]
    return hn @ p["w2"] + p["b2"]


if __name__ == "__main__":
    # Lane-dense feature dims (multiples of 128) and a batch large enough that
    # every pass runs a multi-tile, pipelined grid with per-tile partial stats.
    dim, hidden_dim, batch = 128, 256, 2048

    key = jax.random.PRNGKey(0)
    kx, kp = jax.random.split(key)
    x = jax.random.normal(kx, (batch, dim), jnp.float32)
    params = make_params(kp, dim, hidden_dim)

    out = jax.jit(feedforward)(x, params)
    out = jax.block_until_ready(out)

    ref = feedforward_ref(x, params)
    assert out.shape == (batch, dim)
    # bf16 matmul operands / bf16 h intermediate (f32 accumulation) loosen
    # agreement with the pure-f32 reference; observed error is ~1e-2 worst-case.
    max_err = float(jnp.max(jnp.abs(out - ref)))
    assert jnp.allclose(out, ref, atol=5e-2, rtol=5e-2), \
        f"mismatch vs reference (max abs err {max_err})"

    print("KERNEL_OK")
</pallas_src>

<mosaic_0001>
module attributes {stable_mosaic.version = 11 : i64} {
  func.func @_colstats_kernel(%arg0: i32, %arg1: memref<1024x128xf32, #tpu.memory_space<vmem>>, %arg2: memref<1x128xf32, #tpu.memory_space<vmem>>, %arg3: memref<1x2x128xf32, #tpu.memory_space<vmem>>) attributes {dimension_semantics = [#tpu.dimension_semantics<parallel>], iteration_bounds = array<i64: 2>, scalar_prefetch = 0 : i64, scratch_operands = 0 : i64, tpu.core_type = #tpu.core_type<tc>, window_params = [{transform_indices = @transform_0, window_bounds = array<i64: 1024, 128>}, {pipeline_mode = #tpu.pipeline_mode<synchronous>, transform_indices = @transform_1, window_bounds = array<i64: 1, 128>}, {transform_indices = @transform_2, window_bounds = array<i64: 1, 2, 128>}]} {
    %c0 = arith.constant 0 : index
    %c0_0 = arith.constant 0 : index
    %0 = vector.load %arg1[%c0, %c0_0] : memref<1024x128xf32, #tpu.memory_space<vmem>>, vector<1024x128xf32>
    %c0_1 = arith.constant 0 : index
    %c0_2 = arith.constant 0 : index
    %1 = vector.load %arg2[%c0_1, %c0_2] : memref<1x128xf32, #tpu.memory_space<vmem>>, vector<1x128xf32>
    %2 = vector.broadcast %1 : vector<1x128xf32> to vector<1024x128xf32>
    %3 = arith.subf %0, %2 : vector<1024x128xf32>
    %cst = arith.constant dense<0.000000e+00> : vector<128xf32>
    %4 = vector.multi_reduction <add>, %3, %cst [0] : vector<1024x128xf32> to vector<128xf32>
    %5 = vector.shape_cast %4 : vector<128xf32> to vector<1x128xf32>
    %6 = arith.mulf %3, %3 : vector<1024x128xf32>
    %cst_3 = arith.constant dense<0.000000e+00> : vector<128xf32>
    %7 = vector.multi_reduction <add>, %6, %cst_3 [0] : vector<1024x128xf32> to vector<128xf32>
    %8 = vector.shape_cast %7 : vector<128xf32> to vector<1x128xf32>
    %9 = tpu.concatenate %5, %8 in 0 : vector<1x128xf32>, vector<1x128xf32> -> vector<2x128xf32>
    %10 = vector.shape_cast %9 : vector<2x128xf32> to vector<1x2x128xf32>
    %c0_4 = arith.constant 0 : index
    %c0_5 = arith.constant 0 : index
    %c0_6 = arith.constant 0 : index
    %11 = vector.load %arg3[%c0_4, %c0_5, %c0_6] : memref<1x2x128xf32, #tpu.memory_space<vmem>>, vector<1x2x128xf32>
    tpu.vector_store %arg3[%c0_4, %c0_5, %c0_6], %10 {strides = array<i32>} : memref<1x2x128xf32, #tpu.memory_space<vmem>>, vector<1x2x128xf32>,
    return
  }
  func.func @transform_0(%arg0: i32) -> (i32, i32) {
    %c0_i32 = arith.constant 0 : i32
    %c0_i32_0 = arith.constant 0 : i32
    return %arg0, %c0_i32 : i32, i32
  }
  func.func @transform_1(%arg0: i32) -> (i32, i32) {
    %c0_i32 = arith.constant 0 : i32
    %c0_i32_0 = arith.constant 0 : i32
    %c0_i32_1 = arith.constant 0 : i32
    return %c0_i32, %c0_i32_0 : i32, i32
  }
  func.func @transform_2(%arg0: i32) -> (i32, i32, i32) {
    %c0_i32 = arith.constant 0 : i32
    %c0_i32_0 = arith.constant 0 : i32
    %c0_i32_1 = arith.constant 0 : i32
    return %arg0, %c0_i32, %c0_i32_0 : i32, i32, i32
  }
}

module attributes {stable_mosaic.version = 11 : i64} {
  func.func @_stage1_kernel(%arg0: i32, %arg1: memref<1024x128xf32, #tpu.memory_space<vmem>>, %arg2: memref<2x128xf32, #tpu.memory_space<vmem>>, %arg3: memref<128x256xbf16, #tpu.memory_space<vmem>>, %arg4: memref<1x256xf32, #tpu.memory_space<vmem>>, %arg5: memref<1024x256xbf16, #tpu.memory_space<vmem>>, %arg6: memref<1x2x256xf32, #tpu.memory_space<vmem>>) attributes {dimension_semantics = [#tpu.dimension_semantics<parallel>], iteration_bounds = array<i64: 2>, scalar_prefetch = 0 : i64, scratch_operands = 0 : i64, tpu.core_type = #tpu.core_type<tc>, window_params = [{transform_indices = @transform_0, window_bounds = array<i64: 1024, 128>}, {pipeline_mode = #tpu.pipeline_mode<synchronous>, transform_indices = @transform_1, window_bounds = array<i64: 2, 128>}, {pipeline_mode = #tpu.pipeline_mode<synchronous>, transform_indices = @transform_2, window_bounds = array<i64: 128, 256>}, {pipeline_mode = #tpu.pipeline_mode<synchronous>, transform_indices = @transform_3, window_bounds = array<i64: 1, 256>}, {transform_indices = @transform_4, window_bounds = array<i64: 1024, 256>}, {transform_indices = @transform_5, window_bounds = array<i64: 1, 2, 256>}]} {
    %c0 = arith.constant 0 : index
    %c0_0 = arith.constant 0 : index
    %0 = vector.load %arg1[%c0, %c0_0] : memref<1024x128xf32, #tpu.memory_space<vmem>>, vector<1024x128xf32>
    %c0_1 = arith.constant 0 : index
    %c0_2 = arith.constant 0 : index
    %1 = vector.load %arg2[%c0_1, %c0_2] : memref<2x128xf32, #tpu.memory_space<vmem>>, vector<1x128xf32>
    %2 = vector.broadcast %1 : vector<1x128xf32> to vector<1024x128xf32>
    %3 = arith.mulf %0, %2 : vector<1024x128xf32>
    %c1 = arith.constant 1 : index
    %c0_3 = arith.constant 0 : index
    %4 = vector.load %arg2[%c1, %c0_3] : memref<2x128xf32, #tpu.memory_space<vmem>>, vector<1x128xf32>
    %5 = vector.broadcast %4 : vector<1x128xf32> to vector<1024x128xf32>
    %6 = arith.addf %3, %5 : vector<1024x128xf32>
    %7 = arith.truncf %6 : vector<1024x128xf32> to vector<1024x128xbf16>
    %c0_4 = arith.constant 0 : index
    %c0_5 = arith.constant 0 : index
    %8 = vector.load %arg3[%c0_4, %c0_5] : memref<128x256xbf16, #tpu.memory_space<vmem>>, vector<128x256xbf16>
    %cst = arith.constant dense<0.000000e+00> : vector<1024x256xf32>
    %9 = tpu.matmul %7, %8, %cst {dimension_numbers = #tpu.dot_dimension_numbers<[1], [0], [0], [1], [0, 0, 1, 1], [], []>} : vector<1024x128xbf16>, vector<128x256xbf16>, vector<1024x256xf32> -> vector<1024x256xf32>
    %c0_6 = arith.constant 0 : index
    %c0_7 = arith.constant 0 : index
    %10 = vector.load %arg4[%c0_6, %c0_7] : memref<1x256xf32, #tpu.memory_space<vmem>>, vector<1x256xf32>
    %11 = vector.broadcast %10 : vector<1x256xf32> to vector<1024x256xf32>
    %12 = arith.addf %9, %11 : vector<1024x256xf32>
    %cst_8 = arith.constant 5.000000e-01 : f32
    %13 = vector.broadcast %cst_8 : f32 to vector<1024x256xf32>
    %14 = arith.mulf %13, %12 : vector<1024x256xf32>
    %cst_9 = arith.constant 0.707106769 : f32
    %15 = vector.broadcast %cst_9 : f32 to vector<1024x256xf32>
    %16 = arith.mulf %12, %15 : vector<1024x256xf32>
    %17 = math.erf %16 : vector<1024x256xf32>
    %cst_10 = arith.constant 1.000000e+00 : f32
    %18 = vector.broadcast %cst_10 : f32 to vector<1024x256xf32>
    %19 = arith.addf %18, %17 : vector<1024x256xf32>
    %20 = arith.mulf %14, %19 : vector<1024x256xf32>
    %cst_11 = arith.constant dense<0.000000e+00> : vector<256xf32>
    %21 = vector.multi_reduction <add>, %20, %cst_11 [0] : vector<1024x256xf32> to vector<256xf32>
    %22 = vector.shape_cast %21 : vector<256xf32> to vector<1x256xf32>
    %23 = arith.mulf %20, %20 : vector<1024x256xf32>
    %cst_12 = arith.constant dense<0.000000e+00> : vector<256xf32>
    %24 = vector.multi_reduction <add>, %23, %cst_12 [0] : vector<1024x256xf32> to vector<256xf32>
    %25 = vector.shape_cast %24 : vector<256xf32> to vector<1x256xf32>
    %26 = tpu.concatenate %22, %25 in 0 : vector<1x256xf32>, vector<1x256xf32> -> vector<2x256xf32>
    %27 = vector.shape_cast %26 : vector<2x256xf32> to vector<1x2x256xf32>
    %c0_13 = arith.constant 0 : index
    %c0_14 = arith.constant 0 : index
    %c0_15 = arith.constant 0 : index
    %28 = vector.load %arg6[%c0_13, %c0_14, %c0_15] : memref<1x2x256xf32, #tpu.memory_space<vmem>>, vector<1x2x256xf32>
    tpu.vector_store %arg6[%c0_13, %c0_14, %c0_15], %27 {strides = array<i32>} : memref<1x2x256xf32, #tpu.memory_space<vmem>>, vector<1x2x256xf32>,
    %29 = arith.truncf %20 : vector<1024x256xf32> to vector<1024x256xbf16>
    %c0_16 = arith.constant 0 : index
    %c0_17 = arith.constant 0 : index
    %30 = vector.load %arg5[%c0_16, %c0_17] : memref<1024x256xbf16, #tpu.memory_space<vmem>>, vector<1024x256xbf16>
    tpu.vector_store %arg5[%c0_16, %c0_17], %29 {strides = array<i32>} : memref<1024x256xbf16, #tpu.memory_space<vmem>>, vector<1024x256xbf16>,
    return
  }
  func.func @transform_0(%arg0: i32) -> (i32, i32) {
    %c0_i32 = arith.constant 0 : i32
    %c0_i32_0 = arith.constant 0 : i32
    return %arg0, %c0_i32 : i32, i32
  }
  func.func @transform_1(%arg0: i32) -> (i32, i32) {
    %c0_i32 = arith.constant 0 : i32
    %c0_i32_0 = arith.constant 0 : i32
    %c0_i32_1 = arith.constant 0 : i32
    return %c0_i32, %c0_i32_0 : i32, i32
  }
  func.func @transform_2(%arg0: i32) -> (i32, i32) {
    %c0_i32 = arith.constant 0 : i32
    %c0_i32_0 = arith.constant 0 : i32
    %c0_i32_1 = arith.constant 0 : i32
    return %c0_i32, %c0_i32_0 : i32, i32
  }
  func.func @transform_3(%arg0: i32) -> (i32, i32) {
    %c0_i32 = arith.constant 0 : i32
    %c0_i32_0 = arith.constant 0 : i32
    %c0_i32_1 = arith.constant 0 : i32
    return %c0_i32, %c0_i32_0 : i32, i32
  }
  func.func @transform_4(%arg0: i32) -> (i32, i32) {
    %c0_i32 = arith.constant 0 : i32
    %c0_i32_0 = arith.constant 0 : i32
    return %arg0, %c0_i32 : i32, i32
  }
  func.func @transform_5(%arg0: i32) -> (i32, i32, i32) {
    %c0_i32 = arith.constant 0 : i32
    %c0_i32_0 = arith.constant 0 : i32
    %c0_i32_1 = arith.constant 0 : i32
    return %arg0, %c0_i32, %c0_i32_0 : i32, i32, i32
  }
}

module attributes {stable_mosaic.version = 11 : i64} {
  func.func @_stage2_kernel(%arg0: i32, %arg1: memref<1024x256xbf16, #tpu.memory_space<vmem>>, %arg2: memref<2x256xf32, #tpu.memory_space<vmem>>, %arg3: memref<256x128xbf16, #tpu.memory_space<vmem>>, %arg4: memref<1x128xf32, #tpu.memory_space<vmem>>, %arg5: memref<1024x128xf32, #tpu.memory_space<vmem>>) attributes {dimension_semantics = [#tpu.dimension_semantics<parallel>], iteration_bounds = array<i64: 2>, scalar_prefetch = 0 : i64, scratch_operands = 0 : i64, tpu.core_type = #tpu.core_type<tc>, window_params = [{transform_indices = @transform_0, window_bounds = array<i64: 1024, 256>}, {pipeline_mode = #tpu.pipeline_mode<synchronous>, transform_indices = @transform_1, window_bounds = array<i64: 2, 256>}, {pipeline_mode = #tpu.pipeline_mode<synchronous>, transform_indices = @transform_2, window_bounds = array<i64: 256, 128>}, {pipeline_mode = #tpu.pipeline_mode<synchronous>, transform_indices = @transform_3, window_bounds = array<i64: 1, 128>}, {transform_indices = @transform_4, window_bounds = array<i64: 1024, 128>}]} {
    %c0 = arith.constant 0 : index
    %c0_0 = arith.constant 0 : index
    %0 = vector.load %arg1[%c0, %c0_0] : memref<1024x256xbf16, #tpu.memory_space<vmem>>, vector<1024x256xbf16>
    %1 = arith.extf %0 : vector<1024x256xbf16> to vector<1024x256xf32>
    %c0_1 = arith.constant 0 : index
    %c0_2 = arith.constant 0 : index
    %2 = vector.load %arg2[%c0_1, %c0_2] : memref<2x256xf32, #tpu.memory_space<vmem>>, vector<1x256xf32>
    %3 = vector.broadcast %2 : vector<1x256xf32> to vector<1024x256xf32>
    %4 = arith.mulf %1, %3 : vector<1024x256xf32>
    %c1 = arith.constant 1 : index
    %c0_3 = arith.constant 0 : index
    %5 = vector.load %arg2[%c1, %c0_3] : memref<2x256xf32, #tpu.memory_space<vmem>>, vector<1x256xf32>
    %6 = vector.broadcast %5 : vector<1x256xf32> to vector<1024x256xf32>
    %7 = arith.addf %4, %6 : vector<1024x256xf32>
    %8 = arith.truncf %7 : vector<1024x256xf32> to vector<1024x256xbf16>
    %c0_4 = arith.constant 0 : index
    %c0_5 = arith.constant 0 : index
    %9 = vector.load %arg3[%c0_4, %c0_5] : memref<256x128xbf16, #tpu.memory_space<vmem>>, vector<256x128xbf16>
    %cst = arith.constant dense<0.000000e+00> : vector<1024x128xf32>
    %10 = tpu.matmul %8, %9, %cst {dimension_numbers = #tpu.dot_dimension_numbers<[1], [0], [0], [1], [0, 0, 1, 1], [], []>} : vector<1024x256xbf16>, vector<256x128xbf16>, vector<1024x128xf32> -> vector<1024x128xf32>
    %c0_6 = arith.constant 0 : index
    %c0_7 = arith.constant 0 : index
    %11 = vector.load %arg4[%c0_6, %c0_7] : memref<1x128xf32, #tpu.memory_space<vmem>>, vector<1x128xf32>
    %12 = vector.broadcast %11 : vector<1x128xf32> to vector<1024x128xf32>
    %13 = arith.addf %10, %12 : vector<1024x128xf32>
    %c0_8 = arith.constant 0 : index
    %c0_9 = arith.constant 0 : index
    %14 = vector.load %arg5[%c0_8, %c0_9] : memref<1024x128xf32, #tpu.memory_space<vmem>>, vector<1024x128xf32>
    tpu.vector_store %arg5[%c0_8, %c0_9], %13 {strides = array<i32>} : memref<1024x128xf32, #tpu.memory_space<vmem>>, vector<1024x128xf32>,
    return
  }
  func.func @transform_0(%arg0: i32) -> (i32, i32) {
    %c0_i32 = arith.constant 0 : i32
    %c0_i32_0 = arith.constant 0 : i32
    return %arg0, %c0_i32 : i32, i32
  }
  func.func @transform_1(%arg0: i32) -> (i32, i32) {
    %c0_i32 = arith.constant 0 : i32
    %c0_i32_0 = arith.constant 0 : i32
    %c0_i32_1 = arith.constant 0 : i32
    return %c0_i32, %c0_i32_0 : i32, i32
  }
  func.func @transform_2(%arg0: i32) -> (i32, i32) {
    %c0_i32 = arith.constant 0 : i32
    %c0_i32_0 = arith.constant 0 : i32
    %c0_i32_1 = arith.constant 0 : i32
    return %c0_i32, %c0_i32_0 : i32, i32
  }
  func.func @transform_3(%arg0: i32) -> (i32, i32) {
    %c0_i32 = arith.constant 0 : i32
    %c0_i32_0 = arith.constant 0 : i32
    %c0_i32_1 = arith.constant 0 : i32
    return %c0_i32, %c0_i32_0 : i32, i32
  }
  func.func @transform_4(%arg0: i32) -> (i32, i32) {
    %c0_i32 = arith.constant 0 : i32
    %c0_i32_0 = arith.constant 0 : i32
    return %arg0, %c0_i32 : i32, i32
  }
}

</mosaic_0001>

<bundles_post_ra>
// kernel: feedforward.3
= control target key start
LH: loop header
LB: loop body
LE: loop exit
PB: predicated region body
PF: predicated region fallthrough
CT: control target
= control target key end

     0   :  { %7 = vsyncpa [#allocation3], 0  ;;  %s1403_s0 = inlined_call_operand.hbm [shape: f32[2048,128], index: 0, kind: input, shape index: {}]   ;;  %s1404_s1 = inlined_call_operand.vmem [shape: f32[1,128], index: 1, kind: input, shape index: {}]   ;;  %s1405_s2 = inlined_call_operand.vmem [shape: f32[2,2,128], index: 2, kind: output, shape index: {}]  }
   0x1   :  { %9 = vsyncpa [#allocation3 + $0x1], 0  ;;  %s1027_s9 = smov 0   ;;  %s1029_s10 = smov 0  }
   0x2   :  { %s1031_s11 = smov 0   ;;  %s1033_s12 = smov 0  }
   0x3 LB: > { %s1046_s13 = sadd.s32 4294967295, %s1007_s12   ;;  %s1049_s14 = sadd.s32 1, %s1007_s12   ;;  %s1007_s12 = sphi %s1033_s12, %s1412_s12   ;;  %s1003_s11 = sphi %s1031_s11, %s1411_s11   ;;  %s999_s10 = sphi %s1029_s10, %s1410_s10   ;;  %s995_s9 = sphi %s1027_s9, %s1409_s9  }
   0x4   : > { %s19_s15 = ssub.s32 %s1007_s12, %s1049_s14  ;;  %s22_s16 = sadd.s32 1, %s1003_s11 }
   0x5   : > { %p20_p0 = scmp.eq.s32.totalorder %s19_s15, 0  ;;  %p29_p1 = scmp.ne.s32.totalorder %s1003_s11, %s999_s10 }
   0x6   : > { %p30_p2 = scmp.eq.s32.totalorder %s1007_s12, 0  ;;  %p35_p3 = scmp.ne.s32.totalorder %s999_s10, %s995_s9 }
   0x7   : > { %s1059_s17 = scalar_select %p20_p0, %s1003_s11, %s22_s16  }
   0x8   : > { %p31_p4 = por %p30_p2, %p29_p1  ;;  %p36_p5 = scmp.eq.s32.totalorder %s1046_s13, 0 }
   0x9   : > { %p907_p6 = scmp.lt.s32.totalorder %s1007_s12, 2  ;;  %s109_s19 = sand.u32 1, %s1003_s11  }
   0xa   : > { %p1063_p7 = por %p36_p5, %p35_p3  ;;  %s891_s20 = sshll.u32 %s109_s19, 10 }
   0xb   : > { %s900_s21 = sshll.u32 %s1007_s12, 14  ;;  %s113_s25 = scalar_lea.vmem [#allocation2], %s891_s20 }
   0xc   : > { %s1072_s24 = scalar_lea.hbm %s1403_s0, %s900_s21  ;;  %s120_s26 = sshll.u32 %s113_s25, 4  ;;  %s1074_s26 = int_to_ptr.vmem [resolvable:$true] %s120_s26 }
   0xd   : > { %p1076_p8 = pnand %p907_p6, %p31_p4  ;;  %s1081_s28 = scalar_lea.sflag [#allocation3], %s109_s19 }
   0xe   : > { %s943_s29 = scalar_lea.hbm %s1072_s24, 16384  ;;  %s948_s4 = scalar_lea.hbm %s1403_s0, 32768 }
   0xf   : > { %p944_p10 = scmp.ne.s32.totalorder %s1072_s24, %s943_s29  ;;  %p945_p11 = pneg %p1076_p8 }
  0x10   : > { %p949_p0 = scmp.lt.u32.totalorder %s1072_s24, %s1403_s0  ;;  %p950_p1 = scmp.lt.u32.totalorder %s948_s4, %s943_s29 }
  0x11   : > { %p946_p12 = pnand %p945_p11, %p944_p10  ;;  %p952_p3 = scmp.lt.u32.totalorder %s943_s29, %s1072_s24 }
  0x12   : > { %p951_p2 = por %p950_p1, %p949_p0 }
  0x13   : > { %p947_p13 = pneg %p946_p12 }
  0x14   : > { %p953_p4 = por %p952_p3, %p951_p2 }
  0x16   : > { %p954_p5 = pnand %p953_p4, %p947_p13 }
  0x18   : > { %957 = shalt.err (!%p954_p5)
}
  0x19   : > { %s958_s7 = scalar_lea.vmem %s1074_s26, 16384  ;;  %s1009_s8 = smov [#allocation2]  }
  0x1a   : > { %p959_p6 = scmp.ne.s32.totalorder %s1074_s26, %s958_s7  ;;  %s963_s9 = sshll.u32 %s1009_s8, 4  ;;  %s964_s9 = int_to_ptr.vmem [resolvable:$false] %s963_s9 }
  0x1b   : > { %s965_s15 = scalar_lea.vmem %s964_s9, 32768  ;;  %p966_p9 = scmp.lt.s32.totalorder %s1074_s26, %s964_s9 }
  0x1c   : > { %p961_p10 = pnand %p959_p6, %p945_p11  ;;  %p967_p0 = scmp.lt.s32.totalorder %s965_s15, %s958_s7 }
  0x1e   : > { %p962_p12 = pneg %p961_p10  ;;  %p968_p1 = por %p967_p0, %p966_p9 }
  0x20   : > { %p969_p2 = pnand %p968_p1, %p962_p12 }
  0x22   : > { %972 = shalt.err (!%p969_p2)
}
  0x23   : > { %s1010_s16 = smov 128   ;;  %s1011_s19 = smov 8  }
  0x24   : > { %906 = dma.hbm_to_vmem [thread:$0]  (!%p1076_p8), %s1072_s24, 16384, %s1074_s26, %s1081_s28, %s1010_s16, %s1010_s16, %s1011_s19  }
  0x25   : > { %p128_p11 = scmp.lt.s32.totalorder %s1007_s12, 3  ;;  %p1408_p13 = scmp.ge.s32.totalorder %s1007_s12, 1 }
  0x27   : > { %p129_p3 = pnand %p1408_p13, %p128_p11 }
  0x28   : > { %s134_s20 = sand.u32 (!%p129_p3), 1, %s999_s10  }
  0x29   : > { %132 = sbr.rel (%p129_p3) target bundleno = 324 (0x144), region = 28  ;;  %s895_s21 = sshll.u32 (!%p129_p3), %s134_s20, 10 }
  0x2a   : > { %s135_s22 = scalar_lea.sflag (!%p129_p3), [#allocation3], %s134_s20  ;;  %s1113_s23 = scalar_lea.vmem (!%p129_p3), [#allocation2], %s895_s21 }
  0x30   : > { %990 = dma.done.wait (%p1063_p7), %s135_s22, 16384  }
  0x31   : > { %992 = vsyncadd (%p1063_p7), %s135_s22, 4294950912  ;;  %v163_v0 = vld [vmem:[%s1113_s23] sm:$0xff]  ;;  %v164_v1 = vld [vmem:[%s1113_s23 + $0x8] sm:$0xff]  ;;  %p159_p7 = scmp.lt.s32.totalorder %s1046_s13, 1  ;;  %vm820_vm0 = vcmask 1040384  }
  0x32   : > { %v1124_v2 = vld [vmem:[%s1404_s1] ss:$0 sm:$0xff]  ;;  %v165_v3 = vld [vmem:[%s1113_s23 + $0x10] sm:$0xff]  ;;  %v166_v6 = vld [vmem:[%s1113_s23 + $0x18] sm:$0xff] }
  0x33   : > { %v298_v4 = vsub.f32 %v163_v0, %v1124_v2  ;;  %v299_v5 = vsub.f32 %v164_v1, %v1124_v2  ;;  %v300_v7 = vsub.f32 %v165_v3, %v1124_v2  ;;  %v167_v9 = vld [vmem:[%s1113_s23 + $0x20] sm:$0xff]  ;;  %v301_v10 = vsub.f32 %v166_v6, %v1124_v2  ;;  %v168_v12 = vld [vmem:[%s1113_s23 + $0x28] sm:$0xff]  ;;  %v169_v15 = vld [vmem:[%s1113_s23 + $0x30] sm:$0xff]  ;;  %s1414_s13 = smov (!%p159_p7, %s1046_s13), 1 }
  0x34   : > { %v302_v13 = vsub.f32 %v167_v9, %v1124_v2  ;;  %v303_v16 = vsub.f32 %v168_v12, %v1124_v2  ;;  %v170_v18 = vld [vmem:[%s1113_s23 + $0x38] sm:$0xff]  ;;  %v304_v19 = vsub.f32 %v169_v15, %v1124_v2  ;;  %v171_v21 = vld [vmem:[%s1113_s23 + $0x40] sm:$0xff]  ;;  %v172_v24 = vld [vmem:[%s1113_s23 + $0x48] sm:$0xff]  ;;  %s896_s26 = sshll.u32 %s1414_s13, 1 }
  0x35   : > { %v426_v8 = vadd.f32 %v299_v5, %v298_v4  ;;  %v305_v22 = vsub.f32 %v170_v18, %v1124_v2  ;;  %v306_v25 = vsub.f32 %v171_v21, %v1124_v2  ;;  %v173_v27 = vld [vmem:[%s1113_s23 + $0x50] sm:$0xff]  ;;  %v307_v28 = vsub.f32 %v172_v24, %v1124_v2  ;;  %v174_v30 = vld [vmem:[%s1113_s23 + $0x58] sm:$0xff]  ;;  %v175_v33 = vld [vmem:[%s1113_s23 + $0x60] sm:$0xff]  ;;  %s162_s29 = scalar_lea.vmem %s1405_s2, %s896_s26 }
  0x36   : > { %v308_v31 = vsub.f32 %v173_v27, %v1124_v2  ;;  %v559_v34 = vmul.f32 %v298_v4, %v298_v4  ;;  %v560_v35 = vmul.f32 %v299_v5, %v299_v5  ;;  %v309_v36 = vsub.f32 %v174_v30, %v1124_v2  ;;  %v176_v38 = vld [vmem:[%s1113_s23 + $0x68] sm:$0xff]  ;;  %v177_v42 = vld [vmem:[%s1113_s23 + $0x70] sm:$0xff]  ;;  %v178_v47 = vld [vmem:[%s1113_s23 + $0x78] sm:$0xff] }
  0x37   : > { %v427_v11 = vadd.f32 %v426_v8, %v300_v7  ;;  %v561_v39 = vmul.f32 %v300_v7, %v300_v7  ;;  %v310_v40 = vsub.f32 %v175_v33, %v1124_v2  ;;  %v562_v43 = vmul.f32 %v301_v10, %v301_v10  ;;  %v179_v52 = vld [vmem:[%s1113_s23 + $0x80] sm:$0xff]  ;;  %v180_v57 = vld [vmem:[%s1113_s23 + $0x88] sm:$0xff]  ;;  %v181_v62 = vld [vmem:[%s1113_s23 + $0x90] sm:$0xff] }
  0x38   : > { %v687_v44 = vadd.f32 %v560_v35, %v559_v34  ;;  %v311_v45 = vsub.f32 %v176_v38, %v1124_v2  ;;  %v563_v48 = vmul.f32 %v302_v13, %v302_v13  ;;  %v312_v50 = vsub.f32 %v177_v42, %v1124_v2  ;;  %v182_v4 = vld [vmem:[%s1113_s23 + $0x98] sm:$0xff]  ;;  %v183_v9 = vld [vmem:[%s1113_s23 + $0xa0] sm:$0xff]  ;;  %v188_v34 = vld [vmem:[%s1113_s23 + $0xc8] sm:$0xff] }
  0x39   : > { %v428_v14 = vadd.f32 %v427_v11, %v301_v10  ;;  %v564_v53 = vmul.f32 %v303_v16, %v303_v16  ;;  %v313_v55 = vsub.f32 %v178_v47, %v1124_v2  ;;  %v565_v58 = vmul.f32 %v304_v19, %v304_v19  ;;  %v186_v24 = vld [vmem:[%s1113_s23 + $0xb8] sm:$0xff] }
  0x3a   : > { %v688_v49 = vadd.f32 %v687_v44, %v561_v39  ;;  %v314_v60 = vsub.f32 %v179_v52, %v1124_v2  ;;  %v566_v63 = vmul.f32 %v305_v22, %v305_v22  ;;  %v315_v1 = vsub.f32 %v180_v57, %v1124_v2  ;;  %v189_v39 = vld [vmem:[%s1113_s23 + $0xd0] sm:$0xff]  ;;  %v190_v44 = vld [vmem:[%s1113_s23 + $0xd8] sm:$0xff] }
  0x3b   : > { %v429_v17 = vadd.f32 %v428_v14, %v302_v13  ;;  %v567_v5 = vmul.f32 %v306_v25, %v306_v25  ;;  %v316_v7 = vsub.f32 %v181_v62, %v1124_v2  ;;  %v568_v10 = vmul.f32 %v307_v28, %v307_v28  ;;  %v184_v14 = vld [vmem:[%s1113_s23 + $0xa8] sm:$0xff] }
  0x3c   : > { %v689_v54 = vadd.f32 %v688_v49, %v562_v43  ;;  %v317_v12 = vsub.f32 %v182_v4, %v1124_v2  ;;  %v569_v15 = vmul.f32 %v308_v31, %v308_v31  ;;  %v572_v30 = vmul.f32 %v311_v45, %v311_v45  ;;  %v191_v49 = vld [vmem:[%s1113_s23 + $0xe0] sm:$0xff] }
  0x3d   : > { %v430_v20 = vadd.f32 %v429_v17, %v303_v16  ;;  %v318_v17 = vsub.f32 %v183_v9, %v1124_v2  ;;  %v573_v35 = vmul.f32 %v312_v50, %v312_v50  ;;  %v323_v42 = vsub.f32 %v188_v34, %v1124_v2 }
  0x3e   : > { %v690_v59 = vadd.f32 %v689_v54, %v563_v48  ;;  %v324_v47 = vsub.f32 %v189_v39, %v1124_v2  ;;  %v325_v52 = vsub.f32 %v190_v44, %v1124_v2  ;;  %v192_v54 = vld [vmem:[%s1113_s23 + $0xe8] sm:$0xff]  ;;  %v326_v57 = vsub.f32 %v191_v49, %v1124_v2 }
  0x3f   : > { %v431_v23 = vadd.f32 %v430_v20, %v304_v19  ;;  %v185_v19 = vld [vmem:[%s1113_s23 + $0xb0] sm:$0xff]  ;;  %v570_v20 = vmul.f32 %v309_v36, %v309_v36  ;;  %v327_v62 = vsub.f32 %v192_v54, %v1124_v2 }
  0x40   : > { %v691_v0 = vadd.f32 %v690_v59, %v564_v53  ;;  %v320_v27 = vsub.f32 %v185_v19, %v1124_v2  ;;  %v193_v59 = vld [vmem:[%s1113_s23 + $0xf0] sm:$0xff] }
  0x41   : > { %v432_v26 = vadd.f32 %v431_v23, %v305_v22  ;;  %v319_v22 = vsub.f32 %v184_v14, %v1124_v2  ;;  %v328_v4 = vsub.f32 %v193_v59, %v1124_v2 }
  0x42   : > { %v692_v6 = vadd.f32 %v691_v0, %v565_v58  ;;  %v194_v0 = vld [vmem:[%s1113_s23 + $0xf8] sm:$0xff] }
  0x43   : > { %v433_v29 = vadd.f32 %v432_v26, %v306_v25  ;;  %v571_v25 = vmul.f32 %v310_v40, %v310_v40  ;;  %v329_v9 = vsub.f32 %v194_v0, %v1124_v2 }
  0x44   : > { %v693_v11 = vadd.f32 %v692_v6, %v566_v63  ;;  %v195_v6 = vld [vmem:[%s1113_s23 + $0x100] sm:$0xff] }
  0x45   : > { %v434_v32 = vadd.f32 %v433_v29, %v307_v28  ;;  %v187_v29 = vld [vmem:[%s1113_s23 + $0xc0] sm:$0xff]  ;;  %v330_v14 = vsub.f32 %v195_v6, %v1124_v2 }
  0x46   : > { %v694_v16 = vadd.f32 %v693_v11, %v567_v5  ;;  %v196_v11 = vld [vmem:[%s1113_s23 + $0x108] sm:$0xff] }
  0x47   : > { %v435_v37 = vadd.f32 %v434_v32, %v308_v31  ;;  %v321_v32 = vsub.f32 %v186_v24, %v1124_v2  ;;  %v331_v19 = vsub.f32 %v196_v11, %v1124_v2 }
  0x48   : > { %v695_v21 = vadd.f32 %v694_v16, %v568_v10  ;;  %v197_v16 = vld [vmem:[%s1113_s23 + $0x110] sm:$0xff] }
  0x49   : > { %v436_v41 = vadd.f32 %v435_v37, %v309_v36  ;;  %v322_v37 = vsub.f32 %v187_v29, %v1124_v2  ;;  %v332_v24 = vsub.f32 %v197_v16, %v1124_v2 }
  0x4a   : > { %v696_v26 = vadd.f32 %v695_v21, %v569_v15  ;;  %v198_v21 = vld [vmem:[%s1113_s23 + $0x118] sm:$0xff] }
  0x4b   : > { %v437_v46 = vadd.f32 %v436_v41, %v310_v40  ;;  %v574_v40 = vmul.f32 %v313_v55, %v313_v55  ;;  %v333_v29 = vsub.f32 %v198_v21, %v1124_v2 }
  0x4c   : > { %v697_v31 = vadd.f32 %v696_v26, %v570_v20  ;;  %v199_v26 = vld [vmem:[%s1113_s23 + $0x120] sm:$0xff] }
  0x4d   : > { %v438_v51 = vadd.f32 %v437_v46, %v311_v45  ;;  %v575_v45 = vmul.f32 %v314_v60, %v314_v60  ;;  %v334_v34 = vsub.f32 %v199_v26, %v1124_v2 }
  0x4e   : > { %v698_v36 = vadd.f32 %v697_v31, %v571_v25  ;;  %v200_v31 = vld [vmem:[%s1113_s23 + $0x128] sm:$0xff] }
  0x4f   : > { %v439_v56 = vadd.f32 %v438_v51, %v312_v50  ;;  %v576_v50 = vmul.f32 %v315_v1, %v315_v1  ;;  %v335_v39 = vsub.f32 %v200_v31, %v1124_v2 }
  0x50   : > { %v699_v41 = vadd.f32 %v698_v36, %v572_v30  ;;  %v201_v36 = vld [vmem:[%s1113_s23 + $0x130] sm:$0xff] }
  0x51   : > { %v440_v61 = vadd.f32 %v439_v56, %v313_v55  ;;  %v577_v55 = vmul.f32 %v316_v7, %v316_v7  ;;  %v336_v44 = vsub.f32 %v201_v36, %v1124_v2 }
  0x52   : > { %v700_v46 = vadd.f32 %v699_v41, %v573_v35  ;;  %v202_v41 = vld [vmem:[%s1113_s23 + $0x138] sm:$0xff] }
  0x53   : > { %v441_v3 = vadd.f32 %v440_v61, %v314_v60  ;;  %v578_v60 = vmul.f32 %v317_v12, %v317_v12  ;;  %v337_v49 = vsub.f32 %v202_v41, %v1124_v2 }
  0x54   : > { %v701_v51 = vadd.f32 %v700_v46, %v574_v40  ;;  %v203_v46 = vld [vmem:[%s1113_s23 + $0x140] sm:$0xff] }
  0x55   : > { %v442_v8 = vadd.f32 %v441_v3, %v315_v1  ;;  %v579_v1 = vmul.f32 %v318_v17, %v318_v17  ;;  %v338_v54 = vsub.f32 %v203_v46, %v1124_v2 }
  0x56   : > { %v702_v56 = vadd.f32 %v701_v51, %v575_v45  ;;  %v204_v51 = vld [vmem:[%s1113_s23 + $0x148] sm:$0xff] }
  0x57   : > { %v443_v13 = vadd.f32 %v442_v8, %v316_v7  ;;  %v580_v7 = vmul.f32 %v319_v22, %v319_v22  ;;  %v339_v59 = vsub.f32 %v204_v51, %v1124_v2 }
  0x58   : > { %v703_v61 = vadd.f32 %v702_v56, %v576_v50  ;;  %v205_v56 = vld [vmem:[%s1113_s23 + $0x150] sm:$0xff] }
  0x59   : > { %v444_v18 = vadd.f32 %v443_v13, %v317_v12  ;;  %v581_v12 = vmul.f32 %v320_v27, %v320_v27  ;;  %v340_v0 = vsub.f32 %v205_v56, %v1124_v2 }
  0x5a   : > { %v704_v3 = vadd.f32 %v703_v61, %v577_v55  ;;  %v206_v61 = vld [vmem:[%s1113_s23 + $0x158] sm:$0xff] }
  0x5b   : > { %v445_v23 = vadd.f32 %v444_v18, %v318_v17  ;;  %v582_v17 = vmul.f32 %v321_v32, %v321_v32  ;;  %v341_v6 = vsub.f32 %v206_v61, %v1124_v2 }
  0x5c   : > { %v705_v8 = vadd.f32 %v704_v3, %v578_v60  ;;  %v207_v3 = vld [vmem:[%s1113_s23 + $0x160] sm:$0xff] }
  0x5d   : > { %v446_v28 = vadd.f32 %v445_v23, %v319_v22  ;;  %v583_v22 = vmul.f32 %v322_v37, %v322_v37  ;;  %v342_v11 = vsub.f32 %v207_v3, %v1124_v2 }
  0x5e   : > { %v706_v13 = vadd.f32 %v705_v8, %v579_v1  ;;  %v208_v8 = vld [vmem:[%s1113_s23 + $0x168] sm:$0xff] }
  0x5f   : > { %v447_v33 = vadd.f32 %v446_v28, %v320_v27  ;;  %v584_v27 = vmul.f32 %v323_v42, %v323_v42  ;;  %v343_v16 = vsub.f32 %v208_v8, %v1124_v2 }
  0x60   : > { %v707_v18 = vadd.f32 %v706_v13, %v580_v7  ;;  %v209_v13 = vld [vmem:[%s1113_s23 + $0x170] sm:$0xff] }
  0x61   : > { %v448_v38 = vadd.f32 %v447_v33, %v321_v32  ;;  %v585_v32 = vmul.f32 %v324_v47, %v324_v47  ;;  %v344_v21 = vsub.f32 %v209_v13, %v1124_v2 }
  0x62   : > { %v708_v23 = vadd.f32 %v707_v18, %v581_v12  ;;  %v210_v18 = vld [vmem:[%s1113_s23 + $0x178] sm:$0xff] }
  0x63   : > { %v449_v43 = vadd.f32 %v448_v38, %v322_v37  ;;  %v586_v37 = vmul.f32 %v325_v52, %v325_v52  ;;  %v345_v26 = vsub.f32 %v210_v18, %v1124_v2 }
  0x64   : > { %v709_v28 = vadd.f32 %v708_v23, %v582_v17  ;;  %v211_v23 = vld [vmem:[%s1113_s23 + $0x180] sm:$0xff] }
  0x65   : > { %v450_v48 = vadd.f32 %v449_v43, %v323_v42  ;;  %v587_v42 = vmul.f32 %v326_v57, %v326_v57  ;;  %v346_v31 = vsub.f32 %v211_v23, %v1124_v2 }
  0x66   : > { %v710_v33 = vadd.f32 %v709_v28, %v583_v22  ;;  %v212_v28 = vld [vmem:[%s1113_s23 + $0x188] sm:$0xff] }
  0x67   : > { %v451_v53 = vadd.f32 %v450_v48, %v324_v47  ;;  %v588_v47 = vmul.f32 %v327_v62, %v327_v62  ;;  %v347_v36 = vsub.f32 %v212_v28, %v1124_v2 }
  0x68   : > { %v711_v38 = vadd.f32 %v710_v33, %v584_v27  ;;  %v213_v33 = vld [vmem:[%s1113_s23 + $0x190] sm:$0xff] }
  0x69   : > { %v452_v58 = vadd.f32 %v451_v53, %v325_v52  ;;  %v589_v52 = vmul.f32 %v328_v4, %v328_v4  ;;  %v348_v41 = vsub.f32 %v213_v33, %v1124_v2 }
  0x6a   : > { %v712_v43 = vadd.f32 %v711_v38, %v585_v32  ;;  %v214_v38 = vld [vmem:[%s1113_s23 + $0x198] sm:$0xff] }
  0x6b   : > { %v453_v63 = vadd.f32 %v452_v58, %v326_v57  ;;  %v590_v57 = vmul.f32 %v329_v9, %v329_v9  ;;  %v349_v46 = vsub.f32 %v214_v38, %v1124_v2 }
  0x6c   : > { %v713_v48 = vadd.f32 %v712_v43, %v586_v37  ;;  %v215_v43 = vld [vmem:[%s1113_s23 + $0x1a0] sm:$0xff] }
  0x6d   : > { %v454_v5 = vadd.f32 %v453_v63, %v327_v62  ;;  %v591_v62 = vmul.f32 %v330_v14, %v330_v14  ;;  %v350_v51 = vsub.f32 %v215_v43, %v1124_v2 }
  0x6e   : > { %v714_v53 = vadd.f32 %v713_v48, %v587_v42  ;;  %v216_v48 = vld [vmem:[%s1113_s23 + $0x1a8] sm:$0xff] }
  0x6f   : > { %v455_v10 = vadd.f32 %v454_v5, %v328_v4  ;;  %v592_v4 = vmul.f32 %v331_v19, %v331_v19  ;;  %v351_v56 = vsub.f32 %v216_v48, %v1124_v2 }
  0x70   : > { %v715_v58 = vadd.f32 %v714_v53, %v588_v47  ;;  %v217_v53 = vld [vmem:[%s1113_s23 + $0x1b0] sm:$0xff] }
  0x71   : > { %v456_v15 = vadd.f32 %v455_v10, %v329_v9  ;;  %v593_v9 = vmul.f32 %v332_v24, %v332_v24  ;;  %v352_v61 = vsub.f32 %v217_v53, %v1124_v2 }
  0x72   : > { %v716_v63 = vadd.f32 %v715_v58, %v589_v52  ;;  %v218_v58 = vld [vmem:[%s1113_s23 + $0x1b8] sm:$0xff] }
  0x73   : > { %v457_v20 = vadd.f32 %v456_v15, %v330_v14  ;;  %v594_v14 = vmul.f32 %v333_v29, %v333_v29  ;;  %v353_v3 = vsub.f32 %v218_v58, %v1124_v2 }
  0x74   : > { %v717_v5 = vadd.f32 %v716_v63, %v590_v57  ;;  %v219_v63 = vld [vmem:[%s1113_s23 + $0x1c0] sm:$0xff] }
  0x75   : > { %v458_v25 = vadd.f32 %v457_v20, %v331_v19  ;;  %v595_v19 = vmul.f32 %v334_v34, %v334_v34  ;;  %v354_v8 = vsub.f32 %v219_v63, %v1124_v2 }
  0x76   : > { %v718_v10 = vadd.f32 %v717_v5, %v591_v62  ;;  %v220_v5 = vld [vmem:[%s1113_s23 + $0x1c8] sm:$0xff] }
  0x77   : > { %v459_v30 = vadd.f32 %v458_v25, %v332_v24  ;;  %v596_v24 = vmul.f32 %v335_v39, %v335_v39  ;;  %v355_v13 = vsub.f32 %v220_v5, %v1124_v2 }
  0x78   : > { %v719_v15 = vadd.f32 %v718_v10, %v592_v4  ;;  %v221_v10 = vld [vmem:[%s1113_s23 + $0x1d0] sm:$0xff] }
  0x79   : > { %v460_v35 = vadd.f32 %v459_v30, %v333_v29  ;;  %v597_v29 = vmul.f32 %v336_v44, %v336_v44  ;;  %v356_v18 = vsub.f32 %v221_v10, %v1124_v2 }
  0x7a   : > { %v720_v20 = vadd.f32 %v719_v15, %v593_v9  ;;  %v222_v15 = vld [vmem:[%s1113_s23 + $0x1d8] sm:$0xff] }
  0x7b   : > { %v461_v40 = vadd.f32 %v460_v35, %v334_v34  ;;  %v598_v34 = vmul.f32 %v337_v49, %v337_v49  ;;  %v357_v23 = vsub.f32 %v222_v15, %v1124_v2 }
  0x7c   : > { %v721_v25 = vadd.f32 %v720_v20, %v594_v14  ;;  %v223_v20 = vld [vmem:[%s1113_s23 + $0x1e0] sm:$0xff] }
  0x7d   : > { %v462_v45 = vadd.f32 %v461_v40, %v335_v39  ;;  %v599_v39 = vmul.f32 %v338_v54, %v338_v54  ;;  %v358_v28 = vsub.f32 %v223_v20, %v1124_v2 }
  0x7e   : > { %v722_v30 = vadd.f32 %v721_v25, %v595_v19  ;;  %v224_v25 = vld [vmem:[%s1113_s23 + $0x1e8] sm:$0xff] }
  0x7f   : > { %v463_v50 = vadd.f32 %v462_v45, %v336_v44  ;;  %v600_v44 = vmul.f32 %v339_v59, %v339_v59  ;;  %v359_v33 = vsub.f32 %v224_v25, %v1124_v2 }
  0x80   : > { %v723_v35 = vadd.f32 %v722_v30, %v596_v24  ;;  %v225_v30 = vld [vmem:[%s1113_s23 + $0x1f0] sm:$0xff] }
  0x81   : > { %v464_v55 = vadd.f32 %v463_v50, %v337_v49  ;;  %v601_v49 = vmul.f32 %v340_v0, %v340_v0  ;;  %v360_v38 = vsub.f32 %v225_v30, %v1124_v2 }
  0x82   : > { %v724_v40 = vadd.f32 %v723_v35, %v597_v29  ;;  %v226_v35 = vld [vmem:[%s1113_s23 + $0x1f8] sm:$0xff] }
  0x83   : > { %v465_v60 = vadd.f32 %v464_v55, %v338_v54  ;;  %v602_v54 = vmul.f32 %v341_v6, %v341_v6  ;;  %v361_v43 = vsub.f32 %v226_v35, %v1124_v2 }
  0x84   : > { %v725_v45 = vadd.f32 %v724_v40, %v598_v34  ;;  %v227_v40 = vld [vmem:[%s1113_s23 + $0x200] sm:$0xff] }
  0x85   : > { %v466_v1 = vadd.f32 %v465_v60, %v339_v59  ;;  %v603_v59 = vmul.f32 %v342_v11, %v342_v11  ;;  %v362_v48 = vsub.f32 %v227_v40, %v1124_v2 }
  0x86   : > { %v726_v50 = vadd.f32 %v725_v45, %v599_v39  ;;  %v228_v45 = vld [vmem:[%s1113_s23 + $0x208] sm:$0xff] }
  0x87   : > { %v467_v7 = vadd.f32 %v466_v1, %v340_v0  ;;  %v604_v0 = vmul.f32 %v343_v16, %v343_v16  ;;  %v363_v53 = vsub.f32 %v228_v45, %v1124_v2 }
  0x88   : > { %v727_v55 = vadd.f32 %v726_v50, %v600_v44  ;;  %v229_v50 = vld [vmem:[%s1113_s23 + $0x210] sm:$0xff] }
  0x89   : > { %v468_v12 = vadd.f32 %v467_v7, %v341_v6  ;;  %v605_v6 = vmul.f32 %v344_v21, %v344_v21  ;;  %v364_v58 = vsub.f32 %v229_v50, %v1124_v2 }
  0x8a   : > { %v728_v60 = vadd.f32 %v727_v55, %v601_v49  ;;  %v230_v55 = vld [vmem:[%s1113_s23 + $0x218] sm:$0xff] }
  0x8b   : > { %v469_v17 = vadd.f32 %v468_v12, %v342_v11  ;;  %v606_v11 = vmul.f32 %v345_v26, %v345_v26  ;;  %v365_v63 = vsub.f32 %v230_v55, %v1124_v2 }
  0x8c   : > { %v729_v1 = vadd.f32 %v728_v60, %v602_v54  ;;  %v231_v60 = vld [vmem:[%s1113_s23 + $0x220] sm:$0xff] }
  0x8d   : > { %v470_v22 = vadd.f32 %v469_v17, %v343_v16  ;;  %v607_v16 = vmul.f32 %v346_v31, %v346_v31  ;;  %v366_v5 = vsub.f32 %v231_v60, %v1124_v2 }
  0x8e   : > { %v730_v7 = vadd.f32 %v729_v1, %v603_v59  ;;  %v232_v1 = vld [vmem:[%s1113_s23 + $0x228] sm:$0xff] }
  0x8f   : > { %v471_v27 = vadd.f32 %v470_v22, %v344_v21  ;;  %v608_v21 = vmul.f32 %v347_v36, %v347_v36  ;;  %v367_v10 = vsub.f32 %v232_v1, %v1124_v2 }
  0x90   : > { %v731_v12 = vadd.f32 %v730_v7, %v604_v0  ;;  %v233_v7 = vld [vmem:[%s1113_s23 + $0x230] sm:$0xff] }
  0x91   : > { %v472_v32 = vadd.f32 %v471_v27, %v345_v26  ;;  %v609_v26 = vmul.f32 %v348_v41, %v348_v41  ;;  %v368_v15 = vsub.f32 %v233_v7, %v1124_v2 }
  0x92   : > { %v732_v17 = vadd.f32 %v731_v12, %v605_v6  ;;  %v234_v12 = vld [vmem:[%s1113_s23 + $0x238] sm:$0xff] }
  0x93   : > { %v473_v37 = vadd.f32 %v472_v32, %v346_v31  ;;  %v610_v31 = vmul.f32 %v349_v46, %v349_v46  ;;  %v369_v20 = vsub.f32 %v234_v12, %v1124_v2 }
  0x94   : > { %v733_v22 = vadd.f32 %v732_v17, %v606_v11  ;;  %v235_v17 = vld [vmem:[%s1113_s23 + $0x240] sm:$0xff] }
  0x95   : > { %v474_v42 = vadd.f32 %v473_v37, %v347_v36  ;;  %v611_v36 = vmul.f32 %v350_v51, %v350_v51  ;;  %v370_v25 = vsub.f32 %v235_v17, %v1124_v2 }
  0x96   : > { %v734_v27 = vadd.f32 %v733_v22, %v607_v16  ;;  %v236_v22 = vld [vmem:[%s1113_s23 + $0x248] sm:$0xff] }
  0x97   : > { %v475_v47 = vadd.f32 %v474_v42, %v348_v41  ;;  %v612_v41 = vmul.f32 %v351_v56, %v351_v56  ;;  %v371_v30 = vsub.f32 %v236_v22, %v1124_v2 }
  0x98   : > { %v735_v32 = vadd.f32 %v734_v27, %v608_v21  ;;  %v237_v27 = vld [vmem:[%s1113_s23 + $0x250] sm:$0xff] }
  0x99   : > { %v476_v52 = vadd.f32 %v475_v47, %v349_v46  ;;  %v613_v46 = vmul.f32 %v352_v61, %v352_v61  ;;  %v372_v35 = vsub.f32 %v237_v27, %v1124_v2 }
  0x9a   : > { %v736_v37 = vadd.f32 %v735_v32, %v609_v26  ;;  %v238_v32 = vld [vmem:[%s1113_s23 + $0x258] sm:$0xff] }
  0x9b   : > { %v477_v57 = vadd.f32 %v476_v52, %v350_v51  ;;  %v614_v51 = vmul.f32 %v353_v3, %v353_v3  ;;  %v373_v40 = vsub.f32 %v238_v32, %v1124_v2 }
  0x9c   : > { %v737_v42 = vadd.f32 %v736_v37, %v610_v31  ;;  %v239_v37 = vld [vmem:[%s1113_s23 + $0x260] sm:$0xff] }
  0x9d   : > { %v478_v62 = vadd.f32 %v477_v57, %v351_v56  ;;  %v615_v56 = vmul.f32 %v354_v8, %v354_v8  ;;  %v374_v45 = vsub.f32 %v239_v37, %v1124_v2 }
  0x9e   : > { %v738_v47 = vadd.f32 %v737_v42, %v611_v36  ;;  %v240_v42 = vld [vmem:[%s1113_s23 + $0x268] sm:$0xff] }
  0x9f   : > { %v479_v4 = vadd.f32 %v478_v62, %v352_v61  ;;  %v616_v61 = vmul.f32 %v355_v13, %v355_v13  ;;  %v375_v50 = vsub.f32 %v240_v42, %v1124_v2 }
  0xa0   : > { %v739_v52 = vadd.f32 %v738_v47, %v612_v41  ;;  %v241_v47 = vld [vmem:[%s1113_s23 + $0x270] sm:$0xff] }
  0xa1   : > { %v480_v9 = vadd.f32 %v479_v4, %v353_v3  ;;  %v617_v3 = vmul.f32 %v356_v18, %v356_v18  ;;  %v376_v55 = vsub.f32 %v241_v47, %v1124_v2 }
  0xa2   : > { %v740_v57 = vadd.f32 %v739_v52, %v613_v46  ;;  %v242_v52 = vld [vmem:[%s1113_s23 + $0x278] sm:$0xff] }
  0xa3   : > { %v481_v14 = vadd.f32 %v480_v9, %v354_v8  ;;  %v618_v8 = vmul.f32 %v357_v23, %v357_v23  ;;  %v377_v60 = vsub.f32 %v242_v52, %v1124_v2 }
  0xa4   : > { %v741_v62 = vadd.f32 %v740_v57, %v614_v51  ;;  %v243_v57 = vld [vmem:[%s1113_s23 + $0x280] sm:$0xff] }
  0xa5   : > { %v482_v19 = vadd.f32 %v481_v14, %v355_v13  ;;  %v619_v13 = vmul.f32 %v358_v28, %v358_v28  ;;  %v378_v1 = vsub.f32 %v243_v57, %v1124_v2 }
  0xa6   : > { %v742_v4 = vadd.f32 %v741_v62, %v615_v56  ;;  %v244_v62 = vld [vmem:[%s1113_s23 + $0x288] sm:$0xff] }
  0xa7   : > { %v483_v24 = vadd.f32 %v482_v19, %v356_v18  ;;  %v620_v18 = vmul.f32 %v359_v33, %v359_v33  ;;  %v379_v7 = vsub.f32 %v244_v62, %v1124_v2 }
  0xa8   : > { %v743_v9 = vadd.f32 %v742_v4, %v616_v61  ;;  %v245_v4 = vld [vmem:[%s1113_s23 + $0x290] sm:$0xff] }
  0xa9   : > { %v484_v29 = vadd.f32 %v483_v24, %v357_v23  ;;  %v621_v23 = vmul.f32 %v360_v38, %v360_v38  ;;  %v380_v12 = vsub.f32 %v245_v4, %v1124_v2 }
  0xaa   : > { %v744_v14 = vadd.f32 %v743_v9, %v617_v3  ;;  %v246_v9 = vld [vmem:[%s1113_s23 + $0x298] sm:$0xff] }
  0xab   : > { %v485_v34 = vadd.f32 %v484_v29, %v358_v28  ;;  %v622_v28 = vmul.f32 %v361_v43, %v361_v43  ;;  %v381_v17 = vsub.f32 %v246_v9, %v1124_v2 }
  0xac   : > { %v745_v19 = vadd.f32 %v744_v14, %v618_v8  ;;  %v247_v14 = vld [vmem:[%s1113_s23 + $0x2a0] sm:$0xff] }
  0xad   : > { %v486_v39 = vadd.f32 %v485_v34, %v359_v33  ;;  %v623_v33 = vmul.f32 %v362_v48, %v362_v48  ;;  %v382_v22 = vsub.f32 %v247_v14, %v1124_v2 }
  0xae   : > { %v746_v24 = vadd.f32 %v745_v19, %v619_v13  ;;  %v248_v19 = vld [vmem:[%s1113_s23 + $0x2a8] sm:$0xff] }
  0xaf   : > { %v487_v44 = vadd.f32 %v486_v39, %v360_v38  ;;  %v624_v38 = vmul.f32 %v363_v53, %v363_v53  ;;  %v383_v27 = vsub.f32 %v248_v19, %v1124_v2 }
  0xb0   : > { %v747_v29 = vadd.f32 %v746_v24, %v620_v18  ;;  %v249_v24 = vld [vmem:[%s1113_s23 + $0x2b0] sm:$0xff] }
  0xb1   : > { %v488_v49 = vadd.f32 %v487_v44, %v361_v43  ;;  %v625_v43 = vmul.f32 %v364_v58, %v364_v58  ;;  %v384_v32 = vsub.f32 %v249_v24, %v1124_v2 }
  0xb2   : > { %v748_v34 = vadd.f32 %v747_v29, %v621_v23  ;;  %v250_v29 = vld [vmem:[%s1113_s23 + $0x2b8] sm:$0xff] }
  0xb3   : > { %v489_v54 = vadd.f32 %v488_v49, %v362_v48  ;;  %v626_v48 = vmul.f32 %v365_v63, %v365_v63  ;;  %v385_v37 = vsub.f32 %v250_v29, %v1124_v2 }
  0xb4   : > { %v749_v39 = vadd.f32 %v748_v34, %v622_v28  ;;  %v251_v34 = vld [vmem:[%s1113_s23 + $0x2c0] sm:$0xff] }
  0xb5   : > { %v490_v59 = vadd.f32 %v489_v54, %v363_v53  ;;  %v627_v53 = vmul.f32 %v366_v5, %v366_v5  ;;  %v386_v42 = vsub.f32 %v251_v34, %v1124_v2 }
  0xb6   : > { %v750_v44 = vadd.f32 %v749_v39, %v623_v33  ;;  %v252_v39 = vld [vmem:[%s1113_s23 + $0x2c8] sm:$0xff] }
  0xb7   : > { %v491_v0 = vadd.f32 %v490_v59, %v364_v58  ;;  %v628_v58 = vmul.f32 %v367_v10, %v367_v10  ;;  %v387_v47 = vsub.f32 %v252_v39, %v1124_v2 }
  0xb8   : > { %v751_v49 = vadd.f32 %v750_v44, %v624_v38  ;;  %v253_v44 = vld [vmem:[%s1113_s23 + $0x2d0] sm:$0xff] }
  0xb9   : > { %v492_v6 = vadd.f32 %v491_v0, %v365_v63  ;;  %v629_v63 = vmul.f32 %v368_v15, %v368_v15  ;;  %v388_v52 = vsub.f32 %v253_v44, %v1124_v2 }
  0xba   : > { %v752_v54 = vadd.f32 %v751_v49, %v625_v43  ;;  %v254_v49 = vld [vmem:[%s1113_s23 + $0x2d8] sm:$0xff] }
  0xbb   : > { %v493_v11 = vadd.f32 %v492_v6, %v366_v5  ;;  %v630_v5 = vmul.f32 %v369_v20, %v369_v20  ;;  %v389_v57 = vsub.f32 %v254_v49, %v1124_v2 }
  0xbc   : > { %v753_v59 = vadd.f32 %v752_v54, %v626_v48  ;;  %v255_v54 = vld [vmem:[%s1113_s23 + $0x2e0] sm:$0xff] }
  0xbd   : > { %v494_v16 = vadd.f32 %v493_v11, %v367_v10  ;;  %v631_v10 = vmul.f32 %v370_v25, %v370_v25  ;;  %v390_v62 = vsub.f32 %v255_v54, %v1124_v2 }
  0xbe   : > { %v754_v0 = vadd.f32 %v753_v59, %v627_v53  ;;  %v256_v59 = vld [vmem:[%s1113_s23 + $0x2e8] sm:$0xff] }
  0xbf   : > { %v495_v21 = vadd.f32 %v494_v16, %v368_v15  ;;  %v632_v15 = vmul.f32 %v371_v30, %v371_v30  ;;  %v391_v4 = vsub.f32 %v256_v59, %v1124_v2 }
  0xc0   : > { %v755_v6 = vadd.f32 %v754_v0, %v628_v58  ;;  %v257_v0 = vld [vmem:[%s1113_s23 + $0x2f0] sm:$0xff] }
  0xc1   : > { %v496_v26 = vadd.f32 %v495_v21, %v369_v20  ;;  %v633_v20 = vmul.f32 %v372_v35, %v372_v35  ;;  %v392_v9 = vsub.f32 %v257_v0, %v1124_v2 }
  0xc2   : > { %v756_v11 = vadd.f32 %v755_v6, %v629_v63  ;;  %v258_v6 = vld [vmem:[%s1113_s23 + $0x2f8] sm:$0xff] }
  0xc3   : > { %v497_v31 = vadd.f32 %v496_v26, %v370_v25  ;;  %v634_v25 = vmul.f32 %v373_v40, %v373_v40  ;;  %v393_v14 = vsub.f32 %v258_v6, %v1124_v2 }
  0xc4   : > { %v757_v16 = vadd.f32 %v756_v11, %v630_v5  ;;  %v259_v11 = vld [vmem:[%s1113_s23 + $0x300] sm:$0xff] }
  0xc5   : > { %v498_v36 = vadd.f32 %v497_v31, %v371_v30  ;;  %v635_v30 = vmul.f32 %v374_v45, %v374_v45  ;;  %v394_v19 = vsub.f32 %v259_v11, %v1124_v2  ;;  %v1343_v11 = vld [vmem:[%s1404_s1] ss:$0 sm:$0xff] }
  0xc6   : > { %v758_v21 = vadd.f32 %v757_v16, %v631_v10  ;;  %v260_v16 = vld [vmem:[%s1113_s23 + $0x308] sm:$0xff] }
  0xc7   : > { %v499_v41 = vadd.f32 %v498_v36, %v372_v35  ;;  %v636_v35 = vmul.f32 %v375_v50, %v375_v50  ;;  %v395_v24 = vsub.f32 %v260_v16, %v1124_v2 }
  0xc8   : > { %v759_v26 = vadd.f32 %v758_v21, %v632_v15  ;;  %v261_v21 = vld [vmem:[%s1113_s23 + $0x310] sm:$0xff] }
  0xc9   : > { %v500_v46 = vadd.f32 %v499_v41, %v373_v40  ;;  %v637_v40 = vmul.f32 %v376_v55, %v376_v55  ;;  %v396_v29 = vsub.f32 %v261_v21, %v1124_v2 }
  0xca   : > { %v760_v31 = vadd.f32 %v759_v26, %v633_v20  ;;  %v262_v26 = vld [vmem:[%s1113_s23 + $0x318] sm:$0xff] }
  0xcb   : > { %v501_v51 = vadd.f32 %v500_v46, %v374_v45  ;;  %v638_v45 = vmul.f32 %v377_v60, %v377_v60  ;;  %v397_v34 = vsub.f32 %v262_v26, %v1124_v2 }
  0xcc   : > { %v761_v36 = vadd.f32 %v760_v31, %v634_v25  ;;  %v263_v31 = vld [vmem:[%s1113_s23 + $0x320] sm:$0xff] }
  0xcd   : > { %v502_v56 = vadd.f32 %v501_v51, %v375_v50  ;;  %v639_v50 = vmul.f32 %v378_v1, %v378_v1  ;;  %v398_v39 = vsub.f32 %v263_v31, %v1124_v2 }
  0xce   : > { %v762_v41 = vadd.f32 %v761_v36, %v635_v30  ;;  %v264_v36 = vld [vmem:[%s1113_s23 + $0x328] sm:$0xff] }
  0xcf   : > { %v503_v61 = vadd.f32 %v502_v56, %v376_v55  ;;  %v640_v55 = vmul.f32 %v379_v7, %v379_v7  ;;  %v399_v44 = vsub.f32 %v264_v36, %v1124_v2 }
  0xd0   : > { %v763_v46 = vadd.f32 %v762_v41, %v636_v35  ;;  %v265_v41 = vld [vmem:[%s1113_s23 + $0x330] sm:$0xff] }
  0xd1   : > { %v504_v3 = vadd.f32 %v503_v61, %v377_v60  ;;  %v641_v60 = vmul.f32 %v380_v12, %v380_v12  ;;  %v400_v49 = vsub.f32 %v265_v41, %v1124_v2 }
  0xd2   : > { %v764_v51 = vadd.f32 %v763_v46, %v637_v40  ;;  %v266_v46 = vld [vmem:[%s1113_s23 + $0x338] sm:$0xff] }
  0xd3   : > { %v505_v8 = vadd.f32 %v504_v3, %v378_v1  ;;  %v642_v1 = vmul.f32 %v381_v17, %v381_v17  ;;  %v401_v54 = vsub.f32 %v266_v46, %v1124_v2 }
  0xd4   : > { %v765_v56 = vadd.f32 %v764_v51, %v638_v45  ;;  %v267_v51 = vld [vmem:[%s1113_s23 + $0x340] sm:$0xff] }
  0xd5   : > { %v506_v13 = vadd.f32 %v505_v8, %v379_v7  ;;  %v643_v7 = vmul.f32 %v382_v22, %v382_v22  ;;  %v402_v59 = vsub.f32 %v267_v51, %v1124_v2 }
  0xd6   : > { %v766_v61 = vadd.f32 %v765_v56, %v639_v50  ;;  %v268_v56 = vld [vmem:[%s1113_s23 + $0x348] sm:$0xff] }
  0xd7   : > { %v507_v18 = vadd.f32 %v506_v13, %v380_v12  ;;  %v644_v12 = vmul.f32 %v383_v27, %v383_v27  ;;  %v403_v0 = vsub.f32 %v268_v56, %v1124_v2 }
  0xd8   : > { %v767_v3 = vadd.f32 %v766_v61, %v640_v55  ;;  %v269_v61 = vld [vmem:[%s1113_s23 + $0x350] sm:$0xff] }
  0xd9   : > { %v508_v23 = vadd.f32 %v507_v18, %v381_v17  ;;  %v645_v17 = vmul.f32 %v384_v32, %v384_v32  ;;  %v404_v6 = vsub.f32 %v269_v61, %v1124_v2 }
  0xda   : > { %v768_v8 = vadd.f32 %v767_v3, %v641_v60  ;;  %v270_v3 = vld [vmem:[%s1113_s23 + $0x358] sm:$0xff] }
  0xdb   : > { %v509_v28 = vadd.f32 %v508_v23, %v382_v22  ;;  %v646_v22 = vmul.f32 %v385_v37, %v385_v37 }
  0xdc   : > { %v769_v13 = vadd.f32 %v768_v8, %v642_v1  ;;  %v271_v8 = vld [vmem:[%s1113_s23 + $0x360] sm:$0xff] }
  0xdd   : > { %v510_v33 = vadd.f32 %v509_v28, %v383_v27  ;;  %v647_v27 = vmul.f32 %v386_v42, %v386_v42 }
  0xde   : > { %v770_v18 = vadd.f32 %v769_v13, %v643_v7 }
  0xdf   : > { %v511_v38 = vadd.f32 %v510_v33, %v384_v32  ;;  %v648_v32 = vmul.f32 %v387_v47, %v387_v47 }
  0xe0   : > { %v771_v23 = vadd.f32 %v770_v18, %v644_v12  ;;  %v405_v12 = vsub.f32 %v270_v3, %v1343_v11  ;;  %v273_v18 = vld [vmem:[%s1113_s23 + $0x370] sm:$0xff] }
  0xe1   : > { %v512_v43 = vadd.f32 %v511_v38, %v385_v37  ;;  %v649_v37 = vmul.f32 %v388_v52, %v388_v52  ;;  %v408_v26 = vsub.f32 %v273_v18, %v1343_v11 }
  0xe2   : > { %v772_v28 = vadd.f32 %v771_v23, %v645_v17  ;;  %v406_v17 = vsub.f32 %v271_v8, %v1343_v11  ;;  %v274_v23 = vld [vmem:[%s1113_s23 + $0x378] sm:$0xff] }
  0xe3   : > { %v513_v48 = vadd.f32 %v512_v43, %v386_v42  ;;  %v650_v42 = vmul.f32 %v389_v57, %v389_v57  ;;  %v409_v31 = vsub.f32 %v274_v23, %v1343_v11 }
  0xe4   : > { %v773_v33 = vadd.f32 %v772_v28, %v646_v22  ;;  %v275_v28 = vld [vmem:[%s1113_s23 + $0x380] sm:$0xff] }
  0xe5   : > { %v514_v53 = vadd.f32 %v513_v48, %v387_v47  ;;  %v651_v47 = vmul.f32 %v390_v62, %v390_v62  ;;  %v410_v36 = vsub.f32 %v275_v28, %v1343_v11 }
  0xe6   : > { %v774_v38 = vadd.f32 %v773_v33, %v647_v27  ;;  %v276_v33 = vld [vmem:[%s1113_s23 + $0x388] sm:$0xff] }
  0xe7   : > { %v515_v58 = vadd.f32 %v514_v53, %v388_v52  ;;  %v652_v52 = vmul.f32 %v391_v4, %v391_v4  ;;  %v411_v41 = vsub.f32 %v276_v33, %v1343_v11 }
  0xe8   : > { %v775_v43 = vadd.f32 %v774_v38, %v648_v32  ;;  %v277_v38 = vld [vmem:[%s1113_s23 + $0x390] sm:$0xff] }
  0xe9   : > { %v516_v63 = vadd.f32 %v515_v58, %v389_v57  ;;  %v653_v57 = vmul.f32 %v392_v9, %v392_v9  ;;  %v412_v46 = vsub.f32 %v277_v38, %v1343_v11 }
  0xea   : > { %v776_v48 = vadd.f32 %v775_v43, %v649_v37  ;;  %v278_v43 = vld [vmem:[%s1113_s23 + $0x398] sm:$0xff] }
  0xeb   : > { %v517_v5 = vadd.f32 %v516_v63, %v390_v62  ;;  %v654_v62 = vmul.f32 %v393_v14, %v393_v14  ;;  %v413_v51 = vsub.f32 %v278_v43, %v1343_v11  ;;  %v289_v43 = vld [vmem:[%s1113_s23 + $0x3f0] sm:$0xff] }
  0xec   : > { %v777_v53 = vadd.f32 %v776_v48, %v650_v42  ;;  %v279_v48 = vld [vmem:[%s1113_s23 + $0x3a0] sm:$0xff] }
  0xed   : > { %v518_v10 = vadd.f32 %v517_v5, %v391_v4  ;;  %v655_v4 = vmul.f32 %v394_v19, %v394_v19  ;;  %v414_v56 = vsub.f32 %v279_v48, %v1343_v11 }
  0xee   : > { %v778_v58 = vadd.f32 %v777_v53, %v651_v47  ;;  %v280_v53 = vld [vmem:[%s1113_s23 + $0x3a8] sm:$0xff] }
  0xef   : > { %v519_v15 = vadd.f32 %v518_v10, %v392_v9  ;;  %v656_v9 = vmul.f32 %v395_v24, %v395_v24  ;;  %v415_v61 = vsub.f32 %v280_v53, %v1343_v11  ;;  %v675_v38 = vmul.f32 %v414_v56, %v414_v56 }
  0xf0   : > { %v779_v63 = vadd.f32 %v778_v58, %v652_v52  ;;  %v281_v58 = vld [vmem:[%s1113_s23 + $0x3b0] sm:$0xff] }
  0xf1   : > { %v520_v20 = vadd.f32 %v519_v15, %v393_v14  ;;  %v272_v14 = vld [vmem:[%s1113_s23 + $0x368] sm:$0xff]  ;;  %v657_v15 = vmul.f32 %v396_v29, %v396_v29  ;;  %v416_v3 = vsub.f32 %v281_v58, %v1343_v11 }
  0xf2   : > { %v780_v5 = vadd.f32 %v779_v63, %v653_v57  ;;  %v407_v21 = vsub.f32 %v272_v14, %v1343_v11  ;;  %v282_v63 = vld [vmem:[%s1113_s23 + $0x3b8] sm:$0xff] }
  0xf3   : > { %v521_v25 = vadd.f32 %v520_v20, %v394_v19  ;;  %v658_v19 = vmul.f32 %v397_v34, %v397_v34  ;;  %v417_v8 = vsub.f32 %v282_v63, %v1343_v11 }
  0xf4   : > { %v781_v10 = vadd.f32 %v780_v5, %v654_v62  ;;  %v283_v5 = vld [vmem:[%s1113_s23 + $0x3c0] sm:$0xff] }
  0xf5   : > { %v522_v30 = vadd.f32 %v521_v25, %v395_v24  ;;  %v659_v24 = vmul.f32 %v398_v39, %v398_v39  ;;  %v418_v14 = vsub.f32 %v283_v5, %v1343_v11  ;;  %v678_v48 = vmul.f32 %v417_v8, %v417_v8 }
  0xf6   : > { %v782_v16 = vadd.f32 %v781_v10, %v655_v4  ;;  %v284_v10 = vld [vmem:[%s1113_s23 + $0x3c8] sm:$0xff] }
  0xf7   : > { %v523_v35 = vadd.f32 %v522_v30, %v396_v29  ;;  %v660_v29 = vmul.f32 %v399_v44, %v399_v44  ;;  %v419_v18 = vsub.f32 %v284_v10, %v1343_v11 }
  0xf8   : > { %v783_v20 = vadd.f32 %v782_v16, %v656_v9  ;;  %v285_v16 = vld [vmem:[%s1113_s23 + $0x3d0] sm:$0xff] }
  0xf9   : > { %v524_v40 = vadd.f32 %v523_v35, %v397_v34  ;;  %v661_v34 = vmul.f32 %v400_v49, %v400_v49  ;;  %v420_v23 = vsub.f32 %v285_v16, %v1343_v11 }
  0xfa   : > { %v784_v25 = vadd.f32 %v783_v20, %v657_v15  ;;  %v286_v20 = vld [vmem:[%s1113_s23 + $0x3d8] sm:$0xff] }
  0xfb   : > { %v525_v45 = vadd.f32 %v524_v40, %v398_v39  ;;  %v662_v39 = vmul.f32 %v401_v54, %v401_v54  ;;  %v421_v28 = vsub.f32 %v286_v20, %v1343_v11  ;;  %v681_v58 = vmul.f32 %v420_v23, %v420_v23 }
  0xfc   : > { %v785_v30 = vadd.f32 %v784_v25, %v658_v19  ;;  %v672_v25 = vmul.f32 %v411_v41, %v411_v41 }
  0xfd   : > { %v526_v50 = vadd.f32 %v525_v45, %v399_v44  ;;  %v663_v44 = vmul.f32 %v402_v59, %v402_v59 }
  0xfe   : > { %v786_v35 = vadd.f32 %v785_v30, %v659_v24  ;;  %v673_v30 = vmul.f32 %v412_v46, %v412_v46 }
  0xff   : > { %v527_v55 = vadd.f32 %v526_v50, %v400_v49  ;;  %v664_v49 = vmul.f32 %v403_v0, %v403_v0 }
 0x100   : > { %v787_v40 = vadd.f32 %v786_v35, %v660_v29 }
 0x101   : > { %v528_v60 = vadd.f32 %v527_v55, %v401_v54  ;;  %v665_v54 = vmul.f32 %v404_v6, %v404_v6 }
 0x102   : > { %v788_v45 = vadd.f32 %v787_v40, %v661_v34  ;;  %v674_v34 = vmul.f32 %v413_v51, %v413_v51 }
 0x103   : > { %v529_v1 = vadd.f32 %v528_v60, %v402_v59  ;;  %v666_v59 = vmul.f32 %v405_v12, %v405_v12 }
 0x104   : > { %v789_v50 = vadd.f32 %v788_v45, %v662_v39  ;;  %v677_v45 = vmul.f32 %v416_v3, %v416_v3 }
 0x105   : > { %v530_v7 = vadd.f32 %v529_v1, %v403_v0  ;;  %v667_v0 = vmul.f32 %v406_v17, %v406_v17 }
 0x106   : > { %v790_v55 = vadd.f32 %v789_v50, %v663_v44  ;;  %v290_v50 = vld [vmem:[%s1113_s23 + $0x3f8] sm:$0xff] }
 0x107   : > { %v531_v13 = vadd.f32 %v530_v7, %v404_v6  ;;  %v668_v6 = vmul.f32 %v407_v21, %v407_v21 }
 0x108   : > { %v791_v60 = vadd.f32 %v790_v55, %v664_v49  ;;  %v680_v55 = vmul.f32 %v419_v18, %v419_v18 }
 0x109   : > { %v532_v2 = vadd.f32 %v531_v13, %v405_v12  ;;  %v669_v12 = vmul.f32 %v408_v26, %v408_v26 }
 0x10a   : > { %v792_v1 = vadd.f32 %v791_v60, %v665_v54  ;;  %v425_v54 = vsub.f32 %v290_v50, %v1343_v11  ;;  %v682_v60 = vmul.f32 %v421_v28, %v421_v28 }
 0x10b   : > { %v533_v22 = vadd.f32 %v532_v2, %v406_v17  ;;  %v670_v17 = vmul.f32 %v409_v31, %v409_v31 }
 0x10c   : > { %v793_v7 = vadd.f32 %v792_v1, %v666_v59 }
 0x10d   : > { %v534_v27 = vadd.f32 %v533_v22, %v407_v21  ;;  %v671_v21 = vmul.f32 %v410_v36, %v410_v36 }
 0x10e   : > { %v794_v13 = vadd.f32 %v793_v7, %v667_v0  ;;  %v686_v7 = vmul.f32 %v425_v54, %v425_v54 }
 0x10f   : > { %v535_v32 = vadd.f32 %v534_v27, %v408_v26  ;;  %v287_v27 = vld [vmem:[%s1113_s23 + $0x3e0] sm:$0xff] }
 0x110   : > { %v795_v2 = vadd.f32 %v794_v13, %v668_v6  ;;  %v422_v33 = vsub.f32 %v287_v27, %v1343_v11 }
 0x111   : > { %v536_v37 = vadd.f32 %v535_v32, %v409_v31 }
 0x112   : > { %v796_v22 = vadd.f32 %v795_v2, %v669_v12  ;;  %v683_v63 = vmul.f32 %v422_v33, %v422_v33 }
 0x113   : > { %v537_v42 = vadd.f32 %v536_v37, %v410_v36  ;;  %v288_v36 = vld [vmem:[%s1113_s23 + $0x3e8] sm:$0xff] }
 0x114   : > { %v797_v26 = vadd.f32 %v796_v22, %v670_v17  ;;  %v423_v40 = vsub.f32 %v288_v36, %v1343_v11 }
 0x115   : > { %v538_v47 = vadd.f32 %v537_v42, %v411_v41  ;;  %v676_v41 = vmul.f32 %v415_v61, %v415_v61 }
 0x116   : > { %v798_v31 = vadd.f32 %v797_v26, %v671_v21  ;;  %v684_v1 = vmul.f32 %v423_v40, %v423_v40 }
 0x117   : > { %v539_v52 = vadd.f32 %v538_v47, %v412_v46  ;;  %v424_v46 = vsub.f32 %v289_v43, %v1343_v11 }
 0x118   : > { %v799_v35 = vadd.f32 %v798_v31, %v672_v25 }
 0x119   : > { %v540_v57 = vadd.f32 %v539_v52, %v413_v51  ;;  %v679_v52 = vmul.f32 %v418_v14, %v418_v14  ;;  %v685_v5 = vmul.f32 %v424_v46, %v424_v46 }
 0x11a   : > { %v800_v39 = vadd.f32 %v799_v35, %v673_v30 }
 0x11b   : > { %v541_v62 = vadd.f32 %v540_v57, %v414_v56 }
 0x11c   : > { %v801_v42 = vadd.f32 %v800_v39, %v674_v34 }
 0x11d   : > { %v542_v4 = vadd.f32 %v541_v62, %v415_v61 }
 0x11e   : > { %v802_v47 = vadd.f32 %v801_v42, %v675_v38 }
 0x11f   : > { %v543_v9 = vadd.f32 %v542_v4, %v416_v3 }
 0x120   : > { %v803_v49 = vadd.f32 %v802_v47, %v676_v41 }
 0x121   : > { %v544_v15 = vadd.f32 %v543_v9, %v417_v8 }
 0x122   : > { %v804_v53 = vadd.f32 %v803_v49, %v677_v45 }
 0x123   : > { %v545_v19 = vadd.f32 %v544_v15, %v418_v14 }
 0x124   : > { %v805_v56 = vadd.f32 %v804_v53, %v678_v48 }
 0x125   : > { %v546_v24 = vadd.f32 %v545_v19, %v419_v18 }
 0x126   : > { %v806_v59 = vadd.f32 %v805_v56, %v679_v52 }
 0x127   : > { %v547_v29 = vadd.f32 %v546_v24, %v420_v23 }
 0x128   : > { %v807_v61 = vadd.f32 %v806_v59, %v680_v55 }
 0x129   : > { %v548_v32 = vadd.f32 %v547_v29, %v421_v28 }
 0x12a   : > { %v808_v0 = vadd.f32 %v807_v61, %v681_v58 }
 0x12b   : > { %v549_v37 = vadd.f32 %v548_v32, %v422_v33 }
 0x12c   : > { %v809_v3 = vadd.f32 %v808_v0, %v682_v60 }
 0x12d   : > { %v550_v44 = vadd.f32 %v549_v37, %v423_v40 }
 0x12e   : > { %v810_v6 = vadd.f32 %v809_v3, %v683_v63 }
 0x12f   : > { %v551_v51 = vadd.f32 %v550_v44, %v424_v46 }
 0x130   : > { %v811_v8 = vadd.f32 %v810_v6, %v684_v1 }
 0x131   : > { %v552_v57 = vadd.f32 %v551_v51, %v425_v54 }
 0x132   : > { %v812_v9 = vadd.f32 %v811_v8, %v685_v5 }
 0x133   : > { %v553_v62 = vrot.slane %v552_v57, 4 }
 0x134   : > { %v813_v10 = vadd.f32 %v812_v9, %v686_v7 }
 0x135   : > { %v554_v4 = vadd.f32 %v553_v62, %v552_v57 }
 0x136   : > { %v814_v13 = vrot.slane %v813_v10, 4 }
 0x137   : > { %v555_v11 = vrot.slane %v554_v4, 2 }
 0x138   : > { %v815_v14 = vadd.f32 %v814_v13, %v813_v10 }
 0x139   : > { %v556_v12 = vadd.f32 %v555_v11, %v554_v4 }
 0x13a   : > { %v816_v16 = vrot.slane %v815_v14, 2 }
 0x13b   : > { %v557_v15 = vrot.slane %v556_v12, 1 }
 0x13c   : > { %v817_v17 = vadd.f32 %v816_v16, %v815_v14 }
 0x13d   : > { %v558_v2 = vadd.f32 %v557_v15, %v556_v12 }
 0x13e   : > { %v818_v18 = vrot.slane %v817_v17, 1 }
 0x140   : > { %v819_v19 = vadd.f32 %v818_v18, %v817_v17 }
 0x142   : > { %v821_v20 = vsel %vm820_vm0, %v558_v2, %v819_v19 }
 0x143   : > { %822 = vst [vmem:[%s162_s29] sm:$0x3] %v821_v20 }
 0x144 PF: > { %p12_p8 = scmp.ge.s32.totalorder %s1049_s14, 4   ;;  %s1409_s9 = smov %s999_s10 }
 0x145   : > { %s1410_s10 = smov %s1003_s11  ;;  %s1411_s11 = smov %s1059_s17 }
 0x146   : > { %s1412_s12 = smov %s1049_s14  ;;  %14 = sbr.rel (!%p12_p8) target bundleno = 3 (0x3), region = 68 }
 0x14d   :  { %842 = vsyncpa [#allocation3], 1 }
 0x14e   :  { %844 = vsyncpa [#allocation3 + $0x1], 1 }

// kernel: feedforward.5
= control target key start
LH: loop header
LB: loop body
LE: loop exit
PB: predicated region body
PF: predicated region fallthrough
CT: control target
= control target key end

     0   :  { %9 = vsyncpa [#allocation3], 0  ;;  %s3643_s0 = inlined_call_operand.vmem [shape: bf16[2048,256], index: 0, kind: input, shape index: {}]   ;;  %s3644_s1 = inlined_call_operand.vmem [shape: f32[2,256], index: 1, kind: input, shape index: {}]   ;;  %s3645_s2 = inlined_call_operand.vmem [shape: bf16[256,128], index: 2, kind: input, shape index: {}]   ;;  %s3646_s3 = inlined_call_operand.vmem [shape: f32[1,128], index: 3, kind: input, shape index: {}]   ;;  %s3647_s4 = inlined_call_operand.hbm [shape: f32[2048,128], index: 4, kind: output, shape index: {}]  }
   0x1   :  { %11 = vsyncpa [#allocation3 + $0x1], 0  ;;  %s2353_s15 = smov 0   ;;  %s2355_s16 = smov 0  }
   0x2   :  { %s2357_s17 = smov 0   ;;  %s2359_s18 = smov 0  }
   0x3 LB: > { %s2374_s19 = sadd.s32 4294967295, %s2322_s18   ;;  %s2136_s20 = sadd.s32 4294967294, %s2322_s18   ;;  %s2322_s18 = sphi %s2359_s18, %s3653_s18   ;;  %s2318_s17 = sphi %s2357_s17, %s3652_s17   ;;  %s2314_s16 = sphi %s2355_s16, %s3651_s16   ;;  %s2310_s15 = sphi %s2353_s15, %s3650_s15  }
   0x4   : > { %s2378_s21 = sadd.s32 1, %s2322_s18   ;;  %s113_s22 = sadd.s32 1, %s2318_s17 }
   0x5   : > { %s110_s23 = ssub.s32 %s2322_s18, %s2378_s21  ;;  %p123_p0 = scmp.ne.s32.totalorder %s2318_s17, %s2314_s16 }
   0x6   : > { %p111_p1 = scmp.eq.s32.totalorder %s110_s23, 0  ;;  %p124_p2 = scmp.eq.s32.totalorder %s2374_s19, 1 }
   0x7   : > { %p129_p3 = scmp.ne.s32.totalorder %s2314_s16, %s2310_s15  ;;  %p130_p4 = scmp.eq.s32.totalorder %s2136_s20, 1 }
   0x8   : > { %s2389_s24 = scalar_select %p111_p1, %s2318_s17, %s113_s22  }
   0x9   : > { %p2391_p5 = por %p124_p2, %p123_p0  ;;  %p2395_p6 = por %p130_p4, %p129_p3 }
   0xa   : > { %p2139_p7 = scmp.ge.s32.totalorder %s2322_s18, 1  ;;  %p167_p8 = scmp.lt.s32.totalorder %s2322_s18, 3 }
   0xc   : > { %p168_p9 = pnand %p2139_p7, %p167_p8 }
   0xd   : > { %v2243_v0 = vld [vmem:[%s3645_s2] sm:$0xff] (!%p168_p9)   ;;  %v2324_v1 = vmov (!%p168_p9), 0   ;;  %s2141_s29 = sshll.u32 (!%p168_p9), %s2374_s19, 7  ;;  %v2244_v2 = vld [vmem:[%s3645_s2 + $0x8] sm:$0xff] (!%p168_p9)   ;;  %v2245_v3 = vld [vmem:[%s3645_s2 + $0x10] sm:$0xff] (!%p168_p9)   ;;  %v589_v4 = vlaneseq (!%p168_p9)  ;;  %s191_s9 = sand.u32 (!%p168_p9), 1, %s2314_s16  }
   0xe   : > { %171 = sbr.rel (%p168_p9) target bundleno = 557 (0x22d), region = 36  ;;  %1387 = vmatprep.subr.bf16.mxu0 (!%p168_p9), %v2324_v1  ;;  %2169 = vmatprep.subr.bf16.mxu1 (!%p168_p9), %v2324_v1  ;;  %p195_p10 = scmp.lt.s32.totalorder (!%p168_p9), %s2141_s29, 255  ;;  %v2246_v5 = vld [vmem:[%s3645_s2 + $0x18] sm:$0xff] (!%p168_p9)   ;;  %v2247_v7 = vld [vmem:[%s3645_s2 + $0x20] sm:$0xff] (!%p168_p9)   ;;  %v2248_v17 = vld [vmem:[%s3645_s2 + $0x28] sm:$0xff] (!%p168_p9)  }
   0xf   : > { %1388 = vmatpush1.bf16.msra.mxu0 (!%p168_p9), %v2243_v0  ;;  %2185 = vmatpush1.bf16.msra.mxu1 (!%p168_p9), %v2243_v0  ;;  %v2420_v6 = vshrl.u32 (!%p168_p9), %v589_v4, 7  ;;  %v2444_v11 = vld [vmem:[%s3644_s1] ss:$2 sm:$0x3] (!%p168_p9)  ;;  %v2249_v26 = vld [vmem:[%s3645_s2 + $0x30] sm:$0xff] (!%p168_p9)   ;;  %v2250_v33 = vld [vmem:[%s3645_s2 + $0x38] sm:$0xff] (!%p168_p9)  }
  0x10   : > { %1389 = vmatprep.subr.bf16.mxu0 (!%p168_p9), %v2324_v1  ;;  %2170 = vmatprep.subr.bf16.mxu1 (!%p168_p9), %v2324_v1  ;;  %v2451_v14 = vld [vmem:[%s3644_s1 + $0x1] ss:$2 sm:$0x3] (!%p168_p9)  ;;  %v2252_v35 = vld [vmem:[%s3645_s2 + $0x48] sm:$0xff] (!%p168_p9)   ;;  %v2253_v36 = vld [vmem:[%s3645_s2 + $0x50] sm:$0xff] (!%p168_p9)   ;;  %s2168_s22 = sshll.u32 (!%p168_p9), %s2374_s19, 14 }
  0x11   : > { %v595_v8 = vsub.s32 (!%p168_p9), 1, %v2420_v6  ;;  %v2251_v34 = vld [vmem:[%s3645_s2 + $0x40] sm:$0xff] (!%p168_p9)   ;;  %v2254_v37 = vld [vmem:[%s3645_s2 + $0x58] sm:$0xff] (!%p168_p9)   ;;  %v591_v38 = vsub.s32 (!%p168_p9), 0, %v2420_v6  ;;  %v2256_v53 = vld [vmem:[%s3645_s2 + $0x68] sm:$0xff] (!%p168_p9)   ;;  %s3602_s19 = scalar_lea.sflag (!%p168_p9), [#allocation3], %s191_s9 }
  0x12   : > { %v2255_v41 = vld [vmem:[%s3645_s2 + $0x60] sm:$0xff] (!%p168_p9)   ;;  %v2257_v63 = vld [vmem:[%s3645_s2 + $0x70] sm:$0xff] (!%p168_p9)   ;;  %s2325_s5 = smov (!%p168_p9), [#allocation2]  }
  0x13   : > { %1390 = vmatpush1.bf16.msra.mxu0 (!%p168_p9), %v2244_v2  ;;  %2186 = vmatpush1.bf16.msra.mxu1 (!%p168_p9), %v2244_v2  ;;  %v2463_v18 = vrot.slane (!%p168_p9), %v2444_v11, %v595_v8  ;;  %v2468_v19 = vrot.slane (!%p168_p9), %v2451_v14, %v595_v8  ;;  %v2522_v43 = vrot.slane (!%p168_p9), %v2444_v11, %v591_v38  ;;  %s2264_s6 = sshll.u32 (!%p168_p9), %s2325_s5, 4  ;;  %s2265_s6 = int_to_ptr.vmem [resolvable:$false] %s2264_s6 }
  0x14   : > { %1391 = vmatprep.subr.bf16.mxu0 (!%p168_p9), %v2324_v1  ;;  %2171 = vmatprep.subr.bf16.mxu1 (!%p168_p9), %v2324_v1  ;;  %v2537_v54 = vrot.slane (!%p168_p9), %v2451_v14, %v591_v38  ;;  %s2266_s7 = scalar_lea.vmem (!%p168_p9), %s2265_s6, 32768 }
  0x15   : > { %s3655_s29 = smov (!%p195_p10, %s2141_s29), 255 }
  0x16   : > { %s2167_s10 = sshll.u32 %s3655_s29, 3  ;;  %s3590_s29 = scalar_lea.hbm %s3647_s4, %s2168_s22 }
  0x17   : > { %1392 = vmatpush1.bf16.msra.mxu0 %v2245_v3  ;;  %2187 = vmatpush1.bf16.msra.mxu1 %v2245_v3  ;;  %s2427_s13 = scalar_lea.vmem %s3643_s0, %s2167_s10  ;;  %s3195_s10 = sshll.u32 %s191_s9, 10 }
  0x18   : > { %1393 = vmatprep.subr.bf16.mxu0 %v2324_v1  ;;  %2172 = vmatprep.subr.bf16.mxu1 %v2324_v1  ;;  %v2436_v9 = vld [vmem:[%s2427_s13] sm:$0xff]  ;;  %v2439_v10 = vld [vmem:[%s2427_s13 + $0x8] sm:$0xff]  ;;  %v2512_v39 = vld [vmem:[%s2427_s13 + $0x10] sm:$0xff]  ;;  %s3240_s14 = scalar_lea.vmem [#allocation2], %s3195_s10 }
  0x19   : > { %v332_v12 = vunpack.c.h.bf16 %v2436_v9  ;;  %v334_v13 = vunpack.c.h.bf16 %v2439_v10  ;;  %v2454_v15 = vld [vmem:[%s2427_s13 + $0x200] sm:$0xff]  ;;  %v2457_v16 = vld [vmem:[%s2427_s13 + $0x208] sm:$0xff]  ;;  %v2515_v40 = vld [vmem:[%s2427_s13 + $0x18] sm:$0xff]  ;;  %v331_v42 = vunpack.c.l.bf16 %v2436_v9  ;;  %v333_v46 = vunpack.c.l.bf16 %v2439_v10  ;;  %s2074_s23 = sshll.u32 %s3240_s14, 4  ;;  %s3592_s23 = int_to_ptr.vmem [resolvable:$true] %s2074_s23 }
  0x1a   : > { %v460_v20 = vunpack.c.h.bf16 %v2454_v15  ;;  %v462_v21 = vunpack.c.h.bf16 %v2457_v16  ;;  %v269_v44 = vld [vmem:[%s2427_s13 + $0x210] sm:$0xff]  ;;  %v270_v45 = vld [vmem:[%s2427_s13 + $0x218] sm:$0xff]  ;;  %v459_v47 = vunpack.c.l.bf16 %v2454_v15  ;;  %v461_v48 = vunpack.c.l.bf16 %v2457_v16  ;;  %v2554_v2 = vld [vmem:[%s2427_s13 + $0x20] sm:$0xff]  ;;  %s2260_s30 = scalar_lea.vmem %s3592_s23, 16384  ;;  %p2267_p0 = scmp.lt.s32.totalorder %s3592_s23, %s2265_s6 }
  0x1b   : > { %1394 = vmatpush1.bf16.msra.mxu0 %v2246_v5  ;;  %2188 = vmatpush1.bf16.msra.mxu1 %v2246_v5  ;;  %v600_v22 = vmul.f32 %v2463_v18, %v332_v12  ;;  %v602_v23 = vmul.f32 %v2463_v18, %v334_v13  ;;  %v336_v49 = vunpack.c.h.bf16 %v2512_v39  ;;  %v338_v50 = vunpack.c.h.bf16 %v2515_v40  ;;  %v271_v8 = vld [vmem:[%s2427_s13 + $0x220] sm:$0xff]  ;;  %v272_v9 = vld [vmem:[%s2427_s13 + $0x228] sm:$0xff]  ;;  %p2261_p11 = scmp.ne.s32.totalorder %s3592_s23, %s2260_s30  ;;  %p2268_p1 = scmp.lt.s32.totalorder %s2266_s7, %s2260_s30 }
  0x1c   : > { %1395 = vmatprep.subr.bf16.mxu0 %v2324_v1  ;;  %2173 = vmatprep.subr.bf16.mxu1 %v2324_v1  ;;  %v728_v24 = vmul.f32 %v2463_v18, %v460_v20  ;;  %v730_v25 = vmul.f32 %v2463_v18, %v462_v21  ;;  %v464_v51 = vunpack.c.h.bf16 %v269_v44  ;;  %v466_v52 = vunpack.c.h.bf16 %v270_v45  ;;  %v2258_v20 = vld [vmem:[%s3645_s2 + $0x78] sm:$0xff]  }
  0x1d   : > { %v869_v27 = vadd.f32 %v2468_v19, %v600_v22  ;;  %v871_v28 = vadd.f32 %v2468_v19, %v602_v23  ;;  %v599_v55 = vmul.f32 %v2522_v43, %v331_v42  ;;  %v601_v56 = vmul.f32 %v2522_v43, %v333_v46  ;;  %v274_v42 = vld [vmem:[%s2427_s13 + $0x238] sm:$0xff]  ;;  %p2262_p12 = pnand %p2261_p11, %p2391_p5  ;;  %p2269_p2 = por %p2268_p1, %p2267_p0 }
  0x1e   : > { %v997_v29 = vadd.f32 %v2468_v19, %v728_v24  ;;  %v999_v30 = vadd.f32 %v2468_v19, %v730_v25  ;;  %v727_v57 = vmul.f32 %v2522_v43, %v459_v47  ;;  %v729_v58 = vmul.f32 %v2522_v43, %v461_v48 }
  0x1f   : > { %1396 = vmatpush1.bf16.msra.mxu0 %v2247_v7  ;;  %2189 = vmatpush1.bf16.msra.mxu1 %v2247_v7  ;;  %v1125_v31 = vpack.c.bf16 %v871_v28, %v869_v27  ;;  %v604_v59 = vmul.f32 %v2463_v18, %v336_v49  ;;  %v606_v60 = vmul.f32 %v2463_v18, %v338_v50  ;;  %v335_v5 = vunpack.c.l.bf16 %v2512_v39  ;;  %v208_v7 = vld [vmem:[%s2427_s13 + $0x28] sm:$0xff]  ;;  %p2263_p13 = pneg %p2262_p12 }
  0x20   : > { %1397 = vmatprep.subr.bf16.mxu0 %v2324_v1  ;;  %2174 = vmatprep.subr.bf16.mxu1 %v2324_v1  ;;  %v1189_v32 = vpack.c.bf16 %v999_v30, %v997_v29  ;;  %v732_v61 = vmul.f32 %v2463_v18, %v464_v51  ;;  %v734_v62 = vmul.f32 %v2463_v18, %v466_v52  ;;  %v337_v6 = vunpack.c.l.bf16 %v2515_v40 }
  0x21   : > { %1419 = vmatprep.mubr.bf16.mxu0 %v1125_v31  ;;  %v868_v0 = vadd.f32 %v2537_v54, %v599_v55  ;;  %v870_v3 = vadd.f32 %v2537_v54, %v601_v56  ;;  %v996_v4 = vadd.f32 %v2537_v54, %v727_v57  ;;  %v998_v10 = vadd.f32 %v2537_v54, %v729_v58  ;;  %p2270_p3 = pnand %p2269_p2, %p2263_p13 }
  0x22   : > { %1675 = vmatprep.mubr.bf16.mxu1 %v1189_v32  ;;  %v873_v11 = vadd.f32 %v2468_v19, %v604_v59  ;;  %v875_v12 = vadd.f32 %v2468_v19, %v606_v60  ;;  %v463_v13 = vunpack.c.l.bf16 %v269_v44  ;;  %v1001_v14 = vadd.f32 %v2468_v19, %v732_v61 }
  0x23   : > { %1398 = vmatpush1.bf16.msra.mxu0 %v2248_v17  ;;  %2190 = vmatpush1.bf16.msra.mxu1 %v2248_v17  ;;  %v1003_v15 = vadd.f32 %v2468_v19, %v734_v62  ;;  %v465_v16 = vunpack.c.l.bf16 %v270_v45  ;;  %v340_v17 = vunpack.c.h.bf16 %v2554_v2  ;;  %v342_v21 = vunpack.c.h.bf16 %v208_v7 }
  0x24   : > { %1399 = vmatprep.subr.bf16.mxu0 %v2324_v1  ;;  %2175 = vmatprep.subr.bf16.mxu1 %v2324_v1  ;;  %v468_v22 = vunpack.c.h.bf16 %v271_v8  ;;  %v470_v23 = vunpack.c.h.bf16 %v272_v9  ;;  %v603_v24 = vmul.f32 %v2522_v43, %v335_v5  ;;  %v605_v25 = vmul.f32 %v2522_v43, %v337_v6  ;;  %v211_v6 = vld [vmem:[%s2427_s13 + $0x40] sm:$0xff] }
  0x25   : > { %v1188_v27 = vpack.c.bf16 %v998_v10, %v996_v4  ;;  %v731_v28 = vmul.f32 %v2522_v43, %v463_v13  ;;  %v1127_v29 = vpack.c.bf16 %v875_v12, %v873_v11  ;;  %v1191_v30 = vpack.c.bf16 %v1003_v15, %v1001_v14  ;;  %v212_v11 = vld [vmem:[%s2427_s13 + $0x48] sm:$0xff]  ;;  %v275_v12 = vld [vmem:[%s2427_s13 + $0x240] sm:$0xff] }
  0x26   : > { %v733_v31 = vmul.f32 %v2522_v43, %v465_v16  ;;  %v608_v32 = vmul.f32 %v2463_v18, %v340_v17  ;;  %v872_v38 = vadd.f32 %v2537_v54, %v603_v24  ;;  %v874_v39 = vadd.f32 %v2537_v54, %v605_v25  ;;  %v276_v13 = vld [vmem:[%s2427_s13 + $0x248] sm:$0xff] }
  0x27   : > { %1400 = vmatpush1.bf16.msra.mxu0 %v2249_v26  ;;  %2191 = vmatpush1.bf16.msra.mxu1 %v2249_v26  ;;  %v1124_v26 = vpack.c.bf16 %v870_v3, %v868_v0  ;;  %v339_v40 = vunpack.c.l.bf16 %v2554_v2  ;;  %v1000_v44 = vadd.f32 %v2537_v54, %v731_v28  ;;  %v467_v45 = vunpack.c.l.bf16 %v271_v8 }
  0x28   : > { %1401 = vmatprep.subr.bf16.mxu0 %v2324_v1  ;;  %2176 = vmatprep.subr.bf16.mxu1 %v2324_v1  ;;  %v469_v46 = vunpack.c.l.bf16 %v272_v9  ;;  %v1002_v48 = vadd.f32 %v2537_v54, %v733_v31  ;;  %v877_v49 = vadd.f32 %v2468_v19, %v608_v32  ;;  %v474_v56 = vunpack.c.h.bf16 %v274_v42 }
  0x29   : > { %v607_v57 = vmul.f32 %v2522_v43, %v339_v40  ;;  %v735_v59 = vmul.f32 %v2522_v43, %v467_v45  ;;  %v1126_v62 = vpack.c.bf16 %v874_v39, %v872_v38  ;;  %v350_v25 = vunpack.c.h.bf16 %v212_v11  ;;  %v214_v40 = vld [vmem:[%s2427_s13 + $0x58] sm:$0xff] }
  0x2a   : > { %v737_v60 = vmul.f32 %v2522_v43, %v469_v46  ;;  %v742_v5 = vmul.f32 %v2463_v18, %v474_v56  ;;  %v347_v45 = vunpack.c.l.bf16 %v211_v6  ;;  %v349_v46 = vunpack.c.l.bf16 %v212_v11 }
  0x2b   : > { %1402 = vmatpush1.bf16.msra.mxu0 %v2250_v33  ;;  %2192 = vmatpush1.bf16.msra.mxu1 %v2250_v33  ;;  %v2582_v33 = vld [vmem:[%s2427_s13 + $0x30] sm:$0xff]  ;;  %v1004_v14 = vadd.f32 %v2537_v54, %v735_v59 }
  0x2c   : > { %1403 = vmatprep.subr.bf16.mxu0 %v2324_v1  ;;  %2177 = vmatprep.subr.bf16.mxu1 %v2324_v1  ;;  %v344_v47 = vunpack.c.h.bf16 %v2582_v33  ;;  %v343_v9 = vunpack.c.l.bf16 %v2582_v33  ;;  %v1006_v15 = vadd.f32 %v2537_v54, %v737_v60  ;;  %v1011_v24 = vadd.f32 %v2468_v19, %v742_v5 }
  0x2e   : > { %v612_v61 = vmul.f32 %v2463_v18, %v344_v47  ;;  %v611_v28 = vmul.f32 %v2522_v43, %v343_v9  ;;  %v1192_v32 = vpack.c.bf16 %v1006_v15, %v1004_v14  ;;  %v278_v47 = vld [vmem:[%s2427_s13 + $0x258] sm:$0xff]  ;;  %v353_v14 = vunpack.c.l.bf16 %v214_v40  ;;  %v216_v15 = vld [vmem:[%s2427_s13 + $0x68] sm:$0xff] }
  0x2f   : > { %1404 = vmatpush1.bf16.msra.mxu0 %v2251_v34  ;;  %2193 = vmatpush1.bf16.msra.mxu1 %v2251_v34  ;;  %v736_v34 = vmul.f32 %v2463_v18, %v468_v22  ;;  %v473_v22 = vunpack.c.l.bf16 %v274_v42  ;;  %v482_v60 = vunpack.c.h.bf16 %v278_v47 }
  0x30   : > { %1405 = vmatprep.subr.bf16.mxu0 %v2324_v1  ;;  %2178 = vmatprep.subr.bf16.mxu1 %v2324_v1  ;;  %v881_v16 = vadd.f32 %v2468_v19, %v612_v61  ;;  %v880_v42 = vadd.f32 %v2537_v54, %v611_v28  ;;  %v615_v61 = vmul.f32 %v2522_v43, %v347_v45  ;;  %v218_v45 = vld [vmem:[%s2427_s13 + $0x78] sm:$0xff] }
  0x31   : > { %v750_v9 = vmul.f32 %v2463_v18, %v482_v60 }
  0x32   : > { %v884_v11 = vadd.f32 %v2537_v54, %v615_v61 }
  0x33   : > { %1406 = vmatpush1.bf16.msra.mxu0 %v2252_v35  ;;  %2194 = vmatpush1.bf16.msra.mxu1 %v2252_v35  ;;  %v738_v35 = vmul.f32 %v2463_v18, %v470_v23  ;;  %v348_v23 = vunpack.c.h.bf16 %v211_v6  ;;  %v1019_v28 = vadd.f32 %v2468_v19, %v750_v9 }
  0x34   : > { %1407 = vmatprep.subr.bf16.mxu0 %v2324_v1  ;;  %2179 = vmatprep.subr.bf16.mxu1 %v2324_v1 }
  0x35   : > { %v1007_v55 = vadd.f32 %v2468_v19, %v738_v35  ;;  %v2627_v35 = vld [vmem:[%s2427_s13 + $0x50] sm:$0xff] }
  0x37   : > { %1408 = vmatpush1.bf16.msra.mxu0 %v2253_v36  ;;  %2195 = vmatpush1.bf16.msra.mxu1 %v2253_v36  ;;  %v210_v36 = vld [vmem:[%s2427_s13 + $0x38] sm:$0xff] }
  0x38   : > { %1409 = vmatprep.subr.bf16.mxu0 %v2324_v1  ;;  %2180 = vmatprep.subr.bf16.mxu1 %v2324_v1  ;;  %v346_v50 = vunpack.c.h.bf16 %v210_v36  ;;  %v345_v10 = vunpack.c.l.bf16 %v210_v36 }
  0x3a   : > { %v614_v0 = vmul.f32 %v2463_v18, %v346_v50  ;;  %v477_v50 = vunpack.c.l.bf16 %v276_v13 }
  0x3b   : > { %1410 = vmatpush1.bf16.msra.mxu0 %v2254_v37  ;;  %2196 = vmatpush1.bf16.msra.mxu1 %v2254_v37  ;;  %v273_v37 = vld [vmem:[%s2427_s13 + $0x230] sm:$0xff] }
  0x3c   : > { %1411 = vmatprep.subr.bf16.mxu0 %v2324_v1  ;;  %2181 = vmatprep.subr.bf16.mxu1 %v2324_v1  ;;  %v472_v51 = vunpack.c.h.bf16 %v273_v37  ;;  %v471_v17 = vunpack.c.l.bf16 %v273_v37  ;;  %v618_v37 = vmul.f32 %v2463_v18, %v350_v25 }
  0x3e   : > { %v740_v2 = vmul.f32 %v2463_v18, %v472_v51  ;;  %v739_v31 = vmul.f32 %v2522_v43, %v471_v17  ;;  %v352_v51 = vunpack.c.h.bf16 %v2627_v35  ;;  %v280_v17 = vld [vmem:[%s2427_s13 + $0x268] sm:$0xff] }
  0x3f   : > { %1412 = vmatpush1.bf16.msra.mxu0 %v2255_v41  ;;  %2197 = vmatpush1.bf16.msra.mxu1 %v2255_v41  ;;  %v341_v41 = vunpack.c.l.bf16 %v208_v7  ;;  %v876_v7 = vadd.f32 %v2537_v54, %v607_v57  ;;  %v887_v57 = vadd.f32 %v2468_v19, %v618_v37 }
  0x40   : > { %1413 = vmatprep.subr.bf16.mxu0 %v2324_v1  ;;  %2182 = vmatprep.subr.bf16.mxu1 %v2324_v1 }
  0x41   : > { %v609_v58 = vmul.f32 %v2522_v43, %v341_v41  ;;  %v277_v41 = vld [vmem:[%s2427_s13 + $0x250] sm:$0xff] }
  0x42   : > { %v480_v56 = vunpack.c.h.bf16 %v277_v41 }
  0x43   : > { %1414 = vmatpush1.bf16.msra.mxu0 %v2256_v53  ;;  %2198 = vmatpush1.bf16.msra.mxu1 %v2256_v53  ;;  %v1005_v53 = vadd.f32 %v2468_v19, %v736_v34  ;;  %v878_v8 = vadd.f32 %v2537_v54, %v609_v58  ;;  %v616_v34 = vmul.f32 %v2463_v18, %v348_v23  ;;  %v479_v23 = vunpack.c.l.bf16 %v277_v41 }
  0x44   : > { %1415 = vmatprep.subr.bf16.mxu0 %v2324_v1  ;;  %2183 = vmatprep.subr.bf16.mxu1 %v2324_v1  ;;  %v748_v6 = vmul.f32 %v2463_v18, %v480_v56 }
  0x45   : > { %v1193_v4 = vpack.c.bf16 %v1007_v55, %v1005_v53  ;;  %v885_v53 = vadd.f32 %v2468_v19, %v616_v34  ;;  %v354_v55 = vunpack.c.h.bf16 %v214_v40  ;;  %v747_v34 = vmul.f32 %v2522_v43, %v479_v23  ;;  %v284_v23 = vld [vmem:[%s2427_s13 + $0x288] sm:$0xff] }
  0x46   : > { %v1017_v25 = vadd.f32 %v2468_v19, %v748_v6 }
  0x47   : > { %1416 = vmatpush1.bf16.msra.mxu0 %v2257_v63  ;;  %2199 = vmatpush1.bf16.msra.mxu1 %v2257_v63  ;;  %v1190_v63 = vpack.c.bf16 %v1002_v48, %v1000_v44  ;;  %v1008_v48 = vadd.f32 %v2537_v54, %v739_v31  ;;  %v622_v5 = vmul.f32 %v2463_v18, %v354_v55  ;;  %v486_v31 = vunpack.c.h.bf16 %v280_v17 }
  0x48   : > { %1417 = vmatprep.subr.bf16.mxu0 %v2324_v1  ;;  %2184 = vmatprep.subr.bf16.mxu1 %v2324_v1  ;;  %v610_v1 = vmul.f32 %v2463_v18, %v342_v21  ;;  %v1009_v21 = vadd.f32 %v2468_v19, %v740_v2  ;;  %v620_v2 = vmul.f32 %v2463_v18, %v352_v51  ;;  %v282_v51 = vld [vmem:[%s2427_s13 + $0x278] sm:$0xff]  ;;  %v485_v55 = vunpack.c.l.bf16 %v280_v17 }
  0x49   : > { %v1199_v40 = vpack.c.bf16 %v1019_v28, %v1017_v25 }
  0x4a   : > { %v879_v52 = vadd.f32 %v2468_v19, %v610_v1  ;;  %v741_v1 = vmul.f32 %v2522_v43, %v473_v22  ;;  %v1195_v36 = vpack.c.bf16 %v1011_v24, %v1009_v21  ;;  %v889_v22 = vadd.f32 %v2468_v19, %v620_v2 }
  0x4b   : > { %1418 = vmatpush1.bf16.msra.mxu0 %v2258_v20  ;;  %2200 = vmatpush1.bf16.msra.mxu1 %v2258_v20  ;;  %v883_v20 = vadd.f32 %v2468_v19, %v614_v0  ;;  %v745_v0 = vmul.f32 %v2522_v43, %v477_v50  ;;  %v891_v24 = vadd.f32 %v2468_v19, %v622_v5  ;;  %v357_v50 = vunpack.c.l.bf16 %v216_v15 }
  0x4c   : > { %v1129_v3 = vpack.c.bf16 %v879_v52, %v877_v49  ;;  %v475_v49 = vunpack.c.l.bf16 %v275_v12  ;;  %v1010_v52 = vadd.f32 %v2537_v54, %v741_v1  ;;  %v753_v5 = vmul.f32 %v2522_v43, %v485_v55 }
  0x4d   : > { %v1131_v33 = vpack.c.bf16 %v883_v20, %v881_v16  ;;  %v279_v16 = vld [vmem:[%s2427_s13 + $0x260] sm:$0xff]  ;;  %v1014_v21 = vadd.f32 %v2537_v54, %v745_v0  ;;  %v490_v0 = vunpack.c.h.bf16 %v282_v51 }
  0x4e   : > { %1420 = vmatmul.mubr.bf16.vlgmr.msra.gmra.mrb[0].mxu0 %v1124_v26  ;;  %1676 = vmatmul.mubr.bf16.vlgmr.msra.gmra.mrb[0].mxu1 %v1188_v27  ;;  %v476_v26 = vunpack.c.h.bf16 %v275_v12  ;;  %v478_v27 = vunpack.c.h.bf16 %v276_v13  ;;  %v351_v13 = vunpack.c.l.bf16 %v2627_v35  ;;  %v1022_v25 = vadd.f32 %v2537_v54, %v753_v5 }
  0x4f   : > { %1427 = vmatprep.mubr.bf16.mxu0 %v1127_v29  ;;  %1683 = vmatprep.mubr.bf16.mxu1 %v1191_v30  ;;  %v613_v29 = vmul.f32 %v2522_v43, %v345_v10  ;;  %v1128_v30 = vpack.c.bf16 %v878_v8, %v876_v7  ;;  %v1133_v7 = vpack.c.bf16 %v887_v57, %v885_v53  ;;  %v215_v10 = vld [vmem:[%s2427_s13 + $0x60] sm:$0xff]  ;;  %v483_v53 = vunpack.c.l.bf16 %v279_v16 }
  0x50   : > { %v744_v38 = vmul.f32 %v2463_v18, %v476_v26  ;;  %v746_v39 = vmul.f32 %v2463_v18, %v478_v27  ;;  %v481_v26 = vunpack.c.l.bf16 %v278_v47  ;;  %v356_v27 = vunpack.c.h.bf16 %v215_v10 }
  0x51   : > { %v882_v44 = vadd.f32 %v2537_v54, %v613_v29  ;;  %v358_v29 = vunpack.c.h.bf16 %v216_v15 }
  0x52   : > { %v1013_v58 = vadd.f32 %v2468_v19, %v744_v38  ;;  %v1015_v59 = vadd.f32 %v2468_v19, %v746_v39  ;;  %v749_v37 = vmul.f32 %v2522_v43, %v481_v26  ;;  %v624_v38 = vmul.f32 %v2463_v18, %v356_v27  ;;  %v2671_v39 = vld [vmem:[%s2427_s13 + $0x70] sm:$0xff] }
  0x53   : > { %v626_v41 = vmul.f32 %v2463_v18, %v358_v29  ;;  %v360_v56 = vunpack.c.h.bf16 %v2671_v39  ;;  %v359_v17 = vunpack.c.l.bf16 %v2671_v39 }
  0x54   : > { %v1197_v8 = vpack.c.bf16 %v1015_v59, %v1013_v58  ;;  %v1018_v57 = vadd.f32 %v2537_v54, %v749_v37  ;;  %v893_v58 = vadd.f32 %v2468_v19, %v624_v38  ;;  %v362_v59 = vunpack.c.h.bf16 %v218_v45 }
  0x55   : > { %v895_v61 = vadd.f32 %v2468_v19, %v626_v41  ;;  %v628_v6 = vmul.f32 %v2463_v18, %v360_v56  ;;  %v286_v56 = vld [vmem:[%s2427_s13 + $0x298] sm:$0xff] }
  0x56   : > { %1428 = vmatmul.mubr.bf16.gmra.mrb[4].mxu0 %v1126_v62  ;;  %1684 = vmatmul.mubr.bf16.gmra.mrb[4].mxu1 %v1190_v63  ;;  %v617_v62 = vmul.f32 %v2522_v43, %v349_v46  ;;  %v743_v63 = vmul.f32 %v2522_v43, %v475_v49  ;;  %v281_v46 = vld [vmem:[%s2427_s13 + $0x270] sm:$0xff]  ;;  %v355_v49 = vunpack.c.l.bf16 %v215_v10  ;;  %v630_v9 = vmul.f32 %v2463_v18, %v362_v59 }
  0x57   : > { %1435 = vmatprep.mubr.bf16.mxu0 %v1129_v3  ;;  %1691 = vmatprep.mubr.bf16.mxu1 %v1193_v4  ;;  %v1130_v3 = vpack.c.bf16 %v882_v44, %v880_v42  ;;  %v1194_v4 = vpack.c.bf16 %v1010_v52, %v1008_v48  ;;  %v754_v44 = vmul.f32 %v2463_v18, %v486_v31  ;;  %v488_v60 = vunpack.c.h.bf16 %v281_v46 }
  0x58   : > { %v886_v12 = vadd.f32 %v2537_v54, %v617_v62  ;;  %v1012_v20 = vadd.f32 %v2537_v54, %v743_v63  ;;  %v1016_v52 = vadd.f32 %v2537_v54, %v747_v34  ;;  %v623_v2 = vmul.f32 %v2522_v43, %v355_v49  ;;  %v222_v49 = vld [vmem:[%s2427_s13 + $0x98] sm:$0xff] }
  0x59   : > { %v1023_v63 = vadd.f32 %v2468_v19, %v754_v44  ;;  %v756_v10 = vmul.f32 %v2463_v18, %v488_v60  ;;  %v897_v26 = vadd.f32 %v2468_v19, %v628_v6  ;;  %v487_v27 = vunpack.c.l.bf16 %v281_v46  ;;  %v2715_v44 = vld [vmem:[%s2427_s13 + $0x90] sm:$0xff] }
  0x5a   : > { %v1132_v1 = vpack.c.bf16 %v886_v12, %v884_v11  ;;  %v1196_v35 = vpack.c.bf16 %v1014_v21, %v1012_v20  ;;  %v1137_v11 = vpack.c.bf16 %v895_v61, %v893_v58  ;;  %v892_v15 = vadd.f32 %v2537_v54, %v623_v2  ;;  %v220_v21 = vld [vmem:[%s2427_s13 + $0x88] sm:$0xff] }
  0x5b   : > { %v361_v20 = vunpack.c.l.bf16 %v218_v45  ;;  %v899_v28 = vadd.f32 %v2468_v19, %v630_v9  ;;  %v1025_v29 = vadd.f32 %v2468_v19, %v756_v10  ;;  %v494_v34 = vunpack.c.h.bf16 %v284_v23 }
  0x5c   : > { %v755_v38 = vmul.f32 %v2522_v43, %v487_v27  ;;  %v365_v55 = vunpack.c.l.bf16 %v220_v21  ;;  %v493_v59 = vunpack.c.l.bf16 %v284_v23  ;;  %v368_v60 = vunpack.c.h.bf16 %v2715_v44  ;;  %v288_v27 = vld [vmem:[%s2427_s13 + $0x2a8] sm:$0xff] }
  0x5d   : > { %v498_v5 = vunpack.c.h.bf16 %v286_v56  ;;  %v367_v23 = vunpack.c.l.bf16 %v2715_v44 }
  0x5e   : > { %1436 = vmatmul.mubr.bf16.gmra.mrb[8].mxu0 %v1128_v30  ;;  %1692 = vmatmul.mubr.bf16.gmra.mrb[8].mxu1 %v1192_v32  ;;  %v484_v30 = vunpack.c.h.bf16 %v279_v16  ;;  %v619_v32 = vmul.f32 %v2522_v43, %v351_v13  ;;  %v758_v13 = vmul.f32 %v2463_v18, %v490_v0  ;;  %v761_v9 = vmul.f32 %v2522_v43, %v493_v59 }
  0x5f   : > { %1443 = vmatprep.mubr.bf16.mxu0 %v1131_v33  ;;  %1699 = vmatprep.mubr.bf16.mxu1 %v1195_v36  ;;  %v621_v33 = vmul.f32 %v2522_v43, %v353_v14  ;;  %v1135_v36 = vpack.c.bf16 %v891_v24, %v889_v22  ;;  %v219_v14 = vld [vmem:[%s2427_s13 + $0x80] sm:$0xff]  ;;  %v636_v10 = vmul.f32 %v2463_v18, %v368_v60  ;;  %v290_v60 = vld [vmem:[%s2427_s13 + $0x2b8] sm:$0xff] }
  0x60   : > { %v752_v42 = vmul.f32 %v2463_v18, %v484_v30  ;;  %v888_v47 = vadd.f32 %v2537_v54, %v619_v32  ;;  %v283_v22 = vld [vmem:[%s2427_s13 + $0x280] sm:$0xff]  ;;  %v489_v30 = vunpack.c.l.bf16 %v282_v51  ;;  %v364_v31 = vunpack.c.h.bf16 %v219_v14 }
  0x61   : > { %v890_v48 = vadd.f32 %v2537_v54, %v621_v33  ;;  %v1027_v32 = vadd.f32 %v2468_v19, %v758_v13  ;;  %v366_v33 = vunpack.c.h.bf16 %v220_v21  ;;  %v491_v58 = vunpack.c.l.bf16 %v283_v22 }
  0x62   : > { %v1021_v62 = vadd.f32 %v2468_v19, %v752_v42  ;;  %v757_v41 = vmul.f32 %v2522_v43, %v489_v30  ;;  %v632_v42 = vmul.f32 %v2463_v18, %v364_v31  ;;  %v905_v30 = vadd.f32 %v2468_v19, %v636_v10 }
  0x63   : > { %v1203_v45 = vpack.c.bf16 %v1027_v32, %v1025_v29  ;;  %v634_v46 = vmul.f32 %v2463_v18, %v366_v33  ;;  %v1030_v29 = vadd.f32 %v2537_v54, %v761_v9  ;;  %v506_v9 = vunpack.c.h.bf16 %v290_v60 }
  0x64   : > { %v1201_v12 = vpack.c.bf16 %v1023_v63, %v1021_v62  ;;  %v1026_v61 = vadd.f32 %v2537_v54, %v757_v41  ;;  %v901_v62 = vadd.f32 %v2468_v19, %v632_v42  ;;  %v370_v63 = vunpack.c.h.bf16 %v222_v49 }
  0x65   : > { %v903_v2 = vadd.f32 %v2468_v19, %v634_v46 }
  0x66   : > { %1444 = vmatmul.mubr.bf16.gmra.mrb[12].mxu0 %v1130_v3  ;;  %1700 = vmatmul.mubr.bf16.gmra.mrb[12].mxu1 %v1194_v4  ;;  %v625_v3 = vmul.f32 %v2522_v43, %v357_v50  ;;  %v751_v4 = vmul.f32 %v2522_v43, %v483_v53  ;;  %v285_v50 = vld [vmem:[%s2427_s13 + $0x290] sm:$0xff]  ;;  %v363_v53 = vunpack.c.l.bf16 %v219_v14  ;;  %v638_v13 = vmul.f32 %v2463_v18, %v370_v63 }
  0x67   : > { %1451 = vmatprep.mubr.bf16.mxu0 %v1133_v7  ;;  %1707 = vmatprep.mubr.bf16.mxu1 %v1197_v8  ;;  %v1134_v7 = vpack.c.bf16 %v890_v48, %v888_v47  ;;  %v1198_v8 = vpack.c.bf16 %v1018_v57, %v1016_v52  ;;  %v762_v48 = vmul.f32 %v2463_v18, %v494_v34  ;;  %v496_v0 = vunpack.c.h.bf16 %v285_v50 }
  0x68   : > { %v894_v16 = vadd.f32 %v2537_v54, %v625_v3  ;;  %v1020_v24 = vadd.f32 %v2537_v54, %v751_v4  ;;  %v1024_v57 = vadd.f32 %v2537_v54, %v755_v38  ;;  %v631_v6 = vmul.f32 %v2522_v43, %v363_v53  ;;  %v226_v53 = vld [vmem:[%s2427_s13 + $0xb8] sm:$0xff] }
  0x69   : > { %v1031_v4 = vadd.f32 %v2468_v19, %v762_v48  ;;  %v764_v14 = vmul.f32 %v2463_v18, %v496_v0  ;;  %v495_v31 = vunpack.c.l.bf16 %v285_v50  ;;  %v907_v32 = vadd.f32 %v2468_v19, %v638_v13  ;;  %v2759_v48 = vld [vmem:[%s2427_s13 + $0xb0] sm:$0xff] }
  0x6a   : > { %v1136_v37 = vpack.c.bf16 %v894_v16, %v892_v15  ;;  %v1200_v39 = vpack.c.bf16 %v1022_v25, %v1020_v24  ;;  %v1141_v15 = vpack.c.bf16 %v903_v2, %v901_v62  ;;  %v900_v21 = vadd.f32 %v2537_v54, %v631_v6  ;;  %v224_v25 = vld [vmem:[%s2427_s13 + $0xa8] sm:$0xff] }
  0x6b   : > { %v369_v24 = vunpack.c.l.bf16 %v222_v49  ;;  %v1033_v33 = vadd.f32 %v2468_v19, %v764_v14  ;;  %v502_v38 = vunpack.c.h.bf16 %v288_v27  ;;  %v763_v42 = vmul.f32 %v2522_v43, %v495_v31  ;;  %v292_v31 = vld [vmem:[%s2427_s13 + $0x2c8] sm:$0xff] }
  0x6c   : > { %v373_v59 = vunpack.c.l.bf16 %v224_v25  ;;  %v501_v63 = vunpack.c.l.bf16 %v288_v27  ;;  %v376_v0 = vunpack.c.h.bf16 %v2759_v48  ;;  %v375_v27 = vunpack.c.l.bf16 %v2759_v48 }
  0x6e   : > { %1452 = vmatmul.mubr.bf16.gmra.mrb[16].mxu0 %v1132_v1  ;;  %1708 = vmatmul.mubr.bf16.gmra.mrb[16].mxu1 %v1196_v35  ;;  %v492_v1 = vunpack.c.h.bf16 %v283_v22  ;;  %v627_v35 = vmul.f32 %v2522_v43, %v359_v17  ;;  %v766_v17 = vmul.f32 %v2463_v18, %v498_v5  ;;  %v769_v13 = vmul.f32 %v2522_v43, %v501_v63 }
  0x6f   : > { %1459 = vmatprep.mubr.bf16.mxu0 %v1135_v36  ;;  %1715 = vmatprep.mubr.bf16.mxu1 %v1199_v40  ;;  %v629_v36 = vmul.f32 %v2522_v43, %v361_v20  ;;  %v1139_v40 = vpack.c.bf16 %v899_v28, %v897_v26  ;;  %v223_v20 = vld [vmem:[%s2427_s13 + $0xa0] sm:$0xff]  ;;  %v644_v14 = vmul.f32 %v2463_v18, %v376_v0  ;;  %v294_v0 = vld [vmem:[%s2427_s13 + $0x2d8] sm:$0xff] }
  0x70   : > { %v760_v47 = vmul.f32 %v2463_v18, %v492_v1  ;;  %v896_v51 = vadd.f32 %v2537_v54, %v627_v35  ;;  %v287_v26 = vld [vmem:[%s2427_s13 + $0x2a0] sm:$0xff]  ;;  %v497_v1 = vunpack.c.l.bf16 %v286_v56  ;;  %v372_v34 = vunpack.c.h.bf16 %v223_v20 }
  0x71   : > { %v898_v52 = vadd.f32 %v2537_v54, %v629_v36  ;;  %v1035_v35 = vadd.f32 %v2468_v19, %v766_v17  ;;  %v374_v36 = vunpack.c.h.bf16 %v224_v25  ;;  %v499_v62 = vunpack.c.l.bf16 %v287_v26 }
  0x72   : > { %v1029_v3 = vadd.f32 %v2468_v19, %v760_v47  ;;  %v765_v46 = vmul.f32 %v2522_v43, %v497_v1  ;;  %v640_v47 = vmul.f32 %v2463_v18, %v372_v34  ;;  %v913_v1 = vadd.f32 %v2468_v19, %v644_v14 }
  0x73   : > { %v1207_v49 = vpack.c.bf16 %v1035_v35, %v1033_v33  ;;  %v642_v50 = vmul.f32 %v2463_v18, %v374_v36  ;;  %v1038_v33 = vadd.f32 %v2537_v54, %v769_v13  ;;  %v514_v13 = vunpack.c.h.bf16 %v294_v0 }
  0x74   : > { %v1205_v16 = vpack.c.bf16 %v1031_v4, %v1029_v3  ;;  %v1034_v2 = vadd.f32 %v2537_v54, %v765_v46  ;;  %v909_v3 = vadd.f32 %v2468_v19, %v640_v47  ;;  %v378_v4 = vunpack.c.h.bf16 %v226_v53 }
  0x75   : > { %v911_v6 = vadd.f32 %v2468_v19, %v642_v50 }
  0x76   : > { %1460 = vmatmul.mubr.bf16.gmra.mrb[20].mxu0 %v1134_v7  ;;  %1716 = vmatmul.mubr.bf16.gmra.mrb[20].mxu1 %v1198_v8  ;;  %v633_v7 = vmul.f32 %v2522_v43, %v365_v55  ;;  %v759_v8 = vmul.f32 %v2522_v43, %v491_v58  ;;  %v289_v55 = vld [vmem:[%s2427_s13 + $0x2b0] sm:$0xff]  ;;  %v371_v58 = vunpack.c.l.bf16 %v223_v20  ;;  %v646_v17 = vmul.f32 %v2463_v18, %v378_v4 }
  0x77   : > { %1467 = vmatprep.mubr.bf16.mxu0 %v1137_v11  ;;  %1723 = vmatprep.mubr.bf16.mxu1 %v1201_v12  ;;  %v1138_v11 = vpack.c.bf16 %v898_v52, %v896_v51  ;;  %v1202_v12 = vpack.c.bf16 %v1026_v61, %v1024_v57  ;;  %v770_v52 = vmul.f32 %v2463_v18, %v502_v38  ;;  %v504_v5 = vunpack.c.h.bf16 %v289_v55 }
  0x78   : > { %v902_v22 = vadd.f32 %v2537_v54, %v633_v7  ;;  %v1028_v28 = vadd.f32 %v2537_v54, %v759_v8  ;;  %v1032_v61 = vadd.f32 %v2537_v54, %v763_v42  ;;  %v639_v10 = vmul.f32 %v2522_v43, %v371_v58  ;;  %v230_v58 = vld [vmem:[%s2427_s13 + $0xd8] sm:$0xff] }
  0x79   : > { %v1039_v8 = vadd.f32 %v2468_v19, %v770_v52  ;;  %v772_v20 = vmul.f32 %v2463_v18, %v504_v5  ;;  %v503_v34 = vunpack.c.l.bf16 %v289_v55  ;;  %v915_v35 = vadd.f32 %v2468_v19, %v646_v17  ;;  %v2803_v52 = vld [vmem:[%s2427_s13 + $0xd0] sm:$0xff] }
  0x7a   : > { %v1140_v41 = vpack.c.bf16 %v902_v22, %v900_v21  ;;  %v1204_v44 = vpack.c.bf16 %v1030_v29, %v1028_v28  ;;  %v1145_v21 = vpack.c.bf16 %v911_v6, %v909_v3  ;;  %v908_v25 = vadd.f32 %v2537_v54, %v639_v10  ;;  %v228_v29 = vld [vmem:[%s2427_s13 + $0xc8] sm:$0xff] }
  0x7b   : > { %v377_v28 = vunpack.c.l.bf16 %v226_v53  ;;  %v1041_v36 = vadd.f32 %v2468_v19, %v772_v20  ;;  %v510_v42 = vunpack.c.h.bf16 %v292_v31  ;;  %v771_v47 = vmul.f32 %v2522_v43, %v503_v34  ;;  %v296_v34 = vld [vmem:[%s2427_s13 + $0x2e8] sm:$0xff] }
  0x7c   : > { %v381_v63 = vunpack.c.l.bf16 %v228_v29  ;;  %v509_v4 = vunpack.c.l.bf16 %v292_v31  ;;  %v384_v5 = vunpack.c.h.bf16 %v2803_v52  ;;  %v383_v31 = vunpack.c.l.bf16 %v2803_v52 }
  0x7e   : > { %1468 = vmatmul.mubr.bf16.gmra.mrb[24].mxu0 %v1136_v37  ;;  %1724 = vmatmul.mubr.bf16.gmra.mrb[24].mxu1 %v1200_v39  ;;  %v500_v37 = vunpack.c.h.bf16 %v287_v26  ;;  %v635_v39 = vmul.f32 %v2522_v43, %v367_v23  ;;  %v774_v23 = vmul.f32 %v2463_v18, %v506_v9  ;;  %v777_v17 = vmul.f32 %v2522_v43, %v509_v4 }
  0x7f   : > { %1475 = vmatprep.mubr.bf16.mxu0 %v1139_v40  ;;  %1731 = vmatprep.mubr.bf16.mxu1 %v1203_v45  ;;  %v637_v40 = vmul.f32 %v2522_v43, %v369_v24  ;;  %v1143_v45 = vpack.c.bf16 %v907_v32, %v905_v30  ;;  %v227_v24 = vld [vmem:[%s2427_s13 + $0xc0] sm:$0xff]  ;;  %v652_v20 = vmul.f32 %v2463_v18, %v384_v5  ;;  %v298_v5 = vld [vmem:[%s2427_s13 + $0x2f8] sm:$0xff] }
  0x80   : > { %v768_v51 = vmul.f32 %v2463_v18, %v500_v37  ;;  %v904_v56 = vadd.f32 %v2537_v54, %v635_v39  ;;  %v291_v30 = vld [vmem:[%s2427_s13 + $0x2c0] sm:$0xff]  ;;  %v505_v37 = vunpack.c.l.bf16 %v290_v60  ;;  %v380_v38 = vunpack.c.h.bf16 %v227_v24 }
  0x81   : > { %v906_v57 = vadd.f32 %v2537_v54, %v637_v40  ;;  %v1043_v39 = vadd.f32 %v2468_v19, %v774_v23  ;;  %v382_v40 = vunpack.c.h.bf16 %v228_v29  ;;  %v507_v3 = vunpack.c.l.bf16 %v291_v30 }
  0x82   : > { %v1037_v7 = vadd.f32 %v2468_v19, %v768_v51  ;;  %v773_v50 = vmul.f32 %v2522_v43, %v505_v37  ;;  %v648_v51 = vmul.f32 %v2463_v18, %v380_v38  ;;  %v921_v37 = vadd.f32 %v2468_v19, %v652_v20 }
  0x83   : > { %v1211_v53 = vpack.c.bf16 %v1043_v39, %v1041_v36  ;;  %v650_v55 = vmul.f32 %v2463_v18, %v382_v40  ;;  %v1046_v36 = vadd.f32 %v2537_v54, %v777_v17  ;;  %v522_v17 = vunpack.c.h.bf16 %v298_v5 }
  0x84   : > { %v1209_v22 = vpack.c.bf16 %v1039_v8, %v1037_v7  ;;  %v1042_v6 = vadd.f32 %v2537_v54, %v773_v50  ;;  %v917_v7 = vadd.f32 %v2468_v19, %v648_v51  ;;  %v386_v8 = vunpack.c.h.bf16 %v230_v58 }
  0x85   : > { %v919_v10 = vadd.f32 %v2468_v19, %v650_v55 }
  0x86   : > { %1476 = vmatmul.mubr.bf16.gmra.mrb[28].mxu0 %v1138_v11  ;;  %1732 = vmatmul.mubr.bf16.gmra.mrb[28].mxu1 %v1202_v12  ;;  %v641_v11 = vmul.f32 %v2522_v43, %v373_v59  ;;  %v767_v12 = vmul.f32 %v2522_v43, %v499_v62  ;;  %v293_v59 = vld [vmem:[%s2427_s13 + $0x2d0] sm:$0xff]  ;;  %v379_v62 = vunpack.c.l.bf16 %v227_v24  ;;  %v654_v23 = vmul.f32 %v2463_v18, %v386_v8 }
  0x87   : > { %1483 = vmatprep.mubr.bf16.mxu0 %v1141_v15  ;;  %1739 = vmatprep.mubr.bf16.mxu1 %v1205_v16  ;;  %v1142_v15 = vpack.c.bf16 %v906_v57, %v904_v56  ;;  %v1206_v16 = vpack.c.bf16 %v1034_v2, %v1032_v61  ;;  %v778_v57 = vmul.f32 %v2463_v18, %v510_v42  ;;  %v512_v9 = vunpack.c.h.bf16 %v293_v59 }
  0x88   : > { %v910_v26 = vadd.f32 %v2537_v54, %v641_v11  ;;  %v1036_v32 = vadd.f32 %v2537_v54, %v767_v12  ;;  %v1040_v2 = vadd.f32 %v2537_v54, %v771_v47  ;;  %v647_v14 = vmul.f32 %v2522_v43, %v379_v62  ;;  %v234_v62 = vld [vmem:[%s2427_s13 + $0xf8] sm:$0xff] }
  0x89   : > { %v1047_v12 = vadd.f32 %v2468_v19, %v778_v57  ;;  %v780_v24 = vmul.f32 %v2463_v18, %v512_v9  ;;  %v511_v38 = vunpack.c.l.bf16 %v293_v59  ;;  %v923_v39 = vadd.f32 %v2468_v19, %v654_v23  ;;  %v2847_v57 = vld [vmem:[%s2427_s13 + $0xf0] sm:$0xff] }
  0x8a   : > { %v1144_v46 = vpack.c.bf16 %v910_v26, %v908_v25  ;;  %v1208_v48 = vpack.c.bf16 %v1038_v33, %v1036_v32  ;;  %v1149_v25 = vpack.c.bf16 %v919_v10, %v917_v7  ;;  %v916_v29 = vadd.f32 %v2537_v54, %v647_v14  ;;  %v232_v33 = vld [vmem:[%s2427_s13 + $0xe8] sm:$0xff] }
  0x8b   : > { %v385_v32 = vunpack.c.l.bf16 %v230_v58  ;;  %v1049_v40 = vadd.f32 %v2468_v19, %v780_v24  ;;  %v518_v47 = vunpack.c.h.bf16 %v296_v34  ;;  %v779_v51 = vmul.f32 %v2522_v43, %v511_v38  ;;  %v300_v38 = vld [vmem:[%s2427_s13 + $0x308] sm:$0xff] }
  0x8c   : > { %v389_v4 = vunpack.c.l.bf16 %v232_v33  ;;  %v517_v8 = vunpack.c.l.bf16 %v296_v34  ;;  %v392_v9 = vunpack.c.h.bf16 %v2847_v57  ;;  %v391_v34 = vunpack.c.l.bf16 %v2847_v57 }
  0x8e   : > { %1484 = vmatmul.mubr.bf16.gmra.mrb[32].mxu0 %v1140_v41  ;;  %1740 = vmatmul.mubr.bf16.gmra.mrb[32].mxu1 %v1204_v44  ;;  %v508_v41 = vunpack.c.h.bf16 %v291_v30  ;;  %v643_v44 = vmul.f32 %v2522_v43, %v375_v27  ;;  %v782_v27 = vmul.f32 %v2463_v18, %v514_v13  ;;  %v785_v23 = vmul.f32 %v2522_v43, %v517_v8 }
  0x8f   : > { %1491 = vmatprep.mubr.bf16.mxu0 %v1143_v45  ;;  %1747 = vmatprep.mubr.bf16.mxu1 %v1207_v49  ;;  %v645_v45 = vmul.f32 %v2522_v43, %v377_v28  ;;  %v1147_v49 = vpack.c.bf16 %v915_v35, %v913_v1  ;;  %v231_v28 = vld [vmem:[%s2427_s13 + $0xe0] sm:$0xff]  ;;  %v660_v24 = vmul.f32 %v2463_v18, %v392_v9  ;;  %v302_v9 = vld [vmem:[%s2427_s13 + $0x318] sm:$0xff] }
  0x90   : > { %v776_v56 = vmul.f32 %v2463_v18, %v508_v41  ;;  %v912_v60 = vadd.f32 %v2537_v54, %v643_v44  ;;  %v295_v1 = vld [vmem:[%s2427_s13 + $0x2e0] sm:$0xff]  ;;  %v513_v41 = vunpack.c.l.bf16 %v294_v0  ;;  %v388_v42 = vunpack.c.h.bf16 %v231_v28 }
  0x91   : > { %v914_v61 = vadd.f32 %v2537_v54, %v645_v45  ;;  %v1051_v44 = vadd.f32 %v2468_v19, %v782_v27  ;;  %v390_v45 = vunpack.c.h.bf16 %v232_v33  ;;  %v515_v7 = vunpack.c.l.bf16 %v295_v1 }
  0x92   : > { %v1045_v11 = vadd.f32 %v2468_v19, %v776_v56  ;;  %v781_v55 = vmul.f32 %v2522_v43, %v513_v41  ;;  %v656_v56 = vmul.f32 %v2463_v18, %v388_v42  ;;  %v929_v41 = vadd.f32 %v2468_v19, %v660_v24 }
  0x93   : > { %v1215_v58 = vpack.c.bf16 %v1051_v44, %v1049_v40  ;;  %v658_v59 = vmul.f32 %v2463_v18, %v390_v45  ;;  %v1054_v40 = vadd.f32 %v2537_v54, %v785_v23  ;;  %v530_v23 = vunpack.c.h.bf16 %v302_v9 }
  0x94   : > { %v1213_v26 = vpack.c.bf16 %v1047_v12, %v1045_v11  ;;  %v1050_v10 = vadd.f32 %v2537_v54, %v781_v55  ;;  %v925_v11 = vadd.f32 %v2468_v19, %v656_v56  ;;  %v394_v12 = vunpack.c.h.bf16 %v234_v62 }
  0x95   : > { %v927_v14 = vadd.f32 %v2468_v19, %v658_v59 }
  0x96   : > { %1492 = vmatmul.mubr.bf16.gmra.mrb[36].mxu0 %v1142_v15  ;;  %1748 = vmatmul.mubr.bf16.gmra.mrb[36].mxu1 %v1206_v16  ;;  %v649_v15 = vmul.f32 %v2522_v43, %v381_v63  ;;  %v775_v16 = vmul.f32 %v2522_v43, %v507_v3  ;;  %v297_v63 = vld [vmem:[%s2427_s13 + $0x2f0] sm:$0xff]  ;;  %v387_v3 = vunpack.c.l.bf16 %v231_v28  ;;  %v662_v27 = vmul.f32 %v2463_v18, %v394_v12 }
  0x97   : > { %1499 = vmatprep.mubr.bf16.mxu0 %v1145_v21  ;;  %1755 = vmatprep.mubr.bf16.mxu1 %v1209_v22  ;;  %v1146_v21 = vpack.c.bf16 %v914_v61, %v912_v60  ;;  %v1210_v22 = vpack.c.bf16 %v1042_v6, %v1040_v2  ;;  %v786_v61 = vmul.f32 %v2463_v18, %v518_v47  ;;  %v520_v13 = vunpack.c.h.bf16 %v297_v63 }
  0x98   : > { %v918_v30 = vadd.f32 %v2537_v54, %v649_v15  ;;  %v1044_v35 = vadd.f32 %v2537_v54, %v775_v16  ;;  %v1048_v6 = vadd.f32 %v2537_v54, %v779_v51  ;;  %v655_v20 = vmul.f32 %v2522_v43, %v387_v3  ;;  %v238_v3 = vld [vmem:[%s2427_s13 + $0x118] sm:$0xff] }
  0x99   : > { %v1055_v16 = vadd.f32 %v2468_v19, %v786_v61  ;;  %v788_v28 = vmul.f32 %v2463_v18, %v520_v13  ;;  %v519_v42 = vunpack.c.l.bf16 %v297_v63  ;;  %v931_v44 = vadd.f32 %v2468_v19, %v662_v27  ;;  %v2891_v61 = vld [vmem:[%s2427_s13 + $0x110] sm:$0xff] }
  0x9a   : > { %v1148_v50 = vpack.c.bf16 %v918_v30, %v916_v29  ;;  %v1212_v52 = vpack.c.bf16 %v1046_v36, %v1044_v35  ;;  %v1153_v29 = vpack.c.bf16 %v927_v14, %v925_v11  ;;  %v924_v33 = vadd.f32 %v2537_v54, %v655_v20  ;;  %v236_v36 = vld [vmem:[%s2427_s13 + $0x108] sm:$0xff] }
  0x9b   : > { %v393_v35 = vunpack.c.l.bf16 %v234_v62  ;;  %v1057_v45 = vadd.f32 %v2468_v19, %v788_v28  ;;  %v526_v51 = vunpack.c.h.bf16 %v300_v38  ;;  %v787_v56 = vmul.f32 %v2522_v43, %v519_v42  ;;  %v304_v42 = vld [vmem:[%s2427_s13 + $0x328] sm:$0xff] }
  0x9c   : > { %v397_v8 = vunpack.c.l.bf16 %v236_v36  ;;  %v525_v12 = vunpack.c.l.bf16 %v300_v38  ;;  %v400_v13 = vunpack.c.h.bf16 %v2891_v61  ;;  %v399_v38 = vunpack.c.l.bf16 %v2891_v61 }
  0x9e   : > { %1500 = vmatmul.mubr.bf16.gmra.mrb[40].mxu0 %v1144_v46  ;;  %1756 = vmatmul.mubr.bf16.gmra.mrb[40].mxu1 %v1208_v48  ;;  %v516_v46 = vunpack.c.h.bf16 %v295_v1  ;;  %v651_v48 = vmul.f32 %v2522_v43, %v383_v31  ;;  %v790_v31 = vmul.f32 %v2463_v18, %v522_v17  ;;  %v793_v27 = vmul.f32 %v2522_v43, %v525_v12 }
  0x9f   : > { %1507 = vmatprep.mubr.bf16.mxu0 %v1147_v49  ;;  %1763 = vmatprep.mubr.bf16.mxu1 %v1211_v53  ;;  %v653_v49 = vmul.f32 %v2522_v43, %v385_v32  ;;  %v1151_v53 = vpack.c.bf16 %v923_v39, %v921_v37  ;;  %v235_v32 = vld [vmem:[%s2427_s13 + $0x100] sm:$0xff]  ;;  %v668_v28 = vmul.f32 %v2463_v18, %v400_v13  ;;  %v306_v13 = vld [vmem:[%s2427_s13 + $0x338] sm:$0xff] }
  0xa0   : > { %v784_v60 = vmul.f32 %v2463_v18, %v516_v46  ;;  %v920_v0 = vadd.f32 %v2537_v54, %v651_v48  ;;  %v299_v37 = vld [vmem:[%s2427_s13 + $0x300] sm:$0xff]  ;;  %v521_v46 = vunpack.c.l.bf16 %v298_v5  ;;  %v396_v47 = vunpack.c.h.bf16 %v235_v32 }
  0xa1   : > { %v922_v2 = vadd.f32 %v2537_v54, %v653_v49  ;;  %v1059_v48 = vadd.f32 %v2468_v19, %v790_v31  ;;  %v398_v49 = vunpack.c.h.bf16 %v236_v36  ;;  %v523_v11 = vunpack.c.l.bf16 %v299_v37 }
  0xa2   : > { %v1053_v15 = vadd.f32 %v2468_v19, %v784_v60  ;;  %v789_v59 = vmul.f32 %v2522_v43, %v521_v46  ;;  %v664_v60 = vmul.f32 %v2463_v18, %v396_v47  ;;  %v937_v46 = vadd.f32 %v2468_v19, %v668_v28 }
  0xa3   : > { %v1219_v62 = vpack.c.bf16 %v1059_v48, %v1057_v45  ;;  %v666_v63 = vmul.f32 %v2463_v18, %v398_v49  ;;  %v1062_v45 = vadd.f32 %v2537_v54, %v793_v27  ;;  %v538_v27 = vunpack.c.h.bf16 %v306_v13 }
  0xa4   : > { %v1217_v30 = vpack.c.bf16 %v1055_v16, %v1053_v15  ;;  %v1058_v14 = vadd.f32 %v2537_v54, %v789_v59  ;;  %v933_v15 = vadd.f32 %v2468_v19, %v664_v60  ;;  %v402_v16 = vunpack.c.h.bf16 %v238_v3 }
  0xa5   : > { %v935_v20 = vadd.f32 %v2468_v19, %v666_v63 }
  0xa6   : > { %1508 = vmatmul.mubr.bf16.gmra.mrb[44].mxu0 %v1146_v21  ;;  %1764 = vmatmul.mubr.bf16.gmra.mrb[44].mxu1 %v1210_v22  ;;  %v657_v21 = vmul.f32 %v2522_v43, %v389_v4  ;;  %v783_v22 = vmul.f32 %v2522_v43, %v515_v7  ;;  %v301_v4 = vld [vmem:[%s2427_s13 + $0x310] sm:$0xff]  ;;  %v395_v7 = vunpack.c.l.bf16 %v235_v32  ;;  %v670_v31 = vmul.f32 %v2463_v18, %v402_v16 }
  0xa7   : > { %1515 = vmatprep.mubr.bf16.mxu0 %v1149_v25  ;;  %1771 = vmatprep.mubr.bf16.mxu1 %v1213_v26  ;;  %v1150_v25 = vpack.c.bf16 %v922_v2, %v920_v0  ;;  %v1214_v26 = vpack.c.bf16 %v1050_v10, %v1048_v6  ;;  %v794_v2 = vmul.f32 %v2463_v18, %v526_v51  ;;  %v528_v17 = vunpack.c.h.bf16 %v301_v4 }
  0xa8   : > { %v926_v1 = vadd.f32 %v2537_v54, %v657_v21  ;;  %v1052_v39 = vadd.f32 %v2537_v54, %v783_v22  ;;  %v1056_v10 = vadd.f32 %v2537_v54, %v787_v56  ;;  %v663_v24 = vmul.f32 %v2522_v43, %v395_v7  ;;  %v242_v7 = vld [vmem:[%s2427_s13 + $0x138] sm:$0xff] }
  0xa9   : > { %v1063_v22 = vadd.f32 %v2468_v19, %v794_v2  ;;  %v796_v32 = vmul.f32 %v2463_v18, %v528_v17  ;;  %v527_v47 = vunpack.c.l.bf16 %v301_v4  ;;  %v939_v48 = vadd.f32 %v2468_v19, %v670_v31  ;;  %v2935_v2 = vld [vmem:[%s2427_s13 + $0x130] sm:$0xff] }
  0xaa   : > { %v1152_v55 = vpack.c.bf16 %v926_v1, %v924_v33  ;;  %v1216_v57 = vpack.c.bf16 %v1054_v40, %v1052_v39  ;;  %v1157_v33 = vpack.c.bf16 %v935_v20, %v933_v15  ;;  %v932_v36 = vadd.f32 %v2537_v54, %v663_v24  ;;  %v240_v40 = vld [vmem:[%s2427_s13 + $0x128] sm:$0xff] }
  0xab   : > { %v401_v39 = vunpack.c.l.bf16 %v238_v3  ;;  %v1065_v49 = vadd.f32 %v2468_v19, %v796_v32  ;;  %v534_v56 = vunpack.c.h.bf16 %v304_v42  ;;  %v795_v60 = vmul.f32 %v2522_v43, %v527_v47  ;;  %v308_v47 = vld [vmem:[%s2427_s13 + $0x348] sm:$0xff] }
  0xac   : > { %v405_v12 = vunpack.c.l.bf16 %v240_v40  ;;  %v533_v16 = vunpack.c.l.bf16 %v304_v42  ;;  %v408_v17 = vunpack.c.h.bf16 %v2935_v2  ;;  %v407_v42 = vunpack.c.l.bf16 %v2935_v2 }
  0xae   : > { %1516 = vmatmul.mubr.bf16.gmra.mrb[48].mxu0 %v1148_v50  ;;  %1772 = vmatmul.mubr.bf16.gmra.mrb[48].mxu1 %v1212_v52  ;;  %v524_v50 = vunpack.c.h.bf16 %v299_v37  ;;  %v659_v52 = vmul.f32 %v2522_v43, %v391_v34  ;;  %v798_v34 = vmul.f32 %v2463_v18, %v530_v23  ;;  %v801_v31 = vmul.f32 %v2522_v43, %v533_v16 }
  0xaf   : > { %1523 = vmatprep.mubr.bf16.mxu0 %v1151_v53  ;;  %1779 = vmatprep.mubr.bf16.mxu1 %v1215_v58  ;;  %v661_v53 = vmul.f32 %v2522_v43, %v393_v35  ;;  %v1155_v58 = vpack.c.bf16 %v931_v44, %v929_v41  ;;  %v239_v35 = vld [vmem:[%s2427_s13 + $0x120] sm:$0xff]  ;;  %v676_v32 = vmul.f32 %v2463_v18, %v408_v17  ;;  %v310_v17 = vld [vmem:[%s2427_s13 + $0x358] sm:$0xff] }
  0xb0   : > { %v792_v0 = vmul.f32 %v2463_v18, %v524_v50  ;;  %v928_v5 = vadd.f32 %v2537_v54, %v659_v52  ;;  %v303_v41 = vld [vmem:[%s2427_s13 + $0x320] sm:$0xff]  ;;  %v529_v50 = vunpack.c.l.bf16 %v302_v9  ;;  %v404_v51 = vunpack.c.h.bf16 %v239_v35 }
  0xb1   : > { %v930_v6 = vadd.f32 %v2537_v54, %v661_v53  ;;  %v1067_v52 = vadd.f32 %v2468_v19, %v798_v34  ;;  %v406_v53 = vunpack.c.h.bf16 %v240_v40  ;;  %v531_v15 = vunpack.c.l.bf16 %v303_v41 }
  0xb2   : > { %v1061_v21 = vadd.f32 %v2468_v19, %v792_v0  ;;  %v797_v63 = vmul.f32 %v2522_v43, %v529_v50  ;;  %v672_v0 = vmul.f32 %v2463_v18, %v404_v51  ;;  %v945_v50 = vadd.f32 %v2468_v19, %v676_v32 }
  0xb3   : > { %v1223_v3 = vpack.c.bf16 %v1067_v52, %v1065_v49  ;;  %v674_v4 = vmul.f32 %v2463_v18, %v406_v53  ;;  %v1070_v49 = vadd.f32 %v2537_v54, %v801_v31  ;;  %v546_v31 = vunpack.c.h.bf16 %v310_v17 }
  0xb4   : > { %v1221_v1 = vpack.c.bf16 %v1063_v22, %v1061_v21  ;;  %v1066_v20 = vadd.f32 %v2537_v54, %v797_v63  ;;  %v941_v21 = vadd.f32 %v2468_v19, %v672_v0  ;;  %v410_v22 = vunpack.c.h.bf16 %v242_v7 }
  0xb5   : > { %v943_v24 = vadd.f32 %v2468_v19, %v674_v4 }
  0xb6   : > { %1524 = vmatmul.mubr.bf16.gmra.mrb[52].mxu0 %v1150_v25  ;;  %1780 = vmatmul.mubr.bf16.gmra.mrb[52].mxu1 %v1214_v26  ;;  %v665_v25 = vmul.f32 %v2522_v43, %v397_v8  ;;  %v791_v26 = vmul.f32 %v2522_v43, %v523_v11  ;;  %v305_v8 = vld [vmem:[%s2427_s13 + $0x330] sm:$0xff]  ;;  %v403_v11 = vunpack.c.l.bf16 %v239_v35  ;;  %v678_v34 = vmul.f32 %v2463_v18, %v410_v22 }
  0xb7   : > { %1531 = vmatprep.mubr.bf16.mxu0 %v1153_v29  ;;  %1787 = vmatprep.mubr.bf16.mxu1 %v1217_v30  ;;  %v1154_v29 = vpack.c.bf16 %v930_v6, %v928_v5  ;;  %v1218_v30 = vpack.c.bf16 %v1058_v14, %v1056_v10  ;;  %v802_v6 = vmul.f32 %v2463_v18, %v534_v56  ;;  %v536_v23 = vunpack.c.h.bf16 %v305_v8 }
  0xb8   : > { %v934_v37 = vadd.f32 %v2537_v54, %v665_v25  ;;  %v1060_v44 = vadd.f32 %v2537_v54, %v791_v26  ;;  %v1064_v14 = vadd.f32 %v2537_v54, %v795_v60  ;;  %v671_v28 = vmul.f32 %v2522_v43, %v403_v11  ;;  %v246_v11 = vld [vmem:[%s2427_s13 + $0x158] sm:$0xff] }
  0xb9   : > { %v1071_v26 = vadd.f32 %v2468_v19, %v802_v6  ;;  %v804_v35 = vmul.f32 %v2463_v18, %v536_v23  ;;  %v535_v51 = vunpack.c.l.bf16 %v305_v8  ;;  %v947_v52 = vadd.f32 %v2468_v19, %v678_v34  ;;  %v2979_v6 = vld [vmem:[%s2427_s13 + $0x150] sm:$0xff] }
  0xba   : > { %v1156_v59 = vpack.c.bf16 %v934_v37, %v932_v36  ;;  %v1220_v61 = vpack.c.bf16 %v1062_v45, %v1060_v44  ;;  %v1161_v36 = vpack.c.bf16 %v943_v24, %v941_v21  ;;  %v940_v40 = vadd.f32 %v2537_v54, %v671_v28  ;;  %v244_v45 = vld [vmem:[%s2427_s13 + $0x148] sm:$0xff] }
  0xbb   : > { %v409_v44 = vunpack.c.l.bf16 %v242_v7  ;;  %v1073_v53 = vadd.f32 %v2468_v19, %v804_v35  ;;  %v542_v60 = vunpack.c.h.bf16 %v308_v47  ;;  %v803_v0 = vmul.f32 %v2522_v43, %v535_v51  ;;  %v312_v51 = vld [vmem:[%s2427_s13 + $0x368] sm:$0xff] }
  0xbc   : > { %v413_v16 = vunpack.c.l.bf16 %v244_v45  ;;  %v541_v22 = vunpack.c.l.bf16 %v308_v47  ;;  %v416_v23 = vunpack.c.h.bf16 %v2979_v6  ;;  %v415_v47 = vunpack.c.l.bf16 %v2979_v6 }
  0xbe   : > { %1532 = vmatmul.mubr.bf16.gmra.mrb[56].mxu0 %v1152_v55  ;;  %1788 = vmatmul.mubr.bf16.gmra.mrb[56].mxu1 %v1216_v57  ;;  %v532_v55 = vunpack.c.h.bf16 %v303_v41  ;;  %v667_v57 = vmul.f32 %v2522_v43, %v399_v38  ;;  %v806_v38 = vmul.f32 %v2463_v18, %v538_v27  ;;  %v809_v34 = vmul.f32 %v2522_v43, %v541_v22 }
  0xbf   : > { %1539 = vmatprep.mubr.bf16.mxu0 %v1155_v58  ;;  %1795 = vmatprep.mubr.bf16.mxu1 %v1219_v62  ;;  %v669_v58 = vmul.f32 %v2522_v43, %v401_v39  ;;  %v1159_v62 = vpack.c.bf16 %v939_v48, %v937_v46  ;;  %v243_v39 = vld [vmem:[%s2427_s13 + $0x140] sm:$0xff]  ;;  %v684_v35 = vmul.f32 %v2463_v18, %v416_v23  ;;  %v314_v23 = vld [vmem:[%s2427_s13 + $0x378] sm:$0xff] }
  0xc0   : > { %v800_v5 = vmul.f32 %v2463_v18, %v532_v55  ;;  %v936_v9 = vadd.f32 %v2537_v54, %v667_v57  ;;  %v307_v46 = vld [vmem:[%s2427_s13 + $0x340] sm:$0xff]  ;;  %v537_v55 = vunpack.c.l.bf16 %v306_v13  ;;  %v412_v56 = vunpack.c.h.bf16 %v243_v39 }
  0xc1   : > { %v938_v10 = vadd.f32 %v2537_v54, %v669_v58  ;;  %v1075_v57 = vadd.f32 %v2468_v19, %v806_v38  ;;  %v414_v58 = vunpack.c.h.bf16 %v244_v45  ;;  %v539_v21 = vunpack.c.l.bf16 %v307_v46 }
  0xc2   : > { %v1069_v25 = vadd.f32 %v2468_v19, %v800_v5  ;;  %v805_v4 = vmul.f32 %v2522_v43, %v537_v55  ;;  %v680_v5 = vmul.f32 %v2463_v18, %v412_v56  ;;  %v953_v55 = vadd.f32 %v2468_v19, %v684_v35 }
  0xc3   : > { %v1227_v7 = vpack.c.bf16 %v1075_v57, %v1073_v53  ;;  %v682_v8 = vmul.f32 %v2463_v18, %v414_v58  ;;  %v1078_v53 = vadd.f32 %v2537_v54, %v809_v34  ;;  %v554_v34 = vunpack.c.h.bf16 %v314_v23 }
  0xc4   : > { %v1225_v37 = vpack.c.bf16 %v1071_v26, %v1069_v25  ;;  %v1074_v24 = vadd.f32 %v2537_v54, %v805_v4  ;;  %v949_v25 = vadd.f32 %v2468_v19, %v680_v5  ;;  %v418_v26 = vunpack.c.h.bf16 %v246_v11 }
  0xc5   : > { %v951_v28 = vadd.f32 %v2468_v19, %v682_v8 }
  0xc6   : > { %1540 = vmatmul.mubr.bf16.gmra.mrb[60].mxu0 %v1154_v29  ;;  %1796 = vmatmul.mubr.bf16.gmra.mrb[60].mxu1 %v1218_v30  ;;  %v673_v29 = vmul.f32 %v2522_v43, %v405_v12  ;;  %v799_v30 = vmul.f32 %v2522_v43, %v531_v15  ;;  %v309_v12 = vld [vmem:[%s2427_s13 + $0x350] sm:$0xff]  ;;  %v411_v15 = vunpack.c.l.bf16 %v243_v39  ;;  %v686_v38 = vmul.f32 %v2463_v18, %v418_v26 }
  0xc7   : > { %1547 = vmatprep.mubr.bf16.mxu0 %v1157_v33  ;;  %1803 = vmatprep.mubr.bf16.mxu1 %v1221_v1  ;;  %v1158_v33 = vpack.c.bf16 %v938_v10, %v936_v9  ;;  %v1222_v1 = vpack.c.bf16 %v1066_v20, %v1064_v14  ;;  %v810_v10 = vmul.f32 %v2463_v18, %v542_v60  ;;  %v544_v27 = vunpack.c.h.bf16 %v309_v12 }
  0xc8   : > { %v942_v41 = vadd.f32 %v2537_v54, %v673_v29  ;;  %v1068_v48 = vadd.f32 %v2537_v54, %v799_v30  ;;  %v1072_v20 = vadd.f32 %v2537_v54, %v803_v0  ;;  %v679_v32 = vmul.f32 %v2522_v43, %v411_v15  ;;  %v250_v15 = vld [vmem:[%s2427_s13 + $0x178] sm:$0xff] }
  0xc9   : > { %v1079_v30 = vadd.f32 %v2468_v19, %v810_v10  ;;  %v812_v39 = vmul.f32 %v2463_v18, %v544_v27  ;;  %v543_v56 = vunpack.c.l.bf16 %v309_v12  ;;  %v955_v57 = vadd.f32 %v2468_v19, %v686_v38  ;;  %v3023_v10 = vld [vmem:[%s2427_s13 + $0x170] sm:$0xff] }
  0xca   : > { %v1160_v63 = vpack.c.bf16 %v942_v41, %v940_v40  ;;  %v1224_v2 = vpack.c.bf16 %v1070_v49, %v1068_v48  ;;  %v1165_v40 = vpack.c.bf16 %v951_v28, %v949_v25  ;;  %v948_v45 = vadd.f32 %v2537_v54, %v679_v32  ;;  %v248_v49 = vld [vmem:[%s2427_s13 + $0x168] sm:$0xff] }
  0xcb   : > { %v417_v48 = vunpack.c.l.bf16 %v246_v11  ;;  %v1081_v58 = vadd.f32 %v2468_v19, %v812_v39  ;;  %v550_v0 = vunpack.c.h.bf16 %v312_v51  ;;  %v811_v5 = vmul.f32 %v2522_v43, %v543_v56  ;;  %v315_v56 = vld [vmem:[%s2427_s13 + $0x380] sm:$0xff] }
  0xcc   : > { %v421_v22 = vunpack.c.l.bf16 %v248_v49  ;;  %v549_v26 = vunpack.c.l.bf16 %v312_v51  ;;  %v424_v27 = vunpack.c.h.bf16 %v3023_v10 }
  0xce   : > { %1548 = vmatmul.mubr.bf16.gmra.mrb[64].mxu0 %v1156_v59  ;;  %1804 = vmatmul.mubr.bf16.gmra.mrb[64].mxu1 %v1220_v61  ;;  %v540_v59 = vunpack.c.h.bf16 %v307_v46  ;;  %v675_v61 = vmul.f32 %v2522_v43, %v407_v42  ;;  %v814_v42 = vmul.f32 %v2463_v18, %v546_v31  ;;  %v817_v38 = vmul.f32 %v2522_v43, %v549_v26 }
  0xcf   : > { %1555 = vmatprep.mubr.bf16.mxu0 %v1159_v62  ;;  %1811 = vmatprep.mubr.bf16.mxu1 %v1223_v3  ;;  %v677_v62 = vmul.f32 %v2522_v43, %v409_v44  ;;  %v1163_v3 = vpack.c.bf16 %v947_v52, %v945_v50  ;;  %v247_v44 = vld [vmem:[%s2427_s13 + $0x160] sm:$0xff]  ;;  %v692_v39 = vmul.f32 %v2463_v18, %v424_v27 }
  0xd0   : > { %v808_v9 = vmul.f32 %v2463_v18, %v540_v59  ;;  %v944_v13 = vadd.f32 %v2537_v54, %v675_v61  ;;  %v311_v50 = vld [vmem:[%s2427_s13 + $0x360] sm:$0xff]  ;;  %v545_v59 = vunpack.c.l.bf16 %v310_v17  ;;  %v420_v60 = vunpack.c.h.bf16 %v247_v44 }
  0xd1   : > { %v946_v14 = vadd.f32 %v2537_v54, %v677_v62  ;;  %v1083_v61 = vadd.f32 %v2468_v19, %v814_v42  ;;  %v422_v62 = vunpack.c.h.bf16 %v248_v49  ;;  %v547_v25 = vunpack.c.l.bf16 %v311_v50  ;;  %v251_v49 = vld [vmem:[%s2427_s13 + $0x180] sm:$0xff] }
  0xd2   : > { %v1077_v29 = vadd.f32 %v2468_v19, %v808_v9  ;;  %v813_v8 = vmul.f32 %v2522_v43, %v545_v59  ;;  %v688_v9 = vmul.f32 %v2463_v18, %v420_v60  ;;  %v1086_v59 = vadd.f32 %v2537_v54, %v817_v38 }
  0xd3   : > { %v1231_v11 = vpack.c.bf16 %v1083_v61, %v1081_v58  ;;  %v690_v12 = vmul.f32 %v2463_v18, %v422_v62  ;;  %v961_v60 = vadd.f32 %v2468_v19, %v692_v39  ;;  %v553_v61 = vunpack.c.l.bf16 %v314_v23 }
  0xd4   : > { %v1229_v41 = vpack.c.bf16 %v1079_v30, %v1077_v29  ;;  %v1082_v28 = vadd.f32 %v2537_v54, %v813_v8  ;;  %v957_v29 = vadd.f32 %v2468_v19, %v688_v9  ;;  %v426_v30 = vunpack.c.h.bf16 %v250_v15 }
  0xd5   : > { %v959_v32 = vadd.f32 %v2468_v19, %v690_v12 }
  0xd6   : > { %1556 = vmatmul.mubr.bf16.gmra.mrb[68].mxu0 %v1158_v33  ;;  %1812 = vmatmul.mubr.bf16.gmra.mrb[68].mxu1 %v1222_v1  ;;  %v681_v33 = vmul.f32 %v2522_v43, %v413_v16  ;;  %v807_v1 = vmul.f32 %v2522_v43, %v539_v21  ;;  %v313_v16 = vld [vmem:[%s2427_s13 + $0x370] sm:$0xff]  ;;  %v419_v21 = vunpack.c.l.bf16 %v247_v44  ;;  %v694_v42 = vmul.f32 %v2463_v18, %v426_v30 }
  0xd7   : > { %1563 = vmatprep.mubr.bf16.mxu0 %v1161_v36  ;;  %1819 = vmatprep.mubr.bf16.mxu1 %v1225_v37  ;;  %v1162_v36 = vpack.c.bf16 %v946_v14, %v944_v13  ;;  %v1226_v37 = vpack.c.bf16 %v1074_v24, %v1072_v20  ;;  %v818_v14 = vmul.f32 %v2463_v18, %v550_v0  ;;  %v552_v31 = vunpack.c.h.bf16 %v313_v16 }
  0xd8   : > { %v950_v46 = vadd.f32 %v2537_v54, %v681_v33  ;;  %v1076_v52 = vadd.f32 %v2537_v54, %v807_v1  ;;  %v1080_v24 = vadd.f32 %v2537_v54, %v811_v5  ;;  %v687_v35 = vmul.f32 %v2522_v43, %v419_v21 }
  0xd9   : > { %v1087_v1 = vadd.f32 %v2468_v19, %v818_v14  ;;  %v820_v44 = vmul.f32 %v2463_v18, %v552_v31  ;;  %v963_v62 = vadd.f32 %v2468_v19, %v694_v42  ;;  %v428_v0 = vunpack.c.h.bf16 %v251_v49 }
  0xda   : > { %v1164_v4 = vpack.c.bf16 %v950_v46, %v948_v45  ;;  %v1228_v6 = vpack.c.bf16 %v1078_v53, %v1076_v52  ;;  %v1169_v45 = vpack.c.bf16 %v959_v32, %v957_v29  ;;  %v956_v51 = vadd.f32 %v2537_v54, %v687_v35  ;;  %v318_v29 = vld [vmem:[%s2427_s13 + $0x398] sm:$0xff] }
  0xdb   : > { %v425_v53 = vunpack.c.l.bf16 %v250_v15  ;;  %v556_v5 = vunpack.c.h.bf16 %v315_v56  ;;  %v1171_v12 = vpack.c.bf16 %v963_v62, %v961_v60  ;;  %v427_v15 = vunpack.c.l.bf16 %v251_v49  ;;  %v320_v60 = vld [vmem:[%s2427_s13 + $0x3a8] sm:$0xff] }
  0xdc   : > { %v562_v39 = vunpack.c.h.bf16 %v318_v29 }
  0xdd   : > { %v695_v35 = vmul.f32 %v2522_v43, %v427_v15 }
  0xde   : > { %1564 = vmatmul.mubr.bf16.gmra.mrb[72].mxu0 %v1160_v63  ;;  %1820 = vmatmul.mubr.bf16.gmra.mrb[72].mxu1 %v1224_v2  ;;  %v548_v63 = vunpack.c.h.bf16 %v311_v50  ;;  %v683_v2 = vmul.f32 %v2522_v43, %v415_v47  ;;  %v822_v47 = vmul.f32 %v2463_v18, %v554_v34  ;;  %v252_v50 = vld [vmem:[%s2427_s13 + $0x188] sm:$0xff] }
  0xdf   : > { %1571 = vmatprep.mubr.bf16.mxu0 %v1163_v3  ;;  %1827 = vmatprep.mubr.bf16.mxu1 %v1227_v7  ;;  %v685_v3 = vmul.f32 %v2522_v43, %v417_v48  ;;  %v1167_v7 = vpack.c.bf16 %v955_v57, %v953_v55  ;;  %v423_v48 = vunpack.c.l.bf16 %v3023_v10  ;;  %v551_v55 = vunpack.c.l.bf16 %v313_v16  ;;  %v316_v57 = vld [vmem:[%s2427_s13 + $0x388] sm:$0xff]  ;;  %v253_v16 = vld [vmem:[%s2427_s13 + $0x190] sm:$0xff] }
  0xe0   : > { %v816_v13 = vmul.f32 %v2463_v18, %v548_v63  ;;  %v952_v17 = vadd.f32 %v2537_v54, %v683_v2  ;;  %v1089_v63 = vadd.f32 %v2468_v19, %v820_v44  ;;  %v430_v2 = vunpack.c.h.bf16 %v252_v50 }
  0xe1   : > { %v954_v20 = vadd.f32 %v2537_v54, %v685_v3  ;;  %v1091_v3 = vadd.f32 %v2468_v19, %v822_v47  ;;  %v819_v8 = vmul.f32 %v2522_v43, %v551_v55  ;;  %v429_v27 = vunpack.c.l.bf16 %v252_v50 }
  0xe2   : > { %v1085_v33 = vadd.f32 %v2468_v19, %v816_v13  ;;  %v696_v13 = vmul.f32 %v2463_v18, %v428_v0  ;;  %v698_v14 = vmul.f32 %v2463_v18, %v430_v2  ;;  %v557_v31 = vunpack.c.l.bf16 %v316_v57 }
  0xe3   : > { %v1088_v26 = vadd.f32 %v2537_v54, %v819_v8  ;;  %v432_v32 = vunpack.c.h.bf16 %v253_v16  ;;  %v964_v50 = vadd.f32 %v2537_v54, %v695_v35  ;;  %v565_v35 = vunpack.c.l.bf16 %v320_v60 }
  0xe4   : > { %v1233_v46 = vpack.c.bf16 %v1087_v1, %v1085_v33  ;;  %v965_v1 = vadd.f32 %v2468_v19, %v696_v13  ;;  %v967_v34 = vadd.f32 %v2468_v19, %v698_v14 }
  0xe6   : > { %1572 = vmatmul.mubr.bf16.gmra.mrb[76].mxu0 %v1162_v36  ;;  %1828 = vmatmul.mubr.bf16.gmra.mrb[76].mxu1 %v1226_v37  ;;  %v689_v36 = vmul.f32 %v2522_v43, %v421_v22  ;;  %v815_v37 = vmul.f32 %v2522_v43, %v547_v25  ;;  %v824_v22 = vmul.f32 %v2463_v18, %v556_v5 }
  0xe7   : > { %1579 = vmatprep.mubr.bf16.mxu0 %v1165_v40  ;;  %1835 = vmatprep.mubr.bf16.mxu1 %v1229_v41  ;;  %v1166_v40 = vpack.c.bf16 %v954_v20, %v952_v17  ;;  %v1230_v41 = vpack.c.bf16 %v1082_v28, %v1080_v24  ;;  %v3069_v17 = vld [vmem:[%s2427_s13 + $0x198] sm:$0xff]  ;;  %v1235_v20 = vpack.c.bf16 %v1091_v3, %v1089_v63  ;;  %v317_v24 = vld [vmem:[%s2427_s13 + $0x390] sm:$0xff]  ;;  %v555_v28 = vunpack.c.l.bf16 %v315_v56 }
  0xe8   : > { %v958_v52 = vadd.f32 %v2537_v54, %v689_v36  ;;  %v1084_v58 = vadd.f32 %v2537_v54, %v815_v37  ;;  %v434_v33 = vunpack.c.h.bf16 %v3069_v17  ;;  %v560_v36 = vunpack.c.h.bf16 %v317_v24 }
  0xe9   : > { %v1093_v37 = vadd.f32 %v2468_v19, %v824_v22  ;;  %v823_v42 = vmul.f32 %v2522_v43, %v555_v28  ;;  %v1173_v49 = vpack.c.bf16 %v967_v34, %v965_v1  ;;  %v830_v56 = vmul.f32 %v2463_v18, %v562_v39 }
  0xea   : > { %v1168_v9 = vpack.c.bf16 %v958_v52, %v956_v51  ;;  %v1232_v10 = vpack.c.bf16 %v1086_v59, %v1084_v58  ;;  %v702_v47 = vmul.f32 %v2463_v18, %v434_v33  ;;  %v828_v51 = vmul.f32 %v2463_v18, %v560_v36  ;;  %v319_v59 = vld [vmem:[%s2427_s13 + $0x3a0] sm:$0xff] }
  0xeb   : > { %v431_v52 = vunpack.c.l.bf16 %v253_v16  ;;  %v559_v58 = vunpack.c.l.bf16 %v317_v24  ;;  %v1092_v62 = vadd.f32 %v2537_v54, %v823_v42  ;;  %v561_v63 = vunpack.c.l.bf16 %v318_v29 }
  0xec   : > { %v564_v8 = vunpack.c.h.bf16 %v319_v59  ;;  %v563_v34 = vunpack.c.l.bf16 %v319_v59 }
  0xed   : > { %v829_v13 = vmul.f32 %v2522_v43, %v561_v63 }
  0xee   : > { %1580 = vmatmul.mubr.bf16.gmra.mrb[80].mxu0 %v1164_v4  ;;  %1836 = vmatmul.mubr.bf16.gmra.mrb[80].mxu1 %v1228_v6  ;;  %v691_v4 = vmul.f32 %v2522_v43, %v423_v48  ;;  %v558_v6 = vunpack.c.h.bf16 %v316_v57  ;;  %v255_v48 = vld [vmem:[%s2427_s13 + $0x1a0] sm:$0xff]  ;;  %v433_v57 = vunpack.c.l.bf16 %v3069_v17 }
  0xef   : > { %1587 = vmatprep.mubr.bf16.mxu0 %v1167_v7  ;;  %1843 = vmatprep.mubr.bf16.mxu1 %v1231_v11  ;;  %v693_v7 = vmul.f32 %v2522_v43, %v425_v53  ;;  %v821_v11 = vmul.f32 %v2522_v43, %v553_v61  ;;  %v256_v53 = vld [vmem:[%s2427_s13 + $0x1a8] sm:$0xff]  ;;  %v436_v0 = vunpack.c.h.bf16 %v255_v48  ;;  %v1098_v33 = vadd.f32 %v2537_v54, %v829_v13 }
  0xf0   : > { %v960_v21 = vadd.f32 %v2537_v54, %v691_v4  ;;  %v826_v23 = vmul.f32 %v2463_v18, %v558_v6  ;;  %v971_v4 = vadd.f32 %v2468_v19, %v702_v47  ;;  %v438_v5 = vunpack.c.h.bf16 %v256_v53 }
  0xf1   : > { %v962_v25 = vadd.f32 %v2537_v54, %v693_v7  ;;  %v1090_v30 = vadd.f32 %v2537_v54, %v821_v11  ;;  %v1097_v6 = vadd.f32 %v2468_v19, %v828_v51  ;;  %v699_v7 = vmul.f32 %v2522_v43, %v431_v52 }
  0xf2   : > { %v1095_v38 = vadd.f32 %v2468_v19, %v826_v23  ;;  %v701_v11 = vmul.f32 %v2522_v43, %v433_v57  ;;  %v704_v14 = vmul.f32 %v2463_v18, %v436_v0  ;;  %v706_v17 = vmul.f32 %v2463_v18, %v438_v5 }
  0xf3   : > { %v1234_v44 = vpack.c.bf16 %v1090_v30, %v1088_v26  ;;  %v968_v22 = vadd.f32 %v2537_v54, %v699_v7  ;;  %v832_v23 = vmul.f32 %v2463_v18, %v564_v8  ;;  %v258_v26 = vld [vmem:[%s2427_s13 + $0x1b8] sm:$0xff]  ;;  %v437_v30 = vunpack.c.l.bf16 %v256_v53 }
  0xf4   : > { %v1237_v55 = vpack.c.bf16 %v1095_v38, %v1093_v37  ;;  %v970_v28 = vadd.f32 %v2537_v54, %v701_v11  ;;  %v973_v1 = vadd.f32 %v2468_v19, %v704_v14  ;;  %v975_v36 = vadd.f32 %v2468_v19, %v706_v17 }
  0xf5   : > { %v442_v39 = vunpack.c.h.bf16 %v258_v26  ;;  %v441_v0 = vunpack.c.l.bf16 %v258_v26 }
  0xf6   : > { %1588 = vmatmul.mubr.bf16.gmra.mrb[84].mxu0 %v1166_v40  ;;  %1844 = vmatmul.mubr.bf16.gmra.mrb[84].mxu1 %v1230_v41  ;;  %v1170_v40 = vpack.c.bf16 %v962_v25, %v960_v21  ;;  %v697_v41 = vmul.f32 %v2522_v43, %v429_v27  ;;  %v257_v25 = vld [vmem:[%s2427_s13 + $0x1b0] sm:$0xff] }
  0xf7   : > { %1595 = vmatprep.mubr.bf16.mxu0 %v1169_v45  ;;  %1851 = vmatprep.mubr.bf16.mxu1 %v1233_v46  ;;  %v825_v45 = vmul.f32 %v2522_v43, %v557_v31  ;;  %v700_v46 = vmul.f32 %v2463_v18, %v432_v32  ;;  %v321_v31 = vld [vmem:[%s2427_s13 + $0x3b0] sm:$0xff]  ;;  %v322_v32 = vld [vmem:[%s2427_s13 + $0x3b8] sm:$0xff]  ;;  %v440_v38 = vunpack.c.h.bf16 %v257_v25  ;;  %v710_v53 = vmul.f32 %v2463_v18, %v442_v39 }
  0xf8   : > { %v966_v61 = vadd.f32 %v2537_v54, %v697_v41  ;;  %v568_v42 = vunpack.c.h.bf16 %v321_v31 }
  0xf9   : > { %v1094_v2 = vadd.f32 %v2537_v54, %v825_v45  ;;  %v969_v3 = vadd.f32 %v2468_v19, %v700_v46  ;;  %v705_v45 = vmul.f32 %v2522_v43, %v437_v30  ;;  %v1174_v46 = vpack.c.bf16 %v970_v28, %v968_v22 }
  0xfa   : > { %v1172_v15 = vpack.c.bf16 %v966_v61, %v964_v50  ;;  %v1177_v50 = vpack.c.bf16 %v975_v36, %v973_v1  ;;  %v708_v52 = vmul.f32 %v2463_v18, %v440_v38  ;;  %v323_v61 = vld [vmem:[%s2427_s13 + $0x3c0] sm:$0xff]  ;;  %v3176_v36 = vld [vmem:[%s2427_s13 + $0x3d0] sm:$0xff] }
  0xfb   : > { %v1236_v16 = vpack.c.bf16 %v1094_v2, %v1092_v62  ;;  %v1175_v21 = vpack.c.bf16 %v971_v4, %v969_v3  ;;  %v3138_v62 = vld [vmem:[%s2427_s13 + $0x3c8] sm:$0xff]  ;;  %v974_v63 = vadd.f32 %v2537_v54, %v705_v45  ;;  %v567_v2 = vunpack.c.l.bf16 %v321_v31 }
  0xfc   : > { %v569_v3 = vunpack.c.l.bf16 %v322_v32  ;;  %v977_v8 = vadd.f32 %v2468_v19, %v708_v52  ;;  %v574_v11 = vunpack.c.h.bf16 %v3138_v62  ;;  %v573_v39 = vunpack.c.l.bf16 %v3138_v62 }
  0xfe   : > { %1596 = vmatmul.mubr.bf16.gmra.mrb[88].mxu0 %v1168_v9  ;;  %1852 = vmatmul.mubr.bf16.gmra.mrb[88].mxu1 %v1232_v10  ;;  %v566_v9 = vunpack.c.h.bf16 %v320_v60  ;;  %v1099_v10 = vadd.f32 %v2468_v19, %v830_v56  ;;  %v260_v56 = vld [vmem:[%s2427_s13 + $0x1c8] sm:$0xff]  ;;  %v439_v60 = vunpack.c.l.bf16 %v257_v25  ;;  %v837_v17 = vmul.f32 %v2522_v43, %v569_v3 }
  0xff   : > { %1603 = vmatprep.mubr.bf16.mxu0 %v1171_v12  ;;  %1859 = vmatprep.mubr.bf16.mxu1 %v1235_v20  ;;  %v827_v12 = vmul.f32 %v2522_v43, %v559_v58  ;;  %v435_v20 = vunpack.c.l.bf16 %v255_v48  ;;  %v831_v48 = vmul.f32 %v2522_v43, %v563_v34  ;;  %v836_v58 = vmul.f32 %v2463_v18, %v568_v42 }
 0x100   : > { %v834_v24 = vmul.f32 %v2463_v18, %v566_v9  ;;  %v1239_v27 = vpack.c.bf16 %v1099_v10, %v1097_v6  ;;  %v446_v7 = vunpack.c.h.bf16 %v260_v56  ;;  %v979_v9 = vadd.f32 %v2468_v19, %v710_v53 }
 0x101   : > { %v1096_v29 = vadd.f32 %v2537_v54, %v827_v12  ;;  %v703_v37 = vmul.f32 %v2522_v43, %v435_v20  ;;  %v1100_v4 = vadd.f32 %v2537_v54, %v831_v48  ;;  %v572_v10 = vunpack.c.h.bf16 %v323_v61 }
 0x102   : > { %v1103_v41 = vadd.f32 %v2468_v19, %v834_v24  ;;  %v1105_v12 = vadd.f32 %v2468_v19, %v836_v58  ;;  %v707_v14 = vmul.f32 %v2522_v43, %v439_v60  ;;  %v714_v22 = vmul.f32 %v2463_v18, %v446_v7 }
 0x103   : > { %v1238_v47 = vpack.c.bf16 %v1098_v33, %v1096_v29  ;;  %v972_v51 = vadd.f32 %v2537_v54, %v703_v37  ;;  %v840_v24 = vmul.f32 %v2463_v18, %v572_v10  ;;  %v842_v25 = vmul.f32 %v2463_v18, %v574_v11 }
 0x104   : > { %v1179_v28 = vpack.c.bf16 %v979_v9, %v977_v8  ;;  %v3160_v30 = vadd.f32 %v2537_v54, %v707_v14  ;;  %v445_v31 = vunpack.c.l.bf16 %v260_v56  ;;  %v3173_v34 = vadd.f32 %v2537_v54, %v837_v17  ;;  %v3237_v14 = vld [vmem:[%s2427_s13 + $0x3e0] sm:$0xff] }
 0x105   : > { %v1176_v20 = vpack.c.bf16 %v974_v63, %v972_v51  ;;  %v3182_v38 = vadd.f32 %v2468_v19, %v714_v22  ;;  %v1109_v42 = vadd.f32 %v2468_v19, %v840_v24  ;;  %v576_v48 = vunpack.c.h.bf16 %v3176_v36 }
 0x106   : > { %1604 = vmatmul.mubr.bf16.gmra.mrb[92].mxu0 %v1170_v40  ;;  %1860 = vmatmul.mubr.bf16.gmra.mrb[92].mxu1 %v1234_v44  ;;  %v1101_v40 = vadd.f32 %v2468_v19, %v832_v23  ;;  %v570_v44 = vunpack.c.h.bf16 %v322_v32  ;;  %v3163_v32 = vld [vmem:[%s2427_s13 + $0x1d8] sm:$0xff] }
 0x107   : > { %1611 = vmatprep.mubr.bf16.mxu0 %v1173_v49  ;;  %1867 = vmatprep.mubr.bf16.mxu1 %v1237_v55  ;;  %v833_v49 = vmul.f32 %v2522_v43, %v565_v35  ;;  %v259_v55 = vld [vmem:[%s2427_s13 + $0x1c0] sm:$0xff]  ;;  %v571_v35 = vunpack.c.l.bf16 %v323_v61 }
 0x108   : > { %v1241_v57 = vpack.c.bf16 %v1103_v41, %v1101_v40  ;;  %v838_v59 = vmul.f32 %v2463_v18, %v570_v44  ;;  %v444_v6 = vunpack.c.h.bf16 %v259_v55  ;;  %v443_v26 = vunpack.c.l.bf16 %v259_v55  ;;  %v3187_v41 = vld [vmem:[%s2427_s13 + $0x3d8] sm:$0xff] }
 0x109   : > { %v1102_v5 = vadd.f32 %v2537_v54, %v833_v49  ;;  %v1111_v44 = vadd.f32 %v2468_v19, %v842_v25  ;;  %v3202_v49 = vld [vmem:[%s3646_s3] ss:$0 sm:$0xff]  ;;  %v578_v51 = vunpack.c.h.bf16 %v3187_v41  ;;  %v841_v55 = vmul.f32 %v2522_v43, %v573_v39 }
 0x10a   : > { %v1107_v13 = vadd.f32 %v2468_v19, %v838_v59  ;;  %v711_v45 = vmul.f32 %v2522_v43, %v443_v26  ;;  %v575_v25 = vunpack.c.l.bf16 %v3176_v36  ;;  %v577_v26 = vunpack.c.l.bf16 %v3187_v41 }
 0x10b   : > { %v1240_v23 = vpack.c.bf16 %v1102_v5, %v1100_v4  ;;  %v1245_v60 = vpack.c.bf16 %v1111_v44, %v1109_v42  ;;  %v844_v5 = vmul.f32 %v2463_v18, %v576_v48  ;;  %v846_v10 = vmul.f32 %v2463_v18, %v578_v51 }
 0x10c   : > { %v1243_v29 = vpack.c.bf16 %v1107_v13, %v1105_v12  ;;  %v3215_v61 = vadd.f32 %v2537_v54, %v711_v45  ;;  %v449_v12 = vunpack.c.l.bf16 %v3163_v32  ;;  %v3234_v13 = vld [vmem:[%s2427_s13 + $0x1e8] sm:$0xff]  ;;  %v843_v39 = vmul.f32 %v2522_v43, %v575_v25 }
 0x10e   : > { %1612 = vmatmul.mubr.bf16.gmra.mrb[96].mxu0 %v1172_v15  ;;  %1868 = vmatmul.mubr.bf16.gmra.mrb[96].mxu1 %v1236_v16  ;;  %v709_v15 = vmul.f32 %v2522_v43, %v441_v0  ;;  %v835_v16 = vmul.f32 %v2522_v43, %v567_v2 }
 0x10f   : > { %1619 = vmatprep.mubr.bf16.mxu0 %v1175_v21  ;;  %1875 = vmatprep.mubr.bf16.mxu1 %v1239_v27  ;;  %v712_v21 = vmul.f32 %v2463_v18, %v444_v6  ;;  %v3157_v27 = vld [vmem:[%s2427_s13 + $0x1d0] sm:$0xff]  ;;  %v3225_v6 = vld [vmem:[%s2427_s13 + $0x1e0] sm:$0xff] }
 0x110   : > { %v3167_v33 = vadd.f32 %v2537_v54, %v709_v15  ;;  %v3170_v1 = vadd.f32 %v2537_v54, %v835_v16  ;;  %v448_v40 = vunpack.c.h.bf16 %v3157_v27  ;;  %v447_v11 = vunpack.c.l.bf16 %v3157_v27 }
 0x111   : > { %v3179_v37 = vadd.f32 %v2468_v19, %v712_v21  ;;  %v1110_v21 = vadd.f32 %v2537_v54, %v841_v55  ;;  %v452_v27 = vunpack.c.h.bf16 %v3225_v6 }
 0x112   : > { %v1178_v52 = vpack.c.bf16 %v3167_v33, %v3160_v30  ;;  %v1242_v53 = vpack.c.bf16 %v3173_v34, %v3170_v1  ;;  %v716_v56 = vmul.f32 %v2463_v18, %v448_v40  ;;  %v580_v30 = vunpack.c.h.bf16 %v3237_v14 }
 0x113   : > { %v1181_v59 = vpack.c.bf16 %v3182_v38, %v3179_v37  ;;  %v717_v33 = vmul.f32 %v2522_v43, %v449_v12  ;;  %v845_v40 = vmul.f32 %v2522_v43, %v577_v26  ;;  %v720_v41 = vmul.f32 %v2463_v18, %v452_v27 }
 0x114   : > { %v3248_v22 = vadd.f32 %v2468_v19, %v716_v56  ;;  %v848_v48 = vmul.f32 %v2463_v18, %v580_v30 }
 0x115   : > { %v3281_v55 = vadd.f32 %v2537_v54, %v717_v33 }
 0x116   : > { %1620 = vmatmul.mubr.bf16.gmra.mrb[100].mxu0 %v1174_v46  ;;  %1876 = vmatmul.mubr.bf16.gmra.mrb[100].mxu1 %v1238_v47  ;;  %v450_v46 = vunpack.c.h.bf16 %v3163_v32  ;;  %v713_v47 = vmul.f32 %v2522_v43, %v445_v31  ;;  %v1115_v31 = vadd.f32 %v2468_v19, %v846_v10  ;;  %v715_v32 = vmul.f32 %v2522_v43, %v447_v11 }
 0x117   : > { %1627 = vmatprep.mubr.bf16.mxu0 %v1177_v50  ;;  %1883 = vmatprep.mubr.bf16.mxu1 %v1241_v57  ;;  %v839_v50 = vmul.f32 %v2522_v43, %v571_v35  ;;  %v1117_v10 = vadd.f32 %v2468_v19, %v848_v48 }
 0x118   : > { %v718_v62 = vmul.f32 %v2463_v18, %v450_v46  ;;  %v3221_v4 = vadd.f32 %v2537_v54, %v713_v47 }
 0x119   : > { %v3228_v9 = vadd.f32 %v2537_v54, %v839_v50 }
 0x11a   : > { %v987_v24 = vadd.f32 %v2468_v19, %v718_v62  ;;  %v1180_v34 = vpack.c.bf16 %v3221_v4, %v3215_v61  ;;  %v451_v62 = vunpack.c.l.bf16 %v3225_v6  ;;  %v1112_v4 = vadd.f32 %v2537_v54, %v843_v39 }
 0x11b   : > { %v1244_v35 = vpack.c.bf16 %v1110_v21, %v3228_v9  ;;  %v989_v6 = vadd.f32 %v2468_v19, %v720_v41 }
 0x11c   : > { %v1183_v38 = vpack.c.bf16 %v987_v24, %v3248_v22 }
 0x11e   : > { %1628 = vmatmul.mubr.bf16.gmra.mrb[104].mxu0 %v1176_v20  ;;  %1884 = vmatmul.mubr.bf16.gmra.mrb[104].mxu1 %v1240_v23  ;;  %v3251_v23 = vld [vmem:[%s2427_s13 + $0x3e8] sm:$0xff] }
 0x11f   : > { %1635 = vmatprep.mubr.bf16.mxu0 %v1179_v28  ;;  %1891 = vmatprep.mubr.bf16.mxu1 %v1243_v29  ;;  %v1113_v28 = vadd.f32 %v2468_v19, %v844_v5  ;;  %v454_v29 = vunpack.c.h.bf16 %v3234_v13  ;;  %v582_v1 = vunpack.c.h.bf16 %v3251_v23  ;;  %v1114_v5 = vadd.f32 %v2537_v54, %v845_v40 }
 0x121   : > { %v1421_v57 = vpop.f32.mrb[0].mxu0  ;;  %v1677_v58 = vpop.f32.mrb[0].mxu1  ;;  %v722_v47 = vmul.f32 %v2463_v18, %v454_v29  ;;  %v850_v56 = vmul.f32 %v2463_v18, %v582_v1 }
 0x122   : > { %v1422_v63 = vadd.f32 %v3202_v49, %v1421_v57  ;;  %v1678_v0 = vadd.f32 %v3202_v49, %v1677_v58  ;;  %v1423_v2 = vpop.f32.mrb[1].mxu0  ;;  %v1679_v3 = vpop.f32.mrb[1].mxu1  ;;  %v3285_v57 = vld [vmem:[%s2427_s13 + $0x1f0] sm:$0xff] }
 0x123   : > { %v1424_v7 = vpop.f32.mrb[2].mxu0  ;;  %v1680_v8 = vpop.f32.mrb[2].mxu1  ;;  %v3297_v2 = vld [vmem:[%s2427_s13 + $0x3f0] sm:$0xff]  ;;  %v3300_v3 = vld [vmem:[%s2427_s13 + $0x3f8] sm:$0xff]  ;;  %v991_v9 = vadd.f32 %v2468_v19, %v722_v47  ;;  %v456_v11 = vunpack.c.h.bf16 %v3285_v57  ;;  %v1119_v12 = vadd.f32 %v2468_v19, %v850_v56 }
 0x124   : > { %1932 = vst [vmem:[%s3240_s14] sm:$0xff] %v1422_v63  ;;  %1996 = vst [vmem:[%s3240_s14 + $0x200] sm:$0xff] %v1678_v0  ;;  %v1425_v15 = vadd.f32 %v3202_v49, %v1424_v7  ;;  %v1681_v16 = vadd.f32 %v3202_v49, %v1680_v8  ;;  %v1426_v17 = vpop.f32.mrb[3].mxu0  ;;  %v1682_v20 = vpop.f32.mrb[3].mxu1  ;;  %v453_v63 = vunpack.c.l.bf16 %v3234_v13  ;;  %v3294_v0 = vld [vmem:[%s2427_s13 + $0x1f8] sm:$0xff]  ;;  %v579_v7 = vunpack.c.l.bf16 %v3237_v14 }
 0x125   : > { %v581_v8 = vunpack.c.l.bf16 %v3251_v23  ;;  %v458_v13 = vunpack.c.h.bf16 %v3294_v0  ;;  %v584_v14 = vunpack.c.h.bf16 %v3297_v2  ;;  %v1246_v23 = vpack.c.bf16 %v1114_v5, %v1112_v4 }
 0x126   : > { %1933 = vst [vmem:[%s3240_s14 + $0x8] sm:$0xff] %v1425_v15  ;;  %1997 = vst [vmem:[%s3240_s14 + $0x208] sm:$0xff] %v1681_v16  ;;  %1636 = vmatmul.mubr.bf16.gmra.mrb[108].mxu0 %v1178_v52  ;;  %1892 = vmatmul.mubr.bf16.gmra.mrb[108].mxu1 %v1242_v53  ;;  %v1247_v52 = vpack.c.bf16 %v1115_v31, %v1113_v28  ;;  %v3278_v53 = vadd.f32 %v2537_v54, %v715_v32  ;;  %v586_v15 = vunpack.c.h.bf16 %v3300_v3 }
 0x127   : > { %1643 = vmatprep.mubr.bf16.mxu0 %v1181_v59  ;;  %1899 = vmatprep.mubr.bf16.mxu1 %v1245_v60  ;;  %v719_v16 = vmul.f32 %v2522_v43, %v451_v62  ;;  %v721_v17 = vmul.f32 %v2522_v43, %v453_v63  ;;  %v847_v24 = vmul.f32 %v2522_v43, %v579_v7  ;;  %v583_v48 = vunpack.c.l.bf16 %v3297_v2 }
 0x128   : > { %v1182_v22 = vpack.c.bf16 %v3281_v55, %v3278_v53  ;;  %v849_v25 = vmul.f32 %v2522_v43, %v581_v8  ;;  %v1185_v30 = vpack.c.bf16 %v991_v9, %v989_v6  ;;  %v724_v31 = vmul.f32 %v2463_v18, %v456_v11 }
 0x129   : > { %v1429_v36 = vpop.f32.mrb[4].mxu0  ;;  %v1685_v37 = vpop.f32.mrb[4].mxu1  ;;  %v1249_v1 = vpack.c.bf16 %v1119_v12, %v1117_v10  ;;  %v988_v41 = vadd.f32 %v2537_v54, %v719_v16 }
 0x12a   : > { %v1430_v42 = vadd.f32 %v3202_v49, %v1429_v36  ;;  %v1686_v44 = vadd.f32 %v3202_v49, %v1685_v37  ;;  %v1431_v45 = vpop.f32.mrb[5].mxu0  ;;  %v1687_v46 = vpop.f32.mrb[5].mxu1  ;;  %v854_v36 = vmul.f32 %v2463_v18, %v586_v15  ;;  %v993_v47 = vadd.f32 %v2468_v19, %v724_v31 }
 0x12b   : > { %v1432_v50 = vpop.f32.mrb[6].mxu0  ;;  %v1688_v51 = vpop.f32.mrb[6].mxu1  ;;  %v1118_v45 = vadd.f32 %v2537_v54, %v849_v25  ;;  %v455_v46 = vunpack.c.l.bf16 %v3285_v57 }
 0x12c   : > { %1934 = vst [vmem:[%s3240_s14 + $0x10] sm:$0xff] %v1430_v42  ;;  %1998 = vst [vmem:[%s3240_s14 + $0x210] sm:$0xff] %v1686_v44  ;;  %v1433_v58 = vadd.f32 %v3202_v49, %v1432_v50  ;;  %v1689_v59 = vadd.f32 %v3202_v49, %v1688_v51  ;;  %v1434_v60 = vpop.f32.mrb[7].mxu0  ;;  %v1690_v61 = vpop.f32.mrb[7].mxu1  ;;  %v990_v42 = vadd.f32 %v2537_v54, %v721_v17  ;;  %v585_v50 = vunpack.c.l.bf16 %v3300_v3 }
 0x12d   : > { %v1116_v44 = vadd.f32 %v2537_v54, %v847_v24  ;;  %v1123_v53 = vadd.f32 %v2468_v19, %v854_v36 }
 0x12e   : > { %1935 = vst [vmem:[%s3240_s14 + $0x18] sm:$0xff] %v1433_v58  ;;  %1999 = vst [vmem:[%s3240_s14 + $0x218] sm:$0xff] %v1689_v59  ;;  %1644 = vmatmul.mubr.bf16.gmra.mrb[112].mxu0 %v1180_v34  ;;  %1900 = vmatmul.mubr.bf16.gmra.mrb[112].mxu1 %v1244_v35  ;;  %v726_v34 = vmul.f32 %v2463_v18, %v458_v13  ;;  %v852_v35 = vmul.f32 %v2463_v18, %v584_v14  ;;  %v457_v18 = vunpack.c.l.bf16 %v3294_v0 }
 0x12f   : > { %1651 = vmatprep.mubr.bf16.mxu0 %v1183_v38  ;;  %1907 = vmatprep.mubr.bf16.mxu1 %v1247_v52  ;;  %v1184_v57 = vpack.c.bf16 %v990_v42, %v988_v41  ;;  %v1248_v58 = vpack.c.bf16 %v1118_v45, %v1116_v44  ;;  %v723_v59 = vmul.f32 %v2522_v43, %v455_v46 }
 0x130   : > { %v995_v51 = vadd.f32 %v2468_v19, %v726_v34  ;;  %v1121_v52 = vadd.f32 %v2468_v19, %v852_v35  ;;  %v725_v60 = vmul.f32 %v2522_v43, %v457_v18  ;;  %v851_v19 = vmul.f32 %v2522_v43, %v583_v48 }
 0x131   : > { %v1437_v20 = vpop.f32.mrb[8].mxu0  ;;  %v1693_v21 = vpop.f32.mrb[8].mxu1  ;;  %v853_v2 = vmul.f32 %v2522_v43, %v585_v50  ;;  %v992_v11 = vadd.f32 %v2537_v54, %v723_v59 }
 0x132   : > { %v1438_v26 = vadd.f32 %v3202_v49, %v1437_v20  ;;  %v1694_v27 = vadd.f32 %v3202_v49, %v1693_v21  ;;  %v1439_v28 = vpop.f32.mrb[9].mxu0  ;;  %v1695_v29 = vpop.f32.mrb[9].mxu1  ;;  %v1187_v5 = vpack.c.bf16 %v995_v51, %v993_v47  ;;  %v1251_v7 = vpack.c.bf16 %v1123_v53, %v1121_v52 }
 0x133   : > { %v1440_v32 = vpop.f32.mrb[10].mxu0  ;;  %v1696_v33 = vpop.f32.mrb[10].mxu1  ;;  %v994_v43 = vadd.f32 %v2537_v54, %v725_v60  ;;  %v1120_v12 = vadd.f32 %v2537_v54, %v851_v19  ;;  %v1122_v13 = vadd.f32 %v2537_v54, %v853_v2 }
 0x134   : > { %1936 = vst [vmem:[%s3240_s14 + $0x20] sm:$0xff] %v1438_v26  ;;  %2000 = vst [vmem:[%s3240_s14 + $0x220] sm:$0xff] %v1694_v27  ;;  %v1441_v37 = vadd.f32 %v3202_v49, %v1440_v32  ;;  %v1697_v38 = vadd.f32 %v3202_v49, %v1696_v33  ;;  %v1442_v39 = vpop.f32.mrb[11].mxu0  ;;  %v1698_v40 = vpop.f32.mrb[11].mxu1 }
 0x136   : > { %1937 = vst [vmem:[%s3240_s14 + $0x28] sm:$0xff] %v1441_v37  ;;  %2001 = vst [vmem:[%s3240_s14 + $0x228] sm:$0xff] %v1697_v38  ;;  %1652 = vmatmul.mubr.bf16.gmra.mrb[116].mxu0 %v1182_v22  ;;  %1908 = vmatmul.mubr.bf16.gmra.mrb[116].mxu1 %v1246_v23  ;;  %v1186_v22 = vpack.c.bf16 %v994_v43, %v992_v11  ;;  %v1250_v23 = vpack.c.bf16 %v1122_v13, %v1120_v12 }
 0x137   : > { %1659 = vmatprep.mubr.bf16.mxu0 %v1185_v30  ;;  %1915 = vmatprep.mubr.bf16.mxu1 %v1249_v1 }
 0x139   : > { %v1445_v55 = vpop.f32.mrb[12].mxu0  ;;  %v1701_v56 = vpop.f32.mrb[12].mxu1 }
 0x13a   : > { %v1446_v61 = vadd.f32 %v3202_v49, %v1445_v55  ;;  %v1702_v62 = vadd.f32 %v3202_v49, %v1701_v56  ;;  %v1447_v63 = vpop.f32.mrb[13].mxu0  ;;  %v1703_v0 = vpop.f32.mrb[13].mxu1 }
 0x13b   : > { %v1448_v3 = vpop.f32.mrb[14].mxu0  ;;  %v1704_v4 = vpop.f32.mrb[14].mxu1 }
 0x13c   : > { %1938 = vst [vmem:[%s3240_s14 + $0x30] sm:$0xff] %v1446_v61  ;;  %2002 = vst [vmem:[%s3240_s14 + $0x230] sm:$0xff] %v1702_v62  ;;  %v1449_v8 = vadd.f32 %v3202_v49, %v1448_v3  ;;  %v1705_v6 = vadd.f32 %v3202_v49, %v1704_v4  ;;  %v1450_v9 = vpop.f32.mrb[15].mxu0  ;;  %v1706_v10 = vpop.f32.mrb[15].mxu1 }
 0x13e   : > { %1939 = vst [vmem:[%s3240_s14 + $0x38] sm:$0xff] %v1449_v8  ;;  %2003 = vst [vmem:[%s3240_s14 + $0x238] sm:$0xff] %v1705_v6  ;;  %1660 = vmatmul.mubr.bf16.gmra.mrb[120].mxu0 %v1184_v57  ;;  %1916 = vmatmul.mubr.bf16.gmra.mrb[120].mxu1 %v1248_v58 }
 0x13f   : > { %1667 = vmatprep.mubr.bf16.mxu0 %v1187_v5  ;;  %1923 = vmatprep.mubr.bf16.mxu1 %v1251_v7 }
 0x141   : > { %v1453_v14 = vpop.f32.mrb[16].mxu0  ;;  %v1709_v15 = vpop.f32.mrb[16].mxu1 }
 0x142   : > { %v1454_v16 = vadd.f32 %v3202_v49, %v1453_v14  ;;  %v1710_v17 = vadd.f32 %v3202_v49, %v1709_v15  ;;  %v1455_v20 = vpop.f32.mrb[17].mxu0  ;;  %v1711_v21 = vpop.f32.mrb[17].mxu1 }
 0x143   : > { %v1456_v24 = vpop.f32.mrb[18].mxu0  ;;  %v1712_v25 = vpop.f32.mrb[18].mxu1 }
 0x144   : > { %1940 = vst [vmem:[%s3240_s14 + $0x40] sm:$0xff] %v1454_v16  ;;  %2004 = vst [vmem:[%s3240_s14 + $0x240] sm:$0xff] %v1710_v17  ;;  %v1457_v54 = vadd.f32 %v3202_v49, %v1456_v24  ;;  %v1713_v26 = vadd.f32 %v3202_v49, %v1712_v25  ;;  %v1458_v27 = vpop.f32.mrb[19].mxu0  ;;  %v1714_v28 = vpop.f32.mrb[19].mxu1 }
 0x146   : > { %1941 = vst [vmem:[%s3240_s14 + $0x48] sm:$0xff] %v1457_v54  ;;  %2005 = vst [vmem:[%s3240_s14 + $0x248] sm:$0xff] %v1713_v26  ;;  %1668 = vmatmul.mubr.bf16.gmra.mrb[124].mxu0 %v1186_v22  ;;  %1924 = vmatmul.mubr.bf16.gmra.mrb[124].mxu1 %v1250_v23 }
 0x149   : > { %v1461_v29 = vpop.f32.mrb[20].mxu0  ;;  %v1717_v30 = vpop.f32.mrb[20].mxu1 }
 0x14a   : > { %v1462_v31 = vadd.f32 %v3202_v49, %v1461_v29  ;;  %v1718_v32 = vadd.f32 %v3202_v49, %v1717_v30  ;;  %v1463_v33 = vpop.f32.mrb[21].mxu0  ;;  %v1719_v1 = vpop.f32.mrb[21].mxu1 }
 0x14b   : > { %v1464_v34 = vpop.f32.mrb[22].mxu0  ;;  %v1720_v35 = vpop.f32.mrb[22].mxu1 }
 0x14c   : > { %1942 = vst [vmem:[%s3240_s14 + $0x50] sm:$0xff] %v1462_v31  ;;  %2006 = vst [vmem:[%s3240_s14 + $0x250] sm:$0xff] %v1718_v32  ;;  %v1465_v36 = vadd.f32 %v3202_v49, %v1464_v34  ;;  %v1721_v37 = vadd.f32 %v3202_v49, %v1720_v35  ;;  %v1466_v38 = vpop.f32.mrb[23].mxu0  ;;  %v1722_v39 = vpop.f32.mrb[23].mxu1 }
 0x14e   : > { %1943 = vst [vmem:[%s3240_s14 + $0x58] sm:$0xff] %v1465_v36  ;;  %2007 = vst [vmem:[%s3240_s14 + $0x258] sm:$0xff] %v1721_v37 }
 0x151   : > { %v1469_v40 = vpop.f32.mrb[24].mxu0  ;;  %v1725_v41 = vpop.f32.mrb[24].mxu1 }
 0x152   : > { %v1470_v42 = vadd.f32 %v3202_v49, %v1469_v40  ;;  %v1726_v44 = vadd.f32 %v3202_v49, %v1725_v41  ;;  %v1471_v45 = vpop.f32.mrb[25].mxu0  ;;  %v1727_v46 = vpop.f32.mrb[25].mxu1 }
 0x153   : > { %v1472_v18 = vpop.f32.mrb[26].mxu0  ;;  %v1728_v47 = vpop.f32.mrb[26].mxu1 }
 0x154   : > { %1944 = vst [vmem:[%s3240_s14 + $0x60] sm:$0xff] %v1470_v42  ;;  %2008 = vst [vmem:[%s3240_s14 + $0x260] sm:$0xff] %v1726_v44  ;;  %v1473_v48 = vadd.f32 %v3202_v49, %v1472_v18  ;;  %v1729_v50 = vadd.f32 %v3202_v49, %v1728_v47  ;;  %v1474_v51 = vpop.f32.mrb[27].mxu0  ;;  %v1730_v52 = vpop.f32.mrb[27].mxu1 }
 0x156   : > { %1945 = vst [vmem:[%s3240_s14 + $0x68] sm:$0xff] %v1473_v48  ;;  %2009 = vst [vmem:[%s3240_s14 + $0x268] sm:$0xff] %v1729_v50 }
 0x159   : > { %v1477_v53 = vpop.f32.mrb[28].mxu0  ;;  %v1733_v55 = vpop.f32.mrb[28].mxu1 }
 0x15a   : > { %v1478_v56 = vadd.f32 %v3202_v49, %v1477_v53  ;;  %v1734_v57 = vadd.f32 %v3202_v49, %v1733_v55  ;;  %v1479_v58 = vpop.f32.mrb[29].mxu0  ;;  %v1735_v59 = vpop.f32.mrb[29].mxu1 }
 0x15b   : > { %v1480_v60 = vpop.f32.mrb[30].mxu0  ;;  %v1736_v61 = vpop.f32.mrb[30].mxu1 }
 0x15c   : > { %1946 = vst [vmem:[%s3240_s14 + $0x70] sm:$0xff] %v1478_v56  ;;  %2010 = vst [vmem:[%s3240_s14 + $0x270] sm:$0xff] %v1734_v57  ;;  %v1481_v62 = vadd.f32 %v3202_v49, %v1480_v60  ;;  %v1737_v63 = vadd.f32 %v3202_v49, %v1736_v61  ;;  %v1482_v0 = vpop.f32.mrb[31].mxu0  ;;  %v1738_v19 = vpop.f32.mrb[31].mxu1 }
 0x15e   : > { %1947 = vst [vmem:[%s3240_s14 + $0x78] sm:$0xff] %v1481_v62  ;;  %2011 = vst [vmem:[%s3240_s14 + $0x278] sm:$0xff] %v1737_v63 }
 0x161   : > { %v1485_v2 = vpop.f32.mrb[32].mxu0  ;;  %v1741_v3 = vpop.f32.mrb[32].mxu1 }
 0x162   : > { %v1486_v4 = vadd.f32 %v3202_v49, %v1485_v2  ;;  %v1742_v5 = vadd.f32 %v3202_v49, %v1741_v3  ;;  %v1487_v7 = vpop.f32.mrb[33].mxu0  ;;  %v1743_v8 = vpop.f32.mrb[33].mxu1 }
 0x163   : > { %v1488_v6 = vpop.f32.mrb[34].mxu0  ;;  %v1744_v9 = vpop.f32.mrb[34].mxu1 }
 0x164   : > { %1948 = vst [vmem:[%s3240_s14 + $0x80] sm:$0xff] %v1486_v4  ;;  %2012 = vst [vmem:[%s3240_s14 + $0x280] sm:$0xff] %v1742_v5  ;;  %v1489_v10 = vadd.f32 %v3202_v49, %v1488_v6  ;;  %v1745_v11 = vadd.f32 %v3202_v49, %v1744_v9  ;;  %v1490_v43 = vpop.f32.mrb[35].mxu0  ;;  %v1746_v12 = vpop.f32.mrb[35].mxu1 }
 0x166   : > { %1949 = vst [vmem:[%s3240_s14 + $0x88] sm:$0xff] %v1489_v10  ;;  %2013 = vst [vmem:[%s3240_s14 + $0x288] sm:$0xff] %v1745_v11 }
 0x169   : > { %v1493_v13 = vpop.f32.mrb[36].mxu0  ;;  %v1749_v14 = vpop.f32.mrb[36].mxu1 }
 0x16a   : > { %v1494_v15 = vadd.f32 %v3202_v49, %v1493_v13  ;;  %v1750_v16 = vadd.f32 %v3202_v49, %v1749_v14  ;;  %v1495_v17 = vpop.f32.mrb[37].mxu0  ;;  %v1751_v20 = vpop.f32.mrb[37].mxu1 }
 0x16b   : > { %v1496_v21 = vpop.f32.mrb[38].mxu0  ;;  %v1752_v22 = vpop.f32.mrb[38].mxu1 }
 0x16c   : > { %1950 = vst [vmem:[%s3240_s14 + $0x90] sm:$0xff] %v1494_v15  ;;  %2014 = vst [vmem:[%s3240_s14 + $0x290] sm:$0xff] %v1750_v16  ;;  %v1497_v23 = vadd.f32 %v3202_v49, %v1496_v21  ;;  %v1753_v24 = vadd.f32 %v3202_v49, %v1752_v22  ;;  %v1498_v25 = vpop.f32.mrb[39].mxu0  ;;  %v1754_v54 = vpop.f32.mrb[39].mxu1 }
 0x16e   : > { %1951 = vst [vmem:[%s3240_s14 + $0x98] sm:$0xff] %v1497_v23  ;;  %2015 = vst [vmem:[%s3240_s14 + $0x298] sm:$0xff] %v1753_v24 }
 0x171   : > { %v1501_v26 = vpop.f32.mrb[40].mxu0  ;;  %v1757_v27 = vpop.f32.mrb[40].mxu1 }
 0x172   : > { %v1502_v28 = vadd.f32 %v3202_v49, %v1501_v26  ;;  %v1758_v29 = vadd.f32 %v3202_v49, %v1757_v27  ;;  %v1503_v30 = vpop.f32.mrb[41].mxu0  ;;  %v1759_v31 = vpop.f32.mrb[41].mxu1 }
 0x173   : > { %v1504_v32 = vpop.f32.mrb[42].mxu0  ;;  %v1760_v33 = vpop.f32.mrb[42].mxu1 }
 0x174   : > { %1952 = vst [vmem:[%s3240_s14 + $0xa0] sm:$0xff] %v1502_v28  ;;  %2016 = vst [vmem:[%s3240_s14 + $0x2a0] sm:$0xff] %v1758_v29  ;;  %v1505_v1 = vadd.f32 %v3202_v49, %v1504_v32  ;;  %v1761_v34 = vadd.f32 %v3202_v49, %v1760_v33  ;;  %v1506_v35 = vpop.f32.mrb[43].mxu0  ;;  %v1762_v36 = vpop.f32.mrb[43].mxu1 }
 0x176   : > { %1953 = vst [vmem:[%s3240_s14 + $0xa8] sm:$0xff] %v1505_v1  ;;  %2017 = vst [vmem:[%s3240_s14 + $0x2a8] sm:$0xff] %v1761_v34 }
 0x179   : > { %v1509_v37 = vpop.f32.mrb[44].mxu0  ;;  %v1765_v38 = vpop.f32.mrb[44].mxu1 }
 0x17a   : > { %v1510_v39 = vadd.f32 %v3202_v49, %v1509_v37  ;;  %v1766_v40 = vadd.f32 %v3202_v49, %v1765_v38  ;;  %v1511_v41 = vpop.f32.mrb[45].mxu0  ;;  %v1767_v42 = vpop.f32.mrb[45].mxu1 }
 0x17b   : > { %v1512_v44 = vpop.f32.mrb[46].mxu0  ;;  %v1768_v45 = vpop.f32.mrb[46].mxu1 }
 0x17c   : > { %1954 = vst [vmem:[%s3240_s14 + $0xb0] sm:$0xff] %v1510_v39  ;;  %2018 = vst [vmem:[%s3240_s14 + $0x2b0] sm:$0xff] %v1766_v40  ;;  %v1513_v46 = vadd.f32 %v3202_v49, %v1512_v44  ;;  %v1769_v18 = vadd.f32 %v3202_v49, %v1768_v45  ;;  %v1514_v47 = vpop.f32.mrb[47].mxu0  ;;  %v1770_v48 = vpop.f32.mrb[47].mxu1 }
 0x17e   : > { %1955 = vst [vmem:[%s3240_s14 + $0xb8] sm:$0xff] %v1513_v46  ;;  %2019 = vst [vmem:[%s3240_s14 + $0x2b8] sm:$0xff] %v1769_v18 }
 0x181   : > { %v1517_v50 = vpop.f32.mrb[48].mxu0  ;;  %v1773_v51 = vpop.f32.mrb[48].mxu1 }
 0x182   : > { %v1518_v52 = vadd.f32 %v3202_v49, %v1517_v50  ;;  %v1774_v53 = vadd.f32 %v3202_v49, %v1773_v51  ;;  %v1519_v55 = vpop.f32.mrb[49].mxu0  ;;  %v1775_v56 = vpop.f32.mrb[49].mxu1 }
 0x183   : > { %v1520_v57 = vpop.f32.mrb[50].mxu0  ;;  %v1776_v58 = vpop.f32.mrb[50].mxu1 }
 0x184   : > { %1956 = vst [vmem:[%s3240_s14 + $0xc0] sm:$0xff] %v1518_v52  ;;  %2020 = vst [vmem:[%s3240_s14 + $0x2c0] sm:$0xff] %v1774_v53  ;;  %v1521_v59 = vadd.f32 %v3202_v49, %v1520_v57  ;;  %v1777_v60 = vadd.f32 %v3202_v49, %v1776_v58  ;;  %v1522_v61 = vpop.f32.mrb[51].mxu0  ;;  %v1778_v62 = vpop.f32.mrb[51].mxu1 }
 0x186   : > { %1957 = vst [vmem:[%s3240_s14 + $0xc8] sm:$0xff] %v1521_v59  ;;  %2021 = vst [vmem:[%s3240_s14 + $0x2c8] sm:$0xff] %v1777_v60 }
 0x189   : > { %v1525_v63 = vpop.f32.mrb[52].mxu0  ;;  %v1781_v0 = vpop.f32.mrb[52].mxu1 }
 0x18a   : > { %v1526_v19 = vadd.f32 %v3202_v49, %v1525_v63  ;;  %v1782_v2 = vadd.f32 %v3202_v49, %v1781_v0  ;;  %v1527_v3 = vpop.f32.mrb[53].mxu0  ;;  %v1783_v4 = vpop.f32.mrb[53].mxu1 }
 0x18b   : > { %v1528_v5 = vpop.f32.mrb[54].mxu0  ;;  %v1784_v7 = vpop.f32.mrb[54].mxu1 }
 0x18c   : > { %1958 = vst [vmem:[%s3240_s14 + $0xd0] sm:$0xff] %v1526_v19  ;;  %2022 = vst [vmem:[%s3240_s14 + $0x2d0] sm:$0xff] %v1782_v2  ;;  %v1529_v8 = vadd.f32 %v3202_v49, %v1528_v5  ;;  %v1785_v6 = vadd.f32 %v3202_v49, %v1784_v7  ;;  %v1530_v9 = vpop.f32.mrb[55].mxu0  ;;  %v1786_v10 = vpop.f32.mrb[55].mxu1 }
 0x18e   : > { %1959 = vst [vmem:[%s3240_s14 + $0xd8] sm:$0xff] %v1529_v8  ;;  %2023 = vst [vmem:[%s3240_s14 + $0x2d8] sm:$0xff] %v1785_v6 }
 0x191   : > { %v1533_v11 = vpop.f32.mrb[56].mxu0  ;;  %v1789_v43 = vpop.f32.mrb[56].mxu1 }
 0x192   : > { %v1534_v12 = vadd.f32 %v3202_v49, %v1533_v11  ;;  %v1790_v13 = vadd.f32 %v3202_v49, %v1789_v43  ;;  %v1535_v14 = vpop.f32.mrb[57].mxu0  ;;  %v1791_v15 = vpop.f32.mrb[57].mxu1 }
 0x193   : > { %v1536_v16 = vpop.f32.mrb[58].mxu0  ;;  %v1792_v17 = vpop.f32.mrb[58].mxu1 }
 0x194   : > { %1960 = vst [vmem:[%s3240_s14 + $0xe0] sm:$0xff] %v1534_v12  ;;  %2024 = vst [vmem:[%s3240_s14 + $0x2e0] sm:$0xff] %v1790_v13  ;;  %v1537_v20 = vadd.f32 %v3202_v49, %v1536_v16  ;;  %v1793_v21 = vadd.f32 %v3202_v49, %v1792_v17  ;;  %v1538_v22 = vpop.f32.mrb[59].mxu0  ;;  %v1794_v23 = vpop.f32.mrb[59].mxu1 }
 0x196   : > { %1961 = vst [vmem:[%s3240_s14 + $0xe8] sm:$0xff] %v1537_v20  ;;  %2025 = vst [vmem:[%s3240_s14 + $0x2e8] sm:$0xff] %v1793_v21 }
 0x199   : > { %v1541_v24 = vpop.f32.mrb[60].mxu0  ;;  %v1797_v25 = vpop.f32.mrb[60].mxu1 }
 0x19a   : > { %v1542_v54 = vadd.f32 %v3202_v49, %v1541_v24  ;;  %v1798_v26 = vadd.f32 %v3202_v49, %v1797_v25  ;;  %v1543_v27 = vpop.f32.mrb[61].mxu0  ;;  %v1799_v28 = vpop.f32.mrb[61].mxu1 }
 0x19b   : > { %v1544_v29 = vpop.f32.mrb[62].mxu0  ;;  %v1800_v30 = vpop.f32.mrb[62].mxu1 }
 0x19c   : > { %1962 = vst [vmem:[%s3240_s14 + $0xf0] sm:$0xff] %v1542_v54  ;;  %2026 = vst [vmem:[%s3240_s14 + $0x2f0] sm:$0xff] %v1798_v26  ;;  %v1545_v31 = vadd.f32 %v3202_v49, %v1544_v29  ;;  %v1801_v32 = vadd.f32 %v3202_v49, %v1800_v30  ;;  %v1546_v33 = vpop.f32.mrb[63].mxu0  ;;  %v1802_v1 = vpop.f32.mrb[63].mxu1 }
 0x19e   : > { %1963 = vst [vmem:[%s3240_s14 + $0xf8] sm:$0xff] %v1545_v31  ;;  %2027 = vst [vmem:[%s3240_s14 + $0x2f8] sm:$0xff] %v1801_v32 }
 0x1a1   : > { %v1549_v34 = vpop.f32.mrb[64].mxu0  ;;  %v1805_v35 = vpop.f32.mrb[64].mxu1 }
 0x1a2   : > { %v1550_v36 = vadd.f32 %v3202_v49, %v1549_v34  ;;  %v1806_v37 = vadd.f32 %v3202_v49, %v1805_v35  ;;  %v1551_v38 = vpop.f32.mrb[65].mxu0  ;;  %v1807_v39 = vpop.f32.mrb[65].mxu1 }
 0x1a3   : > { %v1552_v40 = vpop.f32.mrb[66].mxu0  ;;  %v1808_v41 = vpop.f32.mrb[66].mxu1 }
 0x1a4   : > { %1964 = vst [vmem:[%s3240_s14 + $0x100] sm:$0xff] %v1550_v36  ;;  %2028 = vst [vmem:[%s3240_s14 + $0x300] sm:$0xff] %v1806_v37  ;;  %v1553_v42 = vadd.f32 %v3202_v49, %v1552_v40  ;;  %v1809_v44 = vadd.f32 %v3202_v49, %v1808_v41  ;;  %v1554_v45 = vpop.f32.mrb[67].mxu0  ;;  %v1810_v46 = vpop.f32.mrb[67].mxu1 }
 0x1a6   : > { %1965 = vst [vmem:[%s3240_s14 + $0x108] sm:$0xff] %v1553_v42  ;;  %2029 = vst [vmem:[%s3240_s14 + $0x308] sm:$0xff] %v1809_v44 }
 0x1a9   : > { %v1557_v18 = vpop.f32.mrb[68].mxu0  ;;  %v1813_v47 = vpop.f32.mrb[68].mxu1 }
 0x1aa   : > { %v1558_v48 = vadd.f32 %v3202_v49, %v1557_v18  ;;  %v1814_v50 = vadd.f32 %v3202_v49, %v1813_v47  ;;  %v1559_v51 = vpop.f32.mrb[69].mxu0  ;;  %v1815_v52 = vpop.f32.mrb[69].mxu1 }
 0x1ab   : > { %v1560_v53 = vpop.f32.mrb[70].mxu0  ;;  %v1816_v55 = vpop.f32.mrb[70].mxu1 }
 0x1ac   : > { %1966 = vst [vmem:[%s3240_s14 + $0x110] sm:$0xff] %v1558_v48  ;;  %2030 = vst [vmem:[%s3240_s14 + $0x310] sm:$0xff] %v1814_v50  ;;  %v1561_v56 = vadd.f32 %v3202_v49, %v1560_v53  ;;  %v1817_v57 = vadd.f32 %v3202_v49, %v1816_v55  ;;  %v1562_v58 = vpop.f32.mrb[71].mxu0  ;;  %v1818_v59 = vpop.f32.mrb[71].mxu1 }
 0x1ae   : > { %1967 = vst [vmem:[%s3240_s14 + $0x118] sm:$0xff] %v1561_v56  ;;  %2031 = vst [vmem:[%s3240_s14 + $0x318] sm:$0xff] %v1817_v57 }
 0x1b1   : > { %v1565_v60 = vpop.f32.mrb[72].mxu0  ;;  %v1821_v61 = vpop.f32.mrb[72].mxu1 }
 0x1b2   : > { %v1566_v62 = vadd.f32 %v3202_v49, %v1565_v60  ;;  %v1822_v63 = vadd.f32 %v3202_v49, %v1821_v61  ;;  %v1567_v0 = vpop.f32.mrb[73].mxu0  ;;  %v1823_v19 = vpop.f32.mrb[73].mxu1 }
 0x1b3   : > { %v1568_v2 = vpop.f32.mrb[74].mxu0  ;;  %v1824_v3 = vpop.f32.mrb[74].mxu1 }
 0x1b4   : > { %1968 = vst [vmem:[%s3240_s14 + $0x120] sm:$0xff] %v1566_v62  ;;  %2032 = vst [vmem:[%s3240_s14 + $0x320] sm:$0xff] %v1822_v63  ;;  %v1569_v4 = vadd.f32 %v3202_v49, %v1568_v2  ;;  %v1825_v5 = vadd.f32 %v3202_v49, %v1824_v3  ;;  %v1570_v7 = vpop.f32.mrb[75].mxu0  ;;  %v1826_v8 = vpop.f32.mrb[75].mxu1 }
 0x1b6   : > { %1969 = vst [vmem:[%s3240_s14 + $0x128] sm:$0xff] %v1569_v4  ;;  %2033 = vst [vmem:[%s3240_s14 + $0x328] sm:$0xff] %v1825_v5 }
 0x1b9   : > { %v1573_v6 = vpop.f32.mrb[76].mxu0  ;;  %v1829_v9 = vpop.f32.mrb[76].mxu1 }
 0x1ba   : > { %v1574_v10 = vadd.f32 %v3202_v49, %v1573_v6  ;;  %v1830_v11 = vadd.f32 %v3202_v49, %v1829_v9  ;;  %v1575_v43 = vpop.f32.mrb[77].mxu0  ;;  %v1831_v12 = vpop.f32.mrb[77].mxu1 }
 0x1bb   : > { %v1576_v13 = vpop.f32.mrb[78].mxu0  ;;  %v1832_v14 = vpop.f32.mrb[78].mxu1  ;;  %v3529_v12 = vld [vmem:[%s3646_s3] ss:$0 sm:$0xff] }
 0x1bc   : > { %1970 = vst [vmem:[%s3240_s14 + $0x130] sm:$0xff] %v1574_v10  ;;  %2034 = vst [vmem:[%s3240_s14 + $0x330] sm:$0xff] %v1830_v11  ;;  %v1577_v15 = vadd.f32 %v3202_v49, %v1576_v13  ;;  %v1833_v16 = vadd.f32 %v3202_v49, %v1832_v14  ;;  %v1578_v17 = vpop.f32.mrb[79].mxu0  ;;  %v1834_v20 = vpop.f32.mrb[79].mxu1 }
 0x1be   : > { %1971 = vst [vmem:[%s3240_s14 + $0x138] sm:$0xff] %v1577_v15  ;;  %2035 = vst [vmem:[%s3240_s14 + $0x338] sm:$0xff] %v1833_v16 }
 0x1c1   : > { %v1581_v21 = vpop.f32.mrb[80].mxu0  ;;  %v1837_v22 = vpop.f32.mrb[80].mxu1 }
 0x1c2   : > { %v1582_v23 = vadd.f32 %v3202_v49, %v1581_v21  ;;  %v1838_v24 = vadd.f32 %v3202_v49, %v1837_v22  ;;  %v1583_v25 = vpop.f32.mrb[81].mxu0  ;;  %v1839_v54 = vpop.f32.mrb[81].mxu1 }
 0x1c3   : > { %v1584_v26 = vpop.f32.mrb[82].mxu0  ;;  %v1840_v27 = vpop.f32.mrb[82].mxu1 }
 0x1c4   : > { %1972 = vst [vmem:[%s3240_s14 + $0x140] sm:$0xff] %v1582_v23  ;;  %2036 = vst [vmem:[%s3240_s14 + $0x340] sm:$0xff] %v1838_v24  ;;  %v1585_v28 = vadd.f32 %v3202_v49, %v1584_v26  ;;  %v1841_v29 = vadd.f32 %v3202_v49, %v1840_v27  ;;  %v1586_v30 = vpop.f32.mrb[83].mxu0  ;;  %v1842_v31 = vpop.f32.mrb[83].mxu1 }
 0x1c6   : > { %1973 = vst [vmem:[%s3240_s14 + $0x148] sm:$0xff] %v1585_v28  ;;  %2037 = vst [vmem:[%s3240_s14 + $0x348] sm:$0xff] %v1841_v29 }
 0x1c9   : > { %v1589_v32 = vpop.f32.mrb[84].mxu0  ;;  %v1845_v33 = vpop.f32.mrb[84].mxu1 }
 0x1ca   : > { %v1590_v1 = vadd.f32 %v3202_v49, %v1589_v32  ;;  %v1846_v34 = vadd.f32 %v3202_v49, %v1845_v33  ;;  %v1591_v35 = vpop.f32.mrb[85].mxu0  ;;  %v1847_v36 = vpop.f32.mrb[85].mxu1 }
 0x1cb   : > { %v1592_v37 = vpop.f32.mrb[86].mxu0  ;;  %v1848_v38 = vpop.f32.mrb[86].mxu1 }
 0x1cc   : > { %1974 = vst [vmem:[%s3240_s14 + $0x150] sm:$0xff] %v1590_v1  ;;  %2038 = vst [vmem:[%s3240_s14 + $0x350] sm:$0xff] %v1846_v34  ;;  %v1593_v39 = vadd.f32 %v3202_v49, %v1592_v37  ;;  %v1849_v40 = vadd.f32 %v3202_v49, %v1848_v38  ;;  %v1594_v41 = vpop.f32.mrb[87].mxu0  ;;  %v1850_v42 = vpop.f32.mrb[87].mxu1 }
 0x1ce   : > { %1975 = vst [vmem:[%s3240_s14 + $0x158] sm:$0xff] %v1593_v39  ;;  %2039 = vst [vmem:[%s3240_s14 + $0x358] sm:$0xff] %v1849_v40 }
 0x1d1   : > { %v1597_v44 = vpop.f32.mrb[88].mxu0  ;;  %v1853_v45 = vpop.f32.mrb[88].mxu1 }
 0x1d2   : > { %v1598_v46 = vadd.f32 %v3202_v49, %v1597_v44  ;;  %v1854_v18 = vadd.f32 %v3202_v49, %v1853_v45  ;;  %v1599_v47 = vpop.f32.mrb[89].mxu0  ;;  %v1855_v48 = vpop.f32.mrb[89].mxu1 }
 0x1d3   : > { %v1600_v50 = vpop.f32.mrb[90].mxu0  ;;  %v1856_v51 = vpop.f32.mrb[90].mxu1 }
 0x1d4   : > { %1976 = vst [vmem:[%s3240_s14 + $0x160] sm:$0xff] %v1598_v46  ;;  %2040 = vst [vmem:[%s3240_s14 + $0x360] sm:$0xff] %v1854_v18  ;;  %v1601_v52 = vadd.f32 %v3202_v49, %v1600_v50  ;;  %v1857_v53 = vadd.f32 %v3202_v49, %v1856_v51  ;;  %v1602_v55 = vpop.f32.mrb[91].mxu0  ;;  %v1858_v56 = vpop.f32.mrb[91].mxu1 }
 0x1d6   : > { %1977 = vst [vmem:[%s3240_s14 + $0x168] sm:$0xff] %v1601_v52  ;;  %2041 = vst [vmem:[%s3240_s14 + $0x368] sm:$0xff] %v1857_v53 }
 0x1d9   : > { %v1605_v57 = vpop.f32.mrb[92].mxu0  ;;  %v1861_v58 = vpop.f32.mrb[92].mxu1 }
 0x1da   : > { %v1606_v59 = vadd.f32 %v3202_v49, %v1605_v57  ;;  %v1862_v60 = vadd.f32 %v3202_v49, %v1861_v58  ;;  %v1607_v61 = vpop.f32.mrb[93].mxu0  ;;  %v1863_v62 = vpop.f32.mrb[93].mxu1 }
 0x1db   : > { %v1608_v63 = vpop.f32.mrb[94].mxu0  ;;  %v1864_v0 = vpop.f32.mrb[94].mxu1 }
 0x1dc   : > { %1978 = vst [vmem:[%s3240_s14 + $0x170] sm:$0xff] %v1606_v59  ;;  %2042 = vst [vmem:[%s3240_s14 + $0x370] sm:$0xff] %v1862_v60  ;;  %v1609_v19 = vadd.f32 %v3202_v49, %v1608_v63  ;;  %v1865_v2 = vadd.f32 %v3202_v49, %v1864_v0  ;;  %v1610_v3 = vpop.f32.mrb[95].mxu0  ;;  %v1866_v4 = vpop.f32.mrb[95].mxu1 }
 0x1de   : > { %1979 = vst [vmem:[%s3240_s14 + $0x178] sm:$0xff] %v1609_v19  ;;  %2043 = vst [vmem:[%s3240_s14 + $0x378] sm:$0xff] %v1865_v2 }
 0x1e1   : > { %v1613_v5 = vpop.f32.mrb[96].mxu0  ;;  %v1869_v7 = vpop.f32.mrb[96].mxu1 }
 0x1e2   : > { %v1614_v8 = vadd.f32 %v3202_v49, %v1613_v5  ;;  %v1870_v6 = vadd.f32 %v3202_v49, %v1869_v7  ;;  %v1615_v9 = vpop.f32.mrb[97].mxu0  ;;  %v1871_v10 = vpop.f32.mrb[97].mxu1 }
 0x1e3   : > { %v1616_v11 = vpop.f32.mrb[98].mxu0  ;;  %v1872_v43 = vpop.f32.mrb[98].mxu1 }
 0x1e4   : > { %1980 = vst [vmem:[%s3240_s14 + $0x180] sm:$0xff] %v1614_v8  ;;  %2044 = vst [vmem:[%s3240_s14 + $0x380] sm:$0xff] %v1870_v6  ;;  %v1617_v13 = vadd.f32 %v3529_v12, %v1616_v11  ;;  %v1873_v14 = vadd.f32 %v3529_v12, %v1872_v43  ;;  %v1618_v15 = vpop.f32.mrb[99].mxu0  ;;  %v1874_v16 = vpop.f32.mrb[99].mxu1 }
 0x1e6   : > { %1981 = vst [vmem:[%s3240_s14 + $0x188] sm:$0xff] %v1617_v13  ;;  %2045 = vst [vmem:[%s3240_s14 + $0x388] sm:$0xff] %v1873_v14 }
 0x1e9   : > { %v1621_v49 = vpop.f32.mrb[100].mxu0  ;;  %v1877_v17 = vpop.f32.mrb[100].mxu1 }
 0x1ea   : > { %v1622_v20 = vadd.f32 %v3529_v12, %v1621_v49  ;;  %v1878_v21 = vadd.f32 %v3529_v12, %v1877_v17  ;;  %v1623_v22 = vpop.f32.mrb[101].mxu0  ;;  %v1879_v23 = vpop.f32.mrb[101].mxu1 }
 0x1eb   : > { %v1624_v24 = vpop.f32.mrb[102].mxu0  ;;  %v1880_v25 = vpop.f32.mrb[102].mxu1 }
 0x1ec   : > { %1982 = vst [vmem:[%s3240_s14 + $0x190] sm:$0xff] %v1622_v20  ;;  %2046 = vst [vmem:[%s3240_s14 + $0x390] sm:$0xff] %v1878_v21  ;;  %v1625_v54 = vadd.f32 %v3529_v12, %v1624_v24  ;;  %v1881_v26 = vadd.f32 %v3529_v12, %v1880_v25  ;;  %v1626_v27 = vpop.f32.mrb[103].mxu0  ;;  %v1882_v28 = vpop.f32.mrb[103].mxu1 }
 0x1ee   : > { %1983 = vst [vmem:[%s3240_s14 + $0x198] sm:$0xff] %v1625_v54  ;;  %2047 = vst [vmem:[%s3240_s14 + $0x398] sm:$0xff] %v1881_v26 }
 0x1f1   : > { %v1629_v29 = vpop.f32.mrb[104].mxu0  ;;  %v1885_v30 = vpop.f32.mrb[104].mxu1 }
 0x1f2   : > { %v1630_v31 = vadd.f32 %v3529_v12, %v1629_v29  ;;  %v1886_v32 = vadd.f32 %v3529_v12, %v1885_v30  ;;  %v1631_v33 = vpop.f32.mrb[105].mxu0  ;;  %v1887_v1 = vpop.f32.mrb[105].mxu1 }
 0x1f3   : > { %v1632_v34 = vpop.f32.mrb[106].mxu0  ;;  %v1888_v35 = vpop.f32.mrb[106].mxu1 }
 0x1f4   : > { %1984 = vst [vmem:[%s3240_s14 + $0x1a0] sm:$0xff] %v1630_v31  ;;  %2048 = vst [vmem:[%s3240_s14 + $0x3a0] sm:$0xff] %v1886_v32  ;;  %v1633_v36 = vadd.f32 %v3529_v12, %v1632_v34  ;;  %v1889_v37 = vadd.f32 %v3529_v12, %v1888_v35  ;;  %v1634_v38 = vpop.f32.mrb[107].mxu0  ;;  %v1890_v39 = vpop.f32.mrb[107].mxu1 }
 0x1f6   : > { %1985 = vst [vmem:[%s3240_s14 + $0x1a8] sm:$0xff] %v1633_v36  ;;  %2049 = vst [vmem:[%s3240_s14 + $0x3a8] sm:$0xff] %v1889_v37 }
 0x1f9   : > { %v1637_v40 = vpop.f32.mrb[108].mxu0  ;;  %v1893_v41 = vpop.f32.mrb[108].mxu1 }
 0x1fa   : > { %v1638_v42 = vadd.f32 %v3529_v12, %v1637_v40  ;;  %v1894_v44 = vadd.f32 %v3529_v12, %v1893_v41  ;;  %v1639_v45 = vpop.f32.mrb[109].mxu0  ;;  %v1895_v46 = vpop.f32.mrb[109].mxu1 }
 0x1fb   : > { %v1640_v18 = vpop.f32.mrb[110].mxu0  ;;  %v1896_v47 = vpop.f32.mrb[110].mxu1 }
 0x1fc   : > { %1986 = vst [vmem:[%s3240_s14 + $0x1b0] sm:$0xff] %v1638_v42  ;;  %2050 = vst [vmem:[%s3240_s14 + $0x3b0] sm:$0xff] %v1894_v44  ;;  %v1641_v48 = vadd.f32 %v3529_v12, %v1640_v18  ;;  %v1897_v50 = vadd.f32 %v3529_v12, %v1896_v47  ;;  %v1642_v51 = vpop.f32.mrb[111].mxu0  ;;  %v1898_v52 = vpop.f32.mrb[111].mxu1 }
 0x1fe   : > { %1987 = vst [vmem:[%s3240_s14 + $0x1b8] sm:$0xff] %v1641_v48  ;;  %2051 = vst [vmem:[%s3240_s14 + $0x3b8] sm:$0xff] %v1897_v50 }
 0x201   : > { %v1645_v53 = vpop.f32.mrb[112].mxu0  ;;  %v1901_v55 = vpop.f32.mrb[112].mxu1 }
 0x202   : > { %v1646_v56 = vadd.f32 %v3529_v12, %v1645_v53  ;;  %v1902_v57 = vadd.f32 %v3529_v12, %v1901_v55  ;;  %v1647_v58 = vpop.f32.mrb[113].mxu0  ;;  %v1903_v59 = vpop.f32.mrb[113].mxu1 }
 0x203   : > { %v1648_v60 = vpop.f32.mrb[114].mxu0  ;;  %v1904_v61 = vpop.f32.mrb[114].mxu1 }
 0x204   : > { %1988 = vst [vmem:[%s3240_s14 + $0x1c0] sm:$0xff] %v1646_v56  ;;  %2052 = vst [vmem:[%s3240_s14 + $0x3c0] sm:$0xff] %v1902_v57  ;;  %v1649_v62 = vadd.f32 %v3529_v12, %v1648_v60  ;;  %v1905_v63 = vadd.f32 %v3529_v12, %v1904_v61  ;;  %v1650_v0 = vpop.f32.mrb[115].mxu0  ;;  %v1906_v19 = vpop.f32.mrb[115].mxu1 }
 0x206   : > { %1989 = vst [vmem:[%s3240_s14 + $0x1c8] sm:$0xff] %v1649_v62  ;;  %2053 = vst [vmem:[%s3240_s14 + $0x3c8] sm:$0xff] %v1905_v63 }
 0x209   : > { %v1653_v2 = vpop.f32.mrb[116].mxu0  ;;  %v1909_v3 = vpop.f32.mrb[116].mxu1 }
 0x20a   : > { %v1654_v4 = vadd.f32 %v3529_v12, %v1653_v2  ;;  %v1910_v5 = vadd.f32 %v3529_v12, %v1909_v3  ;;  %v1655_v7 = vpop.f32.mrb[117].mxu0  ;;  %v1911_v8 = vpop.f32.mrb[117].mxu1 }
 0x20b   : > { %v1656_v6 = vpop.f32.mrb[118].mxu0  ;;  %v1912_v9 = vpop.f32.mrb[118].mxu1 }
 0x20c   : > { %1990 = vst [vmem:[%s3240_s14 + $0x1d0] sm:$0xff] %v1654_v4  ;;  %2054 = vst [vmem:[%s3240_s14 + $0x3d0] sm:$0xff] %v1910_v5  ;;  %v1657_v10 = vadd.f32 %v3529_v12, %v1656_v6  ;;  %v1913_v11 = vadd.f32 %v3529_v12, %v1912_v9  ;;  %v1658_v43 = vpop.f32.mrb[119].mxu0  ;;  %v1914_v13 = vpop.f32.mrb[119].mxu1 }
 0x20e   : > { %1991 = vst [vmem:[%s3240_s14 + $0x1d8] sm:$0xff] %v1657_v10  ;;  %2055 = vst [vmem:[%s3240_s14 + $0x3d8] sm:$0xff] %v1913_v11 }
 0x211   : > { %v1661_v14 = vpop.f32.mrb[120].mxu0  ;;  %v1917_v15 = vpop.f32.mrb[120].mxu1 }
 0x212   : > { %v1662_v16 = vadd.f32 %v3529_v12, %v1661_v14  ;;  %v1918_v49 = vadd.f32 %v3529_v12, %v1917_v15  ;;  %v1663_v17 = vpop.f32.mrb[121].mxu0  ;;  %v1919_v20 = vpop.f32.mrb[121].mxu1 }
 0x213   : > { %v1664_v21 = vpop.f32.mrb[122].mxu0  ;;  %v1920_v22 = vpop.f32.mrb[122].mxu1 }
 0x214   : > { %1992 = vst [vmem:[%s3240_s14 + $0x1e0] sm:$0xff] %v1662_v16  ;;  %2056 = vst [vmem:[%s3240_s14 + $0x3e0] sm:$0xff] %v1918_v49  ;;  %v1665_v23 = vadd.f32 %v3529_v12, %v1664_v21  ;;  %v1921_v24 = vadd.f32 %v3529_v12, %v1920_v22  ;;  %v1666_v25 = vpop.f32.mrb[123].mxu0  ;;  %v1922_v54 = vpop.f32.mrb[123].mxu1 }
 0x216   : > { %1993 = vst [vmem:[%s3240_s14 + $0x1e8] sm:$0xff] %v1665_v23  ;;  %2057 = vst [vmem:[%s3240_s14 + $0x3e8] sm:$0xff] %v1921_v24 }
 0x219   : > { %v1669_v26 = vpop.f32.mrb[124].mxu0  ;;  %v1925_v27 = vpop.f32.mrb[124].mxu1 }
 0x21a   : > { %v1670_v28 = vadd.f32 %v3529_v12, %v1669_v26  ;;  %v1926_v29 = vadd.f32 %v3529_v12, %v1925_v27  ;;  %v1671_v30 = vpop.f32.mrb[125].mxu0  ;;  %v1927_v31 = vpop.f32.mrb[125].mxu1 }
 0x21b   : > { %v1672_v32 = vpop.f32.mrb[126].mxu0  ;;  %v1928_v33 = vpop.f32.mrb[126].mxu1 }
 0x21c   : > { %1994 = vst [vmem:[%s3240_s14 + $0x1f0] sm:$0xff] %v1670_v28  ;;  %2058 = vst [vmem:[%s3240_s14 + $0x3f0] sm:$0xff] %v1926_v29  ;;  %v1673_v1 = vadd.f32 %v3529_v12, %v1672_v32  ;;  %v1929_v34 = vadd.f32 %v3529_v12, %v1928_v33  ;;  %v1674_v35 = vpop.f32.mrb[127].mxu0  ;;  %v1930_v36 = vpop.f32.mrb[127].mxu1 }
 0x21e   : > { %1995 = vst [vmem:[%s3240_s14 + $0x1f8] sm:$0xff] %v1673_v1  ;;  %2059 = vst [vmem:[%s3240_s14 + $0x3f8] sm:$0xff] %v1929_v34 }
 0x21f   : > { %2273 = shalt.err (!%p2270_p3)
}
 0x220   : > { %s2274_s8 = scalar_lea.hbm %s3590_s29, 16384  ;;  %s2278_s11 = scalar_lea.hbm %s3647_s4, 32768 }
 0x221   : > { %p2275_p4 = scmp.ne.s32.totalorder %s3590_s29, %s2274_s8  ;;  %p2279_p9 = scmp.lt.u32.totalorder %s3590_s29, %s3647_s4 }
 0x222   : > { %p2280_p10 = scmp.lt.u32.totalorder %s2278_s11, %s2274_s8  ;;  %p2282_p12 = scmp.lt.u32.totalorder %s2274_s8, %s3590_s29 }
 0x223   : > { %p2276_p7 = pnand %p2275_p4, %p2391_p5 }
 0x224   : > { %p2281_p11 = por %p2280_p10, %p2279_p9 }
 0x225   : > { %p2277_p8 = pneg %p2276_p7 }
 0x226   : > { %p2283_p13 = por %p2282_p12, %p2281_p11 }
 0x228   : > { %p2284_p0 = pnand %p2283_p13, %p2277_p8 }
 0x22a   : > { %2287 = shalt.err (!%p2284_p0)
}
 0x22b   : > { %s2326_s13 = smov 128   ;;  %s2327_s20 = smov 8  }
 0x22c   : > { %2201 = dma.vmem_to_hbm [thread:$0]  (%p2391_p5), %s3592_s23, 16384, %s3590_s29, %s3602_s19, %s2326_s13, %s2326_s13, %s2327_s20  }
 0x22d PF: > { %p2207_p1 = scmp.ge.s32.totalorder %s2322_s18, 2  ;;  %s2089_s22 = sand.u32 1, %s2310_s15  }
 0x22e   : > { %s2090_s27 = scalar_lea.sflag [#allocation3], %s2089_s22 }
 0x22f   : > { %p2204_p2 = pnand %p2207_p1, %p2395_p6 }
 0x231   : > { %2305 = dma.done.wait (!%p2204_p2), %s2090_s27, 16384  }
 0x232   : > { %2307 = vsyncadd (!%p2204_p2), %s2090_s27, 4294950912  ;;  %p14_p3 = scmp.ge.s32.totalorder %s2378_s21, 4   ;;  %s3650_s15 = smov %s2314_s16 }
 0x233   : > { %s3651_s16 = smov %s2318_s17  ;;  %s3652_s17 = smov %s2389_s24 }
 0x234   : > { %s3653_s18 = smov %s2378_s21  ;;  %16 = sbr.rel (!%p14_p3) target bundleno = 3 (0x3), region = 72 }
 0x23b   :  { %2095 = vsyncpa [#allocation3], 1 }
 0x23c   :  { %2097 = vsyncpa [#allocation3 + $0x1], 1 }

// kernel: feedforward.4
= control target key start
LH: loop header
LB: loop body
LE: loop exit
PB: predicated region body
PF: predicated region fallthrough
CT: control target
= control target key end

     0   :  { %s5448_s18 = smov 0   ;;  %s8574_s0 = inlined_call_operand.vmem [shape: f32[2048,128], index: 0, kind: input, shape index: {}]   ;;  %s8575_s1 = inlined_call_operand.vmem [shape: f32[2,128], index: 1, kind: input, shape index: {}]   ;;  %s8576_s2 = inlined_call_operand.vmem [shape: bf16[128,256], index: 2, kind: input, shape index: {}]   ;;  %s8577_s3 = inlined_call_operand.vmem [shape: f32[1,256], index: 3, kind: input, shape index: {}]   ;;  %s8578_s4 = inlined_call_operand.vmem [shape: bf16[2048,256], index: 4, kind: output, shape index: {0}]   ;;  %s8579_s5 = inlined_call_operand.vmem [shape: f32[2,2,256], index: 5, kind: output, shape index: {1}]  }
   0x1 LB: > { %s5454_s19 = sadd.s32 4294967295, %s5415_s18   ;;  %p4557_p0 = scmp.ge.s32.totalorder %s5415_s18, 1  ;;  %s5415_s18 = sphi %s5448_s18, %s16_s18  }
   0x2   : > { %p191_p1 = scmp.lt.s32.totalorder %s5415_s18, 3 }
   0x4   : > { %p192_p2 = pnand %p4557_p0, %p191_p1 }
   0x6   : > { %195 = sbr.rel (%p192_p2) target bundleno = 900 (0x384), region = 36 }
   0xd   : > { %v4869_v0 = vld [vmem:[%s8576_s2 + $0x4] ss:$8 sps:$4 sm:$0xff]   ;;  %v4871_v1 = vld [vmem:[%s8576_s2] ss:$8 sps:$4 sm:$0xff]   ;;  %v8580_v2 = vmov 0   ;;  %s4558_s26 = sshll.u32 %s5454_s19, 7 }
   0xe   : > { %842 = vmatprep.mubr.bf16.mxu0 %v8580_v2  ;;  %1162 = vmatprep.mubr.bf16.mxu1 %v8580_v2  ;;  %v4872_v3 = vld [vmem:[%s8576_s2 + $0x14] ss:$8 sps:$4 sm:$0xff]   ;;  %v4874_v4 = vld [vmem:[%s8576_s2 + $0x10] ss:$8 sps:$4 sm:$0xff]   ;;  %v4875_v5 = vld [vmem:[%s8576_s2 + $0x24] ss:$8 sps:$4 sm:$0xff]  }
   0xf   : > { %810 = vmatprep.subr.bf16.mxu0 %v4869_v0  ;;  %4844 = vmatprep.subr.bf16.mxu1 %v4869_v0  ;;  %p226_p3 = scmp.lt.s32.totalorder %s4558_s26, 255  ;;  %v4877_v6 = vld [vmem:[%s8576_s2 + $0x20] ss:$8 sps:$4 sm:$0xff]   ;;  %v4878_v7 = vld [vmem:[%s8576_s2 + $0x34] ss:$8 sps:$4 sm:$0xff]   ;;  %p238_p4 = scmp.lt.s32.totalorder %s5454_s19, 1 }
  0x10   : > { %811 = vmatpush1.bf16.msra.mxu0 %v4871_v1  ;;  %4852 = vmatpush1.bf16.msra.mxu1 %v4871_v1  ;;  %v4880_v8 = vld [vmem:[%s8576_s2 + $0x30] ss:$8 sps:$4 sm:$0xff]   ;;  %v4881_v9 = vld [vmem:[%s8576_s2 + $0x44] ss:$8 sps:$4 sm:$0xff]   ;;  %v4883_v10 = vld [vmem:[%s8576_s2 + $0x40] ss:$8 sps:$4 sm:$0xff]  }
  0x11   : > { %812 = vmatprep.subr.bf16.mxu0 %v4872_v3  ;;  %4845 = vmatprep.subr.bf16.mxu1 %v4872_v3  ;;  %s9130_s26 = smov (!%p226_p3, %s4558_s26), 255  ;;  %v4884_v11 = vld [vmem:[%s8576_s2 + $0x54] ss:$8 sps:$4 sm:$0xff]   ;;  %v4886_v12 = vld [vmem:[%s8576_s2 + $0x50] ss:$8 sps:$4 sm:$0xff]   ;;  %s9132_s19 = smov (!%p238_p4, %s5454_s19), 1 }
  0x12   : > { %s4559_s14 = sshll.u32 %s9130_s26, 3  ;;  %v5512_v15 = vld [vmem:[%s8575_s1] ss:$0 sm:$0xff]  ;;  %v4887_v16 = vld [vmem:[%s8576_s2 + $0x64] ss:$8 sps:$4 sm:$0xff]   ;;  %vm3551_vm0 = vcmask 1040384  }
  0x13   : > { %s5502_s23 = scalar_lea.vmem %s8574_s0, %s4559_s14  ;;  %v4889_v19 = vld [vmem:[%s8576_s2 + $0x60] ss:$8 sps:$4 sm:$0xff]   ;;  %v4890_v21 = vld [vmem:[%s8576_s2 + $0x74] ss:$8 sps:$4 sm:$0xff]   ;;  %v4892_v22 = vld [vmem:[%s8576_s2 + $0x70] ss:$8 sps:$4 sm:$0xff]   ;;  %s6015_s27 = scalar_lea.vmem %s8578_s4, %s4559_s14 }
  0x14   : > { %813 = vmatpush1.bf16.msra.mxu0 %v4874_v4  ;;  %4853 = vmatpush1.bf16.msra.mxu1 %v4874_v4  ;;  %v244_v13 = vld [vmem:[%s5502_s23] sm:$0xff]  ;;  %v245_v14 = vld [vmem:[%s5502_s23 + $0x8] sm:$0xff]  ;;  %v246_v25 = vld [vmem:[%s5502_s23 + $0x10] sm:$0xff] }
  0x15   : > { %814 = vmatprep.subr.bf16.mxu0 %v4875_v5  ;;  %4846 = vmatprep.subr.bf16.mxu1 %v4875_v5  ;;  %v377_v17 = vmul.f32 %v5512_v15, %v244_v13  ;;  %v378_v18 = vmul.f32 %v5512_v15, %v245_v14  ;;  %v5525_v20 = vld [vmem:[%s8575_s1 + $0x1] ss:$0 sm:$0xff]  ;;  %v247_v26 = vld [vmem:[%s5502_s23 + $0x18] sm:$0xff]  ;;  %v309_v28 = vld [vmem:[%s5502_s23 + $0x208] sm:$0xff]  ;;  %v379_v29 = vmul.f32 %v5512_v15, %v246_v25 }
  0x16   : > { %v308_v27 = vld [vmem:[%s5502_s23 + $0x200] sm:$0xff]  ;;  %v310_v30 = vld [vmem:[%s5502_s23 + $0x210] sm:$0xff]  ;;  %v380_v32 = vmul.f32 %v5512_v15, %v247_v26  ;;  %v442_v34 = vmul.f32 %v5512_v15, %v309_v28  ;;  %v311_v35 = vld [vmem:[%s5502_s23 + $0x218] sm:$0xff] }
  0x17   : > { %v510_v23 = vadd.f32 %v5525_v20, %v377_v17  ;;  %v511_v24 = vadd.f32 %v5525_v20, %v378_v18  ;;  %v441_v33 = vmul.f32 %v5512_v15, %v308_v27  ;;  %v443_v38 = vmul.f32 %v5512_v15, %v310_v30  ;;  %v248_v43 = vld [vmem:[%s5502_s23 + $0x20] sm:$0xff]  ;;  %v249_v44 = vld [vmem:[%s5502_s23 + $0x28] sm:$0xff]  ;;  %v250_v57 = vld [vmem:[%s5502_s23 + $0x30] sm:$0xff] }
  0x18   : > { %815 = vmatpush1.bf16.msra.mxu0 %v4877_v6  ;;  %4854 = vmatpush1.bf16.msra.mxu1 %v4877_v6  ;;  %v575_v37 = vadd.f32 %v5525_v20, %v442_v34  ;;  %v444_v39 = vmul.f32 %v5512_v15, %v311_v35  ;;  %v512_v40 = vadd.f32 %v5525_v20, %v379_v29  ;;  %v312_v47 = vld [vmem:[%s5502_s23 + $0x220] sm:$0xff]  ;;  %v313_v48 = vld [vmem:[%s5502_s23 + $0x228] sm:$0xff]  ;;  %v251_v58 = vld [vmem:[%s5502_s23 + $0x38] sm:$0xff] }
  0x19   : > { %816 = vmatprep.subr.bf16.mxu0 %v4878_v7  ;;  %4847 = vmatprep.subr.bf16.mxu1 %v4878_v7  ;;  %v638_v31 = vpack.c.bf16 %v511_v24, %v510_v23  ;;  %v574_v36 = vadd.f32 %v5525_v20, %v441_v33  ;;  %v513_v41 = vadd.f32 %v5525_v20, %v380_v32  ;;  %v314_v61 = vld [vmem:[%s5502_s23 + $0x230] sm:$0xff]  ;;  %v315_v62 = vld [vmem:[%s5502_s23 + $0x238] sm:$0xff]  ;;  %v317_v13 = vld [vmem:[%s5502_s23 + $0x248] sm:$0xff] }
  0x1a   : > { %v576_v45 = vadd.f32 %v5525_v20, %v443_v38  ;;  %v577_v46 = vadd.f32 %v5525_v20, %v444_v39  ;;  %v381_v50 = vmul.f32 %v5512_v15, %v248_v43  ;;  %v382_v51 = vmul.f32 %v5512_v15, %v249_v44  ;;  %v254_v24 = vld [vmem:[%s5502_s23 + $0x50] sm:$0xff]  ;;  %v255_v25 = vld [vmem:[%s5502_s23 + $0x58] sm:$0xff]  ;;  %v256_v38 = vld [vmem:[%s5502_s23 + $0x60] sm:$0xff] }
  0x1b   : > { %v670_v42 = vpack.c.bf16 %v575_v37, %v574_v36  ;;  %v639_v49 = vpack.c.bf16 %v513_v41, %v512_v40  ;;  %v445_v53 = vmul.f32 %v5512_v15, %v312_v47  ;;  %v446_v54 = vmul.f32 %v5512_v15, %v313_v48  ;;  %v318_v28 = vld [vmem:[%s5502_s23 + $0x250] sm:$0xff]  ;;  %v319_v29 = vld [vmem:[%s5502_s23 + $0x258] sm:$0xff]  ;;  %v257_v39 = vld [vmem:[%s5502_s23 + $0x68] sm:$0xff] }
  0x1c   : > { %817 = vmatpush1.bf16.msra.mxu0 %v4880_v8  ;;  %4855 = vmatpush1.bf16.msra.mxu1 %v4880_v8  ;;  %v671_v52 = vpack.c.bf16 %v577_v46, %v576_v45  ;;  %v514_v55 = vadd.f32 %v5525_v20, %v381_v50  ;;  %v515_v56 = vadd.f32 %v5525_v20, %v382_v51  ;;  %v252_v8 = vld [vmem:[%s5502_s23 + $0x40] sm:$0xff]  ;;  %v321_v43 = vld [vmem:[%s5502_s23 + $0x268] sm:$0xff] }
  0x1d   : > { %818 = vmatprep.subr.bf16.mxu0 %v4881_v9  ;;  %4848 = vmatprep.subr.bf16.mxu1 %v4881_v9  ;;  %v578_v59 = vadd.f32 %v5525_v20, %v445_v53  ;;  %v579_v60 = vadd.f32 %v5525_v20, %v446_v54  ;;  %v383_v0 = vmul.f32 %v5512_v15, %v250_v57  ;;  %v253_v9 = vld [vmem:[%s5502_s23 + $0x48] sm:$0xff]  ;;  %v259_v53 = vld [vmem:[%s5502_s23 + $0x78] sm:$0xff] }
  0x1e   : > { %v640_v63 = vpack.c.bf16 %v515_v56, %v514_v55  ;;  %v384_v1 = vmul.f32 %v5512_v15, %v251_v58  ;;  %v447_v4 = vmul.f32 %v5512_v15, %v314_v61  ;;  %v448_v5 = vmul.f32 %v5512_v15, %v315_v62  ;;  %v322_v56 = vld [vmem:[%s5502_s23 + $0x270] sm:$0xff]  ;;  %v323_v57 = vld [vmem:[%s5502_s23 + $0x278] sm:$0xff] }
  0x1f   : > { %v672_v3 = vpack.c.bf16 %v579_v60, %v578_v59  ;;  %v516_v6 = vadd.f32 %v5525_v20, %v383_v0  ;;  %v386_v17 = vmul.f32 %v5512_v15, %v253_v9  ;;  %v388_v32 = vmul.f32 %v5512_v15, %v255_v25 }
  0x20   : > { %819 = vmatpush1.bf16.msra.mxu0 %v4883_v10  ;;  %4856 = vmatpush1.bf16.msra.mxu1 %v4883_v10  ;;  %v517_v7 = vadd.f32 %v5525_v20, %v384_v1  ;;  %v580_v10 = vadd.f32 %v5525_v20, %v447_v4  ;;  %v451_v34 = vmul.f32 %v5512_v15, %v318_v28  ;;  %v261_v4 = vld [vmem:[%s5502_s23 + $0x88] sm:$0xff] }
  0x21   : > { %820 = vmatprep.subr.bf16.mxu0 %v4884_v11  ;;  %4849 = vmatprep.subr.bf16.mxu1 %v4884_v11  ;;  %v581_v11 = vadd.f32 %v5525_v20, %v448_v5  ;;  %v519_v23 = vadd.f32 %v5525_v20, %v386_v17  ;;  %v452_v35 = vmul.f32 %v5512_v15, %v319_v29 }
  0x22   : > { %v641_v14 = vpack.c.bf16 %v517_v7, %v516_v6  ;;  %v521_v37 = vadd.f32 %v5525_v20, %v388_v32  ;;  %v584_v40 = vadd.f32 %v5525_v20, %v451_v34  ;;  %v389_v45 = vmul.f32 %v5512_v15, %v256_v38  ;;  %v324_v7 = vld [vmem:[%s5502_s23 + $0x280] sm:$0xff]  ;;  %v265_v34 = vld [vmem:[%s5502_s23 + $0xa8] sm:$0xff] }
  0x23   : > { %v673_v18 = vpack.c.bf16 %v581_v11, %v580_v10  ;;  %v585_v41 = vadd.f32 %v5525_v20, %v452_v35  ;;  %v390_v46 = vmul.f32 %v5512_v15, %v257_v39  ;;  %v392_v60 = vmul.f32 %v5512_v15, %v259_v53  ;;  %v329_v38 = vld [vmem:[%s5502_s23 + $0x2a8] sm:$0xff] }
  0x24   : > { %821 = vmatpush1.bf16.msra.mxu0 %v4886_v12  ;;  %4857 = vmatpush1.bf16.msra.mxu1 %v4886_v12  ;;  %v316_v12 = vld [vmem:[%s5502_s23 + $0x240] sm:$0xff]  ;;  %v522_v50 = vadd.f32 %v5525_v20, %v389_v45  ;;  %v455_v62 = vmul.f32 %v5512_v15, %v322_v56  ;;  %v394_v11 = vmul.f32 %v5512_v15, %v261_v4 }
  0x25   : > { %822 = vmatprep.subr.bf16.mxu0 %v4887_v16  ;;  %4850 = vmatprep.subr.bf16.mxu1 %v4887_v16  ;;  %v385_v16 = vmul.f32 %v5512_v15, %v252_v8  ;;  %v675_v47 = vpack.c.bf16 %v585_v41, %v584_v40  ;;  %v523_v51 = vadd.f32 %v5525_v20, %v390_v46  ;;  %v325_v8 = vld [vmem:[%s5502_s23 + $0x288] sm:$0xff] }
  0x26   : > { %v525_v1 = vadd.f32 %v5525_v20, %v392_v60  ;;  %v588_v5 = vadd.f32 %v5525_v20, %v455_v62  ;;  %v527_v17 = vadd.f32 %v5525_v20, %v394_v11  ;;  %v398_v41 = vmul.f32 %v5512_v15, %v265_v34  ;;  %v269_v62 = vld [vmem:[%s5502_s23 + $0xc8] sm:$0xff] }
  0x27   : > { %v644_v58 = vpack.c.bf16 %v523_v51, %v522_v50  ;;  %v330_v51 = vld [vmem:[%s5502_s23 + $0x2b0] sm:$0xff] }
  0x28   : > { %823 = vmatpush1.bf16.msra.mxu0 %v4889_v19  ;;  %4858 = vmatpush1.bf16.msra.mxu1 %v4889_v19  ;;  %v449_v19 = vmul.f32 %v5512_v15, %v316_v12  ;;  %v531_v46 = vadd.f32 %v5525_v20, %v398_v41 }
  0x29   : > { %824 = vmatprep.subr.bf16.mxu0 %v4890_v21  ;;  %4851 = vmatprep.subr.bf16.mxu1 %v4890_v21  ;;  %v450_v21 = vmul.f32 %v5512_v15, %v317_v13  ;;  %v457_v13 = vmul.f32 %v5512_v15, %v324_v7 }
  0x2a   : > { %v582_v26 = vadd.f32 %v5525_v20, %v449_v19  ;;  %v263_v19 = vld [vmem:[%s5502_s23 + $0x98] sm:$0xff] }
  0x2b   : > { %v583_v27 = vadd.f32 %v5525_v20, %v450_v21  ;;  %v590_v21 = vadd.f32 %v5525_v20, %v457_v13  ;;  %v271_v13 = vld [vmem:[%s5502_s23 + $0xd8] sm:$0xff] }
  0x2c   : > { %825 = vmatpush1.bf16.msra.mxu0 %v4892_v22  ;;  %4859 = vmatpush1.bf16.msra.mxu1 %v4892_v22  ;;  %v518_v22 = vadd.f32 %v5525_v20, %v385_v16 }
  0x2d   : > { %v674_v33 = vpack.c.bf16 %v583_v27, %v582_v26  ;;  %v396_v27 = vmul.f32 %v5512_v15, %v263_v19 }
  0x2e   : > { %v642_v30 = vpack.c.bf16 %v519_v23, %v518_v22  ;;  %v326_v23 = vld [vmem:[%s5502_s23 + $0x290] sm:$0xff] }
  0x2f   : > { %843 = vmatmul.mubr.bf16.vlgmr.msra.gmra.mrb[0].mxu0 %v638_v31  ;;  %1163 = vmatmul.mubr.bf16.vlgmr.msra.gmra.mrb[0].mxu1 %v670_v42  ;;  %v387_v31 = vmul.f32 %v5512_v15, %v254_v24  ;;  %v320_v42 = vld [vmem:[%s5502_s23 + $0x260] sm:$0xff]  ;;  %v327_v24 = vld [vmem:[%s5502_s23 + $0x298] sm:$0xff]  ;;  %v459_v29 = vmul.f32 %v5512_v15, %v326_v23  ;;  %v529_v32 = vadd.f32 %v5525_v20, %v396_v27 }
  0x30   : > { %852 = vmatprep.mubr.bf16.mxu0 %v8580_v2  ;;  %1172 = vmatprep.mubr.bf16.mxu1 %v8580_v2  ;;  %v453_v48 = vmul.f32 %v5512_v15, %v320_v42 }
  0x31   : > { %v520_v36 = vadd.f32 %v5525_v20, %v387_v31  ;;  %v592_v35 = vadd.f32 %v5525_v20, %v459_v29  ;;  %v273_v29 = vld [vmem:[%s5502_s23 + $0xe8] sm:$0xff] }
  0x32   : > { %v586_v54 = vadd.f32 %v5525_v20, %v453_v48  ;;  %v267_v48 = vld [vmem:[%s5502_s23 + $0xb8] sm:$0xff] }
  0x33   : > { %v643_v44 = vpack.c.bf16 %v521_v37, %v520_v36  ;;  %v328_v37 = vld [vmem:[%s5502_s23 + $0x2a0] sm:$0xff] }
  0x37   : > { %853 = vmatmul.mubr.bf16.gmra.mrb[4].mxu0 %v639_v49  ;;  %1173 = vmatmul.mubr.bf16.gmra.mrb[4].mxu1 %v671_v52  ;;  %v454_v49 = vmul.f32 %v5512_v15, %v321_v43  ;;  %v258_v52 = vld [vmem:[%s5502_s23 + $0x70] sm:$0xff]  ;;  %v461_v43 = vmul.f32 %v5512_v15, %v328_v37 }
  0x38   : > { %862 = vmatprep.mubr.bf16.mxu0 %v8580_v2  ;;  %1182 = vmatprep.mubr.bf16.mxu1 %v8580_v2  ;;  %v391_v59 = vmul.f32 %v5512_v15, %v258_v52  ;;  %v331_v52 = vld [vmem:[%s5502_s23 + $0x2b8] sm:$0xff] }
  0x39   : > { %v587_v55 = vadd.f32 %v5525_v20, %v454_v49  ;;  %v594_v49 = vadd.f32 %v5525_v20, %v461_v43  ;;  %v275_v43 = vld [vmem:[%s5502_s23 + $0xf8] sm:$0xff] }
  0x3a   : > { %v524_v0 = vadd.f32 %v5525_v20, %v391_v59 }
  0x3b   : > { %v676_v61 = vpack.c.bf16 %v587_v55, %v586_v54  ;;  %v400_v55 = vmul.f32 %v5512_v15, %v267_v48 }
  0x3c   : > { %v645_v9 = vpack.c.bf16 %v525_v1, %v524_v0  ;;  %v332_v1 = vld [vmem:[%s5502_s23 + $0x2c0] sm:$0xff] }
  0x3d   : > { %v533_v60 = vadd.f32 %v5525_v20, %v400_v55 }
  0x3f   : > { %863 = vmatmul.mubr.bf16.gmra.mrb[8].mxu0 %v640_v63  ;;  %1183 = vmatmul.mubr.bf16.gmra.mrb[8].mxu1 %v672_v3  ;;  %v456_v63 = vmul.f32 %v5512_v15, %v323_v57  ;;  %v260_v3 = vld [vmem:[%s5502_s23 + $0x80] sm:$0xff]  ;;  %v463_v57 = vmul.f32 %v5512_v15, %v330_v51 }
  0x40   : > { %872 = vmatprep.mubr.bf16.mxu0 %v8580_v2  ;;  %1192 = vmatprep.mubr.bf16.mxu1 %v8580_v2  ;;  %v393_v10 = vmul.f32 %v5512_v15, %v260_v3  ;;  %v333_v3 = vld [vmem:[%s5502_s23 + $0x2c8] sm:$0xff] }
  0x41   : > { %v589_v6 = vadd.f32 %v5525_v20, %v456_v63  ;;  %v596_v63 = vadd.f32 %v5525_v20, %v463_v57  ;;  %v277_v57 = vld [vmem:[%s5502_s23 + $0x108] sm:$0xff] }
  0x42   : > { %v526_v16 = vadd.f32 %v5525_v20, %v393_v10 }
  0x43   : > { %v677_v12 = vpack.c.bf16 %v589_v6, %v588_v5  ;;  %v402_v6 = vmul.f32 %v5512_v15, %v269_v62 }
  0x44   : > { %v646_v25 = vpack.c.bf16 %v527_v17, %v526_v16  ;;  %v334_v17 = vld [vmem:[%s5502_s23 + $0x2d0] sm:$0xff] }
  0x45   : > { %v535_v11 = vadd.f32 %v5525_v20, %v402_v6 }
  0x47   : > { %873 = vmatmul.mubr.bf16.gmra.mrb[12].mxu0 %v641_v14  ;;  %1193 = vmatmul.mubr.bf16.gmra.mrb[12].mxu1 %v673_v18  ;;  %v458_v14 = vmul.f32 %v5512_v15, %v325_v8  ;;  %v262_v18 = vld [vmem:[%s5502_s23 + $0x90] sm:$0xff]  ;;  %v465_v8 = vmul.f32 %v5512_v15, %v332_v1 }
  0x48   : > { %882 = vmatprep.mubr.bf16.mxu0 %v8580_v2  ;;  %1202 = vmatprep.mubr.bf16.mxu1 %v8580_v2  ;;  %v395_v26 = vmul.f32 %v5512_v15, %v262_v18  ;;  %v335_v18 = vld [vmem:[%s5502_s23 + $0x2d8] sm:$0xff] }
  0x49   : > { %v591_v22 = vadd.f32 %v5525_v20, %v458_v14  ;;  %v598_v14 = vadd.f32 %v5525_v20, %v465_v8  ;;  %v279_v8 = vld [vmem:[%s5502_s23 + $0x118] sm:$0xff] }
  0x4a   : > { %v528_v31 = vadd.f32 %v5525_v20, %v395_v26 }
  0x4b   : > { %v678_v28 = vpack.c.bf16 %v591_v22, %v590_v21  ;;  %v404_v22 = vmul.f32 %v5512_v15, %v271_v13 }
  0x4c   : > { %v647_v39 = vpack.c.bf16 %v529_v32, %v528_v31  ;;  %v336_v32 = vld [vmem:[%s5502_s23 + $0x2e0] sm:$0xff] }
  0x4d   : > { %v537_v27 = vadd.f32 %v5525_v20, %v404_v22 }
  0x4f   : > { %883 = vmatmul.mubr.bf16.gmra.mrb[16].mxu0 %v642_v30  ;;  %1203 = vmatmul.mubr.bf16.gmra.mrb[16].mxu1 %v674_v33  ;;  %v460_v30 = vmul.f32 %v5512_v15, %v327_v24  ;;  %v264_v33 = vld [vmem:[%s5502_s23 + $0xa0] sm:$0xff]  ;;  %v467_v24 = vmul.f32 %v5512_v15, %v334_v17 }
  0x50   : > { %892 = vmatprep.mubr.bf16.mxu0 %v8580_v2  ;;  %1212 = vmatprep.mubr.bf16.mxu1 %v8580_v2  ;;  %v397_v40 = vmul.f32 %v5512_v15, %v264_v33  ;;  %v337_v33 = vld [vmem:[%s5502_s23 + $0x2e8] sm:$0xff] }
  0x51   : > { %v593_v36 = vadd.f32 %v5525_v20, %v460_v30  ;;  %v600_v30 = vadd.f32 %v5525_v20, %v467_v24  ;;  %v281_v24 = vld [vmem:[%s5502_s23 + $0x128] sm:$0xff] }
  0x52   : > { %v530_v45 = vadd.f32 %v5525_v20, %v397_v40 }
  0x53   : > { %v679_v42 = vpack.c.bf16 %v593_v36, %v592_v35  ;;  %v406_v36 = vmul.f32 %v5512_v15, %v273_v29 }
  0x54   : > { %v648_v53 = vpack.c.bf16 %v531_v46, %v530_v45  ;;  %v338_v46 = vld [vmem:[%s5502_s23 + $0x2f0] sm:$0xff] }
  0x55   : > { %v539_v41 = vadd.f32 %v5525_v20, %v406_v36 }
  0x57   : > { %893 = vmatmul.mubr.bf16.gmra.mrb[20].mxu0 %v643_v44  ;;  %1213 = vmatmul.mubr.bf16.gmra.mrb[20].mxu1 %v675_v47  ;;  %v462_v44 = vmul.f32 %v5512_v15, %v329_v38  ;;  %v266_v47 = vld [vmem:[%s5502_s23 + $0xb0] sm:$0xff]  ;;  %v469_v38 = vmul.f32 %v5512_v15, %v336_v32 }
  0x58   : > { %902 = vmatprep.mubr.bf16.mxu0 %v8580_v2  ;;  %1222 = vmatprep.mubr.bf16.mxu1 %v8580_v2  ;;  %v399_v54 = vmul.f32 %v5512_v15, %v266_v47  ;;  %v339_v47 = vld [vmem:[%s5502_s23 + $0x2f8] sm:$0xff] }
  0x59   : > { %v595_v50 = vadd.f32 %v5525_v20, %v462_v44  ;;  %v602_v44 = vadd.f32 %v5525_v20, %v469_v38  ;;  %v283_v38 = vld [vmem:[%s5502_s23 + $0x138] sm:$0xff] }
  0x5a   : > { %v532_v59 = vadd.f32 %v5525_v20, %v399_v54 }
  0x5b   : > { %v680_v56 = vpack.c.bf16 %v595_v50, %v594_v49  ;;  %v408_v50 = vmul.f32 %v5512_v15, %v275_v43  ;;  %v416_v43 = vmul.f32 %v5512_v15, %v283_v38 }
  0x5c   : > { %v649_v4 = vpack.c.bf16 %v533_v60, %v532_v59  ;;  %v340_v60 = vld [vmem:[%s5502_s23 + $0x300] sm:$0xff] }
  0x5d   : > { %v541_v55 = vadd.f32 %v5525_v20, %v408_v50 }
  0x5f   : > { %903 = vmatmul.mubr.bf16.gmra.mrb[24].mxu0 %v644_v58  ;;  %1223 = vmatmul.mubr.bf16.gmra.mrb[24].mxu1 %v676_v61  ;;  %v464_v58 = vmul.f32 %v5512_v15, %v331_v52  ;;  %v268_v61 = vld [vmem:[%s5502_s23 + $0xc0] sm:$0xff]  ;;  %v471_v52 = vmul.f32 %v5512_v15, %v338_v46  ;;  %v347_v46 = vld [vmem:[%s5502_s23 + $0x338] sm:$0xff] }
  0x60   : > { %912 = vmatprep.mubr.bf16.mxu0 %v8580_v2  ;;  %1232 = vmatprep.mubr.bf16.mxu1 %v8580_v2  ;;  %v401_v5 = vmul.f32 %v5512_v15, %v268_v61  ;;  %v341_v61 = vld [vmem:[%s5502_s23 + $0x308] sm:$0xff]  ;;  %v480_v50 = vmul.f32 %v5512_v15, %v347_v46 }
  0x61   : > { %v597_v0 = vadd.f32 %v5525_v20, %v464_v58  ;;  %v604_v58 = vadd.f32 %v5525_v20, %v471_v52  ;;  %v285_v52 = vld [vmem:[%s5502_s23 + $0x148] sm:$0xff] }
  0x62   : > { %v534_v10 = vadd.f32 %v5525_v20, %v401_v5 }
  0x63   : > { %v681_v7 = vpack.c.bf16 %v597_v0, %v596_v63  ;;  %v410_v0 = vmul.f32 %v5512_v15, %v277_v57  ;;  %v418_v57 = vmul.f32 %v5512_v15, %v285_v52 }
  0x64   : > { %v650_v19 = vpack.c.bf16 %v535_v11, %v534_v10  ;;  %v342_v11 = vld [vmem:[%s5502_s23 + $0x310] sm:$0xff] }
  0x65   : > { %v543_v6 = vadd.f32 %v5525_v20, %v410_v0 }
  0x67   : > { %913 = vmatmul.mubr.bf16.gmra.mrb[28].mxu0 %v645_v9  ;;  %1233 = vmatmul.mubr.bf16.gmra.mrb[28].mxu1 %v677_v12  ;;  %v466_v9 = vmul.f32 %v5512_v15, %v333_v3  ;;  %v270_v12 = vld [vmem:[%s5502_s23 + $0xd0] sm:$0xff]  ;;  %v473_v3 = vmul.f32 %v5512_v15, %v340_v60  ;;  %v349_v60 = vld [vmem:[%s5502_s23 + $0x348] sm:$0xff] }
  0x68   : > { %922 = vmatprep.mubr.bf16.mxu0 %v8580_v2  ;;  %1242 = vmatprep.mubr.bf16.mxu1 %v8580_v2  ;;  %v403_v21 = vmul.f32 %v5512_v15, %v270_v12  ;;  %v343_v12 = vld [vmem:[%s5502_s23 + $0x318] sm:$0xff]  ;;  %v482_v0 = vmul.f32 %v5512_v15, %v349_v60 }
  0x69   : > { %v599_v16 = vadd.f32 %v5525_v20, %v466_v9  ;;  %v606_v9 = vadd.f32 %v5525_v20, %v473_v3  ;;  %v287_v3 = vld [vmem:[%s5502_s23 + $0x158] sm:$0xff] }
  0x6a   : > { %v536_v26 = vadd.f32 %v5525_v20, %v403_v21 }
  0x6b   : > { %v682_v23 = vpack.c.bf16 %v599_v16, %v598_v14  ;;  %v412_v16 = vmul.f32 %v5512_v15, %v279_v8  ;;  %v420_v8 = vmul.f32 %v5512_v15, %v287_v3 }
  0x6c   : > { %v651_v34 = vpack.c.bf16 %v537_v27, %v536_v26  ;;  %v344_v27 = vld [vmem:[%s5502_s23 + $0x320] sm:$0xff] }
  0x6d   : > { %v545_v22 = vadd.f32 %v5525_v20, %v412_v16  ;;  %v289_v16 = vld [vmem:[%s5502_s23 + $0x168] sm:$0xff] }
  0x6f   : > { %923 = vmatmul.mubr.bf16.gmra.mrb[32].mxu0 %v646_v25  ;;  %1243 = vmatmul.mubr.bf16.gmra.mrb[32].mxu1 %v678_v28  ;;  %v468_v25 = vmul.f32 %v5512_v15, %v335_v18  ;;  %v272_v28 = vld [vmem:[%s5502_s23 + $0xe0] sm:$0xff]  ;;  %v475_v18 = vmul.f32 %v5512_v15, %v342_v11  ;;  %v351_v11 = vld [vmem:[%s5502_s23 + $0x358] sm:$0xff] }
  0x70   : > { %932 = vmatprep.mubr.bf16.mxu0 %v8580_v2  ;;  %1252 = vmatprep.mubr.bf16.mxu1 %v8580_v2  ;;  %v405_v35 = vmul.f32 %v5512_v15, %v272_v28  ;;  %v345_v28 = vld [vmem:[%s5502_s23 + $0x328] sm:$0xff] }
  0x71   : > { %v601_v31 = vadd.f32 %v5525_v20, %v468_v25  ;;  %v608_v25 = vadd.f32 %v5525_v20, %v475_v18  ;;  %v484_v18 = vmul.f32 %v5512_v15, %v351_v11 }
  0x72   : > { %v538_v40 = vadd.f32 %v5525_v20, %v405_v35 }
  0x73   : > { %v683_v37 = vpack.c.bf16 %v601_v31, %v600_v30  ;;  %v414_v31 = vmul.f32 %v5512_v15, %v281_v24 }
  0x74   : > { %v652_v48 = vpack.c.bf16 %v539_v41, %v538_v40 }
  0x75   : > { %v547_v36 = vadd.f32 %v5525_v20, %v414_v31  ;;  %v352_v31 = vld [vmem:[%s5502_s23 + $0x360] sm:$0xff] }
  0x77   : > { %933 = vmatmul.mubr.bf16.gmra.mrb[36].mxu0 %v647_v39  ;;  %1253 = vmatmul.mubr.bf16.gmra.mrb[36].mxu1 %v679_v42  ;;  %v470_v39 = vmul.f32 %v5512_v15, %v337_v33  ;;  %v274_v42 = vld [vmem:[%s5502_s23 + $0xf0] sm:$0xff]  ;;  %v477_v33 = vmul.f32 %v5512_v15, %v344_v27 }
  0x78   : > { %942 = vmatprep.mubr.bf16.mxu0 %v8580_v2  ;;  %1262 = vmatprep.mubr.bf16.mxu1 %v8580_v2  ;;  %v407_v49 = vmul.f32 %v5512_v15, %v274_v42 }
  0x79   : > { %v603_v45 = vadd.f32 %v5525_v20, %v470_v39  ;;  %v610_v39 = vadd.f32 %v5525_v20, %v477_v33 }
  0x7a   : > { %v540_v54 = vadd.f32 %v5525_v20, %v407_v49 }
  0x7b   : > { %v684_v51 = vpack.c.bf16 %v603_v45, %v602_v44  ;;  %v346_v45 = vld [vmem:[%s5502_s23 + $0x330] sm:$0xff] }
  0x7c   : > { %v653_v62 = vpack.c.bf16 %v541_v55, %v540_v54  ;;  %v479_v49 = vmul.f32 %v5512_v15, %v346_v45  ;;  %v613_v54 = vadd.f32 %v5525_v20, %v480_v50 }
  0x7f   : > { %943 = vmatmul.mubr.bf16.gmra.mrb[40].mxu0 %v648_v53  ;;  %1263 = vmatmul.mubr.bf16.gmra.mrb[40].mxu1 %v680_v56  ;;  %v472_v53 = vmul.f32 %v5512_v15, %v339_v47  ;;  %v276_v56 = vld [vmem:[%s5502_s23 + $0x100] sm:$0xff] }
  0x80   : > { %952 = vmatprep.mubr.bf16.mxu0 %v8580_v2  ;;  %1272 = vmatprep.mubr.bf16.mxu1 %v8580_v2  ;;  %v409_v63 = vmul.f32 %v5512_v15, %v276_v56 }
  0x81   : > { %v605_v59 = vadd.f32 %v5525_v20, %v472_v53  ;;  %v612_v53 = vadd.f32 %v5525_v20, %v479_v49 }
  0x82   : > { %v542_v5 = vadd.f32 %v5525_v20, %v409_v63 }
  0x83   : > { %v685_v1 = vpack.c.bf16 %v605_v59, %v604_v58  ;;  %v689_v58 = vpack.c.bf16 %v613_v54, %v612_v53  ;;  %v348_v59 = vld [vmem:[%s5502_s23 + $0x340] sm:$0xff] }
  0x84   : > { %v654_v13 = vpack.c.bf16 %v543_v6, %v542_v5  ;;  %v481_v63 = vmul.f32 %v5512_v15, %v348_v59  ;;  %v615_v5 = vadd.f32 %v5525_v20, %v482_v0 }
  0x87   : > { %953 = vmatmul.mubr.bf16.gmra.mrb[44].mxu0 %v649_v4  ;;  %1273 = vmatmul.mubr.bf16.gmra.mrb[44].mxu1 %v681_v7  ;;  %v474_v4 = vmul.f32 %v5512_v15, %v341_v61  ;;  %v278_v7 = vld [vmem:[%s5502_s23 + $0x110] sm:$0xff] }
  0x88   : > { %962 = vmatprep.mubr.bf16.mxu0 %v8580_v2  ;;  %1282 = vmatprep.mubr.bf16.mxu1 %v8580_v2  ;;  %v411_v14 = vmul.f32 %v5512_v15, %v278_v7 }
  0x89   : > { %v607_v10 = vadd.f32 %v5525_v20, %v474_v4  ;;  %v614_v4 = vadd.f32 %v5525_v20, %v481_v63 }
  0x8a   : > { %v544_v21 = vadd.f32 %v5525_v20, %v411_v14  ;;  %v288_v14 = vld [vmem:[%s5502_s23 + $0x160] sm:$0xff] }
  0x8b   : > { %v686_v17 = vpack.c.bf16 %v607_v10, %v606_v9  ;;  %v690_v9 = vpack.c.bf16 %v615_v5, %v614_v4  ;;  %v350_v10 = vld [vmem:[%s5502_s23 + $0x350] sm:$0xff] }
  0x8c   : > { %v655_v29 = vpack.c.bf16 %v545_v22, %v544_v21  ;;  %v617_v21 = vadd.f32 %v5525_v20, %v484_v18  ;;  %v421_v22 = vmul.f32 %v5512_v15, %v288_v14  ;;  %v359_v14 = vld [vmem:[%s5502_s23 + $0x398] sm:$0xff] }
  0x8f   : > { %963 = vmatmul.mubr.bf16.gmra.mrb[48].mxu0 %v650_v19  ;;  %1283 = vmatmul.mubr.bf16.gmra.mrb[48].mxu1 %v682_v23  ;;  %v476_v19 = vmul.f32 %v5512_v15, %v343_v12  ;;  %v280_v23 = vld [vmem:[%s5502_s23 + $0x120] sm:$0xff] }
  0x90   : > { %972 = vmatprep.mubr.bf16.mxu0 %v8580_v2  ;;  %1292 = vmatprep.mubr.bf16.mxu1 %v8580_v2  ;;  %v413_v30 = vmul.f32 %v5512_v15, %v280_v23  ;;  %v422_v23 = vmul.f32 %v5512_v15, %v289_v16 }
  0x91   : > { %v609_v26 = vadd.f32 %v5525_v20, %v476_v19 }
  0x92   : > { %v546_v35 = vadd.f32 %v5525_v20, %v413_v30  ;;  %v555_v27 = vadd.f32 %v5525_v20, %v422_v23 }
  0x93   : > { %v687_v32 = vpack.c.bf16 %v609_v26, %v608_v25  ;;  %v554_v26 = vadd.f32 %v5525_v20, %v421_v22 }
  0x94   : > { %v656_v41 = vpack.c.bf16 %v547_v36, %v546_v35  ;;  %v485_v35 = vmul.f32 %v5512_v15, %v352_v31  ;;  %v300_v31 = vld [vmem:[%s5502_s23 + $0x1c0] sm:$0xff] }
  0x95   : > { %v660_v30 = vpack.c.bf16 %v555_v27, %v554_v26 }
  0x97   : > { %973 = vmatmul.mubr.bf16.gmra.mrb[52].mxu0 %v651_v34  ;;  %1293 = vmatmul.mubr.bf16.gmra.mrb[52].mxu1 %v683_v37  ;;  %v478_v34 = vmul.f32 %v5512_v15, %v345_v28  ;;  %v282_v37 = vld [vmem:[%s5502_s23 + $0x130] sm:$0xff] }
  0x98   : > { %982 = vmatprep.mubr.bf16.mxu0 %v8580_v2  ;;  %1302 = vmatprep.mubr.bf16.mxu1 %v8580_v2  ;;  %v415_v42 = vmul.f32 %v5512_v15, %v282_v37  ;;  %v290_v28 = vld [vmem:[%s5502_s23 + $0x170] sm:$0xff]  ;;  %v618_v37 = vadd.f32 %v5525_v20, %v485_v35 }
  0x99   : > { %v611_v40 = vadd.f32 %v5525_v20, %v478_v34  ;;  %v423_v33 = vmul.f32 %v5512_v15, %v290_v28  ;;  %v302_v35 = vld [vmem:[%s5502_s23 + $0x1d0] sm:$0xff] }
  0x9a   : > { %v548_v47 = vadd.f32 %v5525_v20, %v415_v42  ;;  %v292_v42 = vld [vmem:[%s5502_s23 + $0x180] sm:$0xff] }
  0x9b   : > { %v688_v44 = vpack.c.bf16 %v611_v40, %v610_v39  ;;  %v556_v39 = vadd.f32 %v5525_v20, %v423_v33  ;;  %v425_v45 = vmul.f32 %v5512_v15, %v292_v42  ;;  %v305_v42 = vld [vmem:[%s5502_s23 + $0x1e8] sm:$0xff] }
  0x9d   : > { %v558_v53 = vadd.f32 %v5525_v20, %v425_v45  ;;  %v5405_v45 = vld [vmem:[%s8575_s1] ss:$0 sm:$0xff] }
  0x9f   : > { %983 = vmatmul.mubr.bf16.gmra.mrb[56].mxu0 %v652_v48  ;;  %1303 = vmatmul.mubr.bf16.gmra.mrb[56].mxu1 %v684_v51  ;;  %v549_v48 = vadd.f32 %v5525_v20, %v416_v43  ;;  %v284_v51 = vld [vmem:[%s5502_s23 + $0x140] sm:$0xff]  ;;  %v293_v43 = vld [vmem:[%s5502_s23 + $0x188] sm:$0xff] }
  0xa0   : > { %992 = vmatprep.mubr.bf16.mxu0 %v8580_v2  ;;  %1312 = vmatprep.mubr.bf16.mxu1 %v8580_v2  ;;  %v417_v56 = vmul.f32 %v5512_v15, %v284_v51  ;;  %v426_v46 = vmul.f32 %v5512_v15, %v293_v43  ;;  %v306_v43 = vld [vmem:[%s5502_s23 + $0x1f0] sm:$0xff] }
  0xa1   : > { %v657_v55 = vpack.c.bf16 %v549_v48, %v548_v47  ;;  %v354_v47 = vld [vmem:[%s5502_s23 + $0x370] sm:$0xff]  ;;  %v355_v48 = vld [vmem:[%s5502_s23 + $0x378] sm:$0xff] }
  0xa2   : > { %v550_v61 = vadd.f32 %v5525_v20, %v417_v56  ;;  %v487_v49 = vmul.f32 %v5512_v15, %v354_v47  ;;  %v488_v50 = vmul.f32 %v5512_v15, %v355_v48  ;;  %v559_v54 = vadd.f32 %v5525_v20, %v426_v46  ;;  %v295_v56 = vld [vmem:[%s5502_s23 + $0x198] sm:$0xff] }
  0xa3   : > { %v428_v60 = vmul.f32 %v5512_v15, %v295_v56  ;;  %v361_v56 = vld [vmem:[%s5502_s23 + $0x3a8] sm:$0xff] }
  0xa4   : > { %v620_v51 = vadd.f32 %v5525_v20, %v487_v49  ;;  %v621_v52 = vadd.f32 %v5525_v20, %v488_v50 }
  0xa5   : > { %v561_v5 = vadd.f32 %v5525_v20, %v428_v60 }
  0xa7   : > { %993 = vmatmul.mubr.bf16.gmra.mrb[60].mxu0 %v653_v62  ;;  %1313 = vmatmul.mubr.bf16.gmra.mrb[60].mxu1 %v685_v1  ;;  %v551_v62 = vadd.f32 %v5525_v20, %v418_v57  ;;  %v286_v1 = vld [vmem:[%s5502_s23 + $0x150] sm:$0xff]  ;;  %v693_v57 = vpack.c.bf16 %v621_v52, %v620_v51  ;;  %v5928_v51 = vld [vmem:[%s8575_s1 + $0x1] ss:$0 sm:$0xff] }
  0xa8   : > { %1002 = vmatprep.mubr.bf16.mxu0 %v8580_v2  ;;  %1322 = vmatprep.mubr.bf16.mxu1 %v8580_v2  ;;  %v419_v7 = vmul.f32 %v5512_v15, %v286_v1 }
  0xa9   : > { %v658_v6 = vpack.c.bf16 %v551_v62, %v550_v61  ;;  %v356_v61 = vld [vmem:[%s5502_s23 + $0x380] sm:$0xff]  ;;  %v357_v62 = vld [vmem:[%s5502_s23 + $0x388] sm:$0xff] }
  0xaa   : > { %v552_v12 = vadd.f32 %v5525_v20, %v419_v7  ;;  %v489_v63 = vmul.f32 %v5512_v15, %v356_v61  ;;  %v490_v0 = vmul.f32 %v5512_v15, %v357_v62  ;;  %v297_v7 = vld [vmem:[%s5502_s23 + $0x1a8] sm:$0xff]  ;;  %v494_v61 = vmul.f32 %v5405_v45, %v361_v56 }
  0xab   : > { %v430_v11 = vmul.f32 %v5512_v15, %v297_v7 }
  0xac   : > { %v622_v1 = vadd.f32 %v5525_v20, %v489_v63  ;;  %v623_v3 = vadd.f32 %v5525_v20, %v490_v0 }
  0xad   : > { %v563_v22 = vadd.f32 %v5525_v20, %v430_v11 }
  0xaf   : > { %1003 = vmatmul.mubr.bf16.gmra.mrb[64].mxu0 %v654_v13  ;;  %1323 = vmatmul.mubr.bf16.gmra.mrb[64].mxu1 %v686_v17  ;;  %v553_v13 = vadd.f32 %v5525_v20, %v420_v8  ;;  %v483_v17 = vmul.f32 %v5512_v15, %v350_v10  ;;  %v694_v8 = vpack.c.bf16 %v623_v3, %v622_v1 }
  0xb0   : > { %1012 = vmatprep.mubr.bf16.mxu0 %v8580_v2  ;;  %1332 = vmatprep.mubr.bf16.mxu1 %v8580_v2 }
  0xb1   : > { %v616_v19 = vadd.f32 %v5525_v20, %v483_v17  ;;  %v659_v24 = vpack.c.bf16 %v553_v13, %v552_v12  ;;  %v720_v12 = vlaneseq  ;;  %v358_v13 = vld [vmem:[%s5502_s23 + $0x390] sm:$0xff]  ;;  %v492_v17 = vmul.f32 %v5512_v15, %v359_v14 }
  0xb2   : > { %v491_v16 = vmul.f32 %v5512_v15, %v358_v13 }
  0xb3   : > { %v691_v25 = vpack.c.bf16 %v617_v21, %v616_v19  ;;  %v625_v19 = vadd.f32 %v5525_v20, %v492_v17  ;;  %v721_v23 = vshrl.u32 %v720_v12, 7  ;;  %v627_v12 = vadd.f32 %v5928_v51, %v494_v61 }
  0xb4   : > { %v624_v18 = vadd.f32 %v5525_v20, %v491_v16 }
  0xb5   : > { %v726_v33 = vsub.s32 1, %v721_v23 }
  0xb6   : > { %v695_v26 = vpack.c.bf16 %v625_v19, %v624_v18 }
  0xb7   : > { %1013 = vmatmul.mubr.bf16.gmra.mrb[68].mxu0 %v655_v29  ;;  %1333 = vmatmul.mubr.bf16.gmra.mrb[68].mxu1 %v687_v32  ;;  %v291_v29 = vld [vmem:[%s5502_s23 + $0x178] sm:$0xff]  ;;  %v353_v32 = vld [vmem:[%s5502_s23 + $0x368] sm:$0xff] }
  0xb8   : > { %1022 = vmatprep.mubr.bf16.mxu0 %v8580_v2  ;;  %1342 = vmatprep.mubr.bf16.mxu1 %v8580_v2  ;;  %v424_v34 = vmul.f32 %v5512_v15, %v291_v29  ;;  %v486_v36 = vmul.f32 %v5512_v15, %v353_v32  ;;  %v718_v32 = vld [vmem:[%s8577_s3] sm:$0x3] }
  0xba   : > { %v619_v38 = vadd.f32 %v5525_v20, %v486_v36  ;;  %v557_v40 = vadd.f32 %v5525_v20, %v424_v34  ;;  %v301_v34 = vld [vmem:[%s5502_s23 + $0x1c8] sm:$0xff]  ;;  %v303_v36 = vld [vmem:[%s5502_s23 + $0x1d8] sm:$0xff] }
  0xbb   : > { %v434_v46 = vmul.f32 %v5405_v45, %v301_v34  ;;  %v436_v47 = vmul.f32 %v5405_v45, %v303_v36 }
  0xbd   : > { %v567_v0 = vadd.f32 %v5928_v51, %v434_v46  ;;  %v5942_v3 = vadd.f32 %v5928_v51, %v436_v47 }
  0xbf   : > { %1023 = vmatmul.mubr.bf16.gmra.mrb[72].mxu0 %v656_v41  ;;  %1343 = vmatmul.mubr.bf16.gmra.mrb[72].mxu1 %v688_v44  ;;  %v692_v41 = vpack.c.bf16 %v619_v38, %v618_v37  ;;  %v661_v44 = vpack.c.bf16 %v557_v40, %v556_v39  ;;  %v433_v39 = vmul.f32 %v5512_v15, %v300_v31  ;;  %v304_v40 = vld [vmem:[%s5502_s23 + $0x1e0] sm:$0xff] }
  0xc0   : > { %1032 = vmatprep.mubr.bf16.mxu0 %v8580_v2  ;;  %1352 = vmatprep.mubr.bf16.mxu1 %v8580_v2  ;;  %v437_v48 = vmul.f32 %v5405_v45, %v304_v40 }
  0xc1   : > { %v5931_v52 = vadd.f32 %v5928_v51, %v433_v39 }
  0xc2   : > { %v5946_v7 = vadd.f32 %v5928_v51, %v437_v48 }
  0xc7   : > { %1033 = vmatmul.mubr.bf16.gmra.mrb[76].mxu0 %v657_v55  ;;  %1353 = vmatmul.mubr.bf16.gmra.mrb[76].mxu1 %v689_v58  ;;  %v294_v55 = vld [vmem:[%s5502_s23 + $0x190] sm:$0xff]  ;;  %v662_v58 = vpack.c.bf16 %v559_v54, %v558_v53  ;;  %v438_v53 = vmul.f32 %v5405_v45, %v305_v42  ;;  %v439_v54 = vmul.f32 %v5405_v45, %v306_v43 }
  0xc8   : > { %1042 = vmatprep.mubr.bf16.mxu0 %v8580_v2  ;;  %1362 = vmatprep.mubr.bf16.mxu1 %v8580_v2  ;;  %v427_v59 = vmul.f32 %v5512_v15, %v294_v55  ;;  %v360_v55 = vld [vmem:[%s5502_s23 + $0x3a0] sm:$0xff] }
  0xc9   : > { %v493_v60 = vmul.f32 %v5405_v45, %v360_v55  ;;  %v5951_v11 = vadd.f32 %v5928_v51, %v438_v53  ;;  %v5955_v14 = vadd.f32 %v5928_v51, %v439_v54 }
  0xca   : > { %v560_v4 = vadd.f32 %v5525_v20, %v427_v59 }
  0xcf   : > { %1043 = vmatmul.mubr.bf16.gmra.mrb[80].mxu0 %v658_v6  ;;  %1363 = vmatmul.mubr.bf16.gmra.mrb[80].mxu1 %v690_v9  ;;  %v296_v6 = vld [vmem:[%s5502_s23 + $0x1a0] sm:$0xff]  ;;  %v663_v9 = vpack.c.bf16 %v561_v5, %v560_v4 }
  0xd0   : > { %1052 = vmatprep.mubr.bf16.mxu0 %v8580_v2  ;;  %1372 = vmatprep.mubr.bf16.mxu1 %v8580_v2  ;;  %v429_v10 = vmul.f32 %v5512_v15, %v296_v6 }
  0xd2   : > { %v562_v21 = vadd.f32 %v5525_v20, %v429_v10 }
  0xd4   : > { %v664_v29 = vpack.c.bf16 %v563_v22, %v562_v21  ;;  %v666_v21 = vpack.c.bf16 %v567_v0, %v5931_v52 }
  0xd7   : > { %1053 = vmatmul.mubr.bf16.gmra.mrb[84].mxu0 %v659_v24  ;;  %1373 = vmatmul.mubr.bf16.gmra.mrb[84].mxu1 %v691_v25  ;;  %v298_v24 = vld [vmem:[%s5502_s23 + $0x1b0] sm:$0xff]  ;;  %v299_v25 = vld [vmem:[%s5502_s23 + $0x1b8] sm:$0xff] }
  0xd8   : > { %1062 = vmatprep.mubr.bf16.mxu0 %v8580_v2  ;;  %1382 = vmatprep.mubr.bf16.mxu1 %v8580_v2  ;;  %v431_v27 = vmul.f32 %v5512_v15, %v298_v24  ;;  %v432_v28 = vmul.f32 %v5512_v15, %v299_v25  ;;  %v307_v15 = vld [vmem:[%s5502_s23 + $0x1f8] sm:$0xff]  ;;  %v668_v25 = vpack.c.bf16 %v5951_v11, %v5946_v7 }
  0xd9   : > { %v440_v59 = vmul.f32 %v5405_v45, %v307_v15 }
  0xda   : > { %v564_v37 = vadd.f32 %v5525_v20, %v431_v27  ;;  %v565_v38 = vadd.f32 %v5525_v20, %v432_v28  ;;  %v435_v20 = vmul.f32 %v5405_v45, %v302_v35  ;;  %v362_v27 = vld [vmem:[%s5502_s23 + $0x3b0] sm:$0xff]  ;;  %v363_v28 = vld [vmem:[%s5502_s23 + $0x3b8] sm:$0xff] }
  0xdb   : > { %v5958_v16 = vadd.f32 %v5928_v51, %v440_v59  ;;  %v496_v34 = vmul.f32 %v5405_v45, %v363_v28 }
  0xdc   : > { %v665_v50 = vpack.c.bf16 %v565_v38, %v564_v37  ;;  %v5939_v1 = vadd.f32 %v5928_v51, %v435_v20 }
  0xde   : > { %v667_v24 = vpack.c.bf16 %v5942_v3, %v5939_v1 }
  0xdf   : > { %1063 = vmatmul.mubr.bf16.gmra.mrb[88].mxu0 %v660_v30  ;;  %1383 = vmatmul.mubr.bf16.gmra.mrb[88].mxu1 %v692_v41  ;;  %v722_v30 = vsub.s32 0, %v721_v23 }
  0xe0   : > { %1072 = vmatprep.mubr.bf16.mxu0 %v8580_v2  ;;  %1392 = vmatprep.mubr.bf16.mxu1 %v8580_v2 }
  0xe1   : > { %v5914_v41 = vrot.slane %v718_v32, %v722_v30 }
  0xe7   : > { %1073 = vmatmul.mubr.bf16.gmra.mrb[92].mxu0 %v661_v44  ;;  %1393 = vmatmul.mubr.bf16.gmra.mrb[92].mxu1 %v693_v57  ;;  %v5918_v44 = vrot.slane %v718_v32, %v726_v33  ;;  %v495_v33 = vmul.f32 %v5405_v45, %v362_v27 }
  0xe8   : > { %1082 = vmatprep.mubr.bf16.mxu0 %v8580_v2  ;;  %1402 = vmatprep.mubr.bf16.mxu1 %v8580_v2 }
  0xe9   : > { %v628_v47 = vadd.f32 %v5928_v51, %v495_v33 }
  0xef   : > { %1083 = vmatmul.mubr.bf16.gmra.mrb[96].mxu0 %v662_v58  ;;  %1403 = vmatmul.mubr.bf16.gmra.mrb[96].mxu1 %v694_v8  ;;  %v626_v8 = vadd.f32 %v5928_v51, %v493_v60 }
  0xf0   : > { %1092 = vmatprep.mubr.bf16.mxu0 %v8580_v2  ;;  %1412 = vmatprep.mubr.bf16.mxu1 %v8580_v2 }
  0xf1   : > { %v696_v18 = vpack.c.bf16 %v627_v12, %v626_v8 }
  0xf7   : > { %1093 = vmatmul.mubr.bf16.gmra.mrb[100].mxu0 %v663_v9  ;;  %1413 = vmatmul.mubr.bf16.gmra.mrb[100].mxu1 %v695_v26  ;;  %v669_v26 = vpack.c.bf16 %v5958_v16, %v5955_v14 }
  0xf8   : > { %1102 = vmatprep.mubr.bf16.mxu0 %v8580_v2  ;;  %1422 = vmatprep.mubr.bf16.mxu1 %v8580_v2 }
  0xff   : > { %1103 = vmatmul.mubr.bf16.gmra.mrb[104].mxu0 %v664_v29  ;;  %1423 = vmatmul.mubr.bf16.gmra.mrb[104].mxu1 %v696_v18 }
 0x100   : > { %1112 = vmatprep.mubr.bf16.mxu0 %v8580_v2  ;;  %1432 = vmatprep.mubr.bf16.mxu1 %v8580_v2 }
 0x102   : > { %v844_v49 = vpop.f32.mrb[0].mxu0  ;;  %v1164_v32 = vpop.f32.mrb[0].mxu1 }
 0x103   : > { %v845_v57 = vadd.f32 %v844_v49, %v5914_v41  ;;  %v846_v58 = vpop.f32.mrb[1].mxu0  ;;  %v1166_v40 = vpop.f32.mrb[1].mxu1  ;;  %v629_v49 = vadd.f32 %v5928_v51, %v496_v34  ;;  %v5983_v53 = vadd.f32 %v1164_v32, %v5914_v41 }
 0x104   : > { %v847_v62 = vadd.f32 %v846_v58, %v5918_v44  ;;  %v848_v63 = vpop.f32.mrb[2].mxu0  ;;  %v1168_v20 = vpop.f32.mrb[2].mxu1  ;;  %v5988_v56 = vadd.f32 %v1166_v40, %v5918_v44 }
 0x105   : > { %v1739_v4 = vmul.f32 0.70710677, %v845_v57  ;;  %v849_v5 = vadd.f32 %v848_v63, %v5914_v41  ;;  %v850_v6 = vpop.f32.mrb[3].mxu0  ;;  %v1483_v29 = vmul.f32 0.5, %v845_v57  ;;  %v1170_v45 = vpop.f32.mrb[3].mxu1  ;;  %v5991_v57 = vadd.f32 %v1168_v20, %v5914_v41 }
 0x106   : > { %v1740_v9 = vmul.f32 0.70710677, %v847_v62  ;;  %v851_v10 = vadd.f32 %v850_v6, %v5918_v44  ;;  %v1484_v35 = vmul.f32 0.5, %v847_v62  ;;  %v1867_v60 = vmul.f32 0.70710677, %v5983_v53 }
 0x107   : > { %4893 = verf.f32 %v1739_v4  ;;  %v1741_v13 = vmul.f32 0.70710677, %v849_v5  ;;  %1113 = vmatmul.mubr.bf16.gmra.mrb[108].mxu0 %v665_v50  ;;  %v1485_v36 = vmul.f32 0.5, %v849_v5  ;;  %v697_v61 = vpack.c.bf16 %v629_v49, %v628_v47 }
 0x108   : > { %4895 = verf.f32 %v1740_v9  ;;  %v1742_v17 = vmul.f32 0.70710677, %v851_v10  ;;  %1122 = vmatprep.mubr.bf16.mxu0 %v8580_v2  ;;  %v1486_v42 = vmul.f32 0.5, %v851_v10  ;;  %v5998_v6 = vmul.f32 0.70710677, %v5988_v56 }
 0x109   : > { %4897 = verf.f32 %v1741_v13  ;;  %1433 = vmatmul.mubr.bf16.gmra.mrb[108].mxu1 %v697_v61 }
 0x10a   : > { %4899 = verf.f32 %v1742_v17  ;;  %v854_v19 = vpop.f32.mrb[4].mxu0  ;;  %v6002_v17 = vmul.f32 0.70710677, %v5991_v57  ;;  %v6007_v27 = vpop.f32.mrb[4].mxu1  ;;  %1442 = vmatprep.mubr.bf16.mxu1 %v8580_v2 }
 0x10b   : > { %v855_v22 = vadd.f32 %v854_v19, %v5914_v41  ;;  %v856_v23 = vpop.f32.mrb[5].mxu0 }
 0x10c   : > { %v857_v30 = vadd.f32 %v856_v23, %v5918_v44  ;;  %v858_v31 = vpop.f32.mrb[6].mxu0  ;;  %v6005_v23 = vadd.f32 %v1170_v45, %v5918_v44 }
 0x10d   : > { %v1743_v37 = vmul.f32 0.70710677, %v855_v22  ;;  %v859_v38 = vadd.f32 %v858_v31, %v5914_v41  ;;  %v860_v39 = vpop.f32.mrb[7].mxu0  ;;  %v5976_v15 = vmul.f32 0.5, %v855_v22  ;;  %v6017_v31 = vpop.f32.mrb[5].mxu1 }
 0x10e   : > { %v1744_v43 = vmul.f32 0.70710677, %v857_v30  ;;  %v861_v46 = vadd.f32 %v860_v39, %v5918_v44  ;;  %v5979_v50 = vmul.f32 0.5, %v857_v30 }
 0x10f   : > { %4901 = verf.f32 %v1743_v37  ;;  %v1745_v48 = vmul.f32 0.70710677, %v859_v38  ;;  %1123 = vmatmul.mubr.bf16.gmra.mrb[112].mxu0 %v666_v21  ;;  %v5985_v55 = vmul.f32 0.5, %v859_v38 }
 0x110   : > { %4903 = verf.f32 %v1744_v43  ;;  %v1746_v52 = vmul.f32 0.70710677, %v861_v46  ;;  %1132 = vmatprep.mubr.bf16.mxu0 %v8580_v2  ;;  %v5994_v0 = vmul.f32 0.5, %v861_v46 }
 0x111   : > { %v4894_v54 = vpop.eup %4893  ;;  %4905 = verf.f32 %v1745_v48 }
 0x112   : > { %v4896_v51 = vpop.eup %4895  ;;  %v2251_v58 = vadd.f32 1.0, %v4894_v54  ;;  %4907 = verf.f32 %v1746_v52  ;;  %v864_v59 = vpop.f32.mrb[8].mxu0 }
 0x113   : > { %v4898_v62 = vpop.eup %4897  ;;  %v2252_v63 = vadd.f32 1.0, %v4896_v51  ;;  %v865_v4 = vadd.f32 %v864_v59, %v5914_v41  ;;  %v866_v5 = vpop.f32.mrb[9].mxu0  ;;  %4909 = verf.f32 %v1867_v60 }
 0x114   : > { %v4900_v8 = vpop.eup %4899  ;;  %v2507_v9 = vmul.f32 %v2251_v58, %v1483_v29  ;;  %v2253_v10 = vadd.f32 1.0, %v4898_v62  ;;  %v867_v12 = vadd.f32 %v866_v5, %v5918_v44  ;;  %v868_v13 = vpop.f32.mrb[10].mxu0 }
 0x115   : > { %v2508_v18 = vmul.f32 %v2252_v63, %v1484_v35  ;;  %v2254_v19 = vadd.f32 1.0, %v4900_v8  ;;  %v1747_v21 = vmul.f32 0.70710677, %v865_v4  ;;  %v870_v22 = vpop.f32.mrb[11].mxu0  ;;  %v869_v38 = vadd.f32 %v868_v13, %v5914_v41 }
 0x116   : > { %v3029_v28 = vmul.f32 %v2507_v9, %v2507_v9  ;;  %v2509_v29 = vmul.f32 %v2253_v10, %v1485_v36  ;;  %v1748_v30 = vmul.f32 0.70710677, %v867_v12  ;;  %v1491_v1 = vmul.f32 0.5, %v865_v4 }
 0x117   : > { %v3030_v32 = vmul.f32 %v2508_v18, %v2508_v18  ;;  %v4716_v33 = vpack.c.bf16 %v2508_v18, %v2507_v9  ;;  %v2510_v34 = vmul.f32 %v2254_v19, %v1486_v42  ;;  %4911 = verf.f32 %v1747_v21  ;;  %1133 = vmatmul.mubr.bf16.gmra.mrb[116].mxu0 %v667_v24 }
 0x118   : > { %v2763_v35 = vadd.f32 %v2509_v29, %v2507_v9  ;;  %v3031_v37 = vmul.f32 %v2509_v29, %v2509_v29  ;;  %4913 = verf.f32 %v1748_v30  ;;  %1142 = vmatprep.mubr.bf16.mxu0 %v8580_v2  ;;  %v871_v42 = vadd.f32 %v870_v22, %v5918_v44  ;;  %v6032_v9 = vpop.f32.mrb[6].mxu1 }
 0x119   : > { %v4902_v36 = vpop.eup %4901  ;;  %4334 = vst [vmem:[%s6015_s27] sm:$0xff] %v4716_v33  ;;  %v2896_v39 = vadd.f32 %v2510_v34, %v2508_v18  ;;  %v3032_v40 = vmul.f32 %v2510_v34, %v2510_v34  ;;  %v4717_v43 = vpack.c.bf16 %v2510_v34, %v2509_v29  ;;  %v1749_v3 = vmul.f32 0.70710677, %v869_v38 }
 0x11a   : > { %v4904_v46 = vpop.eup %4903  ;;  %v3285_v20 = vadd.f32 %v3031_v37, %v3029_v28  ;;  %v2255_v47 = vadd.f32 1.0, %v4902_v36  ;;  %v874_v24 = vpop.f32.mrb[12].mxu0  ;;  %v1492_v52 = vmul.f32 0.5, %v867_v12  ;;  %v1750_v54 = vmul.f32 0.70710677, %v871_v42 }
 0x11b   : > { %v4906_v48 = vpop.eup %4905  ;;  %v3418_v45 = vadd.f32 %v3032_v40, %v3030_v32  ;;  %4335 = vst [vmem:[%s6015_s27 + $0x8] sm:$0xff] %v4717_v43  ;;  %v2256_v49 = vadd.f32 1.0, %v4904_v46  ;;  %v876_v51 = vpop.f32.mrb[13].mxu0  ;;  %4915 = verf.f32 %v1749_v3  ;;  %v875_v61 = vadd.f32 %v874_v24, %v5914_v41 }
 0x11c   : > { %v4908_v58 = vpop.eup %4907  ;;  %v2511_v59 = vmul.f32 %v2255_v47, %v5976_v15  ;;  %v2257_v60 = vadd.f32 1.0, %v4906_v48  ;;  %v878_v62 = vpop.f32.mrb[14].mxu0  ;;  %v6030_v5 = vmul.f32 0.5, %v869_v38  ;;  %4917 = verf.f32 %v1750_v54 }
 0x11d   : > { %v2512_v63 = vmul.f32 %v2256_v49, %v5979_v50  ;;  %v2258_v4 = vadd.f32 1.0, %v4908_v58  ;;  %v880_v8 = vpop.f32.mrb[15].mxu0  ;;  %v877_v15 = vadd.f32 %v876_v51, %v5918_v44  ;;  %v6040_v50 = vpop.eup %4909  ;;  %v1751_v32 = vmul.f32 0.70710677, %v875_v61 }
 0x11e   : > { %v2764_v10 = vadd.f32 %v2763_v35, %v2511_v59  ;;  %v3033_v12 = vmul.f32 %v2511_v59, %v2511_v59  ;;  %v2513_v13 = vmul.f32 %v2257_v60, %v5985_v55  ;;  %v1494_v7 = vmul.f32 0.5, %v871_v42 }
 0x11f   : > { %v2897_v18 = vadd.f32 %v2896_v39, %v2512_v63  ;;  %v3034_v19 = vmul.f32 %v2512_v63, %v2512_v63  ;;  %v4718_v21 = vpack.c.bf16 %v2512_v63, %v2511_v59  ;;  %v2514_v22 = vmul.f32 %v2258_v4, %v5994_v0  ;;  %1143 = vmatmul.mubr.bf16.gmra.mrb[120].mxu0 %v668_v25 }
 0x120   : > { %v3286_v28 = vadd.f32 %v3285_v20, %v3033_v12  ;;  %v2765_v29 = vadd.f32 %v2764_v10, %v2513_v13  ;;  %v3035_v30 = vmul.f32 %v2513_v13, %v2513_v13  ;;  %1152 = vmatprep.mubr.bf16.mxu0 %v8580_v2  ;;  %4919 = verf.f32 %v1751_v32 }
 0x121   : > { %v4912_v55 = vpop.eup %4911  ;;  %v3419_v33 = vadd.f32 %v3418_v45, %v3034_v19  ;;  %4336 = vst [vmem:[%s6015_s27 + $0x10] sm:$0xff] %v4718_v21  ;;  %v2898_v34 = vadd.f32 %v2897_v18, %v2514_v22  ;;  %v3036_v35 = vmul.f32 %v2514_v22, %v2514_v22  ;;  %v4719_v37 = vpack.c.bf16 %v2514_v22, %v2513_v13 }
 0x122   : > { %v4914_v0 = vpop.eup %4913  ;;  %v3287_v38 = vadd.f32 %v3286_v28, %v3035_v30  ;;  %v2259_v36 = vadd.f32 1.0, %v4912_v55  ;;  %v884_v11 = vpop.f32.mrb[16].mxu0  ;;  %v1752_v40 = vmul.f32 0.70710677, %v877_v15  ;;  %v879_v43 = vadd.f32 %v878_v62, %v5914_v41 }
 0x123   : > { %v3420_v25 = vadd.f32 %v3419_v33, %v3036_v35  ;;  %4337 = vst [vmem:[%s6015_s27 + $0x18] sm:$0xff] %v4719_v37  ;;  %v2260_v39 = vadd.f32 1.0, %v4914_v0  ;;  %v886_v46 = vpop.f32.mrb[17].mxu0  ;;  %v1495_v47 = vmul.f32 0.5, %v875_v61  ;;  %v6046_v3 = vmul.f32 0.5, %v877_v15 }
 0x124   : > { %v2515_v20 = vmul.f32 %v2259_v36, %v1491_v1  ;;  %v881_v24 = vadd.f32 %v880_v8, %v5918_v44  ;;  %v888_v48 = vpop.f32.mrb[18].mxu0  ;;  %4921 = verf.f32 %v1752_v40  ;;  %v1753_v49 = vmul.f32 0.70710677, %v879_v43  ;;  %v6051_v1 = vpop.f32.mrb[7].mxu1 }
 0x125   : > { %v2516_v45 = vmul.f32 %v2260_v39, %v1492_v52  ;;  %v885_v42 = vadd.f32 %v884_v11, %v5914_v41  ;;  %v890_v54 = vpop.f32.mrb[19].mxu0  ;;  %v4916_v51 = vpop.eup %4915  ;;  %v887_v62 = vadd.f32 %v886_v46, %v5918_v44  ;;  %v6056_v13 = vmul.f32 0.5, %v879_v43 }
 0x126   : > { %v2766_v58 = vadd.f32 %v2765_v29, %v2515_v20  ;;  %v3037_v59 = vmul.f32 %v2515_v20, %v2515_v20  ;;  %v1754_v60 = vmul.f32 0.70710677, %v881_v24  ;;  %v4918_v61 = vpop.eup %4917  ;;  %v2261_v10 = vadd.f32 1.0, %v4916_v51 }
 0x127   : > { %v2899_v63 = vadd.f32 %v2898_v34, %v2516_v45  ;;  %v3038_v4 = vmul.f32 %v2516_v45, %v2516_v45  ;;  %v4720_v8 = vpack.c.bf16 %v2516_v45, %v2515_v20  ;;  %1153 = vmatmul.mubr.bf16.gmra.mrb[124].mxu0 %v669_v26  ;;  %v2262_v12 = vadd.f32 1.0, %v4918_v61 }
 0x128   : > { %v3288_v52 = vadd.f32 %v3287_v38, %v3037_v59  ;;  %4923 = verf.f32 %v1753_v49  ;;  %v2517_v18 = vmul.f32 %v2261_v10, %v6030_v5  ;;  %v1755_v19 = vmul.f32 0.70710677, %v885_v42 }
 0x129   : > { %v3421_v15 = vadd.f32 %v3420_v25, %v3038_v4  ;;  %4338 = vst [vmem:[%s6015_s27 + $0x20] sm:$0xff] %v4720_v8  ;;  %4925 = verf.f32 %v1754_v60  ;;  %v2518_v21 = vmul.f32 %v2262_v12, %v1494_v7  ;;  %v6060_v22 = vmul.f32 0.5, %v881_v24  ;;  %v6076_v12 = vpop.f32.mrb[8].mxu1 }
 0x12a   : > { %v1756_v28 = vmul.f32 0.70710677, %v887_v62  ;;  %v889_v29 = vadd.f32 %v888_v48, %v5914_v41  ;;  %v894_v30 = vpop.f32.mrb[20].mxu0  ;;  %v2767_v14 = vadd.f32 %v2766_v58, %v2517_v18  ;;  %v3039_v16 = vmul.f32 %v2517_v18, %v2517_v18  ;;  %v4920_v55 = vpop.eup %4919 }
 0x12b   : > { %4927 = verf.f32 %v1755_v19  ;;  %v891_v26 = vadd.f32 %v890_v54, %v5918_v44  ;;  %v896_v32 = vpop.f32.mrb[21].mxu0  ;;  %v2900_v33 = vadd.f32 %v2899_v63, %v2518_v21  ;;  %v3040_v34 = vmul.f32 %v2518_v21, %v2518_v21 }
 0x12c   : > { %v4721_v5 = vpack.c.bf16 %v2518_v21, %v2517_v18  ;;  %4929 = verf.f32 %v1756_v28  ;;  %v898_v35 = vpop.f32.mrb[22].mxu0  ;;  %v3289_v37 = vadd.f32 %v3288_v52, %v3039_v16  ;;  %v2263_v0 = vadd.f32 1.0, %v4920_v55  ;;  %v6078_v28 = vpop.f32.mrb[9].mxu1 }
 0x12d   : > { %v1499_v38 = vmul.f32 0.5, %v885_v42  ;;  %v1757_v36 = vmul.f32 0.70710677, %v889_v29  ;;  %v900_v7 = vpop.f32.mrb[23].mxu0  ;;  %v3422_v11 = vadd.f32 %v3421_v15, %v3040_v34  ;;  %v1500_v25 = vmul.f32 0.5, %v887_v62 }
 0x12e   : > { %4339 = vst [vmem:[%s6015_s27 + $0x28] sm:$0xff] %v4721_v5  ;;  %v1758_v39 = vmul.f32 0.70710677, %v891_v26  ;;  %v895_v40 = vadd.f32 %v894_v30, %v5914_v41  ;;  %v4922_v43 = vpop.eup %4921  ;;  %v2519_v46 = vmul.f32 %v2263_v0, %v1495_v47  ;;  %v897_v20 = vadd.f32 %v896_v32, %v5918_v44  ;;  %v6083_v32 = vpop.f32.mrb[10].mxu1 }
 0x12f   : > { %4931 = verf.f32 %v1757_v36  ;;  %v899_v24 = vadd.f32 %v898_v35, %v5914_v41  ;;  %v2264_v48 = vadd.f32 1.0, %v4922_v43  ;;  %v6068_v45 = vmul.f32 0.5, %v889_v29 }
 0x130   : > { %4933 = verf.f32 %v1758_v39  ;;  %v1759_v49 = vmul.f32 0.70710677, %v895_v40  ;;  %v2768_v42 = vadd.f32 %v2767_v14, %v2519_v46  ;;  %v3041_v54 = vmul.f32 %v2519_v46, %v2519_v46 }
 0x131   : > { %v6070_v51 = vmul.f32 0.5, %v891_v26  ;;  %v1760_v58 = vmul.f32 0.70710677, %v897_v20  ;;  %v2520_v60 = vmul.f32 %v2264_v48, %v6046_v3  ;;  %v6073_v62 = vmul.f32 0.5, %v895_v40 }
 0x132   : > { %v4924_v59 = vpop.eup %4923  ;;  %4935 = verf.f32 %v1759_v49  ;;  %v1761_v47 = vmul.f32 0.70710677, %v899_v24  ;;  %v904_v61 = vpop.f32.mrb[24].mxu0  ;;  %v3290_v4 = vadd.f32 %v3289_v37, %v3041_v54  ;;  %v901_v10 = vadd.f32 %v900_v7, %v5918_v44 }
 0x133   : > { %v4926_v63 = vpop.eup %4925  ;;  %v2265_v8 = vadd.f32 1.0, %v4924_v59  ;;  %4937 = verf.f32 %v1760_v58  ;;  %v906_v52 = vpop.f32.mrb[25].mxu0  ;;  %v2901_v15 = vadd.f32 %v2900_v33, %v2520_v60  ;;  %v3042_v18 = vmul.f32 %v2520_v60, %v2520_v60 }
 0x134   : > { %v4722_v19 = vpack.c.bf16 %v2520_v60, %v2519_v46  ;;  %v2266_v21 = vadd.f32 1.0, %v4926_v63  ;;  %v908_v3 = vpop.f32.mrb[26].mxu0  ;;  %v1504_v14 = vmul.f32 0.5, %v897_v20  ;;  %4939 = verf.f32 %v1761_v47  ;;  %v6088_v37 = vpop.f32.mrb[11].mxu1 }
 0x135   : > { %v4928_v29 = vpop.eup %4927  ;;  %v2521_v30 = vmul.f32 %v2265_v8, %v6056_v13  ;;  %v1762_v16 = vmul.f32 0.70710677, %v901_v10  ;;  %v6081_v26 = vpop.f32.mrb[27].mxu0  ;;  %v3423_v34 = vadd.f32 %v3422_v11, %v3042_v18  ;;  %v905_v35 = vadd.f32 %v904_v61, %v5914_v41 }
 0x136   : > { %v4930_v55 = vpop.eup %4929  ;;  %4340 = vst [vmem:[%s6015_s27 + $0x30] sm:$0xff] %v4722_v19  ;;  %v2522_v33 = vmul.f32 %v2266_v21, %v6060_v22  ;;  %v2267_v5 = vadd.f32 1.0, %v4928_v29  ;;  %v1505_v48 = vmul.f32 0.5, %v899_v24 }
 0x137   : > { %v2769_v0 = vadd.f32 %v2768_v42, %v2521_v30  ;;  %v3043_v13 = vmul.f32 %v2521_v30, %v2521_v30  ;;  %v2268_v36 = vadd.f32 1.0, %v4930_v55  ;;  %4941 = verf.f32 %v1762_v16 }
 0x138   : > { %v2902_v7 = vadd.f32 %v2901_v15, %v2522_v33  ;;  %v3044_v39 = vmul.f32 %v2522_v33, %v2522_v33  ;;  %v4723_v40 = vpack.c.bf16 %v2522_v33, %v2521_v30  ;;  %v2523_v43 = vmul.f32 %v2267_v5, %v1499_v38 }
 0x139   : > { %v4932_v46 = vpop.eup %4931  ;;  %v3291_v20 = vadd.f32 %v3290_v4, %v3043_v13  ;;  %v2524_v11 = vmul.f32 %v2268_v36, %v1500_v25  ;;  %v1763_v49 = vmul.f32 0.70710677, %v905_v35  ;;  %v907_v25 = vadd.f32 %v906_v52, %v5918_v44 }
 0x13a   : > { %v4934_v22 = vpop.eup %4933  ;;  %v3424_v54 = vadd.f32 %v3423_v34, %v3044_v39  ;;  %4341 = vst [vmem:[%s6015_s27 + $0x38] sm:$0xff] %v4723_v40  ;;  %v2770_v58 = vadd.f32 %v2769_v0, %v2523_v43  ;;  %v3045_v59 = vmul.f32 %v2523_v43, %v2523_v43  ;;  %v2269_v60 = vadd.f32 1.0, %v4932_v46  ;;  %v914_v42 = vpop.f32.mrb[28].mxu0 }
 0x13b   : > { %v2903_v47 = vadd.f32 %v2902_v7, %v2524_v11  ;;  %v3046_v61 = vmul.f32 %v2524_v11, %v2524_v11  ;;  %v4724_v63 = vpack.c.bf16 %v2524_v11, %v2523_v43  ;;  %v2270_v8 = vadd.f32 1.0, %v4934_v22  ;;  %v916_v15 = vpop.f32.mrb[29].mxu0 }
 0x13c   : > { %v4936_v18 = vpop.eup %4935  ;;  %v3292_v38 = vadd.f32 %v3291_v20, %v3045_v59  ;;  %v2525_v4 = vmul.f32 %v2269_v60, %v6068_v45  ;;  %4943 = verf.f32 %v1763_v49  ;;  %v918_v24 = vpop.f32.mrb[30].mxu0  ;;  %v1506_v16 = vmul.f32 0.5, %v901_v10 }
 0x13d   : > { %v4938_v19 = vpop.eup %4937  ;;  %v3425_v21 = vadd.f32 %v3424_v54, %v3046_v61  ;;  %4342 = vst [vmem:[%s6015_s27 + $0x40] sm:$0xff] %v4724_v63  ;;  %v2526_v29 = vmul.f32 %v2270_v8, %v6070_v51  ;;  %v2271_v30 = vadd.f32 1.0, %v4936_v18  ;;  %v6095_v55 = vpop.f32.mrb[31].mxu0  ;;  %v909_v0 = vadd.f32 %v908_v3, %v5914_v41 }
 0x13e   : > { %v2771_v34 = vadd.f32 %v2770_v58, %v2525_v4  ;;  %v3047_v33 = vmul.f32 %v2525_v4, %v2525_v4  ;;  %v2272_v5 = vadd.f32 1.0, %v4938_v19  ;;  %v6098_v45 = vpop.f32.mrb[12].mxu1  ;;  %v4940_v13 = vpop.eup %4939  ;;  %v1764_v46 = vmul.f32 0.70710677, %v907_v25 }
 0x13f   : > { %v2904_v52 = vadd.f32 %v2903_v47, %v2526_v29  ;;  %v3048_v36 = vmul.f32 %v2526_v29, %v2526_v29  ;;  %v4725_v7 = vpack.c.bf16 %v2526_v29, %v2525_v4  ;;  %v2527_v39 = vmul.f32 %v2271_v30, %v6073_v62  ;;  %v6101_v40 = vpop.f32.mrb[13].mxu1 }
 0x140   : > { %8644 = vst [vmem:[#allocation2_spill] sm:$0xff] %v6101_v40  ;;  %v3293_v51 = vadd.f32 %v3292_v38, %v3047_v33  ;;  %v2528_v10 = vmul.f32 %v2272_v5, %v1504_v14  ;;  %v2273_v43 = vadd.f32 1.0, %v4940_v13  ;;  %v1507_v22 = vmul.f32 0.5, %v905_v35  ;;  %v6104_v14 = vpop.f32.mrb[14].mxu1 }
 0x141   : > { %v4942_v20 = vpop.eup %4941  ;;  %v3426_v11 = vadd.f32 %v3425_v21, %v3048_v36  ;;  %4343 = vst [vmem:[%s6015_s27 + $0x48] sm:$0xff] %v4725_v7  ;;  %v2772_v49 = vadd.f32 %v2771_v34, %v2527_v39  ;;  %v3049_v3 = vmul.f32 %v2527_v39, %v2527_v39  ;;  %4945 = verf.f32 %v1764_v46  ;;  %8645 = vst [vmem:[#allocation3_spill] sm:$0xff] %v6104_v14 }
 0x142   : > { %v2905_v54 = vadd.f32 %v2904_v52, %v2528_v10  ;;  %v3050_v58 = vmul.f32 %v2528_v10, %v2528_v10  ;;  %v4726_v59 = vpack.c.bf16 %v2528_v10, %v2527_v39  ;;  %v2529_v60 = vmul.f32 %v2273_v43, %v1505_v48  ;;  %v924_v47 = vpop.f32.mrb[32].mxu0 }
 0x143   : > { %v3294_v61 = vadd.f32 %v3293_v51, %v3049_v3  ;;  %v2274_v62 = vadd.f32 1.0, %v4942_v20  ;;  %v1765_v63 = vmul.f32 0.70710677, %v909_v0  ;;  %v926_v8 = vpop.f32.mrb[33].mxu0  ;;  %v911_v19 = vadd.f32 %v6081_v26, %v5918_v44 }
 0x144   : > { %v3427_v18 = vadd.f32 %v3426_v11, %v3050_v58  ;;  %4344 = vst [vmem:[%s6015_s27 + $0x50] sm:$0xff] %v4726_v59  ;;  %v2773_v38 = vadd.f32 %v2772_v49, %v2529_v60  ;;  %v3051_v4 = vmul.f32 %v2529_v60, %v2529_v60  ;;  %v928_v35 = vpop.f32.mrb[34].mxu0  ;;  %v915_v48 = vadd.f32 %v914_v42, %v5914_v41  ;;  %v6114_v42 = vpop.f32.mrb[15].mxu1 }
 0x145   : > { %v2530_v21 = vmul.f32 %v2274_v62, %v1506_v16  ;;  %4947 = verf.f32 %v1765_v63  ;;  %v917_v29 = vadd.f32 %v916_v15, %v5918_v44  ;;  %v930_v30 = vpop.f32.mrb[35].mxu0  ;;  %v1508_v5 = vmul.f32 0.5, %v907_v25  ;;  %8646 = vst [vmem:[#allocation4_spill] sm:$0xff] %v6114_v42 }
 0x146   : > { %v4944_v34 = vpop.eup %4943  ;;  %v3295_v33 = vadd.f32 %v3294_v61, %v3051_v4  ;;  %v1766_v13 = vmul.f32 0.70710677, %v911_v19  ;;  %v919_v52 = vadd.f32 %v918_v24, %v5914_v41  ;;  %v1509_v26 = vmul.f32 0.5, %v909_v0 }
 0x147   : > { %v2906_v36 = vadd.f32 %v2905_v54, %v2530_v21  ;;  %v3052_v7 = vmul.f32 %v2530_v21, %v2530_v21  ;;  %v4727_v39 = vpack.c.bf16 %v2530_v21, %v2529_v60  ;;  %v2275_v51 = vadd.f32 1.0, %v4944_v34 }
 0x148   : > { %v6112_v10 = vmul.f32 0.5, %v911_v19  ;;  %4949 = verf.f32 %v1766_v13  ;;  %v1767_v16 = vmul.f32 0.70710677, %v915_v48  ;;  %v6117_v46 = vmul.f32 0.5, %v915_v48 }
 0x149   : > { %v3428_v15 = vadd.f32 %v3427_v18, %v3052_v7  ;;  %4345 = vst [vmem:[%s6015_s27 + $0x58] sm:$0xff] %v4727_v39  ;;  %v2531_v43 = vmul.f32 %v2275_v51, %v1507_v22  ;;  %v1768_v25 = vmul.f32 0.70710677, %v917_v29  ;;  %v1769_v20 = vmul.f32 0.70710677, %v919_v52 }
 0x14a   : > { %4951 = verf.f32 %v1767_v16  ;;  %v921_v24 = vadd.f32 %v6095_v55, %v5918_v44  ;;  %v925_v11 = vadd.f32 %v924_v47, %v5914_v41  ;;  %v934_v0 = vpop.f32.mrb[36].mxu0  ;;  %v927_v54 = vadd.f32 %v926_v8, %v5918_v44 }
 0x14b   : > { %v2774_v49 = vadd.f32 %v2773_v38, %v2531_v43  ;;  %v3053_v3 = vmul.f32 %v2531_v43, %v2531_v43  ;;  %4953 = verf.f32 %v1768_v25  ;;  %v936_v58 = vpop.f32.mrb[37].mxu0  ;;  %v6123_v59 = vmul.f32 0.5, %v917_v29  ;;  %v4946_v62 = vpop.eup %4945 }
 0x14c   : > { %v6125_v22 = vmul.f32 0.5, %v919_v52  ;;  %4955 = verf.f32 %v1769_v20  ;;  %v1770_v60 = vmul.f32 0.70710677, %v921_v24  ;;  %v938_v61 = vpop.f32.mrb[38].mxu0  ;;  %v6127_v18 = vmul.f32 0.5, %v921_v24 }
 0x14d   : > { %v3296_v63 = vadd.f32 %v3295_v33, %v3053_v3  ;;  %v1771_v55 = vmul.f32 0.70710677, %v925_v11  ;;  %v1772_v47 = vmul.f32 0.70710677, %v927_v54  ;;  %v940_v4 = vpop.f32.mrb[39].mxu0  ;;  %v2276_v38 = vadd.f32 1.0, %v4946_v62 }
 0x14e   : > { %4957 = verf.f32 %v1770_v60  ;;  %v929_v19 = vadd.f32 %v928_v35, %v5914_v41  ;;  %v931_v8 = vadd.f32 %v930_v30, %v5918_v44  ;;  %v6131_v48 = vmul.f32 0.5, %v925_v11 }
 0x14f   : > { %v4948_v21 = vpop.eup %4947  ;;  %4959 = verf.f32 %v1771_v55  ;;  %v6133_v29 = vmul.f32 0.5, %v927_v54  ;;  %v935_v34 = vadd.f32 %v934_v0, %v5914_v41  ;;  %v2532_v33 = vmul.f32 %v2276_v38, %v1508_v5 }
 0x150   : > { %v2277_v13 = vadd.f32 1.0, %v4948_v21  ;;  %4961 = verf.f32 %v1772_v47  ;;  %v6137_v52 = vadd.f32 %v936_v58, %v5918_v44  ;;  %v6139_v7 = vmul.f32 0.5, %v929_v19 }
 0x151   : > { %v1773_v39 = vmul.f32 0.70710677, %v929_v19  ;;  %v1774_v35 = vmul.f32 0.70710677, %v931_v8  ;;  %v6142_v30 = vadd.f32 %v938_v61, %v5914_v41  ;;  %v2907_v16 = vadd.f32 %v2906_v36, %v2532_v33  ;;  %v6157_v19 = vpop.f32.mrb[16].mxu1 }
 0x152   : > { %v4950_v51 = vpop.eup %4949  ;;  %v3054_v25 = vmul.f32 %v2532_v33, %v2532_v33  ;;  %v4728_v20 = vpack.c.bf16 %v2532_v33, %v2531_v43  ;;  %v2533_v24 = vmul.f32 %v2277_v13, %v1509_v26  ;;  %v6144_v11 = vpop.f32.mrb[40].mxu0  ;;  %v6146_v0 = vmul.f32 0.5, %v931_v8  ;;  %8647 = vst [vmem:[#allocation5_spill] sm:$0xff] %v6157_v19 }
 0x153   : > { %v2278_v5 = vadd.f32 1.0, %v4950_v51  ;;  %4963 = verf.f32 %v1773_v39  ;;  %v1775_v3 = vmul.f32 0.70710677, %v935_v34  ;;  %v6148_v54 = vpop.f32.mrb[41].mxu0  ;;  %v1776_v47 = vmul.f32 0.70710677, %v6137_v52 }
 0x154   : > { %v4952_v58 = vpop.eup %4951  ;;  %v3429_v60 = vadd.f32 %v3428_v15, %v3054_v25  ;;  %4346 = vst [vmem:[%s6015_s27 + $0x60] sm:$0xff] %v4728_v20  ;;  %v2775_v62 = vadd.f32 %v2774_v49, %v2533_v24  ;;  %v3055_v61 = vmul.f32 %v2533_v24, %v2533_v24  ;;  %4965 = verf.f32 %v1774_v35  ;;  %v6151_v55 = vpop.f32.mrb[42].mxu0 }
 0x155   : > { %v4954_v36 = vpop.eup %4953  ;;  %v2534_v26 = vmul.f32 %v2278_v5, %v6112_v10  ;;  %v2279_v43 = vadd.f32 1.0, %v4952_v58  ;;  %4967 = verf.f32 %v1775_v3  ;;  %v6155_v38 = vpop.f32.mrb[43].mxu0  ;;  %v6159_v33 = vmul.f32 0.5, %v935_v34 }
 0x156   : > { %v4956_v8 = vpop.eup %4955  ;;  %v3297_v21 = vadd.f32 %v3296_v63, %v3055_v61  ;;  %v2280_v15 = vadd.f32 1.0, %v4954_v36  ;;  %v1777_v49 = vmul.f32 0.70710677, %v6142_v30  ;;  %v6162_v13 = vpop.f32.mrb[17].mxu1  ;;  %4969 = verf.f32 %v1776_v47 }
 0x157   : > { %8648 = vst [vmem:[#allocation6_spill] sm:$0xff] %v6162_v13  ;;  %v2908_v39 = vadd.f32 %v2907_v16, %v2534_v26  ;;  %v3056_v10 = vmul.f32 %v2534_v26, %v2534_v26  ;;  %v4729_v35 = vpack.c.bf16 %v2534_v26, %v2533_v24  ;;  %v2535_v51 = vmul.f32 %v2279_v43, %v6117_v46  ;;  %v6165_v25 = vpop.f32.mrb[18].mxu1 }
 0x158   : > { %8649 = vst [vmem:[#allocation7_spill] sm:$0xff] %v6165_v25  ;;  %v4958_v20 = vpop.eup %4957  ;;  %v2536_v5 = vmul.f32 %v2280_v15, %v6123_v59  ;;  %v2281_v3 = vadd.f32 1.0, %v4956_v8  ;;  %v6169_v63 = vadd.f32 %v940_v4, %v5918_v44  ;;  %v6171_v34 = vpop.f32.mrb[19].mxu1  ;;  %4971 = verf.f32 %v1777_v49 }
 0x159   : > { %8650 = vst [vmem:[#allocation8_spill] sm:$0xff] %v6171_v34  ;;  %v4960_v58 = vpop.eup %4959  ;;  %v3430_v61 = vadd.f32 %v3429_v60, %v3056_v10  ;;  %4347 = vst [vmem:[%s6015_s27 + $0x68] sm:$0xff] %v4729_v35  ;;  %v2776_v16 = vadd.f32 %v2775_v62, %v2535_v51  ;;  %v3057_v24 = vmul.f32 %v2535_v51, %v2535_v51  ;;  %v2282_v36 = vadd.f32 1.0, %v4958_v20 }
 0x15a   : > { %v4962_v46 = vpop.eup %4961  ;;  %v2909_v26 = vadd.f32 %v2908_v39, %v2536_v5  ;;  %v3058_v43 = vmul.f32 %v2536_v5, %v2536_v5  ;;  %v4730_v2 = vpack.c.bf16 %v2536_v5, %v2535_v51  ;;  %v2537_v59 = vmul.f32 %v2281_v3, %v6125_v22  ;;  %v6175_v8 = vpop.f32.mrb[44].mxu0 }
 0x15b   : > { %v3298_v47 = vadd.f32 %v3297_v21, %v3057_v24  ;;  %v2538_v4 = vmul.f32 %v2282_v36, %v6127_v18  ;;  %v2283_v15 = vadd.f32 1.0, %v4960_v58  ;;  %v2284_v34 = vadd.f32 1.0, %v4962_v46  ;;  %v6178_v25 = vpop.f32.mrb[45].mxu0 }
 0x15c   : > { %v3431_v60 = vadd.f32 %v3430_v61, %v3058_v43  ;;  %4348 = vst [vmem:[%s6015_s27 + $0x70] sm:$0xff] %v4730_v2  ;;  %v2777_v62 = vadd.f32 %v2776_v16, %v2537_v59  ;;  %v3059_v10 = vmul.f32 %v2537_v59, %v2537_v59  ;;  %v6181_v39 = vpop.f32.mrb[46].mxu0  ;;  %v1520_v2 = vmul.f32 0.5, %v6137_v52 }
 0x15d   : > { %v4964_v35 = vpop.eup %4963  ;;  %v2910_v51 = vadd.f32 %v2909_v26, %v2538_v4  ;;  %v3060_v22 = vmul.f32 %v2538_v4, %v2538_v4  ;;  %v4731_v20 = vpack.c.bf16 %v2538_v4, %v2537_v59  ;;  %v2539_v21 = vmul.f32 %v2283_v15, %v6131_v48  ;;  %v6184_v5 = vpop.f32.mrb[47].mxu0 }
 0x15e   : > { %v4966_v18 = vpop.eup %4965  ;;  %v3299_v3 = vadd.f32 %v3298_v47, %v3059_v10  ;;  %v2540_v58 = vmul.f32 %v2284_v34, %v6133_v29  ;;  %v2285_v61 = vadd.f32 1.0, %v4964_v35  ;;  %v1778_v29 = vmul.f32 0.70710677, %v6169_v63 }
 0x15f   : > { %v4968_v16 = vpop.eup %4967  ;;  %v3432_v49 = vadd.f32 %v3431_v60, %v3060_v22  ;;  %4349 = vst [vmem:[%s6015_s27 + $0x78] sm:$0xff] %v4731_v20  ;;  %v2778_v24 = vadd.f32 %v2777_v62, %v2539_v21  ;;  %v3061_v36 = vmul.f32 %v2539_v21, %v2539_v21  ;;  %v2286_v46 = vadd.f32 1.0, %v4966_v18 }
 0x160   : > { %v2911_v26 = vadd.f32 %v2910_v51, %v2540_v58  ;;  %v3062_v43 = vmul.f32 %v2540_v58, %v2540_v58  ;;  %v4732_v59 = vpack.c.bf16 %v2540_v58, %v2539_v21  ;;  %v2541_v48 = vmul.f32 %v2285_v61, %v6139_v7  ;;  %v4970_v34 = vpop.eup %4969 }
 0x161   : > { %v3300_v4 = vadd.f32 %v3299_v3, %v3061_v36  ;;  %v2542_v47 = vmul.f32 %v2286_v46, %v6146_v0  ;;  %v2287_v15 = vadd.f32 1.0, %v4968_v16  ;;  %v945_v62 = vadd.f32 %v6144_v11, %v5914_v41  ;;  %v6202_v36 = vpop.f32.mrb[20].mxu1 }
 0x162   : > { %v3433_v52 = vadd.f32 %v3432_v49, %v3062_v43  ;;  %4350 = vst [vmem:[%s6015_s27 + $0x80] sm:$0xff] %v4732_v59  ;;  %v2779_v60 = vadd.f32 %v2778_v24, %v2541_v48  ;;  %v3063_v10 = vmul.f32 %v2541_v48, %v2541_v48  ;;  %v964_v35 = vpop.f32.mrb[48].mxu0  ;;  %v2288_v18 = vadd.f32 1.0, %v4970_v34  ;;  %8651 = vst [vmem:[#allocation9_spill] sm:$0xff] %v6202_v36  ;;  %v4972_v46 = vpop.eup %4971 }
 0x163   : > { %v2912_v51 = vadd.f32 %v2911_v26, %v2542_v47  ;;  %v3064_v22 = vmul.f32 %v2542_v47, %v2542_v47  ;;  %v4733_v20 = vpack.c.bf16 %v2542_v47, %v2541_v48  ;;  %v2543_v7 = vmul.f32 %v2287_v15, %v6159_v33  ;;  %v966_v21 = vpop.f32.mrb[49].mxu0  ;;  %v6210_v59 = vpop.f32.mrb[21].mxu1 }
 0x164   : > { %v3301_v0 = vadd.f32 %v3300_v4, %v3063_v10  ;;  %v1521_v3 = vmul.f32 0.5, %v6142_v30  ;;  %4973 = verf.f32 %v1778_v29  ;;  %v6197_v58 = vpop.f32.mrb[50].mxu0  ;;  %v1779_v24 = vmul.f32 0.70710677, %v945_v62  ;;  %8652 = vst [vmem:[#allocation10_spill] sm:$0xff] %v6210_v59  ;;  %v6214_v15 = vpop.f32.mrb[22].mxu1 }
 0x165   : > { %v3434_v61 = vadd.f32 %v3433_v52, %v3064_v22  ;;  %4351 = vst [vmem:[%s6015_s27 + $0x88] sm:$0xff] %v4733_v20  ;;  %v2780_v16 = vadd.f32 %v2779_v60, %v2543_v7  ;;  %v3065_v49 = vmul.f32 %v2543_v7, %v2543_v7  ;;  %v6200_v11 = vpop.f32.mrb[51].mxu0  ;;  %v2544_v26 = vmul.f32 %v2288_v18, %v1520_v2  ;;  %v6224_v18 = vpop.f32.mrb[23].mxu1 }
 0x166   : > { %v947_v33 = vadd.f32 %v6148_v54, %v5918_v44  ;;  %v949_v30 = vadd.f32 %v6151_v55, %v5914_v41  ;;  %v951_v43 = vadd.f32 %v6155_v38, %v5918_v44  ;;  %v2289_v4 = vadd.f32 1.0, %v4972_v46  ;;  %8653 = vst [vmem:[#allocation11_spill] sm:$0xff] %v6214_v15  ;;  %8654 = vst [vmem:[#allocation12_spill] sm:$0xff] %v6224_v18 }
 0x167   : > { %v3302_v48 = vadd.f32 %v3301_v0, %v3065_v49  ;;  %4975 = verf.f32 %v1779_v24  ;;  %v955_v47 = vadd.f32 %v6175_v8, %v5914_v41  ;;  %v2913_v2 = vadd.f32 %v2912_v51, %v2544_v26 }
 0x168   : > { %v3066_v29 = vmul.f32 %v2544_v26, %v2544_v26  ;;  %v4734_v54 = vpack.c.bf16 %v2544_v26, %v2543_v7  ;;  %v1522_v34 = vmul.f32 0.5, %v6169_v63  ;;  %v6217_v55 = vmul.f32 %v2289_v4, %v1521_v3 }
 0x169   : > { %v1523_v52 = vmul.f32 0.5, %v945_v62  ;;  %v1780_v38 = vmul.f32 0.70710677, %v947_v33  ;;  %v1781_v60 = vmul.f32 0.70710677, %v949_v30  ;;  %v6220_v22 = vmul.f32 0.5, %v947_v33 }
 0x16a   : > { %v3435_v10 = vadd.f32 %v3434_v61, %v3066_v29  ;;  %4352 = vst [vmem:[%s6015_s27 + $0x90] sm:$0xff] %v4734_v54  ;;  %v6222_v20 = vmul.f32 0.5, %v949_v30  ;;  %v1782_v0 = vmul.f32 0.70710677, %v951_v43  ;;  %v974_v8 = vpop.f32.mrb[52].mxu0  ;;  %v2781_v51 = vadd.f32 %v2780_v16, %v6217_v55 }
 0x16b   : > { %v3067_v63 = vmul.f32 %v6217_v55, %v6217_v55  ;;  %4977 = verf.f32 %v1780_v38  ;;  %v1783_v7 = vmul.f32 0.70710677, %v955_v47  ;;  %v6229_v62 = vpop.f32.mrb[53].mxu0  ;;  %v957_v3 = vadd.f32 %v6178_v25, %v5918_v44 }
 0x16c   : > { %4979 = verf.f32 %v1781_v60  ;;  %v959_v61 = vadd.f32 %v6181_v39, %v5914_v41  ;;  %v961_v49 = vadd.f32 %v6184_v5, %v5918_v44  ;;  %v6237_v24 = vpop.f32.mrb[54].mxu0  ;;  %v965_v46 = vadd.f32 %v964_v35, %v5914_v41 }
 0x16d   : > { %v3303_v16 = vadd.f32 %v3302_v48, %v3067_v63  ;;  %4981 = verf.f32 %v1782_v0  ;;  %v967_v26 = vadd.f32 %v966_v21, %v5918_v44  ;;  %v6241_v33 = vpop.f32.mrb[55].mxu0  ;;  %v6243_v4 = vmul.f32 0.5, %v951_v43 }
 0x16e   : > { %v4974_v30 = vpop.eup %4973  ;;  %v6245_v25 = vmul.f32 0.5, %v955_v47  ;;  %4983 = verf.f32 %v1783_v7  ;;  %v1784_v39 = vmul.f32 0.70710677, %v957_v3  ;;  %v6247_v54 = vmul.f32 0.5, %v957_v3 }
 0x16f   : > { %v2290_v29 = vadd.f32 1.0, %v4974_v30  ;;  %v1785_v5 = vmul.f32 0.70710677, %v959_v61  ;;  %v1786_v38 = vmul.f32 0.70710677, %v961_v49  ;;  %v6249_v48 = vmul.f32 0.5, %v959_v61 }
 0x170   : > { %4985 = verf.f32 %v1784_v39  ;;  %v6251_v35 = vmul.f32 0.5, %v961_v49  ;;  %v1787_v21 = vmul.f32 0.70710677, %v965_v46  ;;  %v1788_v43 = vmul.f32 0.70710677, %v967_v26  ;;  %v6260_v49 = vpop.f32.mrb[24].mxu1 }
 0x171   : > { %v4976_v60 = vpop.eup %4975  ;;  %v2546_v0 = vmul.f32 %v2290_v29, %v1522_v34  ;;  %4987 = verf.f32 %v1785_v5  ;;  %v969_v47 = vadd.f32 %v6197_v58, %v5914_v41  ;;  %v971_v7 = vadd.f32 %v6200_v11, %v5918_v44  ;;  %8655 = vst [vmem:[#allocation13_spill] sm:$0xff] %v6260_v49  ;;  %v6265_v58 = vpop.f32.mrb[25].mxu1 }
 0x172   : > { %v2291_v63 = vadd.f32 1.0, %v4976_v60  ;;  %4989 = verf.f32 %v1786_v38  ;;  %v975_v3 = vadd.f32 %v974_v8, %v5914_v41  ;;  %v6258_v61 = vpop.f32.mrb[56].mxu0  ;;  %8656 = vst [vmem:[#allocation14_spill] sm:$0xff] %v6265_v58  ;;  %v6267_v38 = vmul.f32 0.5, %v965_v46  ;;  %v6278_v46 = vpop.f32.mrb[26].mxu1 }
 0x173   : > { %v2914_v30 = vadd.f32 %v2913_v2, %v2546_v0  ;;  %v3068_v39 = vmul.f32 %v2546_v0, %v2546_v0  ;;  %v4735_v34 = vpack.c.bf16 %v2546_v0, %v6217_v55  ;;  %4991 = verf.f32 %v1787_v21  ;;  %v6263_v29 = vpop.f32.mrb[57].mxu0  ;;  %8657 = vst [vmem:[#allocation15_spill] sm:$0xff] %v6278_v46 }
 0x174   : > { %v2547_v5 = vmul.f32 %v2291_v63, %v1523_v52  ;;  %4993 = verf.f32 %v1788_v43  ;;  %v1789_v11 = vmul.f32 0.70710677, %v969_v47  ;;  %v6269_v8 = vpop.f32.mrb[58].mxu0  ;;  %v6272_v49 = vmul.f32 0.5, %v967_v26 }
 0x175   : > { %v4978_v60 = vpop.eup %4977  ;;  %v3436_v18 = vadd.f32 %v3435_v10, %v3068_v39  ;;  %4353 = vst [vmem:[%s6015_s27 + $0x98] sm:$0xff] %v4735_v34  ;;  %v6274_v2 = vmul.f32 0.5, %v969_v47  ;;  %v1790_v55 = vmul.f32 0.70710677, %v971_v7  ;;  %v6276_v21 = vpop.f32.mrb[59].mxu0  ;;  %v6280_v59 = vmul.f32 0.5, %v971_v7 }
 0x176   : > { %v4980_v0 = vpop.eup %4979  ;;  %v2782_v15 = vadd.f32 %v2781_v51, %v2547_v5  ;;  %v3069_v58 = vmul.f32 %v2547_v5, %v2547_v5  ;;  %v2292_v52 = vadd.f32 1.0, %v4978_v60  ;;  %4995 = verf.f32 %v1789_v11 }
 0x177   : > { %v4982_v43 = vpop.eup %4981  ;;  %v2293_v63 = vadd.f32 1.0, %v4980_v0  ;;  %4997 = verf.f32 %v1790_v55  ;;  %v1791_v10 = vmul.f32 0.70710677, %v975_v3  ;;  %v6283_v36 = vmul.f32 0.5, %v975_v3 }
 0x178   : > { %v4984_v26 = vpop.eup %4983  ;;  %v3304_v39 = vadd.f32 %v3303_v16, %v3069_v58  ;;  %v2548_v47 = vmul.f32 %v2292_v52, %v6220_v22  ;;  %v2294_v34 = vadd.f32 1.0, %v4982_v43  ;;  %v6288_v11 = vadd.f32 %v6229_v62, %v5918_v44  ;;  %v6293_v22 = vpop.f32.mrb[27].mxu1 }
 0x179   : > { %v2549_v51 = vmul.f32 %v2293_v63, %v6222_v20  ;;  %v2295_v13 = vadd.f32 1.0, %v4984_v26  ;;  %4999 = verf.f32 %v1791_v10  ;;  %8658 = vst [vmem:[#allocation16_spill] sm:$0xff] %v6293_v22 }
 0x17a   : > { %v4986_v7 = vpop.eup %4985  ;;  %v2915_v60 = vadd.f32 %v2914_v30, %v2548_v47  ;;  %v3070_v55 = vmul.f32 %v2548_v47, %v2548_v47  ;;  %v4736_v0 = vpack.c.bf16 %v2548_v47, %v2547_v5  ;;  %v2550_v16 = vmul.f32 %v2294_v34, %v6243_v4  ;;  %v6291_v58 = vpop.f32.mrb[60].mxu0 }
 0x17b   : > { %v4988_v3 = vpop.eup %4987  ;;  %v2783_v52 = vadd.f32 %v2782_v15, %v2549_v51  ;;  %v3071_v20 = vmul.f32 %v2549_v51, %v2549_v51  ;;  %v2551_v43 = vmul.f32 %v2295_v13, %v6245_v25  ;;  %v2296_v63 = vadd.f32 1.0, %v4986_v7  ;;  %v6296_v10 = vpop.f32.mrb[61].mxu0 }
 0x17c   : > { %v4990_v62 = vpop.eup %4989  ;;  %v3437_v26 = vadd.f32 %v3436_v18, %v3070_v55  ;;  %4354 = vst [vmem:[%s6015_s27 + $0xa0] sm:$0xff] %v4736_v0  ;;  %v2916_v30 = vadd.f32 %v2915_v60, %v2550_v16  ;;  %v3072_v5 = vmul.f32 %v2550_v16, %v2550_v16  ;;  %v4737_v47 = vpack.c.bf16 %v2550_v16, %v2549_v51  ;;  %v6299_v4 = vpop.f32.mrb[62].mxu0 }
 0x17d   : > { %v4992_v34 = vpop.eup %4991  ;;  %v3305_v46 = vadd.f32 %v3304_v39, %v3071_v20  ;;  %v2784_v22 = vadd.f32 %v2783_v52, %v2551_v43  ;;  %v3073_v19 = vmul.f32 %v2551_v43, %v2551_v43  ;;  %v2552_v15 = vmul.f32 %v2296_v63, %v6247_v54  ;;  %v6302_v42 = vpop.f32.mrb[63].mxu0 }
 0x17e   : > { %v4994_v13 = vpop.eup %4993  ;;  %v3438_v25 = vadd.f32 %v3437_v26, %v3072_v5  ;;  %4355 = vst [vmem:[%s6015_s27 + $0xa8] sm:$0xff] %v4737_v47  ;;  %v2297_v7 = vadd.f32 1.0, %v4988_v3  ;;  %v2298_v18 = vadd.f32 1.0, %v4990_v62  ;;  %v2299_v55 = vadd.f32 1.0, %v4992_v34 }
 0x17f   : > { %v3306_v60 = vadd.f32 %v3305_v46, %v3073_v19  ;;  %v2917_v0 = vadd.f32 %v2916_v30, %v2552_v15  ;;  %v3074_v51 = vmul.f32 %v2552_v15, %v2552_v15  ;;  %v4738_v16 = vpack.c.bf16 %v2552_v15, %v2551_v43 }
 0x180   : > { %v4996_v14 = vpop.eup %4995  ;;  %v2553_v39 = vmul.f32 %v2297_v7, %v6249_v48  ;;  %v2554_v52 = vmul.f32 %v2298_v18, %v6251_v35  ;;  %v2555_v54 = vmul.f32 %v2299_v55, %v6267_v38  ;;  %v2300_v20 = vadd.f32 1.0, %v4994_v13  ;;  %v6314_v35 = vpop.f32.mrb[28].mxu1 }
 0x181   : > { %v4998_v63 = vpop.eup %4997  ;;  %v3439_v40 = vadd.f32 %v3438_v25, %v3074_v51  ;;  %4356 = vst [vmem:[%s6015_s27 + $0xb0] sm:$0xff] %v4738_v16  ;;  %v2301_v26 = vadd.f32 1.0, %v4996_v14  ;;  %v1792_v3 = vmul.f32 0.70710677, %v6288_v11  ;;  %v979_v19 = vadd.f32 %v6237_v24, %v5914_v41  ;;  %8659 = vst [vmem:[#allocation17_spill] sm:$0xff] %v6314_v35 }
 0x182   : > { %v2785_v46 = vadd.f32 %v2784_v22, %v2553_v39  ;;  %v3075_v62 = vmul.f32 %v2553_v39, %v2553_v39  ;;  %v2918_v43 = vadd.f32 %v2917_v0, %v2554_v52  ;;  %v3076_v30 = vmul.f32 %v2554_v52, %v2554_v52  ;;  %v6312_v48 = vpop.f32.mrb[64].mxu0 }
 0x183   : > { %v5000_v38 = vpop.eup %4999  ;;  %v4739_v5 = vpack.c.bf16 %v2554_v52, %v2553_v39  ;;  %v3077_v47 = vmul.f32 %v2555_v54, %v2555_v54  ;;  %v2556_v34 = vmul.f32 %v2300_v20, %v6272_v49  ;;  %v2557_v14 = vmul.f32 %v2301_v26, %v6274_v2  ;;  %v6318_v15 = vpop.f32.mrb[65].mxu0 }
 0x184   : > { %v3307_v13 = vadd.f32 %v3306_v60, %v3075_v62  ;;  %v3440_v24 = vadd.f32 %v3439_v40, %v3076_v30  ;;  %v2786_v22 = vadd.f32 %v2785_v46, %v2555_v54  ;;  %v2302_v25 = vadd.f32 1.0, %v4998_v63  ;;  %v6320_v7 = vpop.f32.mrb[66].mxu0  ;;  %v6325_v39 = vpop.f32.mrb[29].mxu1 }
 0x185   : > { %4357 = vst [vmem:[%s6015_s27 + $0xb8] sm:$0xff] %v4739_v5  ;;  %v2919_v18 = vadd.f32 %v2918_v43, %v2556_v34  ;;  %v3078_v55 = vmul.f32 %v2556_v34, %v2556_v34  ;;  %v4740_v0 = vpack.c.bf16 %v2556_v34, %v2555_v54  ;;  %v3079_v51 = vmul.f32 %v2557_v14, %v2557_v14  ;;  %v6323_v16 = vpop.f32.mrb[67].mxu0  ;;  %v6333_v43 = vpop.f32.mrb[30].mxu1 }
 0x186   : > { %8660 = vst [vmem:[#allocation18_spill] sm:$0xff] %v6325_v39  ;;  %v3308_v49 = vadd.f32 %v3307_v13, %v3077_v47  ;;  %v2787_v2 = vadd.f32 %v2786_v22, %v2557_v14  ;;  %v2558_v52 = vmul.f32 %v2302_v25, %v6280_v59  ;;  %v2303_v60 = vadd.f32 1.0, %v5000_v38  ;;  %8661 = vst [vmem:[#allocation19_spill] sm:$0xff] %v6333_v43  ;;  %v6363_v25 = vpop.f32.mrb[31].mxu1 }
 0x187   : > { %v3441_v40 = vadd.f32 %v3440_v24, %v3078_v55  ;;  %4358 = vst [vmem:[%s6015_s27 + $0xc0] sm:$0xff] %v4740_v0  ;;  %5001 = verf.f32 %v1792_v3  ;;  %v1793_v20 = vmul.f32 0.70710677, %v979_v19  ;;  %v981_v63 = vadd.f32 %v6241_v33, %v5918_v44  ;;  %8663 = vst [vmem:[#allocation21_spill] sm:$0xff] %v6363_v25 }
 0x188   : > { %v3309_v26 = vadd.f32 %v3308_v49, %v3079_v51  ;;  %v6331_v54 = vadd.f32 %v2919_v18, %v2558_v52  ;;  %v3080_v46 = vmul.f32 %v2558_v52, %v2558_v52  ;;  %v4741_v62 = vpack.c.bf16 %v2558_v52, %v2557_v14 }
 0x189   : > { %v6336_v30 = vmul.f32 %v2303_v60, %v6283_v36  ;;  %v1536_v59 = vmul.f32 0.5, %v6288_v11  ;;  %5003 = verf.f32 %v1793_v20  ;;  %v1794_v38 = vmul.f32 0.70710677, %v981_v63 }
 0x18a   : > { %v6339_v5 = vadd.f32 %v3441_v40, %v3080_v46  ;;  %4359 = vst [vmem:[%s6015_s27 + $0xc8] sm:$0xff] %v4741_v62  ;;  %v985_v33 = vadd.f32 %v6258_v61, %v5914_v41  ;;  %v1611_v3 = vmul.f32 0.5, %v5983_v53  ;;  %v2379_v47 = vadd.f32 1.0, %v6040_v50  ;;  %v6346_v34 = vpop.f32.mrb[68].mxu0 }
 0x18b   : > { %v6349_v14 = vadd.f32 %v2787_v2, %v6336_v30  ;;  %v3081_v36 = vmul.f32 %v6336_v30, %v6336_v30  ;;  %5005 = verf.f32 %v1794_v38  ;;  %v987_v11 = vadd.f32 %v6263_v29, %v5918_v44  ;;  %v6355_v13 = vpop.f32.mrb[69].mxu0 }
 0x18c   : > { %v1537_v24 = vmul.f32 0.5, %v979_v19  ;;  %v6357_v61 = vmul.f32 0.5, %v981_v63  ;;  %v1795_v53 = vmul.f32 0.70710677, %v985_v33  ;;  %v6359_v22 = vmul.f32 %v2379_v47, %v1611_v3  ;;  %v6361_v50 = vpop.f32.mrb[70].mxu0 }
 0x18d   : > { %v6365_v18 = vadd.f32 %v3309_v26, %v3081_v36  ;;  %v6367_v55 = vmul.f32 0.5, %v985_v33  ;;  %v1796_v0 = vmul.f32 0.70710677, %v987_v11  ;;  %5007 = verf.f32 %v5998_v6  ;;  %v6370_v29 = vpop.f32.mrb[71].mxu0 }
 0x18e   : > { %8662 = vst [vmem:[#allocation20_spill] sm:$0xff] %v6359_v22  ;;  %5009 = verf.f32 %v1795_v53  ;;  %v6372_v19 = vmul.f32 0.5, %v987_v11  ;;  %v6375_v51 = vmul.f32 0.5, %v5988_v56  ;;  %v989_v49 = vadd.f32 %v6269_v8, %v5914_v41 }
 0x18f   : > { %v6381_v2 = vmul.f32 %v6359_v22, %v6359_v22  ;;  %5011 = verf.f32 %v1796_v0  ;;  %v991_v52 = vadd.f32 %v6276_v21, %v5918_v44  ;;  %v1870_v6 = vmul.f32 0.70710677, %v6005_v23 }
 0x190   : > { %v1797_v60 = vmul.f32 0.70710677, %v989_v49  ;;  %v6387_v40 = vmul.f32 0.5, %v5991_v57  ;;  %5013 = verf.f32 %v6002_v17  ;;  %v995_v56 = vadd.f32 %v6291_v58, %v5914_v41  ;;  %v6401_v17 = vpop.f32.mrb[32].mxu1 }
 0x191   : > { %8664 = vst [vmem:[#allocation22_spill] sm:$0xff] %v6381_v2  ;;  %v5002_v8 = vpop.eup %5001  ;;  %v1798_v20 = vmul.f32 0.70710677, %v991_v52  ;;  %v6393_v63 = vmul.f32 0.5, %v6005_v23  ;;  %5015 = verf.f32 %v1870_v6  ;;  %v1175_v21 = vadd.f32 %v6007_v27, %v5914_v41  ;;  %8665 = vst [vmem:[#allocation23_spill] sm:$0xff] %v6401_v17  ;;  %v6409_v27 = vpop.f32.mrb[33].mxu1 }
 0x192   : > { %v2304_v26 = vadd.f32 1.0, %v5002_v8  ;;  %v6397_v46 = vmul.f32 0.5, %v989_v49  ;;  %5017 = verf.f32 %v1797_v60  ;;  %v1799_v57 = vmul.f32 0.70710677, %v995_v56  ;;  %v6399_v62 = vpop.f32.mrb[72].mxu0  ;;  %8666 = vst [vmem:[#allocation24_spill] sm:$0xff] %v6409_v27 }
 0x193   : > { %v5004_v38 = vpop.eup %5003  ;;  %v6403_v58 = vmul.f32 0.5, %v991_v52  ;;  %5019 = verf.f32 %v1798_v20  ;;  %v1871_v33 = vmul.f32 0.70710677, %v1175_v21  ;;  %v997_v23 = vadd.f32 %v6296_v10, %v5918_v44  ;;  %v6407_v3 = vpop.f32.mrb[73].mxu0 }
 0x194   : > { %v2560_v47 = vmul.f32 %v2304_v26, %v1536_v59  ;;  %v2305_v36 = vadd.f32 1.0, %v5004_v38  ;;  %5021 = verf.f32 %v1799_v57  ;;  %v1177_v11 = vadd.f32 %v6017_v31, %v5918_v44  ;;  %v6413_v53 = vpop.f32.mrb[74].mxu0 }
 0x195   : > { %v5006_v0 = vpop.eup %5005  ;;  %v6415_v49 = vmul.f32 0.5, %v995_v56  ;;  %v6417_v52 = vmul.f32 0.5, %v1175_v21  ;;  %5023 = verf.f32 %v1871_v33  ;;  %v1800_v10 = vmul.f32 0.70710677, %v997_v23  ;;  %v6419_v6 = vpop.f32.mrb[75].mxu0 }
 0x196   : > { %v2921_v60 = vadd.f32 %v6331_v54, %v2560_v47  ;;  %v3082_v59 = vmul.f32 %v2560_v47, %v2560_v47  ;;  %v4742_v8 = vpack.c.bf16 %v2560_v47, %v6336_v30  ;;  %v2561_v20 = vmul.f32 %v2305_v36, %v1537_v24  ;;  %v6428_v54 = vpop.f32.mrb[34].mxu1 }
 0x197   : > { %v5008_v26 = vpop.eup %5007  ;;  %v2306_v31 = vadd.f32 1.0, %v5006_v0  ;;  %5025 = verf.f32 %v1800_v10  ;;  %v1872_v57 = vmul.f32 0.70710677, %v1177_v11  ;;  %v999_v56 = vadd.f32 %v6299_v4, %v5914_v41  ;;  %8667 = vst [vmem:[#allocation25_spill] sm:$0xff] %v6428_v54 }
 0x198   : > { %v5010_v38 = vpop.eup %5009  ;;  %v3443_v21 = vadd.f32 %v6339_v5, %v3082_v59  ;;  %4360 = vst [vmem:[%s6015_s27 + $0xd0] sm:$0xff] %v4742_v8  ;;  %v2789_v33 = vadd.f32 %v6349_v14, %v2561_v20  ;;  %v3083_v2 = vmul.f32 %v2561_v20, %v2561_v20  ;;  %v2380_v27 = vadd.f32 1.0, %v5008_v26 }
 0x199   : > { %v5012_v17 = vpop.eup %5011  ;;  %v2562_v30 = vmul.f32 %v2306_v31, %v6357_v61  ;;  %v2307_v24 = vadd.f32 1.0, %v5010_v38  ;;  %v6431_v47 = vmul.f32 0.5, %v997_v23  ;;  %5027 = verf.f32 %v1872_v57 }
 0x19a   : > { %v5014_v36 = vpop.eup %5013  ;;  %v3311_v4 = vadd.f32 %v6365_v18, %v3083_v2  ;;  %v2308_v0 = vadd.f32 1.0, %v5012_v17  ;;  %v6435_v5 = vmul.f32 %v2380_v27, %v6375_v51  ;;  %v6437_v10 = vmul.f32 0.5, %v1177_v11  ;;  %v6439_v14 = vpop.f32.mrb[76].mxu0 }
 0x19b   : > { %v5016_v59 = vpop.eup %5015  ;;  %v2922_v8 = vadd.f32 %v2921_v60, %v2562_v30  ;;  %v3084_v26 = vmul.f32 %v2562_v30, %v2562_v30  ;;  %v4743_v61 = vpack.c.bf16 %v2562_v30, %v2561_v20  ;;  %v2563_v23 = vmul.f32 %v2307_v24, %v6367_v55  ;;  %v6442_v31 = vpop.f32.mrb[77].mxu0 }
 0x19c   : > { %8668 = vst [vmem:[#allocation26_spill] sm:$0xff] %v6435_v5  ;;  %v5018_v57 = vpop.eup %5017  ;;  %v2564_v18 = vmul.f32 %v2308_v0, %v6372_v19  ;;  %v4780_v51 = vpack.c.bf16 %v6435_v5, %v6359_v22  ;;  %v2381_v2 = vadd.f32 1.0, %v5014_v36  ;;  %v6447_v17 = vmul.f32 0.5, %v999_v56  ;;  %v6449_v27 = vpop.f32.mrb[78].mxu0 }
 0x19d   : > { %v5020_v11 = vpop.eup %5019  ;;  %v3444_v60 = vadd.f32 %v3443_v21, %v3084_v26  ;;  %4361 = vst [vmem:[%s6015_s27 + $0xd8] sm:$0xff] %v4743_v61  ;;  %v2790_v20 = vadd.f32 %v2789_v33, %v2563_v23  ;;  %v3085_v38 = vmul.f32 %v2563_v23, %v2563_v23  ;;  %v2309_v55 = vadd.f32 1.0, %v5018_v57  ;;  %v6452_v30 = vpop.f32.mrb[79].mxu0 }
 0x19e   : > { %8669 = vst [vmem:[#allocation27_spill] sm:$0xff] %v6452_v30  ;;  %v5022_v24 = vpop.eup %5021  ;;  %v2923_v19 = vadd.f32 %v2922_v8, %v2564_v18  ;;  %v3086_v0 = vmul.f32 %v2564_v18, %v2564_v18  ;;  %v4744_v54 = vpack.c.bf16 %v2564_v18, %v2563_v23  ;;  %4398 = vst [vmem:[%s6015_s27 + $0x200] sm:$0xff] %v4780_v51  ;;  %v1801_v22 = vmul.f32 0.70710677, %v999_v56  ;;  %v6455_v36 = vpop.f32.mrb[35].mxu1 }
 0x19f   : > { %v5024_v25 = vpop.eup %5023  ;;  %v3312_v43 = vadd.f32 %v3311_v4, %v3085_v38  ;;  %v2565_v39 = vmul.f32 %v2309_v55, %v6397_v46  ;;  %v2310_v21 = vadd.f32 1.0, %v5020_v11  ;;  %v2382_v26 = vadd.f32 1.0, %v5016_v59 }
 0x1a0   : > { %v3445_v33 = vadd.f32 %v3444_v60, %v3086_v0  ;;  %4362 = vst [vmem:[%s6015_s27 + $0xe0] sm:$0xff] %v4744_v54  ;;  %v6460_v61 = vmul.f32 %v2381_v2, %v6387_v40  ;;  %v2311_v57 = vadd.f32 1.0, %v5022_v24  ;;  %v2383_v35 = vadd.f32 1.0, %v5024_v25 }
 0x1a1   : > { %v5026_v8 = vpop.eup %5025  ;;  %v2791_v30 = vadd.f32 %v2790_v20, %v2565_v39  ;;  %v3087_v23 = vmul.f32 %v2565_v39, %v2565_v39  ;;  %v2566_v56 = vmul.f32 %v2310_v21, %v6403_v58  ;;  %v6464_v18 = vmul.f32 %v2382_v26, %v6393_v63 }
 0x1a2   : > { %8670 = vst [vmem:[#allocation28_spill] sm:$0xff] %v6460_v61  ;;  %v6468_v46 = vmul.f32 %v6435_v5, %v6435_v5  ;;  %v2567_v4 = vmul.f32 %v2311_v57, %v6415_v49  ;;  %v2312_v54 = vadd.f32 1.0, %v5026_v8  ;;  %5029 = verf.f32 %v1801_v22  ;;  %v6471_v40 = vpop.f32.mrb[80].mxu0  ;;  %v364_v8 = vld [vmem:[%s5502_s23 + $0x3c0] sm:$0xff] }
 0x1a3   : > { %8671 = vst [vmem:[#allocation29_spill] sm:$0xff] %v6464_v18  ;;  %v5028_v25 = vpop.eup %5027  ;;  %v3313_v59 = vadd.f32 %v3312_v43, %v3087_v23  ;;  %v2924_v51 = vadd.f32 %v2923_v19, %v2566_v56  ;;  %v3088_v2 = vmul.f32 %v2566_v56, %v2566_v56  ;;  %v4745_v58 = vpack.c.bf16 %v2566_v56, %v2565_v39  ;;  %v6473_v11 = vpop.f32.mrb[81].mxu0  ;;  %v365_v23 = vld [vmem:[%s5502_s23 + $0x3c8] sm:$0xff] }
 0x1a4   : > { %8672 = vst [vmem:[#allocation30_spill] sm:$0xff] %v6468_v46  ;;  %v4781_v63 = vpack.c.bf16 %v6464_v18, %v6460_v61  ;;  %v6477_v60 = vadd.f32 %v2791_v30, %v2567_v4  ;;  %v3089_v20 = vmul.f32 %v2567_v4, %v2567_v4  ;;  %v6480_v49 = vmul.f32 %v2383_v35, %v6417_v52  ;;  %v6482_v22 = vpop.f32.mrb[82].mxu0  ;;  %v6492_v30 = vpop.f32.mrb[36].mxu1 }
 0x1a5   : > { %v6486_v43 = vmul.f32 %v6460_v61, %v6460_v61  ;;  %v3446_v38 = vadd.f32 %v3445_v33, %v3088_v2  ;;  %4363 = vst [vmem:[%s6015_s27 + $0xe8] sm:$0xff] %v4745_v58  ;;  %v2568_v39 = vmul.f32 %v2312_v54, %v6431_v47  ;;  %v2384_v55 = vadd.f32 1.0, %v5028_v25  ;;  %v6490_v24 = vpop.f32.mrb[83].mxu0  ;;  %8675 = vst [vmem:[#allocation33_spill] sm:$0xff] %v6492_v30  ;;  %v6503_v21 = vpop.f32.mrb[37].mxu1 }
 0x1a6   : > { %8673 = vst [vmem:[#allocation31_spill] sm:$0xff] %v6480_v49  ;;  %4399 = vst [vmem:[%s6015_s27 + $0x208] sm:$0xff] %v4781_v63  ;;  %v6495_v35 = vadd.f32 %v3313_v59, %v3089_v20  ;;  %v1179_v52 = vadd.f32 %v6032_v9, %v5914_v41  ;;  %v1001_v19 = vadd.f32 %v6302_v42, %v5918_v44 }
 0x1a7   : > { %8674 = vst [vmem:[#allocation32_spill] sm:$0xff] %v6486_v43  ;;  %v1181_v0 = vadd.f32 %v6051_v1, %v5918_v44  ;;  %8676 = vst [vmem:[#allocation34_spill] sm:$0xff] %v6503_v21  ;;  %v6505_v47 = vadd.f32 %v2924_v51, %v2568_v39  ;;  %v3090_v26 = vmul.f32 %v2568_v39, %v2568_v39  ;;  %v6532_v51 = vld [vmem:[%s8575_s1] ss:$0 sm:$0xff] }
 0x1a8   : > { %v4746_v33 = vpack.c.bf16 %v2568_v39, %v2567_v4  ;;  %v6508_v57 = vmul.f32 %v2384_v55, %v6437_v10  ;;  %v6514_v9 = vmul.f32 %v6464_v18, %v6464_v18  ;;  %v6518_v42 = vmul.f32 %v6480_v49, %v6480_v49 }
 0x1a9   : > { %v1873_v1 = vmul.f32 0.70710677, %v1179_v52  ;;  %v1802_v56 = vmul.f32 0.70710677, %v1001_v19  ;;  %v6520_v54 = vadd.f32 %v3446_v38, %v3090_v26  ;;  %v6525_v4 = vmul.f32 0.5, %v1179_v52  ;;  %v6547_v52 = vpop.f32.mrb[38].mxu1 }
 0x1aa   : > { %8677 = vst [vmem:[#allocation35_spill] sm:$0xff] %v6508_v57  ;;  %8678 = vst [vmem:[#allocation36_spill] sm:$0xff] %v6514_v9  ;;  %v4782_v10 = vpack.c.bf16 %v6508_v57, %v6480_v49  ;;  %v6527_v25 = vmul.f32 0.5, %v1001_v19  ;;  %v1874_v59 = vmul.f32 0.70710677, %v1181_v0  ;;  %v497_v2 = vmul.f32 %v6532_v51, %v364_v8  ;;  %v6536_v63 = vpop.f32.mrb[84].mxu0 }
 0x1ab   : > { %8679 = vst [vmem:[#allocation37_spill] sm:$0xff] %v6518_v42  ;;  %4364 = vst [vmem:[%s6015_s27 + $0xf0] sm:$0xff] %v4746_v33  ;;  %5031 = verf.f32 %v1873_v1  ;;  %v498_v58 = vmul.f32 %v6532_v51, %v365_v23  ;;  %v1005_v20 = vadd.f32 %v6312_v48, %v5914_v41  ;;  %v1185_v38 = vadd.f32 %v6076_v12, %v5914_v41  ;;  %v6545_v55 = vpop.f32.mrb[85].mxu0  ;;  %v6552_v26 = vld [vmem:[%s8575_s1 + $0x1] ss:$0 sm:$0xff] }
 0x1ac   : > { %4400 = vst [vmem:[%s6015_s27 + $0x210] sm:$0xff] %v4782_v10  ;;  %5033 = verf.f32 %v1802_v56  ;;  %v1007_v39 = vadd.f32 %v6318_v15, %v5918_v44  ;;  %8680 = vst [vmem:[#allocation38_spill] sm:$0xff] %v6547_v52  ;;  %v5030_v19 = vpop.eup %5029  ;;  %v630_v33 = vadd.f32 %v6552_v26, %v497_v2  ;;  %v1187_v12 = vadd.f32 %v6078_v28, %v5918_v44  ;;  %v6558_v8 = vpop.f32.mrb[86].mxu0 }
 0x1ad   : > { %5035 = verf.f32 %v1874_v59  ;;  %v631_v48 = vadd.f32 %v6552_v26, %v498_v58  ;;  %v6562_v15 = vmul.f32 %v6508_v57, %v6508_v57  ;;  %v2313_v23 = vadd.f32 1.0, %v5030_v19  ;;  %v6564_v10 = vpop.f32.mrb[87].mxu0  ;;  %v6568_v58 = vpop.f32.mrb[39].mxu1 }
 0x1ae   : > { %v1618_v1 = vmul.f32 0.5, %v1181_v0  ;;  %v1803_v56 = vmul.f32 0.70710677, %v1005_v20  ;;  %v6566_v9 = vmul.f32 0.5, %v1005_v20  ;;  %v1875_v2 = vmul.f32 0.70710677, %v1185_v38 }
 0x1af   : > { %8681 = vst [vmem:[#allocation39_spill] sm:$0xff] %v6562_v15  ;;  %v698_v59 = vpack.c.bf16 %v631_v48, %v630_v33  ;;  %v1804_v46 = vmul.f32 0.70710677, %v1007_v39  ;;  %8682 = vst [vmem:[#allocation40_spill] sm:$0xff] %v6568_v58  ;;  %v6571_v28 = vmul.f32 %v2313_v23, %v6447_v17  ;;  %v6573_v18 = vmul.f32 0.5, %v1185_v38  ;;  %v6615_v61 = vpop.f32.mrb[40].mxu1 }
 0x1b0   : > { %5037 = verf.f32 %v1803_v56  ;;  %v1876_v15 = vmul.f32 0.70710677, %v1187_v12  ;;  %v1009_v0 = vadd.f32 %v6320_v7, %v5914_v41  ;;  %v1189_v20 = vadd.f32 %v6083_v32, %v5914_v41  ;;  %v366_v7 = vld [vmem:[%s5502_s23 + $0x3d0] sm:$0xff]  ;;  %v367_v56 = vld [vmem:[%s5502_s23 + $0x3d8] sm:$0xff]  ;;  %8684 = vst [vmem:[#allocation41_spill] sm:$0xff] %v6615_v61  ;;  %v6620_v52 = vpop.f32.mrb[41].mxu1 }
 0x1b1   : > { %1443 = vmatmul.mubr.bf16.gmra.mrb[112].mxu1 %v698_v59  ;;  %5039 = verf.f32 %v1875_v2  ;;  %v1011_v19 = vadd.f32 %v6323_v16, %v5918_v44  ;;  %v6583_v17 = vadd.f32 %v6477_v60, %v6571_v28  ;;  %v3091_v38 = vmul.f32 %v6571_v28, %v6571_v28  ;;  %8685 = vst [vmem:[#allocation42_spill] sm:$0xff] %v6620_v52 }
 0x1b2   : > { %5041 = verf.f32 %v1804_v46  ;;  %v1191_v33 = vadd.f32 %v6088_v37, %v5918_v44  ;;  %v8683_v48 = vmov 0   ;;  %v6591_v23 = vmul.f32 0.5, %v1007_v39  ;;  %v6596_v59 = vpop.f32.mrb[88].mxu0 }
 0x1b3   : > { %1452 = vmatprep.mubr.bf16.mxu1 %v8683_v48  ;;  %v6593_v32 = vmul.f32 0.5, %v1187_v12  ;;  %5043 = verf.f32 %v1876_v15  ;;  %v1805_v16 = vmul.f32 0.70710677, %v1009_v0  ;;  %v6599_v60 = vadd.f32 %v6495_v35, %v3091_v38  ;;  %v6603_v37 = vpop.f32.mrb[89].mxu0 }
 0x1b4   : > { %v6601_v2 = vmul.f32 0.5, %v1009_v0  ;;  %v1877_v46 = vmul.f32 0.70710677, %v1189_v20  ;;  %v1806_v57 = vmul.f32 0.70710677, %v1011_v19  ;;  %v6605_v39 = vmul.f32 0.5, %v1189_v20 }
 0x1b5   : > { %v5032_v42 = vpop.eup %5031  ;;  %5045 = verf.f32 %v1805_v16  ;;  %v1878_v12 = vmul.f32 0.70710677, %v1191_v33  ;;  %v499_v15 = vmul.f32 %v6532_v51, %v366_v7  ;;  %v6608_v5 = vpop.f32.mrb[90].mxu0  ;;  %v500_v35 = vmul.f32 %v6532_v51, %v367_v56 }
 0x1b6   : > { %v5034_v43 = vpop.eup %5033  ;;  %v2385_v49 = vadd.f32 1.0, %v5032_v42  ;;  %5047 = verf.f32 %v1877_v46  ;;  %v1015_v0 = vadd.f32 %v6346_v34, %v5914_v41  ;;  %v6613_v38 = vpop.f32.mrb[91].mxu0  ;;  %v1195_v7 = vadd.f32 %v6098_v45, %v5914_v41 }
 0x1b7   : > { %v5036_v16 = vpop.eup %5035  ;;  %v2314_v20 = vadd.f32 1.0, %v5034_v43  ;;  %5049 = verf.f32 %v1806_v57  ;;  %v632_v58 = vadd.f32 %v6552_v26, %v499_v15  ;;  %v633_v34 = vadd.f32 %v6552_v26, %v500_v35 }
 0x1b8   : > { %v6623_v42 = vmul.f32 %v2385_v49, %v6525_v4  ;;  %v2386_v56 = vadd.f32 1.0, %v5036_v16  ;;  %5051 = verf.f32 %v1878_v12  ;;  %v6627_v61 = vmul.f32 0.5, %v1011_v19  ;;  %v6635_v49 = vpop.f32.mrb[42].mxu1 }
 0x1b9   : > { %v2570_v46 = vmul.f32 %v2314_v20, %v6527_v25  ;;  %v6629_v43 = vmul.f32 0.5, %v1191_v33  ;;  %v1807_v57 = vmul.f32 0.70710677, %v1015_v0  ;;  %v699_v45 = vpack.c.bf16 %v633_v34, %v632_v58  ;;  %8688 = vst [vmem:[#allocation45_spill] sm:$0xff] %v6635_v49 }
 0x1ba   : > { %8686 = vst [vmem:[#allocation43_spill] sm:$0xff] %v6623_v42  ;;  %v5038_v15 = vpop.eup %5037  ;;  %v6631_v21 = vmul.f32 %v2386_v56, %v1618_v1  ;;  %v6633_v30 = vmul.f32 0.5, %v1015_v0  ;;  %v1879_v52 = vmul.f32 0.70710677, %v1195_v7  ;;  %v6639_v33 = vpop.f32.mrb[92].mxu0  ;;  %v6643_v0 = vmul.f32 0.5, %v1195_v7 }
 0x1bb   : > { %v5040_v4 = vpop.eup %5039  ;;  %v2926_v12 = vadd.f32 %v6505_v47, %v2570_v46  ;;  %v3092_v35 = vmul.f32 %v2570_v46, %v2570_v46  ;;  %v4747_v25 = vpack.c.bf16 %v2570_v46, %v6571_v28  ;;  %v2315_v19 = vadd.f32 1.0, %v5038_v15  ;;  %1453 = vmatmul.mubr.bf16.gmra.mrb[116].mxu1 %v699_v45  ;;  %v6645_v20 = vpop.f32.mrb[93].mxu0 }
 0x1bc   : > { %8687 = vst [vmem:[#allocation44_spill] sm:$0xff] %v6631_v21  ;;  %v5042_v16 = vpop.eup %5041  ;;  %v4783_v1 = vpack.c.bf16 %v6631_v21, %v6623_v42  ;;  %v2387_v58 = vadd.f32 1.0, %v5040_v4  ;;  %5053 = verf.f32 %v1807_v57  ;;  %1462 = vmatprep.mubr.bf16.mxu1 %v8683_v48  ;;  %v6651_v46 = vpop.f32.mrb[94].mxu0  ;;  %v6655_v15 = vmul.f32 %v6623_v42, %v6623_v42 }
 0x1bd   : > { %v5044_v56 = vpop.eup %5043  ;;  %v3448_v47 = vadd.f32 %v6520_v54, %v3092_v35  ;;  %4365 = vst [vmem:[%s6015_s27 + $0xf8] sm:$0xff] %v4747_v25  ;;  %v2571_v28 = vmul.f32 %v2315_v19, %v6566_v9  ;;  %v2316_v34 = vadd.f32 1.0, %v5042_v16  ;;  %5055 = verf.f32 %v1879_v52  ;;  %v6665_v9 = vpop.f32.mrb[95].mxu0 }
 0x1be   : > { %8689 = vst [vmem:[#allocation46_spill] sm:$0xff] %v6655_v15  ;;  %v6659_v7 = vmul.f32 %v6631_v21, %v6631_v21  ;;  %4401 = vst [vmem:[%s6015_s27 + $0x218] sm:$0xff] %v4783_v1  ;;  %v6663_v54 = vmul.f32 %v2387_v58, %v6573_v18  ;;  %v2388_v57 = vadd.f32 1.0, %v5044_v56  ;;  %v1017_v25 = vadd.f32 %v6355_v13, %v5918_v44  ;;  %v6671_v19 = vpop.f32.mrb[43].mxu1  ;;  %v8694_v58 = vld [vmem:[#allocation2_spill] sm:$0xff] }
 0x1bf   : > { %v5046_v52 = vpop.eup %5045  ;;  %v2794_v45 = vadd.f32 %v6583_v17, %v2571_v28  ;;  %v3093_v4 = vmul.f32 %v2571_v28, %v2571_v28  ;;  %v2572_v35 = vmul.f32 %v2316_v34, %v6591_v23  ;;  %8692 = vst [vmem:[#allocation49_spill] sm:$0xff] %v6671_v19  ;;  %v1197_v56 = vadd.f32 %v8694_v58, %v5918_v44 }
 0x1c0   : > { %8690 = vst [vmem:[#allocation47_spill] sm:$0xff] %v6659_v7  ;;  %8691 = vst [vmem:[#allocation48_spill] sm:$0xff] %v6663_v54  ;;  %v5048_v16 = vpop.eup %5047  ;;  %v6674_v1 = vmul.f32 %v2388_v57, %v6593_v32  ;;  %v2317_v18 = vadd.f32 1.0, %v5046_v52  ;;  %v1019_v17 = vadd.f32 %v6361_v50, %v5914_v41  ;;  %v6683_v42 = vmul.f32 %v6663_v54, %v6663_v54 }
 0x1c1   : > { %v5050_v7 = vpop.eup %5049  ;;  %v3316_v23 = vadd.f32 %v6599_v60, %v3093_v4  ;;  %v2927_v34 = vadd.f32 %v2926_v12, %v2572_v35  ;;  %v3094_v13 = vmul.f32 %v2572_v35, %v2572_v35  ;;  %v4748_v21 = vpack.c.bf16 %v2572_v35, %v2571_v28 }
 0x1c2   : > { %8693 = vst [vmem:[#allocation50_spill] sm:$0xff] %v6674_v1  ;;  %v5052_v15 = vpop.eup %5051  ;;  %8695 = vst [vmem:[#allocation2_spill] sm:$0xff] %v6683_v42  ;;  %v4784_v32 = vpack.c.bf16 %v6674_v1, %v6663_v54  ;;  %v2573_v57 = vmul.f32 %v2317_v18, %v6601_v2  ;;  %v2389_v52 = vadd.f32 1.0, %v5048_v16  ;;  %v2318_v50 = vadd.f32 1.0, %v5050_v7  ;;  %v6689_v60 = vpop.f32.mrb[96].mxu0  ;;  %v8711_v54 = vld [vmem:[#allocation6_spill] sm:$0xff] }
 0x1c3   : > { %v3449_v58 = vadd.f32 %v3448_v47, %v3094_v13  ;;  %4366 = vst [vmem:[%s6015_s27 + $0x100] sm:$0xff] %v4748_v21  ;;  %v2390_v19 = vadd.f32 1.0, %v5052_v15  ;;  %v1808_v49 = vmul.f32 0.70710677, %v1017_v25  ;;  %v6695_v35 = vmul.f32 0.5, %v1017_v25  ;;  %v6697_v42 = vpop.f32.mrb[97].mxu0 }
 0x1c4   : > { %4402 = vst [vmem:[%s6015_s27 + $0x220] sm:$0xff] %v4784_v32  ;;  %v2795_v12 = vadd.f32 %v2794_v45, %v2573_v57  ;;  %v3095_v28 = vmul.f32 %v2573_v57, %v2573_v57  ;;  %v6693_v4 = vmul.f32 %v2389_v52, %v6605_v39  ;;  %v2574_v2 = vmul.f32 %v2318_v50, %v6627_v61  ;;  %v6703_v15 = vpop.f32.mrb[98].mxu0  ;;  %v368_v32 = vld [vmem:[%s5502_s23 + $0x3e0] sm:$0xff]  ;;  %v6722_v50 = vpop.f32.mrb[44].mxu1 }
 0x1c5   : > { %v6701_v21 = vmul.f32 %v2390_v19, %v6629_v43  ;;  %5057 = verf.f32 %v1808_v49  ;;  %v1880_v47 = vmul.f32 0.70710677, %v1197_v56  ;;  %v6707_v45 = vmul.f32 %v6674_v1, %v6674_v1  ;;  %v6711_v18 = vpop.f32.mrb[99].mxu0  ;;  %8700 = vst [vmem:[#allocation55_spill] sm:$0xff] %v6722_v50 }
 0x1c6   : > { %8696 = vst [vmem:[#allocation51_spill] sm:$0xff] %v6693_v4  ;;  %v5054_v7 = vpop.eup %5053  ;;  %v3317_v39 = vadd.f32 %v3316_v23, %v3095_v28  ;;  %v6709_v25 = vmul.f32 0.5, %v1197_v56  ;;  %v1809_v16 = vmul.f32 0.70710677, %v1019_v17  ;;  %v6715_v43 = vmul.f32 %v6693_v4, %v6693_v4 }
 0x1c7   : > { %8697 = vst [vmem:[#allocation52_spill] sm:$0xff] %v6701_v21  ;;  %8698 = vst [vmem:[#allocation53_spill] sm:$0xff] %v6707_v45  ;;  %v5056_v61 = vpop.eup %5055  ;;  %v6717_v49 = vadd.f32 %v2927_v34, %v2574_v2  ;;  %v3096_v19 = vmul.f32 %v2574_v2, %v2574_v2  ;;  %v4749_v13 = vpack.c.bf16 %v2574_v2, %v2573_v57  ;;  %v2319_v56 = vadd.f32 1.0, %v5054_v7  ;;  %v8701_v45 = vld [vmem:[#allocation3_spill] sm:$0xff]  ;;  %v8702_v7 = vld [vmem:[#allocation4_spill] sm:$0xff] }
 0x1c8   : > { %8699 = vst [vmem:[#allocation54_spill] sm:$0xff] %v6715_v43  ;;  %v4785_v23 = vpack.c.bf16 %v6701_v21, %v6693_v4  ;;  %v2391_v52 = vadd.f32 1.0, %v5056_v61  ;;  %5059 = verf.f32 %v1880_v47  ;;  %v1199_v34 = vadd.f32 %v8701_v45, %v5914_v41  ;;  %v369_v47 = vld [vmem:[%s5502_s23 + $0x3e8] sm:$0xff] }
 0x1c9   : > { %v6724_v28 = vadd.f32 %v3449_v58, %v3096_v19  ;;  %4367 = vst [vmem:[%s6015_s27 + $0x108] sm:$0xff] %v4749_v13  ;;  %5061 = verf.f32 %v1809_v16  ;;  %v1021_v57 = vadd.f32 %v6370_v29, %v5918_v44  ;;  %v2575_v2 = vmul.f32 %v2319_v56, %v6633_v30  ;;  %v6737_v58 = vpop.f32.mrb[45].mxu1 }
 0x1ca   : > { %4403 = vst [vmem:[%s6015_s27 + $0x228] sm:$0xff] %v4785_v23  ;;  %v1553_v1 = vmul.f32 0.5, %v1019_v17  ;;  %v1201_v61 = vadd.f32 %v8702_v7, %v5918_v44  ;;  %v501_v43 = vmul.f32 %v6532_v51, %v368_v32  ;;  %8703 = vst [vmem:[#allocation3_spill] sm:$0xff] %v6737_v58  ;;  %v6741_v16 = vmul.f32 %v6701_v21, %v6701_v21  ;;  %v6752_v56 = vpop.f32.mrb[100].mxu0 }
 0x1cb   : > { %v6744_v45 = vmul.f32 %v2391_v52, %v6643_v0  ;;  %v1881_v29 = vmul.f32 0.70710677, %v1199_v34  ;;  %v1810_v19 = vmul.f32 0.70710677, %v1021_v57  ;;  %v6746_v13 = vadd.f32 %v2795_v12, %v2575_v2  ;;  %8706 = vst [vmem:[#allocation57_spill] sm:$0xff] %v6752_v56  ;;  %v6756_v21 = vpop.f32.mrb[101].mxu0 }
 0x1cc   : > { %8704 = vst [vmem:[#allocation4_spill] sm:$0xff] %v6741_v16  ;;  %v3097_v30 = vmul.f32 %v2575_v2, %v2575_v2  ;;  %v6748_v17 = vmul.f32 0.5, %v1199_v34  ;;  %v6750_v23 = vmul.f32 0.5, %v1021_v57  ;;  %v1882_v32 = vmul.f32 0.70710677, %v1201_v61  ;;  %8707 = vst [vmem:[#allocation58_spill] sm:$0xff] %v6756_v21 }
 0x1cd   : > { %8705 = vst [vmem:[#allocation56_spill] sm:$0xff] %v6744_v45  ;;  %5063 = verf.f32 %v1881_v29  ;;  %v502_v7 = vmul.f32 %v6532_v51, %v369_v47  ;;  %v634_v16 = vadd.f32 %v6552_v26, %v501_v43  ;;  %v6758_v0 = vpop.f32.mrb[46].mxu1  ;;  %v1025_v12 = vadd.f32 %v6399_v62, %v5914_v41  ;;  %v8709_v34 = vld [vmem:[#allocation5_spill] sm:$0xff]  ;;  %v6766_v4 = vpop.f32.mrb[102].mxu0 }
 0x1ce   : > { %8708 = vst [vmem:[#allocation59_spill] sm:$0xff] %v6758_v0  ;;  %v6760_v52 = vadd.f32 %v3317_v39, %v3097_v30  ;;  %5065 = verf.f32 %v1810_v19  ;;  %v1205_v57 = vadd.f32 %v8709_v34, %v5914_v41  ;;  %8710 = vst [vmem:[#allocation5_spill] sm:$0xff] %v6766_v4  ;;  %v1027_v43 = vadd.f32 %v6407_v3, %v5918_v44  ;;  %v6773_v30 = vpop.f32.mrb[103].mxu0  ;;  %v6783_v21 = vpop.f32.mrb[47].mxu1 }
 0x1cf   : > { %v5058_v29 = vpop.eup %5057  ;;  %5067 = verf.f32 %v1882_v32  ;;  %v635_v47 = vadd.f32 %v6552_v26, %v502_v7  ;;  %v1207_v39 = vadd.f32 %v8711_v54, %v5918_v44  ;;  %8712 = vst [vmem:[#allocation6_spill] sm:$0xff] %v6773_v30  ;;  %v6777_v62 = vmul.f32 %v6744_v45, %v6744_v45 }
 0x1d0   : > { %v2320_v19 = vadd.f32 1.0, %v5058_v29  ;;  %v6779_v34 = vmul.f32 0.5, %v1201_v61  ;;  %v1811_v0 = vmul.f32 0.70710677, %v1025_v12  ;;  %v6781_v32 = vmul.f32 0.5, %v1025_v12 }
 0x1d1   : > { %8713 = vst [vmem:[#allocation60_spill] sm:$0xff] %v6777_v62  ;;  %v700_v4 = vpack.c.bf16 %v635_v47, %v634_v16  ;;  %v1883_v7 = vmul.f32 0.70710677, %v1205_v57  ;;  %v1812_v58 = vmul.f32 0.70710677, %v1027_v43  ;;  %v6786_v30 = vmul.f32 0.5, %v1205_v57 }
 0x1d2   : > { %v5060_v3 = vpop.eup %5059  ;;  %v2576_v54 = vmul.f32 %v2320_v19, %v6695_v35  ;;  %5069 = verf.f32 %v1811_v0  ;;  %v1884_v50 = vmul.f32 0.70710677, %v1207_v39  ;;  %v1029_v61 = vadd.f32 %v6413_v53, %v5914_v41  ;;  %v8714_v16 = vld [vmem:[#allocation7_spill] sm:$0xff] }
 0x1d3   : > { %v5062_v56 = vpop.eup %5061  ;;  %v2392_v29 = vadd.f32 1.0, %v5060_v3  ;;  %1463 = vmatmul.mubr.bf16.gmra.mrb[120].mxu1 %v700_v4  ;;  %5071 = verf.f32 %v1883_v7  ;;  %v1209_v12 = vadd.f32 %v8714_v16, %v5914_v41  ;;  %v6797_v19 = vmul.f32 0.5, %v1027_v43  ;;  %v6810_v43 = vpop.f32.mrb[48].mxu1 }
 0x1d4   : > { %v2929_v47 = vadd.f32 %v6717_v49, %v2576_v54  ;;  %v3098_v62 = vmul.f32 %v2576_v54, %v2576_v54  ;;  %v4750_v35 = vpack.c.bf16 %v2576_v54, %v2575_v2  ;;  %v2321_v0 = vadd.f32 1.0, %v5062_v56  ;;  %1472 = vmatprep.mubr.bf16.mxu1 %v8683_v48  ;;  %v370_v49 = vld [vmem:[%s5502_s23 + $0x3f0] sm:$0xff]  ;;  %8716 = vst [vmem:[#allocation61_spill] sm:$0xff] %v6810_v43 }
 0x1d5   : > { %v6795_v57 = vmul.f32 %v2392_v29, %v6709_v25  ;;  %5073 = verf.f32 %v1812_v58  ;;  %v1813_v4 = vmul.f32 0.70710677, %v1029_v61  ;;  %v6801_v3 = vmul.f32 0.5, %v1207_v39  ;;  %v6808_v58 = vpop.f32.mrb[104].mxu0  ;;  %v6817_v29 = vpop.f32.mrb[49].mxu1 }
 0x1d6   : > { %v3451_v53 = vadd.f32 %v6724_v28, %v3098_v62  ;;  %4368 = vst [vmem:[%s6015_s27 + $0x110] sm:$0xff] %v4750_v35  ;;  %v2577_v7 = vmul.f32 %v2321_v0, %v1553_v1  ;;  %5075 = verf.f32 %v1884_v50  ;;  %v6806_v56 = vmul.f32 0.5, %v1029_v61  ;;  %v6815_v54 = vpop.f32.mrb[105].mxu0  ;;  %8718 = vst [vmem:[#allocation63_spill] sm:$0xff] %v6817_v29  ;;  %v8719_v35 = vld [vmem:[#allocation8_spill] sm:$0xff]  ;;  %v6837_v29 = vpop.f32.mrb[50].mxu1 }
 0x1d7   : > { %8715 = vst [vmem:[#allocation7_spill] sm:$0xff] %v6795_v57  ;;  %v5064_v2 = vpop.eup %5063  ;;  %v4786_v48 = vpack.c.bf16 %v6795_v57, %v6744_v45  ;;  %5077 = verf.f32 %v1813_v4  ;;  %v1885_v25 = vmul.f32 0.70710677, %v1209_v12  ;;  %v1031_v62 = vadd.f32 %v6419_v6, %v5918_v44  ;;  %8717 = vst [vmem:[#allocation62_spill] sm:$0xff] %v6815_v54  ;;  %v371_v4 = vld [vmem:[%s5502_s23 + $0x3f8] sm:$0xff]  ;;  %v6830_v54 = vpop.f32.mrb[106].mxu0 }
 0x1d8   : > { %v5066_v28 = vpop.eup %5065  ;;  %v2797_v1 = vadd.f32 %v6746_v13, %v2577_v7  ;;  %v3099_v39 = vmul.f32 %v2577_v7, %v2577_v7  ;;  %v2393_v50 = vadd.f32 1.0, %v5064_v2  ;;  %v1211_v0 = vadd.f32 %v8719_v35, %v5918_v44  ;;  %8721 = vst [vmem:[#allocation64_spill] sm:$0xff] %v6830_v54  ;;  %8723 = vst [vmem:[#allocation66_spill] sm:$0xff] %v6837_v29  ;;  %s4715_s23 = sshll.u32 %s9132_s19, 2 }
 0x1d9   : > { %v5068_v61 = vpop.eup %5067  ;;  %4404 = vst [vmem:[%s6015_s27 + $0x230] sm:$0xff] %v4786_v48  ;;  %v2322_v16 = vadd.f32 1.0, %v5066_v28  ;;  %5079 = verf.f32 %v1885_v25  ;;  %v503_v45 = vmul.f32 %v6532_v51, %v370_v49  ;;  %v6828_v43 = vmul.f32 0.5, %v1209_v12  ;;  %s242_s7 = scalar_lea.vmem %s8579_s5, %s4715_s23 }
 0x1da   : > { %v3319_v13 = vadd.f32 %v6760_v52, %v3099_v39  ;;  %v6826_v2 = vmul.f32 %v2393_v50, %v6748_v17  ;;  %v2394_v6 = vadd.f32 1.0, %v5068_v61  ;;  %v6834_v48 = vmul.f32 %v6795_v57, %v6795_v57 }
 0x1db   : > { %v2578_v25 = vmul.f32 %v2322_v16, %v6750_v23  ;;  %v1814_v28 = vmul.f32 0.70710677, %v1031_v62  ;;  %v1886_v35 = vmul.f32 0.70710677, %v1211_v0  ;;  %v6842_v52 = vmul.f32 0.5, %v1031_v62 }
 0x1dc   : > { %8720 = vst [vmem:[#allocation8_spill] sm:$0xff] %v6826_v2  ;;  %8722 = vst [vmem:[#allocation65_spill] sm:$0xff] %v6834_v48  ;;  %v5070_v49 = vpop.eup %5069  ;;  %v6840_v17 = vmul.f32 %v2394_v6, %v6779_v34  ;;  %v504_v12 = vmul.f32 %v6532_v51, %v371_v4  ;;  %v636_v39 = vadd.f32 %v6552_v26, %v503_v45  ;;  %v6848_v54 = vmul.f32 0.5, %v1211_v0 }
 0x1dd   : > { %v5072_v50 = vpop.eup %5071  ;;  %v2930_v61 = vadd.f32 %v2929_v47, %v2578_v25  ;;  %v3100_v48 = vmul.f32 %v2578_v25, %v2578_v25  ;;  %v4751_v23 = vpack.c.bf16 %v2578_v25, %v2577_v7  ;;  %v2323_v16 = vadd.f32 1.0, %v5070_v49 }
 0x1de   : > { %8724 = vst [vmem:[#allocation67_spill] sm:$0xff] %v6840_v17  ;;  %v4787_v57 = vpack.c.bf16 %v6840_v17, %v6826_v2  ;;  %v2395_v29 = vadd.f32 1.0, %v5072_v50  ;;  %5081 = verf.f32 %v1814_v28  ;;  %v637_v45 = vadd.f32 %v6552_v26, %v504_v12  ;;  %v6872_v12 = vpop.f32.mrb[51].mxu1 }
 0x1df   : > { %v5074_v34 = vpop.eup %5073  ;;  %v3452_v62 = vadd.f32 %v3451_v53, %v3100_v48  ;;  %4369 = vst [vmem:[%s6015_s27 + $0x118] sm:$0xff] %v4751_v23  ;;  %v2579_v51 = vmul.f32 %v2323_v16, %v6781_v32  ;;  %5083 = verf.f32 %v1886_v35  ;;  %v6855_v7 = vmul.f32 %v6826_v2, %v6826_v2  ;;  %v6863_v53 = vpop.f32.mrb[107].mxu0 }
 0x1e0   : > { %v5076_v47 = vpop.eup %5075  ;;  %4405 = vst [vmem:[%s6015_s27 + $0x238] sm:$0xff] %v4787_v57  ;;  %v6859_v4 = vmul.f32 %v2395_v29, %v6786_v30  ;;  %v2324_v6 = vadd.f32 1.0, %v5074_v34  ;;  %v1035_v0 = vadd.f32 %v6439_v14, %v5914_v41  ;;  %v701_v26 = vpack.c.bf16 %v637_v45, %v636_v39  ;;  %v8728_v30 = vld [vmem:[#allocation9_spill] sm:$0xff] }
 0x1e1   : > { %8725 = vst [vmem:[#allocation68_spill] sm:$0xff] %v6855_v7  ;;  %v5078_v48 = vpop.eup %5077  ;;  %v2798_v32 = vadd.f32 %v2797_v1, %v2579_v51  ;;  %v3101_v25 = vmul.f32 %v2579_v51, %v2579_v51  ;;  %v2396_v28 = vadd.f32 1.0, %v5076_v47  ;;  %v6867_v35 = vmul.f32 %v6840_v17, %v6840_v17 }
 0x1e2   : > { %8726 = vst [vmem:[#allocation69_spill] sm:$0xff] %v6859_v4  ;;  %v2580_v57 = vmul.f32 %v2324_v6, %v6797_v19  ;;  %v2325_v49 = vadd.f32 1.0, %v5078_v48  ;;  %v1215_v29 = vadd.f32 %v8728_v30, %v5914_v41  ;;  %v6876_v1 = vmul.f32 %v6859_v4, %v6859_v4  ;;  %1473 = vmatmul.mubr.bf16.gmra.mrb[124].mxu1 %v701_v26 }
 0x1e3   : > { %8727 = vst [vmem:[#allocation70_spill] sm:$0xff] %v6867_v35  ;;  %v5080_v14 = vpop.eup %5079  ;;  %v3320_v50 = vadd.f32 %v3319_v13, %v3101_v25  ;;  %v6879_v39 = vmul.f32 %v2396_v28, %v6801_v3  ;;  %v1815_v23 = vmul.f32 0.70710677, %v1035_v0  ;;  %v6884_v13 = vmul.f32 0.5, %v1035_v0 }
 0x1e4   : > { %8729 = vst [vmem:[#allocation9_spill] sm:$0xff] %v6876_v1  ;;  %v2931_v19 = vadd.f32 %v2930_v61, %v2580_v57  ;;  %v3102_v16 = vmul.f32 %v2580_v57, %v2580_v57  ;;  %v4752_v34 = vpack.c.bf16 %v2580_v57, %v2579_v51  ;;  %v2581_v45 = vmul.f32 %v2325_v49, %v6806_v56  ;;  %v8732_v51 = vld [vmem:[#allocation10_spill] sm:$0xff]  ;;  %v8733_v49 = vld [vmem:[#allocation11_spill] sm:$0xff] }
 0x1e5   : > { %8730 = vst [vmem:[#allocation71_spill] sm:$0xff] %v6879_v39  ;;  %v4788_v47 = vpack.c.bf16 %v6879_v39, %v6859_v4  ;;  %v2397_v6 = vadd.f32 1.0, %v5080_v14  ;;  %5085 = verf.f32 %v1815_v23  ;;  %v1887_v28 = vmul.f32 0.70710677, %v1215_v29 }
 0x1e6   : > { %v3453_v48 = vadd.f32 %v3452_v62, %v3102_v16  ;;  %4370 = vst [vmem:[%s6015_s27 + $0x120] sm:$0xff] %v4752_v34  ;;  %v6887_v25 = vadd.f32 %v2798_v32, %v2581_v45  ;;  %v3103_v3 = vmul.f32 %v2581_v45, %v2581_v45  ;;  %v1037_v56 = vadd.f32 %v6442_v31, %v5918_v44  ;;  %v8735_v16 = vld [vmem:[#allocation27_spill] sm:$0xff] }
 0x1e7   : > { %4406 = vst [vmem:[%s6015_s27 + $0x240] sm:$0xff] %v4788_v47  ;;  %v6891_v61 = vmul.f32 %v2397_v6, %v6828_v43  ;;  %v1217_v26 = vadd.f32 %v8732_v51, %v5918_v44  ;;  %v1039_v0 = vadd.f32 %v6449_v27, %v5914_v41  ;;  %v6901_v32 = vmul.f32 0.5, %v1215_v29 }
 0x1e8   : > { %v5082_v57 = vpop.eup %5081  ;;  %v6899_v62 = vadd.f32 %v3320_v50, %v3103_v3  ;;  %5087 = verf.f32 %v1887_v28  ;;  %v1219_v30 = vadd.f32 %v8733_v49, %v5914_v41  ;;  %v6907_v14 = vmul.f32 %v6879_v39, %v6879_v39 }
 0x1e9   : > { %8731 = vst [vmem:[#allocation72_spill] sm:$0xff] %v6891_v61  ;;  %v5084_v43 = vpop.eup %5083  ;;  %v2326_v31 = vadd.f32 1.0, %v5082_v57  ;;  %v1816_v23 = vmul.f32 0.70710677, %v1037_v56  ;;  %v1041_v34 = vadd.f32 %v8735_v16, %v5918_v44  ;;  %v6913_v27 = vmul.f32 %v6891_v61, %v6891_v61 }
 0x1ea   : > { %8734 = vst [vmem:[#allocation10_spill] sm:$0xff] %v6907_v14  ;;  %v2398_v29 = vadd.f32 1.0, %v5084_v43  ;;  %v6915_v50 = vmul.f32 0.5, %v1037_v56  ;;  %v1888_v47 = vmul.f32 0.70710677, %v1217_v26  ;;  %v6918_v3 = vmul.f32 0.5, %v1217_v26 }
 0x1eb   : > { %8736 = vst [vmem:[#allocation11_spill] sm:$0xff] %v6913_v27  ;;  %v2582_v6 = vmul.f32 %v2326_v31, %v6842_v52  ;;  %5089 = verf.f32 %v1816_v23  ;;  %v1817_v28 = vmul.f32 0.70710677, %v1039_v0  ;;  %v6923_v57 = vmul.f32 0.5, %v1039_v0  ;;  %v6927_v14 = vpop.f32.mrb[108].mxu0  ;;  %v6929_v52 = vpop.f32.mrb[52].mxu1 }
 0x1ec   : > { %v6921_v51 = vmul.f32 %v2398_v29, %v6848_v54  ;;  %5091 = verf.f32 %v1888_v47  ;;  %v1889_v49 = vmul.f32 0.70710677, %v1219_v30  ;;  %v6933_v54 = vmul.f32 0.5, %v1219_v30  ;;  %v6935_v31 = vpop.f32.mrb[109].mxu0  ;;  %v6937_v23 = vpop.f32.mrb[53].mxu1 }
 0x1ed   : > { %v6925_v16 = vadd.f32 %v2931_v19, %v2582_v6  ;;  %v3104_v43 = vmul.f32 %v2582_v6, %v2582_v6  ;;  %v4753_v56 = vpack.c.bf16 %v2582_v6, %v2581_v45  ;;  %5093 = verf.f32 %v1817_v28  ;;  %v8738_v45 = vld [vmem:[#allocation12_spill] sm:$0xff]  ;;  %v8739_v28 = vld [vmem:[#allocation13_spill] sm:$0xff]  ;;  %v6948_v35 = vpop.f32.mrb[110].mxu0 }
 0x1ee   : > { %8737 = vst [vmem:[#allocation27_spill] sm:$0xff] %v6921_v51  ;;  %v4789_v26 = vpack.c.bf16 %v6921_v51, %v6891_v61  ;;  %5095 = verf.f32 %v1889_v49  ;;  %v1818_v0 = vmul.f32 0.70710677, %v1041_v34  ;;  %v1221_v47 = vadd.f32 %v8738_v45, %v5918_v44  ;;  %v6968_v1 = vpop.f32.mrb[111].mxu0 }
 0x1ef   : > { %v5086_v19 = vpop.eup %5085  ;;  %v6939_v29 = vadd.f32 %v3453_v48, %v3104_v43  ;;  %4371 = vst [vmem:[%s6015_s27 + $0x128] sm:$0xff] %v4753_v56  ;;  %v1045_v6 = vadd.f32 %v6471_v40, %v5914_v41  ;;  %v1225_v30 = vadd.f32 %v8739_v28, %v5914_v41  ;;  %v1047_v39 = vadd.f32 %v6473_v11, %v5918_v44  ;;  %v8740_v48 = vld [vmem:[#allocation14_spill] sm:$0xff]  ;;  %v6955_v56 = vpop.f32.mrb[54].mxu1 }
 0x1f0   : > { %4407 = vst [vmem:[%s6015_s27 + $0x248] sm:$0xff] %v4789_v26  ;;  %v2327_v49 = vadd.f32 1.0, %v5086_v19  ;;  %5097 = verf.f32 %v1818_v0  ;;  %v1227_v43 = vadd.f32 %v8740_v48, %v5918_v44  ;;  %8741 = vst [vmem:[#allocation12_spill] sm:$0xff] %v6955_v56  ;;  %v6959_v45 = vmul.f32 %v6921_v51, %v6921_v51  ;;  %v6970_v48 = vpop.f32.mrb[55].mxu1 }
 0x1f1   : > { %v6961_v40 = vmul.f32 0.5, %v1041_v34  ;;  %v1890_v28 = vmul.f32 0.70710677, %v1221_v47  ;;  %v1819_v27 = vmul.f32 0.70710677, %v1045_v6  ;;  %v6964_v0 = vmul.f32 0.5, %v1221_v47 }
 0x1f2   : > { %8742 = vst [vmem:[#allocation13_spill] sm:$0xff] %v6959_v45  ;;  %v5088_v17 = vpop.eup %5087  ;;  %v2583_v26 = vmul.f32 %v2327_v49, %v6884_v13  ;;  %v6966_v19 = vmul.f32 0.5, %v1045_v6  ;;  %v1891_v11 = vmul.f32 0.70710677, %v1225_v30  ;;  %8743 = vst [vmem:[#allocation14_spill] sm:$0xff] %v6968_v1  ;;  %v6972_v51 = vmul.f32 0.5, %v1225_v30 }
 0x1f3   : > { %8744 = vst [vmem:[#allocation73_spill] sm:$0xff] %v6970_v48  ;;  %v2399_v61 = vadd.f32 1.0, %v5088_v17  ;;  %5099 = verf.f32 %v1890_v28  ;;  %v1820_v34 = vmul.f32 0.70710677, %v1047_v39  ;;  %v1892_v4 = vmul.f32 0.70710677, %v1227_v43 }
 0x1f4   : > { %v2800_v45 = vadd.f32 %v6887_v25, %v2583_v26  ;;  %v3105_v7 = vmul.f32 %v2583_v26, %v2583_v26  ;;  %5101 = verf.f32 %v1819_v27  ;;  %v1049_v6 = vadd.f32 %v6482_v22, %v5914_v41  ;;  %v8746_v49 = vld [vmem:[#allocation15_spill] sm:$0xff] }
 0x1f5   : > { %v5090_v13 = vpop.eup %5089  ;;  %v6976_v47 = vmul.f32 %v2399_v61, %v6901_v32  ;;  %5103 = verf.f32 %v1891_v11  ;;  %v1229_v17 = vadd.f32 %v8746_v49, %v5914_v41  ;;  %v6983_v48 = vmul.f32 0.5, %v1047_v39 }
 0x1f6   : > { %v5092_v28 = vpop.eup %5091  ;;  %v3322_v30 = vadd.f32 %v6899_v62, %v3105_v7  ;;  %v2328_v2 = vadd.f32 1.0, %v5090_v13  ;;  %5105 = verf.f32 %v1820_v34  ;;  %v6985_v1 = vmul.f32 0.5, %v1227_v43 }
 0x1f7   : > { %8745 = vst [vmem:[#allocation74_spill] sm:$0xff] %v6976_v47  ;;  %v5094_v25 = vpop.eup %5093  ;;  %v2400_v27 = vadd.f32 1.0, %v5092_v28  ;;  %5107 = verf.f32 %v1892_v4  ;;  %v1051_v61 = vadd.f32 %v6490_v24, %v5918_v44  ;;  %v6991_v22 = vmul.f32 %v6976_v47, %v6976_v47 }
 0x1f8   : > { %v5096_v32 = vpop.eup %5095  ;;  %v2584_v11 = vmul.f32 %v2328_v2, %v6915_v50  ;;  %v2329_v7 = vadd.f32 1.0, %v5094_v25  ;;  %v1821_v62 = vmul.f32 0.70710677, %v1049_v6  ;;  %v6997_v13 = vmul.f32 0.5, %v1049_v6  ;;  %v7003_v2 = vpop.f32.mrb[56].mxu1 }
 0x1f9   : > { %8747 = vst [vmem:[#allocation15_spill] sm:$0xff] %v6991_v22  ;;  %v6995_v39 = vmul.f32 %v2400_v27, %v6918_v3  ;;  %v2401_v34 = vadd.f32 1.0, %v5096_v32  ;;  %v1893_v4 = vmul.f32 0.70710677, %v1229_v17  ;;  %v7001_v22 = vpop.f32.mrb[112].mxu0  ;;  %8749 = vst [vmem:[#allocation76_spill] sm:$0xff] %v7003_v2 }
 0x1fa   : > { %v5098_v43 = vpop.eup %5097  ;;  %v2933_v24 = vadd.f32 %v6925_v16, %v2584_v11  ;;  %v3106_v49 = vmul.f32 %v2584_v11, %v2584_v11  ;;  %v4754_v28 = vpack.c.bf16 %v2584_v11, %v2583_v26  ;;  %v2585_v56 = vmul.f32 %v2329_v7, %v6923_v57  ;;  %v7011_v27 = vpop.f32.mrb[113].mxu0 }
 0x1fb   : > { %8748 = vst [vmem:[#allocation75_spill] sm:$0xff] %v6995_v39  ;;  %v4790_v50 = vpack.c.bf16 %v6995_v39, %v6976_v47  ;;  %v2330_v3 = vadd.f32 1.0, %v5098_v43  ;;  %v7007_v6 = vmul.f32 0.5, %v1229_v17  ;;  %v7009_v25 = vmul.f32 0.5, %v1051_v61  ;;  %8750 = vst [vmem:[#allocation77_spill] sm:$0xff] %v7011_v27  ;;  %v7013_v16 = vpop.f32.mrb[57].mxu1 }
 0x1fc   : > { %8751 = vst [vmem:[#allocation78_spill] sm:$0xff] %v7013_v16  ;;  %v3455_v26 = vadd.f32 %v6939_v29, %v3106_v49  ;;  %4372 = vst [vmem:[%s6015_s27 + $0x130] sm:$0xff] %v4754_v28  ;;  %v2801_v57 = vadd.f32 %v2800_v45, %v2585_v56  ;;  %v3107_v32 = vmul.f32 %v2585_v56, %v2585_v56  ;;  %5109 = verf.f32 %v1821_v62  ;;  %v7017_v11 = vpop.f32.mrb[114].mxu0  ;;  %v7025_v27 = vpop.f32.mrb[58].mxu1  ;;  %v8755_v49 = vld [vmem:[#allocation16_spill] sm:$0xff] }
 0x1fd   : > { %8752 = vst [vmem:[#allocation79_spill] sm:$0xff] %v7017_v11  ;;  %v5100_v7 = vpop.eup %5099  ;;  %v7021_v43 = vmul.f32 %v6995_v39, %v6995_v39  ;;  %4408 = vst [vmem:[%s6015_s27 + $0x250] sm:$0xff] %v4790_v50  ;;  %v2586_v17 = vmul.f32 %v2330_v3, %v6961_v40  ;;  %5111 = verf.f32 %v1893_v4  ;;  %v1822_v47 = vmul.f32 0.70710677, %v1051_v61 }
 0x1fe   : > { %v5102_v16 = vpop.eup %5101  ;;  %v3323_v29 = vadd.f32 %v3322_v30, %v3107_v32  ;;  %v7028_v45 = vmul.f32 %v2401_v34, %v6933_v54  ;;  %v2402_v62 = vadd.f32 1.0, %v5100_v7  ;;  %v1231_v28 = vadd.f32 %v8755_v49, %v5918_v44  ;;  %v7049_v7 = vpop.f32.mrb[115].mxu0 }
 0x1ff   : > { %8753 = vst [vmem:[#allocation80_spill] sm:$0xff] %v7021_v43  ;;  %v5104_v11 = vpop.eup %5103  ;;  %v2934_v39 = vadd.f32 %v2933_v24, %v2586_v17  ;;  %v3108_v43 = vmul.f32 %v2586_v17, %v2586_v17  ;;  %v4755_v50 = vpack.c.bf16 %v2586_v17, %v2585_v56  ;;  %v2331_v2 = vadd.f32 1.0, %v5102_v16 }
 0x200   : > { %8754 = vst [vmem:[#allocation81_spill] sm:$0xff] %v7028_v45  ;;  %v5106_v40 = vpop.eup %5105  ;;  %v7033_v61 = vmul.f32 %v2402_v62, %v6964_v0  ;;  %v2403_v4 = vadd.f32 1.0, %v5104_v11  ;;  %5113 = verf.f32 %v1822_v47  ;;  %v1055_v30 = vadd.f32 %v6536_v63, %v5914_v41 }
 0x201   : > { %v5108_v54 = vpop.eup %5107  ;;  %v3456_v34 = vadd.f32 %v3455_v26, %v3108_v43  ;;  %4373 = vst [vmem:[%s6015_s27 + $0x138] sm:$0xff] %v4755_v50  ;;  %v2587_v3 = vmul.f32 %v2331_v2, %v6966_v19  ;;  %v2332_v32 = vadd.f32 1.0, %v5106_v40  ;;  %v1894_v24 = vmul.f32 0.70710677, %v1231_v28 }
 0x202   : > { %8756 = vst [vmem:[#allocation16_spill] sm:$0xff] %v7033_v61  ;;  %v7041_v56 = vmul.f32 %v7028_v45, %v7028_v45  ;;  %v4791_v0 = vpack.c.bf16 %v7033_v61, %v7028_v45  ;;  %v7046_v47 = vmul.f32 %v2403_v4, %v6972_v51  ;;  %v2404_v16 = vadd.f32 1.0, %v5108_v54 }
 0x203   : > { %v2802_v63 = vadd.f32 %v2801_v57, %v2587_v3  ;;  %v3109_v11 = vmul.f32 %v2587_v3, %v2587_v3  ;;  %v2588_v26 = vmul.f32 %v2332_v32, %v6983_v48  ;;  %5115 = verf.f32 %v1894_v24  ;;  %v7059_v48 = vpop.f32.mrb[59].mxu1  ;;  %v8763_v32 = vld [vmem:[#allocation18_spill] sm:$0xff] }
 0x204   : > { %8757 = vst [vmem:[#allocation82_spill] sm:$0xff] %v7041_v56  ;;  %8758 = vst [vmem:[#allocation83_spill] sm:$0xff] %v7046_v47  ;;  %v7053_v19 = vmul.f32 %v7033_v61, %v7033_v61  ;;  %v7057_v2 = vmul.f32 %v2404_v16, %v6985_v1  ;;  %v1638_v43 = vmul.f32 0.5, %v1231_v28  ;;  %v1823_v51 = vmul.f32 0.70710677, %v1055_v30  ;;  %v8762_v1 = vld [vmem:[#allocation17_spill] sm:$0xff] }
 0x205   : > { %4409 = vst [vmem:[%s6015_s27 + $0x258] sm:$0xff] %v4791_v0  ;;  %v3324_v17 = vadd.f32 %v3323_v29, %v3109_v11  ;;  %v2935_v57 = vadd.f32 %v2934_v39, %v2588_v26  ;;  %v3110_v62 = vmul.f32 %v2588_v26, %v2588_v26  ;;  %v4756_v49 = vpack.c.bf16 %v2588_v26, %v2587_v3 }
 0x206   : > { %8759 = vst [vmem:[#allocation84_spill] sm:$0xff] %v7053_v19  ;;  %8760 = vst [vmem:[#allocation85_spill] sm:$0xff] %v7057_v2  ;;  %v5110_v50 = vpop.eup %5109  ;;  %v7063_v40 = vmul.f32 %v7046_v47, %v7046_v47  ;;  %v4792_v4 = vpack.c.bf16 %v7057_v2, %v7046_v47  ;;  %5117 = verf.f32 %v1823_v51  ;;  %v1235_v28 = vadd.f32 %v8762_v1, %v5914_v41 }
 0x207   : > { %v5112_v54 = vpop.eup %5111  ;;  %v3457_v29 = vadd.f32 %v3456_v34, %v3110_v62  ;;  %4374 = vst [vmem:[%s6015_s27 + $0x140] sm:$0xff] %v4756_v49  ;;  %v2333_v39 = vadd.f32 1.0, %v5110_v50  ;;  %v1057_v3 = vadd.f32 %v6545_v55, %v5918_v44  ;;  %v1237_v24 = vadd.f32 %v8763_v32, %v5918_v44 }
 0x208   : > { %8761 = vst [vmem:[#allocation86_spill] sm:$0xff] %v7063_v40  ;;  %4410 = vst [vmem:[%s6015_s27 + $0x260] sm:$0xff] %v4792_v4  ;;  %v2405_v0 = vadd.f32 1.0, %v5112_v54  ;;  %v1567_v16 = vmul.f32 0.5, %v1055_v30  ;;  %v1895_v11 = vmul.f32 0.70710677, %v1235_v28  ;;  %v1059_v26 = vadd.f32 %v6558_v8, %v5914_v41 }
 0x209   : > { %v7079_v51 = vmul.f32 %v7057_v2, %v7057_v2  ;;  %v2589_v34 = vmul.f32 %v2333_v39, %v6997_v13  ;;  %v7082_v62 = vmul.f32 0.5, %v1235_v28  ;;  %v1824_v49 = vmul.f32 0.70710677, %v1057_v3  ;;  %v8766_v13 = vld [vmem:[#allocation19_spill] sm:$0xff] }
 0x20a   : > { %v5114_v55 = vpop.eup %5113  ;;  %v7085_v50 = vmul.f32 %v2405_v0, %v7007_v6  ;;  %5119 = verf.f32 %v1895_v11  ;;  %v7087_v4 = vmul.f32 0.5, %v1057_v3  ;;  %v1896_v30 = vmul.f32 0.70710677, %v1237_v24  ;;  %v8767_v0 = vld [vmem:[#allocation21_spill] sm:$0xff]  ;;  %v7098_v11 = vpop.f32.mrb[116].mxu0 }
 0x20b   : > { %8764 = vst [vmem:[#allocation17_spill] sm:$0xff] %v7079_v51  ;;  %v2803_v1 = vadd.f32 %v2802_v63, %v2589_v34  ;;  %v3111_v54 = vmul.f32 %v2589_v34, %v2589_v34  ;;  %v2334_v8 = vadd.f32 1.0, %v5114_v55  ;;  %5121 = verf.f32 %v1824_v49  ;;  %v7100_v49 = vpop.f32.mrb[60].mxu1 }
 0x20c   : > { %8765 = vst [vmem:[#allocation18_spill] sm:$0xff] %v7085_v50  ;;  %v7089_v32 = vmul.f32 0.5, %v1237_v24  ;;  %5123 = verf.f32 %v1896_v30  ;;  %v1825_v51 = vmul.f32 0.70710677, %v1059_v26  ;;  %v1239_v28 = vadd.f32 %v8766_v13, %v5914_v41  ;;  %v7104_v13 = vpop.f32.mrb[117].mxu0 }
 0x20d   : > { %v5116_v39 = vpop.eup %5115  ;;  %v3325_v19 = vadd.f32 %v3324_v17, %v3111_v54  ;;  %v2590_v6 = vmul.f32 %v2334_v8, %v7009_v25  ;;  %v1061_v3 = vadd.f32 %v6564_v10, %v5918_v44  ;;  %v1241_v63 = vadd.f32 %v8767_v0, %v5918_v44  ;;  %v7110_v8 = vpop.f32.mrb[61].mxu1 }
 0x20e   : > { %v2406_v24 = vadd.f32 1.0, %v5116_v39  ;;  %v7102_v55 = vmul.f32 0.5, %v1059_v26  ;;  %5125 = verf.f32 %v1825_v51  ;;  %v1897_v30 = vmul.f32 0.70710677, %v1239_v28  ;;  %v7116_v51 = vpop.f32.mrb[118].mxu0 }
 0x20f   : > { %v7108_v25 = vmul.f32 %v7085_v50, %v7085_v50  ;;  %v2936_v10 = vadd.f32 %v2935_v57, %v2590_v6  ;;  %v3112_v17 = vmul.f32 %v2590_v6, %v2590_v6  ;;  %v4757_v54 = vpack.c.bf16 %v2590_v6, %v2589_v34  ;;  %v7121_v34 = vpop.f32.mrb[62].mxu1 }
 0x210   : > { %v5118_v0 = vpop.eup %5117  ;;  %v7112_v2 = vmul.f32 %v2406_v24, %v1638_v43  ;;  %v7114_v39 = vmul.f32 0.5, %v1239_v28  ;;  %5127 = verf.f32 %v1897_v30  ;;  %v1826_v26 = vmul.f32 0.70710677, %v1061_v3  ;;  %8770 = vst [vmem:[#allocation87_spill] sm:$0xff] %v7121_v34  ;;  %v8771_v28 = vld [vmem:[#allocation23_spill] sm:$0xff]  ;;  %v7129_v30 = vpop.f32.mrb[119].mxu0 }
 0x211   : > { %8768 = vst [vmem:[#allocation19_spill] sm:$0xff] %v7108_v25  ;;  %v3458_v61 = vadd.f32 %v3457_v29, %v3112_v17  ;;  %4375 = vst [vmem:[%s6015_s27 + $0x148] sm:$0xff] %v4757_v54  ;;  %v2335_v40 = vadd.f32 1.0, %v5118_v0  ;;  %v1898_v56 = vmul.f32 0.70710677, %v1241_v63  ;;  %v1065_v57 = vadd.f32 %v6596_v59, %v5914_v41 }
 0x212   : > { %8769 = vst [vmem:[#allocation21_spill] sm:$0xff] %v7112_v2  ;;  %v4793_v43 = vpack.c.bf16 %v7112_v2, %v7085_v50  ;;  %v7125_v6 = vmul.f32 0.5, %v1061_v3  ;;  %5129 = verf.f32 %v1826_v26  ;;  %v1245_v24 = vadd.f32 %v8771_v28, %v5914_v41  ;;  %8772 = vst [vmem:[#allocation23_spill] sm:$0xff] %v7129_v30  ;;  %v8774_v26 = vld [vmem:[#allocation24_spill] sm:$0xff]  ;;  %v7142_v50 = vpop.f32.mrb[63].mxu1 }
 0x213   : > { %v2591_v29 = vmul.f32 %v2335_v40, %v1567_v16  ;;  %v7131_v17 = vmul.f32 0.5, %v1241_v63  ;;  %5131 = verf.f32 %v1898_v56  ;;  %v1827_v54 = vmul.f32 0.70710677, %v1065_v57  ;;  %8775 = vst [vmem:[#allocation24_spill] sm:$0xff] %v7142_v50 }
 0x214   : > { %v5120_v0 = vpop.eup %5119  ;;  %v7135_v59 = vmul.f32 %v7112_v2, %v7112_v2  ;;  %4411 = vst [vmem:[%s6015_s27 + $0x268] sm:$0xff] %v4793_v43  ;;  %v1899_v25 = vmul.f32 0.70710677, %v1245_v24  ;;  %v1067_v3 = vadd.f32 %v6603_v37, %v5918_v44  ;;  %v1247_v28 = vadd.f32 %v8774_v26, %v5918_v44 }
 0x215   : > { %v5122_v40 = vpop.eup %5121  ;;  %v2804_v16 = vadd.f32 %v2803_v1, %v2591_v29  ;;  %v3113_v63 = vmul.f32 %v2591_v29, %v2591_v29  ;;  %v2407_v56 = vadd.f32 1.0, %v5120_v0  ;;  %5133 = verf.f32 %v1827_v54 }
 0x216   : > { %8773 = vst [vmem:[#allocation88_spill] sm:$0xff] %v7135_v59  ;;  %v5124_v47 = vpop.eup %5123  ;;  %v2336_v45 = vadd.f32 1.0, %v5122_v40  ;;  %v7144_v30 = vmul.f32 0.5, %v1065_v57  ;;  %5135 = verf.f32 %v1899_v25  ;;  %v1828_v43 = vmul.f32 0.70710677, %v1067_v3 }
 0x217   : > { %v3326_v59 = vadd.f32 %v3325_v19, %v3113_v63  ;;  %v7147_v2 = vmul.f32 %v2407_v56, %v7082_v62  ;;  %v2408_v37 = vadd.f32 1.0, %v5124_v47  ;;  %v1643_v34 = vmul.f32 0.5, %v1245_v24  ;;  %v8778_v19 = vld [vmem:[#allocation25_spill] sm:$0xff] }
 0x218   : > { %v5126_v26 = vpop.eup %5125  ;;  %v2592_v50 = vmul.f32 %v2336_v45, %v7087_v4  ;;  %5137 = verf.f32 %v1828_v43  ;;  %v1900_v1 = vmul.f32 0.70710677, %v1247_v28  ;;  %v1069_v54 = vadd.f32 %v6608_v5, %v5914_v41  ;;  %v7159_v45 = vpop.f32.mrb[120].mxu0 }
 0x219   : > { %8776 = vst [vmem:[#allocation89_spill] sm:$0xff] %v7147_v2  ;;  %v7153_v0 = vmul.f32 %v2408_v37, %v7089_v32  ;;  %v2337_v57 = vadd.f32 1.0, %v5126_v26  ;;  %v7155_v25 = vmul.f32 0.5, %v1067_v3  ;;  %v1249_v62 = vadd.f32 %v8778_v19, %v5914_v41  ;;  %v7161_v4 = vpop.f32.mrb[64].mxu1  ;;  %v7168_v43 = vpop.f32.mrb[121].mxu0 }
 0x21a   : > { %v5128_v40 = vpop.eup %5127  ;;  %v2937_v47 = vadd.f32 %v2936_v10, %v2592_v50  ;;  %v3114_v24 = vmul.f32 %v2592_v50, %v2592_v50  ;;  %v4758_v63 = vpack.c.bf16 %v2592_v50, %v2591_v29  ;;  %5139 = verf.f32 %v1900_v1  ;;  %8779 = vst [vmem:[#allocation25_spill] sm:$0xff] %v7168_v43  ;;  %v7170_v37 = vpop.f32.mrb[65].mxu1 }
 0x21b   : > { %8777 = vst [vmem:[#allocation90_spill] sm:$0xff] %v7153_v0  ;;  %v4794_v5 = vpack.c.bf16 %v7153_v0, %v7147_v2  ;;  %v2593_v32 = vmul.f32 %v2337_v57, %v7102_v55  ;;  %v2409_v3 = vadd.f32 1.0, %v5128_v40  ;;  %v7166_v56 = vmul.f32 0.5, %v1247_v28  ;;  %8780 = vst [vmem:[#allocation91_spill] sm:$0xff] %v7170_v37  ;;  %v7181_v55 = vpop.f32.mrb[122].mxu0 }
 0x21c   : > { %v5130_v10 = vpop.eup %5129  ;;  %v7174_v50 = vmul.f32 %v7147_v2, %v7147_v2  ;;  %v3459_v29 = vadd.f32 %v3458_v61, %v3114_v24  ;;  %4376 = vst [vmem:[%s6015_s27 + $0x150] sm:$0xff] %v4758_v63  ;;  %v7179_v26 = vmul.f32 %v7153_v0, %v7153_v0  ;;  %v1829_v1 = vmul.f32 0.70710677, %v1069_v54 }
 0x21d   : > { %v5132_v28 = vpop.eup %5131  ;;  %4412 = vst [vmem:[%s6015_s27 + $0x270] sm:$0xff] %v4794_v5  ;;  %v2805_v57 = vadd.f32 %v2804_v16, %v2593_v32  ;;  %v3115_v19 = vmul.f32 %v2593_v32, %v2593_v32  ;;  %v7185_v40 = vmul.f32 %v2409_v3, %v7114_v39  ;;  %v2338_v37 = vadd.f32 1.0, %v5130_v10 }
 0x21e   : > { %8781 = vst [vmem:[#allocation92_spill] sm:$0xff] %v7174_v50  ;;  %8782 = vst [vmem:[#allocation93_spill] sm:$0xff] %v7179_v26  ;;  %v2410_v43 = vadd.f32 1.0, %v5132_v28  ;;  %5141 = verf.f32 %v1829_v1  ;;  %v1901_v50 = vmul.f32 0.70710677, %v1249_v62  ;;  %v1071_v61 = vadd.f32 %v6613_v38, %v5918_v44  ;;  %v7197_v28 = vpop.f32.mrb[66].mxu1 }
 0x21f   : > { %8783 = vst [vmem:[#allocation94_spill] sm:$0xff] %v7185_v40  ;;  %v5134_v24 = vpop.eup %5133  ;;  %v3327_v63 = vadd.f32 %v3326_v59, %v3115_v19  ;;  %v2594_v26 = vmul.f32 %v2338_v37, %v7125_v6  ;;  %v1573_v0 = vmul.f32 0.5, %v1069_v54  ;;  %v7190_v2 = vmul.f32 0.5, %v1249_v62 }
 0x220   : > { %v5136_v5 = vpop.eup %5135  ;;  %v7193_v16 = vmul.f32 %v2410_v43, %v7131_v17  ;;  %v2339_v39 = vadd.f32 1.0, %v5134_v24  ;;  %5143 = verf.f32 %v1901_v50  ;;  %v1251_v3 = vadd.f32 %v6455_v36, %v5918_v44 }
 0x221   : > { %v2938_v10 = vadd.f32 %v2937_v47, %v2594_v26  ;;  %v3116_v38 = vmul.f32 %v2594_v26, %v2594_v26  ;;  %v4759_v1 = vpack.c.bf16 %v2594_v26, %v2593_v32  ;;  %v2411_v59 = vadd.f32 1.0, %v5136_v5  ;;  %v7212_v5 = vpop.f32.mrb[123].mxu0 }
 0x222   : > { %8784 = vst [vmem:[#allocation95_spill] sm:$0xff] %v7193_v16  ;;  %v5138_v6 = vpop.eup %5137  ;;  %v7201_v54 = vmul.f32 %v7185_v40, %v7185_v40  ;;  %v4795_v17 = vpack.c.bf16 %v7193_v16, %v7185_v40  ;;  %v2595_v62 = vmul.f32 %v2339_v39, %v7144_v30  ;;  %v1830_v43 = vmul.f32 0.70710677, %v1071_v61 }
 0x223   : > { %v3460_v37 = vadd.f32 %v3459_v29, %v3116_v38  ;;  %4377 = vst [vmem:[%s6015_s27 + $0x158] sm:$0xff] %v4759_v1  ;;  %v7207_v36 = vmul.f32 %v2411_v59, %v1643_v34  ;;  %v2340_v47 = vadd.f32 1.0, %v5138_v6  ;;  %v7209_v32 = vmul.f32 0.5, %v1071_v61 }
 0x224   : > { %8785 = vst [vmem:[#allocation96_spill] sm:$0xff] %v7201_v54  ;;  %v5140_v50 = vpop.eup %5139  ;;  %4413 = vst [vmem:[%s6015_s27 + $0x278] sm:$0xff] %v4795_v17  ;;  %v2806_v26 = vadd.f32 %v2805_v57, %v2595_v62  ;;  %v3117_v19 = vmul.f32 %v2595_v62, %v2595_v62  ;;  %5145 = verf.f32 %v1830_v43  ;;  %v1902_v24 = vmul.f32 0.70710677, %v1251_v3  ;;  %v8788_v57 = vld [vmem:[#allocation33_spill] sm:$0xff] }
 0x225   : > { %8786 = vst [vmem:[#allocation97_spill] sm:$0xff] %v7207_v36  ;;  %v7216_v54 = vmul.f32 %v7193_v16, %v7193_v16  ;;  %v2596_v30 = vmul.f32 %v2340_v47, %v7155_v25  ;;  %v2412_v29 = vadd.f32 1.0, %v5140_v50  ;;  %v1075_v34 = vadd.f32 %v6639_v33, %v5914_v41 }
 0x226   : > { %v3328_v61 = vadd.f32 %v3327_v63, %v3117_v19  ;;  %5147 = verf.f32 %v1902_v24  ;;  %v1255_v39 = vadd.f32 %v8788_v57, %v5914_v41  ;;  %v1077_v38 = vadd.f32 %v6645_v20, %v5918_v44 }
 0x227   : > { %8787 = vst [vmem:[#allocation98_spill] sm:$0xff] %v7216_v54  ;;  %v2939_v1 = vadd.f32 %v2938_v10, %v2596_v30  ;;  %v3118_v59 = vmul.f32 %v2596_v30, %v2596_v30  ;;  %v4760_v6 = vpack.c.bf16 %v2596_v30, %v2595_v62  ;;  %v7226_v17 = vmul.f32 %v2412_v29, %v7166_v56  ;;  %v7239_v56 = vpop.f32.mrb[67].mxu1 }
 0x228   : > { %v5142_v25 = vpop.eup %5141  ;;  %v7230_v43 = vmul.f32 %v7207_v36, %v7207_v36  ;;  %v1646_v33 = vmul.f32 0.5, %v1251_v3  ;;  %v1831_v63 = vmul.f32 0.70710677, %v1075_v34  ;;  %v1903_v47 = vmul.f32 0.70710677, %v1255_v39  ;;  %v8791_v3 = vld [vmem:[#allocation34_spill] sm:$0xff] }
 0x229   : > { %8789 = vst [vmem:[#allocation33_spill] sm:$0xff] %v7226_v17  ;;  %v7232_v50 = vadd.f32 %v3460_v37, %v3118_v59  ;;  %4378 = vst [vmem:[%s6015_s27 + $0x160] sm:$0xff] %v4760_v6  ;;  %v4796_v20 = vpack.c.bf16 %v7226_v17, %v7207_v36  ;;  %v2341_v10 = vadd.f32 1.0, %v5142_v25  ;;  %v7237_v62 = vmul.f32 0.5, %v1075_v34 }
 0x22a   : > { %8790 = vst [vmem:[#allocation99_spill] sm:$0xff] %v7230_v43  ;;  %v5144_v19 = vpop.eup %5143  ;;  %5149 = verf.f32 %v1831_v63  ;;  %v7241_v24 = vmul.f32 0.5, %v1255_v39  ;;  %v1832_v30 = vmul.f32 0.70710677, %v1077_v38  ;;  %v1257_v29 = vadd.f32 %v8791_v3, %v5918_v44  ;;  %v8793_v39 = vld [vmem:[#allocation38_spill] sm:$0xff] }
 0x22b   : > { %4414 = vst [vmem:[%s6015_s27 + $0x280] sm:$0xff] %v4796_v20  ;;  %v2597_v37 = vmul.f32 %v2341_v10, %v1573_v0  ;;  %v2413_v57 = vadd.f32 1.0, %v5144_v19  ;;  %5151 = verf.f32 %v1903_v47  ;;  %v1079_v59 = vadd.f32 %v6651_v46, %v5914_v41 }
 0x22c   : > { %v7250_v34 = vmul.f32 %v7226_v17, %v7226_v17  ;;  %5153 = verf.f32 %v1832_v30  ;;  %v1904_v6 = vmul.f32 0.70710677, %v1257_v29  ;;  %v1259_v25 = vadd.f32 %v8793_v39, %v5914_v41  ;;  %v7275_v17 = vpop.f32.mrb[124].mxu0 }
 0x22d   : > { %v7254_v63 = vadd.f32 %v2806_v26, %v2597_v37  ;;  %v3119_v54 = vmul.f32 %v2597_v37, %v2597_v37  ;;  %v7256_v3 = vmul.f32 0.5, %v1077_v38  ;;  %v7258_v0 = vmul.f32 0.5, %v1257_v29  ;;  %v8795_v38 = vld [vmem:[#allocation40_spill] sm:$0xff] }
 0x22e   : > { %8792 = vst [vmem:[#allocation34_spill] sm:$0xff] %v7250_v34  ;;  %v5146_v47 = vpop.eup %5145  ;;  %v7261_v20 = vmul.f32 %v2413_v57, %v7190_v2  ;;  %5155 = verf.f32 %v1904_v6  ;;  %v1833_v46 = vmul.f32 0.70710677, %v1079_v59  ;;  %v1905_v10 = vmul.f32 0.70710677, %v1259_v25  ;;  %v8796_v57 = vld [vmem:[#allocation41_spill] sm:$0xff] }
 0x22f   : > { %v7263_v19 = vadd.f32 %v3328_v61, %v3119_v54  ;;  %v2342_v30 = vadd.f32 1.0, %v5146_v47  ;;  %v7265_v34 = vmul.f32 0.5, %v1079_v59  ;;  %v1081_v26 = vadd.f32 %v6665_v9, %v5918_v44  ;;  %v7277_v54 = vpop.f32.mrb[68].mxu1  ;;  %v7282_v9 = vpop.f32.mrb[125].mxu0 }
 0x230   : > { %8794 = vst [vmem:[#allocation38_spill] sm:$0xff] %v7261_v20  ;;  %v5148_v39 = vpop.eup %5147  ;;  %5157 = verf.f32 %v1833_v46  ;;  %v1261_v29 = vadd.f32 %v8795_v38, %v5918_v44  ;;  %v1085_v2 = vadd.f32 %v6689_v60, %v5914_v41  ;;  %v1265_v6 = vadd.f32 %v8796_v57, %v5914_v41  ;;  %8797 = vst [vmem:[#allocation40_spill] sm:$0xff] %v7282_v9  ;;  %v7284_v46 = vpop.f32.mrb[69].mxu1 }
 0x231   : > { %v2598_v61 = vmul.f32 %v2342_v30, %v7209_v32  ;;  %v2414_v59 = vadd.f32 1.0, %v5148_v39  ;;  %v7280_v47 = vmul.f32 0.5, %v1259_v25  ;;  %5159 = verf.f32 %v1905_v10  ;;  %8798 = vst [vmem:[#allocation41_spill] sm:$0xff] %v7284_v46  ;;  %v7294_v25 = vpop.f32.mrb[126].mxu0  ;;  %v7296_v10 = vpop.f32.mrb[70].mxu1 }
 0x232   : > { %v7288_v60 = vmul.f32 %v7261_v20, %v7261_v20  ;;  %v7290_v38 = vmul.f32 0.5, %v1081_v26  ;;  %v1834_v57 = vmul.f32 0.70710677, %v1081_v26  ;;  %v1906_v16 = vmul.f32 0.70710677, %v1261_v29  ;;  %8801 = vst [vmem:[#allocation102_spill] sm:$0xff] %v7294_v25 }
 0x233   : > { %v2940_v43 = vadd.f32 %v2939_v1, %v2598_v61  ;;  %v3120_v36 = vmul.f32 %v2598_v61, %v2598_v61  ;;  %v4761_v32 = vpack.c.bf16 %v2598_v61, %v2597_v37  ;;  %v7292_v30 = vmul.f32 %v2414_v59, %v1646_v33  ;;  %8802 = vst [vmem:[#allocation103_spill] sm:$0xff] %v7296_v10  ;;  %v7300_v9 = vpop.f32.mrb[127].mxu0 }
 0x234   : > { %8799 = vst [vmem:[#allocation100_spill] sm:$0xff] %v7288_v60  ;;  %v5150_v39 = vpop.eup %5149  ;;  %5161 = verf.f32 %v1834_v57  ;;  %v7298_v40 = vmul.f32 0.5, %v1261_v29  ;;  %v1835_v60 = vmul.f32 0.70710677, %v1085_v2  ;;  %v1907_v46 = vmul.f32 0.70710677, %v1265_v6 }
 0x235   : > { %8800 = vst [vmem:[#allocation101_spill] sm:$0xff] %v7292_v30  ;;  %8803 = vst [vmem:[#allocation104_spill] sm:$0xff] %v7300_v9  ;;  %v5152_v26 = vpop.eup %5151  ;;  %v3462_v1 = vadd.f32 %v7232_v50, %v3120_v36  ;;  %v4797_v33 = vpack.c.bf16 %v7292_v30, %v7261_v20  ;;  %v2343_v37 = vadd.f32 1.0, %v5150_v39  ;;  %v7306_v61 = vmul.f32 0.5, %v1085_v2  ;;  %v8804_v57 = vld [vmem:[#allocation42_spill] sm:$0xff] }
 0x236   : > { %4379 = vst [vmem:[%s6015_s27 + $0x168] sm:$0xff] %v4761_v32  ;;  %v5154_v59 = vpop.eup %5153  ;;  %v2415_v10 = vadd.f32 1.0, %v5152_v26  ;;  %5163 = verf.f32 %v1906_v16  ;;  %v1087_v29 = vadd.f32 %v6697_v42, %v5918_v44  ;;  %v1267_v25 = vadd.f32 %v8804_v57, %v5918_v44  ;;  %v7316_v32 = vpop.f32.mrb[71].mxu1 }
 0x237   : > { %4415 = vst [vmem:[%s6015_s27 + $0x288] sm:$0xff] %v4797_v33  ;;  %v2599_v9 = vmul.f32 %v2343_v37, %v7237_v62  ;;  %v2344_v36 = vadd.f32 1.0, %v5154_v59  ;;  %5165 = verf.f32 %v1835_v60  ;;  %v7314_v50 = vmul.f32 0.5, %v1265_v6 }
 0x238   : > { %v5156_v2 = vpop.eup %5155  ;;  %v7319_v39 = vmul.f32 %v2415_v10, %v7241_v24  ;;  %5167 = verf.f32 %v1907_v46  ;;  %v1836_v16 = vmul.f32 0.70710677, %v1087_v29  ;;  %v1089_v42 = vadd.f32 %v6703_v15, %v5914_v41 }
 0x239   : > { %v2808_v26 = vadd.f32 %v7254_v63, %v2599_v9  ;;  %v3121_v33 = vmul.f32 %v2599_v9, %v2599_v9  ;;  %v2600_v62 = vmul.f32 %v2344_v36, %v7256_v3  ;;  %v2416_v37 = vadd.f32 1.0, %v5156_v2  ;;  %v7335_v2 = vpop.f32.mrb[72].mxu1 }
 0x23a   : > { %8805 = vst [vmem:[#allocation42_spill] sm:$0xff] %v7319_v39  ;;  %v5158_v60 = vpop.eup %5157  ;;  %v7327_v6 = vmul.f32 %v7292_v30, %v7292_v30  ;;  %v7329_v59 = vmul.f32 0.5, %v1087_v29  ;;  %5169 = verf.f32 %v1836_v16  ;;  %v1908_v24 = vmul.f32 0.70710677, %v1267_v25 }
 0x23b   : > { %v5160_v46 = vpop.eup %5159  ;;  %v3330_v10 = vadd.f32 %v7263_v19, %v3121_v33  ;;  %v2941_v15 = vadd.f32 %v2940_v43, %v2600_v62  ;;  %v3122_v57 = vmul.f32 %v2600_v62, %v2600_v62  ;;  %v4762_v63 = vpack.c.bf16 %v2600_v62, %v2599_v9  ;;  %v8809_v43 = vld [vmem:[#allocation45_spill] sm:$0xff]  ;;  %v7344_v9 = vpop.f32.mrb[73].mxu1 }
 0x23c   : > { %8806 = vst [vmem:[#allocation105_spill] sm:$0xff] %v7327_v6  ;;  %v7333_v20 = vmul.f32 %v2416_v37, %v7258_v0  ;;  %v2345_v3 = vadd.f32 1.0, %v5158_v60  ;;  %v2417_v36 = vadd.f32 1.0, %v5160_v46  ;;  %5171 = verf.f32 %v1908_v24  ;;  %8810 = vst [vmem:[#allocation45_spill] sm:$0xff] %v7344_v9  ;;  %v7351_v24 = vpop.f32.mrb[74].mxu1 }
 0x23d   : > { %v7339_v29 = vmul.f32 %v7319_v39, %v7319_v39  ;;  %v3463_v16 = vadd.f32 %v3462_v1, %v3122_v57  ;;  %4380 = vst [vmem:[%s6015_s27 + $0x170] sm:$0xff] %v4762_v63  ;;  %v1837_v6 = vmul.f32 0.70710677, %v1089_v42  ;;  %v1269_v19 = vadd.f32 %v8809_v43, %v5914_v41  ;;  %8811 = vst [vmem:[#allocation108_spill] sm:$0xff] %v7351_v24  ;;  %v7357_v63 = vpop.f32.mrb[75].mxu1 }
 0x23e   : > { %8807 = vst [vmem:[#allocation106_spill] sm:$0xff] %v7333_v20  ;;  %v5162_v0 = vpop.eup %5161  ;;  %v4798_v33 = vpack.c.bf16 %v7333_v20, %v7319_v39  ;;  %v2601_v62 = vmul.f32 %v2345_v3, %v7265_v34  ;;  %v1652_v37 = vmul.f32 0.5, %v1267_v25  ;;  %v7349_v60 = vmul.f32 0.5, %v1089_v42  ;;  %8813 = vst [vmem:[#allocation110_spill] sm:$0xff] %v7357_v63 }
 0x23f   : > { %8808 = vst [vmem:[#allocation107_spill] sm:$0xff] %v7339_v29  ;;  %v7355_v1 = vmul.f32 %v7333_v20, %v7333_v20  ;;  %v2346_v46 = vadd.f32 1.0, %v5162_v0  ;;  %5173 = verf.f32 %v1837_v6  ;;  %v1909_v57 = vmul.f32 0.70710677, %v1269_v19 }
 0x240   : > { %v5164_v43 = vpop.eup %5163  ;;  %4416 = vst [vmem:[%s6015_s27 + $0x290] sm:$0xff] %v4798_v33  ;;  %v2809_v30 = vadd.f32 %v2808_v26, %v2601_v62  ;;  %v3123_v29 = vmul.f32 %v2601_v62, %v2601_v62  ;;  %v7361_v34 = vmul.f32 %v2417_v36, %v7280_v47  ;;  %v1091_v25 = vadd.f32 %v6711_v18, %v5918_v44  ;;  %v8815_v26 = vld [vmem:[#allocation49_spill] sm:$0xff] }
 0x241   : > { %8812 = vst [vmem:[#allocation109_spill] sm:$0xff] %v7355_v1  ;;  %v5166_v42 = vpop.eup %5165  ;;  %v2602_v3 = vmul.f32 %v2346_v46, %v7290_v38  ;;  %v2418_v20 = vadd.f32 1.0, %v5164_v43  ;;  %v7366_v1 = vmul.f32 0.5, %v1269_v19  ;;  %5175 = verf.f32 %v1909_v57 }
 0x242   : > { %8814 = vst [vmem:[#allocation111_spill] sm:$0xff] %v7361_v34  ;;  %v5168_v6 = vpop.eup %5167  ;;  %v3331_v0 = vadd.f32 %v3330_v10, %v3123_v29  ;;  %v2347_v39 = vadd.f32 1.0, %v5166_v42  ;;  %v1838_v33 = vmul.f32 0.70710677, %v1091_v25  ;;  %v1271_v63 = vadd.f32 %v8815_v26, %v5918_v44 }
 0x243   : > { %v2942_v47 = vadd.f32 %v2941_v15, %v2602_v3  ;;  %v3124_v36 = vmul.f32 %v2602_v3, %v2602_v3  ;;  %v4763_v24 = vpack.c.bf16 %v2602_v3, %v2601_v62  ;;  %v7371_v18 = vmul.f32 %v2418_v20, %v7298_v40  ;;  %v7384_v3 = vpop.f32.mrb[76].mxu1 }
 0x244   : > { %v5170_v9 = vpop.eup %5169  ;;  %v7375_v38 = vmul.f32 %v7361_v34, %v7361_v34  ;;  %v2603_v19 = vmul.f32 %v2347_v39, %v7306_v61  ;;  %v2419_v10 = vadd.f32 1.0, %v5168_v6  ;;  %5177 = verf.f32 %v1838_v33  ;;  %8819 = vst [vmem:[#allocation114_spill] sm:$0xff] %v7384_v3  ;;  %v8821_v6 = vld [vmem:[#allocation55_spill] sm:$0xff] }
 0x245   : > { %8816 = vst [vmem:[#allocation49_spill] sm:$0xff] %v7371_v18  ;;  %v3464_v29 = vadd.f32 %v3463_v16, %v3124_v36  ;;  %4381 = vst [vmem:[%s6015_s27 + $0x178] sm:$0xff] %v4763_v24  ;;  %v4799_v15 = vpack.c.bf16 %v7371_v18, %v7361_v34  ;;  %v2348_v46 = vadd.f32 1.0, %v5170_v9  ;;  %v1582_v62 = vmul.f32 0.5, %v1091_v25  ;;  %v8820_v16 = vld [vmem:[#allocation57_spill] sm:$0xff]  ;;  %v7392_v25 = vpop.f32.mrb[77].mxu1 }
 0x246   : > { %8817 = vst [vmem:[#allocation112_spill] sm:$0xff] %v7375_v38  ;;  %v5172_v57 = vpop.eup %5171  ;;  %v2810_v40 = vadd.f32 %v2809_v30, %v2603_v19  ;;  %v3125_v20 = vmul.f32 %v2603_v19, %v2603_v19  ;;  %v7382_v43 = vmul.f32 %v2419_v10, %v7314_v50  ;;  %v1910_v42 = vmul.f32 0.70710677, %v1271_v63  ;;  %8822 = vst [vmem:[#allocation57_spill] sm:$0xff] %v7392_v25  ;;  %v8823_v50 = vld [vmem:[#allocation58_spill] sm:$0xff] }
 0x247   : > { %4417 = vst [vmem:[%s6015_s27 + $0x298] sm:$0xff] %v4799_v15  ;;  %v2604_v61 = vmul.f32 %v2348_v46, %v7329_v59  ;;  %v2420_v39 = vadd.f32 1.0, %v5172_v57  ;;  %v1095_v24 = vadd.f32 %v8820_v16, %v5914_v41  ;;  %v1275_v9 = vadd.f32 %v8821_v6, %v5914_v41 }
 0x248   : > { %8818 = vst [vmem:[#allocation113_spill] sm:$0xff] %v7382_v43  ;;  %v3332_v30 = vadd.f32 %v3331_v0, %v3125_v20  ;;  %v1654_v33 = vmul.f32 0.5, %v1271_v63  ;;  %5179 = verf.f32 %v1910_v42  ;;  %v1097_v26 = vadd.f32 %v8823_v50, %v5918_v44  ;;  %v7406_v42 = vpop.f32.mrb[78].mxu1 }
 0x249   : > { %v5174_v36 = vpop.eup %5173  ;;  %v2943_v10 = vadd.f32 %v2942_v47, %v2604_v61  ;;  %v3126_v15 = vmul.f32 %v2604_v61, %v2604_v61  ;;  %v4764_v59 = vpack.c.bf16 %v2604_v61, %v2603_v19  ;;  %v7396_v46 = vmul.f32 %v2420_v39, %v1652_v37  ;;  %8827 = vst [vmem:[#allocation116_spill] sm:$0xff] %v7406_v42 }
 0x24a   : > { %v7400_v57 = vmul.f32 %v7371_v18, %v7371_v18  ;;  %v7404_v0 = vmul.f32 %v7382_v43, %v7382_v43  ;;  %v2349_v63 = vadd.f32 1.0, %v5174_v36  ;;  %v1839_v20 = vmul.f32 0.70710677, %v1095_v24 }
 0x24b   : > { %8824 = vst [vmem:[#allocation55_spill] sm:$0xff] %v7396_v46  ;;  %v5176_v16 = vpop.eup %5175  ;;  %v3465_v6 = vadd.f32 %v3464_v29, %v3126_v15  ;;  %4382 = vst [vmem:[%s6015_s27 + $0x180] sm:$0xff] %v4764_v59  ;;  %v4800_v37 = vpack.c.bf16 %v7396_v46, %v7382_v43  ;;  %v7411_v47 = vmul.f32 0.5, %v1095_v24  ;;  %v1911_v19 = vmul.f32 0.70710677, %v1275_v9  ;;  %v8829_v29 = vld [vmem:[#allocation5_spill] sm:$0xff] }
 0x24c   : > { %8825 = vst [vmem:[#allocation58_spill] sm:$0xff] %v7400_v57  ;;  %8826 = vst [vmem:[#allocation115_spill] sm:$0xff] %v7404_v0  ;;  %v2605_v61 = vmul.f32 %v2349_v63, %v7349_v60  ;;  %v2421_v39 = vadd.f32 1.0, %v5176_v16  ;;  %5181 = verf.f32 %v1839_v20  ;;  %v7414_v50 = vmul.f32 0.5, %v1275_v9  ;;  %v8828_v57 = vld [vmem:[#allocation3_spill] sm:$0xff] }
 0x24d   : > { %4418 = vst [vmem:[%s6015_s27 + $0x2a0] sm:$0xff] %v4800_v37  ;;  %5183 = verf.f32 %v1911_v19  ;;  %v1840_v36 = vmul.f32 0.70710677, %v1097_v26  ;;  %v1277_v18 = vadd.f32 %v8828_v57, %v5918_v44  ;;  %v1099_v15 = vadd.f32 %v8829_v29, %v5914_v41  ;;  %v8831_v60 = vld [vmem:[#allocation59_spill] sm:$0xff] }
 0x24e   : > { %v5178_v59 = vpop.eup %5177  ;;  %v2811_v0 = vadd.f32 %v2810_v40, %v2605_v61  ;;  %v3127_v24 = vmul.f32 %v2605_v61, %v2605_v61  ;;  %v7422_v38 = vmul.f32 %v2421_v39, %v7366_v1  ;;  %v1279_v63 = vadd.f32 %v8831_v60, %v5914_v41  ;;  %v7438_v60 = vpop.f32.mrb[79].mxu1 }
 0x24f   : > { %v7428_v9 = vmul.f32 %v7396_v46, %v7396_v46  ;;  %v2350_v20 = vadd.f32 1.0, %v5178_v59  ;;  %5185 = verf.f32 %v1840_v36  ;;  %v1912_v16 = vmul.f32 0.70710677, %v1277_v18  ;;  %8834 = vst [vmem:[#allocation117_spill] sm:$0xff] %v7438_v60  ;;  %v8835_v36 = vld [vmem:[#allocation6_spill] sm:$0xff] }
 0x250   : > { %8830 = vst [vmem:[#allocation3_spill] sm:$0xff] %v7422_v38  ;;  %v7430_v57 = vadd.f32 %v3332_v30, %v3127_v24  ;;  %v1584_v37 = vmul.f32 0.5, %v1097_v26  ;;  %v7432_v19 = vmul.f32 0.5, %v1277_v18  ;;  %v1841_v40 = vmul.f32 0.70710677, %v1099_v15 }
 0x251   : > { %8832 = vst [vmem:[#allocation5_spill] sm:$0xff] %v7428_v9  ;;  %v7436_v1 = vmul.f32 %v7422_v38, %v7422_v38  ;;  %v2606_v39 = vmul.f32 %v2350_v20, %v1582_v62  ;;  %5187 = verf.f32 %v1912_v16  ;;  %v1913_v29 = vmul.f32 0.70710677, %v1279_v63 }
 0x252   : > { %v5180_v9 = vpop.eup %5179  ;;  %5189 = verf.f32 %v1841_v40  ;;  %v1101_v30 = vadd.f32 %v8835_v36, %v5918_v44  ;;  %v1281_v18 = vadd.f32 %v6783_v21, %v5918_v44  ;;  %v1105_v26 = vadd.f32 %v6808_v58, %v5914_v41 }
 0x253   : > { %8833 = vst [vmem:[#allocation59_spill] sm:$0xff] %v7436_v1  ;;  %v2944_v59 = vadd.f32 %v2943_v10, %v2606_v39  ;;  %v3128_v24 = vmul.f32 %v2606_v39, %v2606_v39  ;;  %v4765_v46 = vpack.c.bf16 %v2606_v39, %v2605_v61  ;;  %v2422_v62 = vadd.f32 1.0, %v5180_v9  ;;  %v8837_v10 = vld [vmem:[#allocation61_spill] sm:$0xff] }
 0x254   : > { %v1585_v20 = vmul.f32 0.5, %v1099_v15  ;;  %v7446_v16 = vmul.f32 0.5, %v1279_v63  ;;  %5191 = verf.f32 %v1913_v29  ;;  %v1842_v1 = vmul.f32 0.70710677, %v1101_v30  ;;  %v8838_v15 = vld [vmem:[#allocation62_spill] sm:$0xff] }
 0x255   : > { %v3466_v43 = vadd.f32 %v3465_v6, %v3128_v24  ;;  %4383 = vst [vmem:[%s6015_s27 + $0x188] sm:$0xff] %v4765_v46  ;;  %v7449_v40 = vmul.f32 %v2422_v62, %v1654_v33  ;;  %v7451_v36 = vmul.f32 0.5, %v1101_v30  ;;  %v1914_v34 = vmul.f32 0.70710677, %v1281_v18 }
 0x256   : > { %v5182_v21 = vpop.eup %5181  ;;  %5193 = verf.f32 %v1842_v1  ;;  %v1843_v58 = vmul.f32 0.70710677, %v1105_v26  ;;  %v1285_v61 = vadd.f32 %v8837_v10, %v5914_v41  ;;  %v1107_v63 = vadd.f32 %v8838_v15, %v5918_v44  ;;  %v8840_v15 = vld [vmem:[#allocation63_spill] sm:$0xff] }
 0x257   : > { %8836 = vst [vmem:[#allocation6_spill] sm:$0xff] %v7449_v40  ;;  %v5184_v9 = vpop.eup %5183  ;;  %v4801_v6 = vpack.c.bf16 %v7449_v40, %v7422_v38  ;;  %v2351_v46 = vadd.f32 1.0, %v5182_v21  ;;  %v7459_v33 = vmul.f32 0.5, %v1281_v18  ;;  %5195 = verf.f32 %v1914_v34  ;;  %v8841_v34 = vld [vmem:[#allocation64_spill] sm:$0xff] }
 0x258   : > { %v2423_v39 = vadd.f32 1.0, %v5184_v9  ;;  %v7461_v29 = vmul.f32 0.5, %v1105_v26  ;;  %5197 = verf.f32 %v1843_v58  ;;  %v1915_v1 = vmul.f32 0.70710677, %v1285_v61  ;;  %v7475_v58 = vpop.f32.mrb[80].mxu1 }
 0x259   : > { %v5186_v30 = vpop.eup %5185  ;;  %v7465_v24 = vmul.f32 %v7449_v40, %v7449_v40  ;;  %4419 = vst [vmem:[%s6015_s27 + $0x2a8] sm:$0xff] %v4801_v6  ;;  %v2607_v62 = vmul.f32 %v2351_v46, %v7411_v47  ;;  %v1844_v10 = vmul.f32 0.70710677, %v1107_v63  ;;  %v1287_v21 = vadd.f32 %v8840_v15, %v5918_v44  ;;  %8842 = vst [vmem:[#allocation62_spill] sm:$0xff] %v7475_v58  ;;  %v7479_v47 = vpop.f32.mrb[81].mxu1 }
 0x25a   : > { %v2352_v18 = vadd.f32 1.0, %v5186_v30  ;;  %v7471_v38 = vmul.f32 0.5, %v1285_v61  ;;  %5199 = verf.f32 %v1915_v1  ;;  %v1109_v26 = vadd.f32 %v8841_v34, %v5914_v41  ;;  %8843 = vst [vmem:[#allocation63_spill] sm:$0xff] %v7479_v47  ;;  %v7484_v15 = vpop.f32.mrb[82].mxu1 }
 0x25b   : > { %8839 = vst [vmem:[#allocation61_spill] sm:$0xff] %v7465_v24  ;;  %v5188_v9 = vpop.eup %5187  ;;  %v2812_v60 = vadd.f32 %v2811_v0, %v2607_v62  ;;  %v3129_v40 = vmul.f32 %v2607_v62, %v2607_v62  ;;  %v7477_v24 = vmul.f32 0.5, %v1107_v63  ;;  %5201 = verf.f32 %v1844_v10  ;;  %v7489_v42 = vpop.f32.mrb[83].mxu1 }
 0x25c   : > { %v5190_v6 = vpop.eup %5189  ;;  %v7482_v46 = vmul.f32 %v2423_v39, %v7414_v50  ;;  %v2608_v61 = vmul.f32 %v2352_v18, %v1584_v37  ;;  %v2424_v30 = vadd.f32 1.0, %v5188_v9  ;;  %v1916_v1 = vmul.f32 0.70710677, %v1287_v21 }
 0x25d   : > { %v3334_v34 = vadd.f32 %v7430_v57, %v3129_v40  ;;  %v2353_v58 = vadd.f32 1.0, %v5190_v6  ;;  %v7487_v0 = vmul.f32 0.5, %v1287_v21  ;;  %v1845_v63 = vmul.f32 0.70710677, %v1109_v26  ;;  %v8845_v57 = vld [vmem:[#allocation66_spill] sm:$0xff] }
 0x25e   : > { %v5192_v10 = vpop.eup %5191  ;;  %v2945_v47 = vadd.f32 %v2944_v59, %v2608_v61  ;;  %v3130_v25 = vmul.f32 %v2608_v61, %v2608_v61  ;;  %v4766_v3 = vpack.c.bf16 %v2608_v61, %v2607_v62  ;;  %v7492_v50 = vmul.f32 %v2424_v30, %v7432_v19 }
 0x25f   : > { %v2609_v37 = vmul.f32 %v2353_v58, %v1585_v20  ;;  %v2425_v39 = vadd.f32 1.0, %v5192_v10  ;;  %5203 = verf.f32 %v1916_v1  ;;  %v1289_v40 = vadd.f32 %v8845_v57, %v5914_v41 }
 0x260   : > { %8844 = vst [vmem:[#allocation64_spill] sm:$0xff] %v7492_v50  ;;  %v5194_v18 = vpop.eup %5193  ;;  %v7498_v21 = vmul.f32 %v7482_v46, %v7482_v46  ;;  %v3467_v9 = vadd.f32 %v3466_v43, %v3130_v25  ;;  %4384 = vst [vmem:[%s6015_s27 + $0x190] sm:$0xff] %v4766_v3  ;;  %v4802_v59 = vpack.c.bf16 %v7492_v50, %v7482_v46  ;;  %5205 = verf.f32 %v1845_v63 }
 0x261   : > { %v5196_v19 = vpop.eup %5195  ;;  %v2813_v62 = vadd.f32 %v2812_v60, %v2609_v37  ;;  %v3131_v20 = vmul.f32 %v2609_v37, %v2609_v37  ;;  %v2354_v58 = vadd.f32 1.0, %v5194_v18  ;;  %v1589_v6 = vmul.f32 0.5, %v1109_v26 }
 0x262   : > { %v5198_v61 = vpop.eup %5197  ;;  %4420 = vst [vmem:[%s6015_s27 + $0x2b0] sm:$0xff] %v4802_v59  ;;  %v7505_v30 = vmul.f32 %v2425_v39, %v7446_v16  ;;  %v2426_v1 = vadd.f32 1.0, %v5196_v19  ;;  %v1917_v10 = vmul.f32 0.70710677, %v1289_v40  ;;  %v1111_v43 = vadd.f32 %v6863_v53, %v5918_v44 }
 0x263   : > { %v7511_v3 = vmul.f32 %v7492_v50, %v7492_v50  ;;  %v3335_v25 = vadd.f32 %v3334_v34, %v3131_v20  ;;  %v2610_v60 = vmul.f32 %v2354_v58, %v7451_v36  ;;  %v2355_v63 = vadd.f32 1.0, %v5198_v61 }
 0x264   : > { %v5200_v57 = vpop.eup %5199  ;;  %v7515_v26 = vmul.f32 %v2426_v1, %v7459_v33  ;;  %v7517_v16 = vmul.f32 0.5, %v1289_v40  ;;  %5207 = verf.f32 %v1917_v10  ;;  %v1846_v39 = vmul.f32 0.70710677, %v1111_v43  ;;  %v7526_v40 = vpop.f32.mrb[84].mxu1 }
 0x265   : > { %8846 = vst [vmem:[#allocation66_spill] sm:$0xff] %v7511_v3  ;;  %v5202_v18 = vpop.eup %5201  ;;  %v2946_v53 = vadd.f32 %v2945_v47, %v2610_v60  ;;  %v3132_v59 = vmul.f32 %v2610_v60, %v2610_v60  ;;  %v4767_v19 = vpack.c.bf16 %v2610_v60, %v2609_v37  ;;  %v2611_v3 = vmul.f32 %v2355_v63, %v7461_v29  ;;  %v7529_v47 = vpop.f32.mrb[85].mxu1 }
 0x266   : > { %8847 = vst [vmem:[#allocation118_spill] sm:$0xff] %v7515_v26  ;;  %v7522_v36 = vmul.f32 %v7505_v30, %v7505_v30  ;;  %v4803_v34 = vpack.c.bf16 %v7515_v26, %v7505_v30  ;;  %v2427_v33 = vadd.f32 1.0, %v5200_v57  ;;  %v2356_v20 = vadd.f32 1.0, %v5202_v18  ;;  %v7540_v63 = vpop.f32.mrb[86].mxu1 }
 0x267   : > { %v3468_v58 = vadd.f32 %v3467_v9, %v3132_v59  ;;  %4385 = vst [vmem:[%s6015_s27 + $0x198] sm:$0xff] %v4767_v19  ;;  %v2814_v61 = vadd.f32 %v2813_v62, %v2611_v3  ;;  %v3133_v1 = vmul.f32 %v2611_v3, %v2611_v3  ;;  %5209 = verf.f32 %v1846_v39 }
 0x268   : > { %8848 = vst [vmem:[#allocation119_spill] sm:$0xff] %v7522_v36  ;;  %4421 = vst [vmem:[%s6015_s27 + $0x2b8] sm:$0xff] %v4803_v34  ;;  %v7533_v29 = vmul.f32 %v2427_v33, %v7471_v38  ;;  %v2612_v37 = vmul.f32 %v2356_v20, %v7477_v24  ;;  %v1291_v10 = vadd.f32 %v6872_v12, %v5918_v44  ;;  %v1590_v39 = vmul.f32 0.5, %v1111_v43 }
 0x269   : > { %v1115_v60 = vadd.f32 %v6927_v14, %v5914_v41  ;;  %v5204_v9 = vpop.eup %5203  ;;  %v7544_v62 = vmul.f32 %v7515_v26, %v7515_v26  ;;  %v3336_v57 = vadd.f32 %v3335_v25, %v3133_v1  ;;  %v1295_v38 = vadd.f32 %v6929_v52, %v5914_v41 }
 0x26a   : > { %8849 = vst [vmem:[#allocation120_spill] sm:$0xff] %v7533_v29  ;;  %v5206_v24 = vpop.eup %5205  ;;  %v2947_v18 = vadd.f32 %v2946_v53, %v2612_v37  ;;  %v3134_v59 = vmul.f32 %v2612_v37, %v2612_v37  ;;  %v4768_v12 = vpack.c.bf16 %v2612_v37, %v2611_v3  ;;  %v1117_v14 = vadd.f32 %v6935_v31, %v5918_v44  ;;  %v7562_v37 = vpop.f32.mrb[87].mxu1 }
 0x26b   : > { %8850 = vst [vmem:[#allocation121_spill] sm:$0xff] %v7544_v62  ;;  %v2428_v19 = vadd.f32 1.0, %v5204_v9  ;;  %v2357_v34 = vadd.f32 1.0, %v5206_v24  ;;  %v1918_v33 = vmul.f32 0.70710677, %v1291_v10  ;;  %v1297_v20 = vadd.f32 %v6937_v23, %v5918_v44 }
 0x26c   : > { %v7554_v25 = vmul.f32 %v7533_v29, %v7533_v29  ;;  %v3469_v43 = vadd.f32 %v3468_v58, %v3134_v59  ;;  %4386 = vst [vmem:[%s6015_s27 + $0x1a0] sm:$0xff] %v4768_v12  ;;  %v7557_v52 = vmul.f32 0.5, %v1291_v10  ;;  %v1847_v53 = vmul.f32 0.70710677, %v1115_v60 }
 0x26d   : > { %v7560_v3 = vmul.f32 %v2428_v19, %v7487_v0  ;;  %v2613_v1 = vmul.f32 %v2357_v34, %v1589_v6  ;;  %5211 = verf.f32 %v1918_v33  ;;  %v1919_v31 = vmul.f32 0.70710677, %v1295_v38 }
 0x26e   : > { %8851 = vst [vmem:[#allocation122_spill] sm:$0xff] %v7554_v25  ;;  %v5208_v9 = vpop.eup %5207  ;;  %v1591_v23 = vmul.f32 0.5, %v1115_v60  ;;  %5213 = verf.f32 %v1847_v53  ;;  %v7564_v24 = vmul.f32 0.5, %v1295_v38  ;;  %v1848_v62 = vmul.f32 0.70710677, %v1117_v14  ;;  %v8853_v38 = vld [vmem:[#allocation12_spill] sm:$0xff] }
 0x26f   : > { %8852 = vst [vmem:[#allocation123_spill] sm:$0xff] %v7560_v3  ;;  %v4804_v58 = vpack.c.bf16 %v7560_v3, %v7533_v29  ;;  %v7568_v10 = vadd.f32 %v2814_v61, %v2613_v1  ;;  %v3135_v59 = vmul.f32 %v2613_v1, %v2613_v1  ;;  %v7570_v0 = vmul.f32 0.5, %v1117_v14  ;;  %v8854_v61 = vld [vmem:[#allocation14_spill] sm:$0xff] }
 0x270   : > { %v2429_v6 = vadd.f32 1.0, %v5208_v9  ;;  %5215 = verf.f32 %v1919_v31  ;;  %v1920_v12 = vmul.f32 0.70710677, %v1297_v20  ;;  %v1119_v19 = vadd.f32 %v6948_v35, %v5914_v41 }
 0x271   : > { %v5210_v34 = vpop.eup %5209  ;;  %4422 = vst [vmem:[%s6015_s27 + $0x2c0] sm:$0xff] %v4804_v58  ;;  %v7575_v60 = vadd.f32 %v3336_v57, %v3135_v59  ;;  %5217 = verf.f32 %v1848_v62  ;;  %v1299_v33 = vadd.f32 %v8853_v38, %v5914_v41  ;;  %v1121_v53 = vadd.f32 %v8854_v61, %v5918_v44  ;;  %v8857_v61 = vld [vmem:[#allocation73_spill] sm:$0xff] }
 0x272   : > { %v7583_v14 = vmul.f32 %v7560_v3, %v7560_v3  ;;  %v2358_v31 = vadd.f32 1.0, %v5210_v34  ;;  %v7585_v9 = vmul.f32 0.5, %v1297_v20  ;;  %5219 = verf.f32 %v1920_v12  ;;  %v8858_v12 = vld [vmem:[#allocation76_spill] sm:$0xff] }
 0x273   : > { %v7588_v35 = vmul.f32 %v2429_v6, %v7517_v16  ;;  %v7590_v57 = vmul.f32 0.5, %v1119_v19  ;;  %v1849_v62 = vmul.f32 0.70710677, %v1119_v19  ;;  %v1921_v58 = vmul.f32 0.70710677, %v1299_v33  ;;  %v8859_v6 = vld [vmem:[#allocation77_spill] sm:$0xff] }
 0x274   : > { %8855 = vst [vmem:[#allocation12_spill] sm:$0xff] %v7583_v14  ;;  %v2614_v59 = vmul.f32 %v2358_v31, %v1590_v39  ;;  %v7592_v38 = vmul.f32 0.5, %v1299_v33  ;;  %v1850_v26 = vmul.f32 0.70710677, %v1121_v53  ;;  %v1301_v25 = vadd.f32 %v8857_v61, %v5918_v44  ;;  %v7602_v33 = vpop.f32.mrb[88].mxu1 }
 0x275   : > { %8856 = vst [vmem:[#allocation14_spill] sm:$0xff] %v7588_v35  ;;  %5221 = verf.f32 %v1849_v62  ;;  %v1125_v20 = vadd.f32 %v7001_v22, %v5914_v41  ;;  %v1305_v16 = vadd.f32 %v8858_v12, %v5914_v41  ;;  %v1127_v34 = vadd.f32 %v8859_v6, %v5918_v44  ;;  %v7610_v3 = vpop.f32.mrb[89].mxu1 }
 0x276   : > { %v2948_v19 = vadd.f32 %v2947_v18, %v2614_v59  ;;  %v3136_v14 = vmul.f32 %v2614_v59, %v2614_v59  ;;  %v4769_v39 = vpack.c.bf16 %v2614_v59, %v2613_v1  ;;  %5223 = verf.f32 %v1921_v58  ;;  %8861 = vst [vmem:[#allocation76_spill] sm:$0xff] %v7610_v3  ;;  %v7615_v58 = vpop.f32.mrb[90].mxu1 }
 0x277   : > { %v5212_v31 = vpop.eup %5211  ;;  %v7606_v62 = vmul.f32 %v7588_v35, %v7588_v35  ;;  %v7608_v61 = vmul.f32 0.5, %v1121_v53  ;;  %5225 = verf.f32 %v1850_v26  ;;  %v1922_v22 = vmul.f32 0.70710677, %v1301_v25  ;;  %8862 = vst [vmem:[#allocation77_spill] sm:$0xff] %v7615_v58 }
 0x278   : > { %v5214_v12 = vpop.eup %5213  ;;  %v3470_v50 = vadd.f32 %v3469_v43, %v3136_v14  ;;  %4387 = vst [vmem:[%s6015_s27 + $0x1a8] sm:$0xff] %v4769_v39  ;;  %v2430_v18 = vadd.f32 1.0, %v5212_v31  ;;  %v7613_v6 = vmul.f32 0.5, %v1301_v25  ;;  %v1851_v1 = vmul.f32 0.70710677, %v1125_v20  ;;  %v8864_v43 = vld [vmem:[#allocation78_spill] sm:$0xff] }
 0x279   : > { %8860 = vst [vmem:[#allocation73_spill] sm:$0xff] %v7606_v62  ;;  %v2359_v59 = vadd.f32 1.0, %v5214_v12  ;;  %5227 = verf.f32 %v1922_v22  ;;  %v7617_v36 = vmul.f32 0.5, %v1125_v20  ;;  %v1923_v62 = vmul.f32 0.70710677, %v1305_v16  ;;  %v8865_v12 = vld [vmem:[#allocation79_spill] sm:$0xff] }
 0x27a   : > { %v5216_v53 = vpop.eup %5215  ;;  %v7620_v26 = vmul.f32 %v2430_v18, %v7557_v52  ;;  %5229 = verf.f32 %v1851_v1  ;;  %v1852_v29 = vmul.f32 0.70710677, %v1127_v34  ;;  %v1307_v14 = vadd.f32 %v8864_v43, %v5918_v44 }
 0x27b   : > { %v5218_v39 = vpop.eup %5217  ;;  %v2615_v25 = vmul.f32 %v2359_v59, %v1591_v23  ;;  %v2431_v31 = vadd.f32 1.0, %v5216_v53  ;;  %5231 = verf.f32 %v1923_v62  ;;  %v1129_v22 = vadd.f32 %v8865_v12, %v5914_v41  ;;  %v7634_v59 = vpop.f32.mrb[91].mxu1 }
 0x27c   : > { %8863 = vst [vmem:[#allocation124_spill] sm:$0xff] %v7620_v26  ;;  %v5220_v20 = vpop.eup %5219  ;;  %v4805_v58 = vpack.c.bf16 %v7620_v26, %v7588_v35  ;;  %v2360_v3 = vadd.f32 1.0, %v5218_v39  ;;  %v7628_v52 = vmul.f32 0.5, %v1305_v16  ;;  %5233 = verf.f32 %v1852_v29  ;;  %8866 = vst [vmem:[#allocation78_spill] sm:$0xff] %v7634_v59 }
 0x27d   : > { %v2816_v18 = vadd.f32 %v7568_v10, %v2615_v25  ;;  %v3137_v1 = vmul.f32 %v2615_v25, %v2615_v25  ;;  %v7632_v43 = vmul.f32 %v2431_v31, %v7564_v24  ;;  %v2432_v23 = vadd.f32 1.0, %v5220_v20 }
 0x27e   : > { %v7638_v62 = vmul.f32 %v7620_v26, %v7620_v26  ;;  %4423 = vst [vmem:[%s6015_s27 + $0x2c8] sm:$0xff] %v4805_v58  ;;  %v2616_v53 = vmul.f32 %v2360_v3, %v7570_v0  ;;  %v1596_v39 = vmul.f32 0.5, %v1127_v34  ;;  %v1924_v16 = vmul.f32 0.70710677, %v1307_v14 }
 0x27f   : > { %v5222_v12 = vpop.eup %5221  ;;  %v3338_v29 = vadd.f32 %v7575_v60, %v3137_v1  ;;  %v7644_v10 = vmul.f32 %v2432_v23, %v7585_v9  ;;  %v7646_v24 = vmul.f32 0.5, %v1307_v14  ;;  %v1853_v31 = vmul.f32 0.70710677, %v1129_v22 }
 0x280   : > { %8867 = vst [vmem:[#allocation79_spill] sm:$0xff] %v7638_v62  ;;  %v5224_v20 = vpop.eup %5223  ;;  %v2949_v59 = vadd.f32 %v2948_v19, %v2616_v53  ;;  %v3138_v26 = vmul.f32 %v2616_v53, %v2616_v53  ;;  %v4770_v62 = vpack.c.bf16 %v2616_v53, %v2615_v25  ;;  %v2361_v58 = vadd.f32 1.0, %v5222_v12 }
 0x281   : > { %v5226_v35 = vpop.eup %5225  ;;  %v4806_v3 = vpack.c.bf16 %v7644_v10, %v7632_v43  ;;  %v2433_v0 = vadd.f32 1.0, %v5224_v20  ;;  %5235 = verf.f32 %v1924_v16  ;;  %v7650_v34 = vmul.f32 0.5, %v1129_v22 }
 0x282   : > { %v3471_v60 = vadd.f32 %v3470_v50, %v3138_v26  ;;  %4388 = vst [vmem:[%s6015_s27 + $0x1b0] sm:$0xff] %v4770_v62  ;;  %v2617_v9 = vmul.f32 %v2361_v58, %v7590_v57  ;;  %v2362_v14 = vadd.f32 1.0, %v5226_v35  ;;  %5237 = verf.f32 %v1853_v31 }
 0x283   : > { %v5228_v1 = vpop.eup %5227  ;;  %v7656_v19 = vmul.f32 %v7632_v43, %v7632_v43  ;;  %4424 = vst [vmem:[%s6015_s27 + $0x2d0] sm:$0xff] %v4806_v3  ;;  %v7660_v25 = vmul.f32 %v2433_v0, %v7592_v38  ;;  %v1309_v23 = vadd.f32 %v7025_v27, %v5914_v41  ;;  %v1131_v50 = vadd.f32 %v7049_v7, %v5918_v44  ;;  %v7673_v3 = vpop.f32.mrb[92].mxu1 }
 0x284   : > { %v5230_v26 = vpop.eup %5229  ;;  %v2817_v22 = vadd.f32 %v2816_v18, %v2617_v9  ;;  %v3139_v57 = vmul.f32 %v2617_v9, %v2617_v9  ;;  %v2618_v35 = vmul.f32 %v2362_v14, %v7608_v61  ;;  %v2434_v62 = vadd.f32 1.0, %v5228_v1 }
 0x285   : > { %v5232_v53 = vpop.eup %5231  ;;  %v7669_v16 = vmul.f32 %v7644_v10, %v7644_v10  ;;  %v2363_v12 = vadd.f32 1.0, %v5230_v26  ;;  %v1925_v38 = vmul.f32 0.70710677, %v1309_v23  ;;  %v1311_v27 = vadd.f32 %v7059_v48, %v5918_v44  ;;  %v7679_v26 = vpop.f32.mrb[93].mxu1 }
 0x286   : > { %v5234_v31 = vpop.eup %5233  ;;  %v3339_v20 = vadd.f32 %v3338_v29, %v3139_v57  ;;  %v2950_v7 = vadd.f32 %v2949_v59, %v2618_v35  ;;  %v3140_v58 = vmul.f32 %v2618_v35, %v2618_v35  ;;  %v4771_v18 = vpack.c.bf16 %v2618_v35, %v2617_v9  ;;  %8869 = vst [vmem:[#allocation126_spill] sm:$0xff] %v7679_v26  ;;  %v7686_v29 = vpop.f32.mrb[94].mxu1 }
 0x287   : > { %8868 = vst [vmem:[#allocation125_spill] sm:$0xff] %v7669_v16  ;;  %v7676_v61 = vmul.f32 %v2434_v62, %v7613_v6  ;;  %v2619_v0 = vmul.f32 %v2363_v12, %v7617_v36  ;;  %v2435_v14 = vadd.f32 1.0, %v5232_v53  ;;  %v2364_v1 = vadd.f32 1.0, %v5234_v31  ;;  %8870 = vst [vmem:[#allocation127_spill] sm:$0xff] %v7686_v29  ;;  %v7690_v35 = vpop.f32.mrb[95].mxu1 }
 0x288   : > { %v7683_v16 = vmul.f32 %v7660_v25, %v7660_v25  ;;  %v3472_v48 = vadd.f32 %v3471_v60, %v3140_v58  ;;  %4389 = vst [vmem:[%s6015_s27 + $0x1b8] sm:$0xff] %v4771_v18  ;;  %5239 = verf.f32 %v1925_v38  ;;  %v1854_v59 = vmul.f32 0.70710677, %v1131_v50  ;;  %8871 = vst [vmem:[#allocation128_spill] sm:$0xff] %v7690_v35  ;;  %v7742_v26 = vpop.f32.mrb[96].mxu1 }
 0x289   : > { %v4807_v6 = vpack.c.bf16 %v7676_v61, %v7660_v25  ;;  %v2818_v9 = vadd.f32 %v2817_v22, %v2619_v0  ;;  %v3141_v36 = vmul.f32 %v2619_v0, %v2619_v0  ;;  %v1669_v57 = vmul.f32 0.5, %v1309_v23 }
 0x28a   : > { %v7693_v62 = vmul.f32 %v2435_v14, %v7628_v52  ;;  %v2620_v53 = vmul.f32 %v2364_v1, %v1596_v39  ;;  %v1598_v12 = vmul.f32 0.5, %v1131_v50  ;;  %5241 = verf.f32 %v1854_v59 }
 0x28b   : > { %v5236_v60 = vpop.eup %5235  ;;  %4425 = vst [vmem:[%s6015_s27 + $0x2d8] sm:$0xff] %v4807_v6  ;;  %v3340_v38 = vadd.f32 %v3339_v20, %v3141_v36  ;;  %v1926_v31 = vmul.f32 0.70710677, %v1311_v27  ;;  %v1135_v58 = vadd.f32 %v7098_v11, %v5914_v41  ;;  %v1315_v22 = vadd.f32 %v7100_v49, %v5914_v41 }
 0x28c   : > { %v5238_v23 = vpop.eup %5237  ;;  %v7702_v18 = vmul.f32 %v7676_v61, %v7676_v61  ;;  %v2951_v52 = vadd.f32 %v2950_v7, %v2620_v53  ;;  %v3142_v39 = vmul.f32 %v2620_v53, %v2620_v53  ;;  %v4772_v50 = vpack.c.bf16 %v2620_v53, %v2619_v0  ;;  %v8874_v53 = vld [vmem:[#allocation87_spill] sm:$0xff] }
 0x28d   : > { %v2436_v14 = vadd.f32 1.0, %v5236_v60  ;;  %v2365_v1 = vadd.f32 1.0, %v5238_v23  ;;  %v1670_v59 = vmul.f32 0.5, %v1311_v27  ;;  %5243 = verf.f32 %v1926_v31 }
 0x28e   : > { %8872 = vst [vmem:[#allocation129_spill] sm:$0xff] %v7702_v18  ;;  %v7706_v20 = vmul.f32 %v7693_v62, %v7693_v62  ;;  %v3473_v11 = vadd.f32 %v3472_v48, %v3142_v39  ;;  %4390 = vst [vmem:[%s6015_s27 + $0x1c0] sm:$0xff] %v4772_v50  ;;  %v1855_v6 = vmul.f32 0.70710677, %v1135_v58  ;;  %v1927_v49 = vmul.f32 0.70710677, %v1315_v22 }
 0x28f   : > { %v7710_v36 = vmul.f32 %v2436_v14, %v7646_v24  ;;  %v2621_v35 = vmul.f32 %v2365_v1, %v7650_v34  ;;  %v1137_v7 = vadd.f32 %v7104_v13, %v5918_v44  ;;  %v1317_v27 = vadd.f32 %v7110_v8, %v5918_v44 }
 0x290   : > { %v7717_v0 = vmul.f32 0.5, %v1135_v58  ;;  %5245 = verf.f32 %v1855_v6  ;;  %v1139_v48 = vadd.f32 %v7116_v51, %v5914_v41  ;;  %v1319_v60 = vadd.f32 %v8874_v53, %v5914_v41  ;;  %v8876_v51 = vld [vmem:[#allocation23_spill] sm:$0xff] }
 0x291   : > { %8873 = vst [vmem:[#allocation130_spill] sm:$0xff] %v7710_v36  ;;  %v4808_v24 = vpack.c.bf16 %v7710_v36, %v7693_v62  ;;  %v7725_v34 = vadd.f32 %v2818_v9, %v2621_v35  ;;  %v3143_v31 = vmul.f32 %v2621_v35, %v2621_v35  ;;  %v7727_v23 = vmul.f32 0.5, %v1315_v22  ;;  %8877 = vst [vmem:[#allocation23_spill] sm:$0xff] %v7742_v26 }
 0x292   : > { %v5240_v13 = vpop.eup %5239  ;;  %v7731_v8 = vmul.f32 %v7710_v36, %v7710_v36  ;;  %5247 = verf.f32 %v1927_v49  ;;  %v1856_v58 = vmul.f32 0.70710677, %v1137_v7  ;;  %v1141_v39 = vadd.f32 %v8876_v51, %v5918_v44 }
 0x293   : > { %4426 = vst [vmem:[%s6015_s27 + $0x2e0] sm:$0xff] %v4808_v24  ;;  %v7736_v50 = vadd.f32 %v3340_v38, %v3143_v31  ;;  %v2437_v14 = vadd.f32 1.0, %v5240_v13  ;;  %v7738_v1 = vmul.f32 0.5, %v1137_v7  ;;  %v1928_v9 = vmul.f32 0.70710677, %v1317_v27  ;;  %v7748_v38 = vpop.f32.mrb[97].mxu1 }
 0x294   : > { %8875 = vst [vmem:[#allocation87_spill] sm:$0xff] %v7731_v8  ;;  %v5242_v6 = vpop.eup %5241  ;;  %5249 = verf.f32 %v1856_v58  ;;  %v7740_v22 = vmul.f32 0.5, %v1317_v27  ;;  %v1857_v53 = vmul.f32 0.70710677, %v1139_v48  ;;  %v1929_v29 = vmul.f32 0.70710677, %v1319_v60 }
 0x295   : > { %v7744_v49 = vmul.f32 %v2437_v14, %v1669_v57  ;;  %v2366_v8 = vadd.f32 1.0, %v5242_v6  ;;  %5251 = verf.f32 %v1928_v9  ;;  %v7746_v51 = vmul.f32 0.5, %v1139_v48  ;;  %8878 = vst [vmem:[#allocation131_spill] sm:$0xff] %v7748_v38  ;;  %v8879_v24 = vld [vmem:[#allocation24_spill] sm:$0xff]  ;;  %v7758_v48 = vpop.f32.mrb[98].mxu1 }
 0x296   : > { %5253 = verf.f32 %v1857_v53  ;;  %v1858_v7 = vmul.f32 0.70710677, %v1141_v39  ;;  %v1321_v31 = vadd.f32 %v8879_v24, %v5918_v44  ;;  %v1145_v27 = vadd.f32 %v7159_v45, %v5914_v41  ;;  %8880 = vst [vmem:[#allocation24_spill] sm:$0xff] %v7758_v48  ;;  %v7773_v26 = vpop.f32.mrb[99].mxu1 }
 0x297   : > { %v5244_v13 = vpop.eup %5243  ;;  %v2622_v58 = vmul.f32 %v2366_v8, %v1598_v12  ;;  %v7754_v18 = vmul.f32 0.5, %v1319_v60  ;;  %5255 = verf.f32 %v1929_v29  ;;  %v1325_v57 = vadd.f32 %v7161_v4, %v5914_v41 }
 0x298   : > { %v2438_v14 = vadd.f32 1.0, %v5244_v13  ;;  %v7760_v9 = vmul.f32 0.5, %v1141_v39  ;;  %5257 = verf.f32 %v1858_v7  ;;  %v1930_v6 = vmul.f32 0.70710677, %v1321_v31  ;;  %v8883_v13 = vld [vmem:[#allocation25_spill] sm:$0xff] }
 0x299   : > { %v7764_v53 = vmul.f32 %v7744_v49, %v7744_v49  ;;  %v2952_v45 = vadd.f32 %v2951_v52, %v2622_v58  ;;  %v3144_v12 = vmul.f32 %v2622_v58, %v2622_v58  ;;  %v4773_v60 = vpack.c.bf16 %v2622_v58, %v2621_v35  ;;  %8884 = vst [vmem:[#allocation25_spill] sm:$0xff] %v7773_v26 }
 0x29a   : > { %v5246_v8 = vpop.eup %5245  ;;  %v7766_v29 = vmul.f32 %v2438_v14, %v1670_v59  ;;  %v7768_v24 = vmul.f32 0.5, %v1321_v31  ;;  %5259 = verf.f32 %v1930_v6  ;;  %v1859_v4 = vmul.f32 0.70710677, %v1145_v27  ;;  %v8885_v31 = vld [vmem:[#allocation91_spill] sm:$0xff] }
 0x29b   : > { %8881 = vst [vmem:[#allocation132_spill] sm:$0xff] %v7764_v53  ;;  %v3474_v48 = vadd.f32 %v3473_v11, %v3144_v12  ;;  %4391 = vst [vmem:[%s6015_s27 + $0x1c8] sm:$0xff] %v4773_v60  ;;  %v2367_v39 = vadd.f32 1.0, %v5246_v8  ;;  %v1931_v7 = vmul.f32 0.70710677, %v1325_v57  ;;  %v1147_v38 = vadd.f32 %v8883_v13, %v5918_v44 }
 0x29c   : > { %8882 = vst [vmem:[#allocation133_spill] sm:$0xff] %v7766_v29  ;;  %v5248_v52 = vpop.eup %5247  ;;  %v4809_v35 = vpack.c.bf16 %v7766_v29, %v7744_v49  ;;  %v7777_v59 = vmul.f32 0.5, %v1145_v27  ;;  %5261 = verf.f32 %v1859_v4  ;;  %v1327_v58 = vadd.f32 %v8885_v31, %v5918_v44 }
 0x29d   : > { %v2623_v11 = vmul.f32 %v2367_v39, %v7717_v0  ;;  %v2439_v14 = vadd.f32 1.0, %v5248_v52  ;;  %v7782_v6 = vmul.f32 0.5, %v1325_v57  ;;  %5263 = verf.f32 %v1931_v7 }
 0x29e   : > { %v5250_v12 = vpop.eup %5249  ;;  %v7786_v60 = vmul.f32 %v7766_v29, %v7766_v29  ;;  %4427 = vst [vmem:[%s6015_s27 + $0x2e8] sm:$0xff] %v4809_v35  ;;  %v1860_v8 = vmul.f32 0.70710677, %v1147_v38  ;;  %v1932_v13 = vmul.f32 0.70710677, %v1327_v58  ;;  %v1149_v27 = vadd.f32 %v7181_v55, %v5914_v41 }
 0x29f   : > { %v5252_v4 = vpop.eup %5251  ;;  %v2820_v31 = vadd.f32 %v7725_v34, %v2623_v11  ;;  %v3145_v26 = vmul.f32 %v2623_v11, %v2623_v11  ;;  %v2368_v0 = vadd.f32 1.0, %v5250_v12  ;;  %v7792_v39 = vmul.f32 0.5, %v1147_v38 }
 0x2a0   : > { %8886 = vst [vmem:[#allocation91_spill] sm:$0xff] %v7786_v60  ;;  %v5254_v57 = vpop.eup %5253  ;;  %v7795_v7 = vmul.f32 %v2439_v14, %v7727_v23  ;;  %v2440_v52 = vadd.f32 1.0, %v5252_v4  ;;  %5265 = verf.f32 %v1860_v8  ;;  %v7797_v60 = vmul.f32 0.5, %v1327_v58  ;;  %v7806_v14 = vpop.f32.mrb[100].mxu1 }
 0x2a1   : > { %v5256_v35 = vpop.eup %5255  ;;  %v3342_v29 = vadd.f32 %v7736_v50, %v3145_v26  ;;  %v2624_v55 = vmul.f32 %v2368_v0, %v7738_v1  ;;  %v2369_v36 = vadd.f32 1.0, %v5254_v57  ;;  %v1861_v53 = vmul.f32 0.70710677, %v1149_v27  ;;  %8887 = vst [vmem:[#allocation134_spill] sm:$0xff] %v7806_v14  ;;  %v7809_v50 = vpop.f32.mrb[101].mxu1 }
 0x2a2   : > { %v5258_v34 = vpop.eup %5257  ;;  %v7802_v12 = vmul.f32 %v2440_v52, %v7740_v22  ;;  %v2441_v38 = vadd.f32 1.0, %v5256_v35  ;;  %5267 = verf.f32 %v1932_v13  ;;  %v1329_v23 = vadd.f32 %v7197_v28, %v5914_v41  ;;  %8888 = vst [vmem:[#allocation135_spill] sm:$0xff] %v7809_v50  ;;  %v7818_v28 = vpop.f32.mrb[102].mxu1 }
 0x2a3   : > { %v2953_v58 = vadd.f32 %v2952_v45, %v2624_v55  ;;  %v3146_v8 = vmul.f32 %v2624_v55, %v2624_v55  ;;  %v4774_v4 = vpack.c.bf16 %v2624_v55, %v2623_v11  ;;  %v2625_v26 = vmul.f32 %v2369_v36, %v7746_v51  ;;  %8889 = vst [vmem:[#allocation136_spill] sm:$0xff] %v7818_v28 }
 0x2a4   : > { %v5260_v1 = vpop.eup %5259  ;;  %v4810_v22 = vpack.c.bf16 %v7802_v12, %v7795_v7  ;;  %v7814_v0 = vmul.f32 %v2441_v38, %v7754_v18  ;;  %v2370_v13 = vadd.f32 1.0, %v5258_v34  ;;  %v7816_v57 = vmul.f32 0.5, %v1149_v27 }
 0x2a5   : > { %v3475_v45 = vadd.f32 %v3474_v48, %v3146_v8  ;;  %4392 = vst [vmem:[%s6015_s27 + $0x1d0] sm:$0xff] %v4774_v4  ;;  %v2821_v11 = vadd.f32 %v2820_v31, %v2625_v26  ;;  %v3147_v52 = vmul.f32 %v2625_v26, %v2625_v26  ;;  %v2442_v36 = vadd.f32 1.0, %v5260_v1  ;;  %v7834_v8 = vpop.f32.mrb[103].mxu1 }
 0x2a6   : > { %v5262_v51 = vpop.eup %5261  ;;  %v7823_v35 = vmul.f32 %v7795_v7, %v7795_v7  ;;  %v7827_v55 = vmul.f32 %v7802_v12, %v7802_v12  ;;  %4428 = vst [vmem:[%s6015_s27 + $0x2f0] sm:$0xff] %v4810_v22  ;;  %v2626_v18 = vmul.f32 %v2370_v13, %v7760_v9  ;;  %5269 = verf.f32 %v1861_v53  ;;  %8892 = vst [vmem:[#allocation139_spill] sm:$0xff] %v7834_v8 }
 0x2a7   : > { %v5264_v27 = vpop.eup %5263  ;;  %v3343_v48 = vadd.f32 %v3342_v29, %v3147_v52  ;;  %v7832_v31 = vmul.f32 %v2442_v36, %v7768_v24  ;;  %v2371_v34 = vadd.f32 1.0, %v5262_v51  ;;  %v1933_v38 = vmul.f32 0.70710677, %v1329_v23 }
 0x2a8   : > { %8890 = vst [vmem:[#allocation137_spill] sm:$0xff] %v7827_v55  ;;  %v2954_v4 = vadd.f32 %v2953_v58, %v2626_v18  ;;  %v3148_v1 = vmul.f32 %v2626_v18, %v2626_v18  ;;  %v4775_v28 = vpack.c.bf16 %v2626_v18, %v2625_v26  ;;  %v2443_v50 = vadd.f32 1.0, %v5264_v27 }
 0x2a9   : > { %8891 = vst [vmem:[#allocation138_spill] sm:$0xff] %v7832_v31  ;;  %v7838_v22 = vmul.f32 %v7814_v0, %v7814_v0  ;;  %v4811_v9 = vpack.c.bf16 %v7832_v31, %v7814_v0  ;;  %v2627_v53 = vmul.f32 %v2371_v34, %v7777_v59  ;;  %5271 = verf.f32 %v1933_v38  ;;  %v7863_v34 = vpop.f32.mrb[104].mxu1 }
 0x2aa   : > { %v5266_v29 = vpop.eup %5265  ;;  %v3476_v24 = vadd.f32 %v3475_v45, %v3148_v1  ;;  %4393 = vst [vmem:[%s6015_s27 + $0x1d8] sm:$0xff] %v4775_v28  ;;  %v7845_v13 = vmul.f32 %v2443_v50, %v7782_v6  ;;  %v1151_v58 = vadd.f32 %v7212_v5, %v5918_v44  ;;  %v1331_v26 = vadd.f32 %v7239_v56, %v5918_v44 }
 0x2ab   : > { %4429 = vst [vmem:[%s6015_s27 + $0x2f8] sm:$0xff] %v4811_v9  ;;  %v2822_v52 = vadd.f32 %v2821_v11, %v2627_v53  ;;  %v3149_v36 = vmul.f32 %v2627_v53, %v2627_v53  ;;  %v2372_v51 = vadd.f32 1.0, %v5266_v29  ;;  %v1155_v59 = vadd.f32 %v7275_v17, %v5914_v41  ;;  %8895 = vst [vmem:[#allocation142_spill] sm:$0xff] %v7863_v34  ;;  %v7869_v9 = vpop.f32.mrb[105].mxu1 }
 0x2ac   : > { %v5268_v18 = vpop.eup %5267  ;;  %v7856_v28 = vmul.f32 %v7832_v31, %v7832_v31  ;;  %v7860_v6 = vmul.f32 %v7845_v13, %v7845_v13  ;;  %v1677_v5 = vmul.f32 0.5, %v1329_v23  ;;  %v1862_v50 = vmul.f32 0.70710677, %v1151_v58  ;;  %8896 = vst [vmem:[#allocation143_spill] sm:$0xff] %v7869_v9 }
 0x2ad   : > { %v3344_v45 = vadd.f32 %v3343_v48, %v3149_v36  ;;  %v2628_v56 = vmul.f32 %v2372_v51, %v7792_v39  ;;  %v2444_v11 = vadd.f32 1.0, %v5268_v18  ;;  %v1934_v27 = vmul.f32 0.70710677, %v1331_v26  ;;  %v7876_v36 = vpop.f32.mrb[106].mxu1 }
 0x2ae   : > { %8893 = vst [vmem:[#allocation140_spill] sm:$0xff] %v7856_v28  ;;  %8894 = vst [vmem:[#allocation141_spill] sm:$0xff] %v7860_v6  ;;  %v7865_v38 = vmul.f32 0.5, %v1151_v58  ;;  %5273 = verf.f32 %v1862_v50  ;;  %v1863_v17 = vmul.f32 0.70710677, %v1155_v59  ;;  %v1335_v1 = vadd.f32 %v7277_v54, %v5914_v41  ;;  %v8899_v50 = vld [vmem:[#allocation40_spill] sm:$0xff] }
 0x2af   : > { %v7871_v29 = vadd.f32 %v2954_v4, %v2628_v56  ;;  %v3150_v23 = vmul.f32 %v2628_v56, %v2628_v56  ;;  %v4776_v48 = vpack.c.bf16 %v2628_v56, %v2627_v53  ;;  %v7874_v39 = vmul.f32 %v2444_v11, %v7797_v60  ;;  %8898 = vst [vmem:[#allocation145_spill] sm:$0xff] %v7876_v36  ;;  %v7882_v34 = vpop.f32.mrb[107].mxu1 }
 0x2b0   : > { %v5270_v51 = vpop.eup %5269  ;;  %v7878_v58 = vmul.f32 0.5, %v1331_v26  ;;  %5275 = verf.f32 %v1934_v27  ;;  %v1935_v18 = vmul.f32 0.70710677, %v1335_v1  ;;  %v1157_v54 = vadd.f32 %v8899_v50, %v5918_v44  ;;  %8900 = vst [vmem:[#allocation40_spill] sm:$0xff] %v7882_v34  ;;  %v8901_v27 = vld [vmem:[#allocation41_spill] sm:$0xff] }
 0x2b1   : > { %8897 = vst [vmem:[#allocation144_spill] sm:$0xff] %v7874_v39  ;;  %v7884_v4 = vadd.f32 %v3476_v24, %v3150_v23  ;;  %4394 = vst [vmem:[%s6015_s27 + $0x1e0] sm:$0xff] %v4776_v48  ;;  %v4812_v60 = vpack.c.bf16 %v7874_v39, %v7845_v13  ;;  %v2373_v53 = vadd.f32 1.0, %v5270_v51  ;;  %v7889_v56 = vmul.f32 0.5, %v1155_v59  ;;  %v8902_v24 = vld [vmem:[#allocation102_spill] sm:$0xff]  ;;  %v8903_v48 = vld [vmem:[#allocation103_spill] sm:$0xff] }
 0x2b2   : > { %5277 = verf.f32 %v1863_v17  ;;  %v7891_v11 = vmul.f32 0.5, %v1335_v1  ;;  %v1864_v26 = vmul.f32 0.70710677, %v1157_v54  ;;  %v1337_v36 = vadd.f32 %v8901_v27, %v5918_v44 }
 0x2b3   : > { %v5272_v9 = vpop.eup %5271  ;;  %4430 = vst [vmem:[%s6015_s27 + $0x300] sm:$0xff] %v4812_v60  ;;  %v2629_v50 = vmul.f32 %v2373_v53, %v7816_v57  ;;  %5279 = verf.f32 %v1935_v18  ;;  %v1159_v23 = vadd.f32 %v8902_v24, %v5914_v41  ;;  %v1339_v51 = vadd.f32 %v8903_v48, %v5914_v41  ;;  %v8905_v48 = vld [vmem:[#allocation104_spill] sm:$0xff] }
 0x2b4   : > { %v7903_v59 = vmul.f32 %v7874_v39, %v7874_v39  ;;  %v2445_v17 = vadd.f32 1.0, %v5272_v9  ;;  %5281 = verf.f32 %v1864_v26  ;;  %v1936_v1 = vmul.f32 0.70710677, %v1337_v36 }
 0x2b5   : > { %v7905_v34 = vadd.f32 %v2822_v52, %v2629_v50  ;;  %v3151_v27 = vmul.f32 %v2629_v50, %v2629_v50  ;;  %v1608_v60 = vmul.f32 0.5, %v1157_v54  ;;  %v1865_v8 = vmul.f32 0.70710677, %v1159_v23 }
 0x2b6   : > { %8904 = vst [vmem:[#allocation41_spill] sm:$0xff] %v7903_v59  ;;  %v7907_v57 = vmul.f32 %v2445_v17, %v1677_v5  ;;  %v7909_v18 = vmul.f32 0.5, %v1337_v36  ;;  %5283 = verf.f32 %v1936_v1  ;;  %v1937_v53 = vmul.f32 0.70710677, %v1339_v51  ;;  %v8906_v36 = vld [vmem:[#allocation45_spill] sm:$0xff]  ;;  %v7923_v17 = vpop.f32.mrb[108].mxu1 }
 0x2b7   : > { %v7911_v24 = vadd.f32 %v3344_v45, %v3151_v27  ;;  %5285 = verf.f32 %v1865_v8  ;;  %v1161_v14 = vadd.f32 %v8905_v48, %v5918_v44  ;;  %v1341_v9 = vadd.f32 %v7316_v32, %v5918_v44  ;;  %8907 = vst [vmem:[#allocation102_spill] sm:$0xff] %v7923_v17  ;;  %v7931_v27 = vpop.f32.mrb[109].mxu1 }
 0x2b8   : > { %v5274_v52 = vpop.eup %5273  ;;  %v7917_v26 = vmul.f32 0.5, %v1159_v23  ;;  %5287 = verf.f32 %v1937_v53  ;;  %v1345_v5 = vadd.f32 %v7335_v2, %v5914_v41  ;;  %v1347_v54 = vadd.f32 %v8906_v36, %v5918_v44  ;;  %8909 = vst [vmem:[#allocation104_spill] sm:$0xff] %v7931_v27  ;;  %v7940_v39 = vpop.f32.mrb[110].mxu1  ;;  %v8911_v27 = vld [vmem:[#allocation108_spill] sm:$0xff] }
 0x2b9   : > { %v7927_v8 = vmul.f32 %v7907_v57, %v7907_v57  ;;  %v2374_v45 = vadd.f32 1.0, %v5274_v52  ;;  %v7929_v1 = vmul.f32 0.5, %v1339_v51  ;;  %v1866_v32 = vmul.f32 0.70710677, %v1161_v14  ;;  %8910 = vst [vmem:[#allocation45_spill] sm:$0xff] %v7940_v39 }
 0x2ba   : > { %v5276_v23 = vpop.eup %5275  ;;  %v7933_v53 = vmul.f32 0.5, %v1161_v14  ;;  %v7935_v48 = vmul.f32 0.5, %v1341_v9  ;;  %v1938_v2 = vmul.f32 0.70710677, %v1341_v9  ;;  %v1939_v59 = vmul.f32 0.70710677, %v1345_v5 }
 0x2bb   : > { %8908 = vst [vmem:[#allocation103_spill] sm:$0xff] %v7927_v8  ;;  %v2630_v36 = vmul.f32 %v2374_v45, %v7865_v38  ;;  %v2446_v17 = vadd.f32 1.0, %v5276_v23  ;;  %5289 = verf.f32 %v1866_v32  ;;  %v7938_v28 = vmul.f32 0.5, %v1345_v5  ;;  %v8912_v8 = vld [vmem:[#allocation110_spill] sm:$0xff]  ;;  %v7946_v9 = vpop.f32.mrb[111].mxu1 }
 0x2bc   : > { %v5278_v51 = vpop.eup %5277  ;;  %5291 = verf.f32 %v1938_v2  ;;  %v1940_v52 = vmul.f32 0.70710677, %v1347_v54  ;;  %v1349_v14 = vadd.f32 %v8911_v27, %v5914_v41  ;;  %v1351_v55 = vadd.f32 %v8912_v8, %v5918_v44  ;;  %8913 = vst [vmem:[#allocation108_spill] sm:$0xff] %v7946_v9 }
 0x2bd   : > { %v5280_v31 = vpop.eup %5279  ;;  %v2956_v38 = vadd.f32 %v7871_v29, %v2630_v36  ;;  %v3152_v45 = vmul.f32 %v2630_v36, %v2630_v36  ;;  %v4777_v5 = vpack.c.bf16 %v2630_v36, %v2629_v50  ;;  %v7950_v32 = vmul.f32 %v2446_v17, %v7878_v58  ;;  %v8915_v29 = vld [vmem:[#allocation114_spill] sm:$0xff] }
 0x2be   : > { %v5282_v23 = vpop.eup %5281  ;;  %v2375_v2 = vadd.f32 1.0, %v5278_v51  ;;  %v2447_v39 = vadd.f32 1.0, %v5280_v31  ;;  %5293 = verf.f32 %v1939_v59  ;;  %v7952_v6 = vmul.f32 0.5, %v1347_v54  ;;  %v7963_v59 = vpop.f32.mrb[112].mxu1 }
 0x2bf   : > { %8914 = vst [vmem:[#allocation110_spill] sm:$0xff] %v7950_v32  ;;  %v3478_v27 = vadd.f32 %v7884_v4, %v3152_v45  ;;  %4395 = vst [vmem:[%s6015_s27 + $0x1e8] sm:$0xff] %v4777_v5  ;;  %v4813_v8 = vpack.c.bf16 %v7950_v32, %v7907_v57  ;;  %v2376_v9 = vadd.f32 1.0, %v5282_v23  ;;  %v1355_v50 = vadd.f32 %v8915_v29, %v5914_v41  ;;  %v7969_v23 = vpop.f32.mrb[113].mxu1 }
 0x2c0   : > { %v5284_v36 = vpop.eup %5283  ;;  %v2631_v58 = vmul.f32 %v2375_v2, %v7889_v56  ;;  %5295 = verf.f32 %v1940_v52  ;;  %v7961_v17 = vmul.f32 0.5, %v1349_v14  ;;  %v1941_v31 = vmul.f32 0.70710677, %v1349_v14  ;;  %8916 = vst [vmem:[#allocation114_spill] sm:$0xff] %v7963_v59  ;;  %8917 = vst [vmem:[#allocation146_spill] sm:$0xff] %v7969_v23  ;;  %v7976_v59 = vpop.f32.mrb[114].mxu1 }
 0x2c1   : > { %v5286_v54 = vpop.eup %5285  ;;  %4431 = vst [vmem:[%s6015_s27 + $0x308] sm:$0xff] %v4813_v8  ;;  %v7967_v4 = vmul.f32 %v2447_v39, %v7891_v11  ;;  %v2632_v51 = vmul.f32 %v2376_v9, %v1608_v60  ;;  %v2448_v45 = vadd.f32 1.0, %v5284_v36  ;;  %v1942_v5 = vmul.f32 0.70710677, %v1351_v55  ;;  %8919 = vst [vmem:[#allocation148_spill] sm:$0xff] %v7976_v59  ;;  %v7981_v9 = vpop.f32.mrb[115].mxu1 }
 0x2c2   : > { %v5288_v29 = vpop.eup %5287  ;;  %v7973_v56 = vmul.f32 %v7950_v32, %v7950_v32  ;;  %v2824_v52 = vadd.f32 %v7905_v34, %v2631_v58  ;;  %v3153_v14 = vmul.f32 %v2631_v58, %v2631_v58  ;;  %v2377_v2 = vadd.f32 1.0, %v5286_v54  ;;  %8921 = vst [vmem:[#allocation150_spill] sm:$0xff] %v7981_v9 }
 0x2c3   : > { %v2957_v8 = vadd.f32 %v2956_v38, %v2632_v51  ;;  %v3154_v39 = vmul.f32 %v2632_v51, %v2632_v51  ;;  %v4778_v11 = vpack.c.bf16 %v2632_v51, %v2631_v58  ;;  %v7979_v60 = vmul.f32 %v2448_v45, %v7909_v18 }
 0x2c4   : > { %8918 = vst [vmem:[#allocation147_spill] sm:$0xff] %v7973_v56  ;;  %v3346_v36 = vadd.f32 %v7911_v24, %v3153_v14  ;;  %v2633_v23 = vmul.f32 %v2377_v2, %v7917_v26  ;;  %v2449_v56 = vadd.f32 1.0, %v5288_v29  ;;  %5297 = verf.f32 %v1941_v31 }
 0x2c5   : > { %8920 = vst [vmem:[#allocation149_spill] sm:$0xff] %v7979_v60  ;;  %v5290_v34 = vpop.eup %5289  ;;  %v3479_v32 = vadd.f32 %v3478_v27, %v3154_v39  ;;  %4396 = vst [vmem:[%s6015_s27 + $0x1f0] sm:$0xff] %v4778_v11  ;;  %v4814_v38 = vpack.c.bf16 %v7979_v60, %v7967_v4  ;;  %v7988_v54 = vmul.f32 0.5, %v1351_v55  ;;  %5299 = verf.f32 %v1942_v5  ;;  %v8923_v5 = vld [vmem:[#allocation20_spill] sm:$0xff] }
 0x2c6   : > { %v5292_v18 = vpop.eup %5291  ;;  %v7992_v58 = vmul.f32 %v7967_v4, %v7967_v4  ;;  %v2825_v24 = vadd.f32 %v2824_v52, %v2633_v23  ;;  %v3155_v51 = vmul.f32 %v2633_v23, %v2633_v23  ;;  %v2378_v45 = vadd.f32 1.0, %v5290_v34  ;;  %v8006_v52 = vpop.f32.mrb[116].mxu1 }
 0x2c7   : > { %v7996_v26 = vmul.f32 %v7979_v60, %v7979_v60  ;;  %4432 = vst [vmem:[%s6015_s27 + $0x310] sm:$0xff] %v4814_v38  ;;  %v8000_v27 = vmul.f32 %v2449_v56, %v7929_v1  ;;  %v2450_v31 = vadd.f32 1.0, %v5292_v18  ;;  %v1943_v55 = vmul.f32 0.70710677, %v1355_v50  ;;  %8924 = vst [vmem:[#allocation20_spill] sm:$0xff] %v8006_v52  ;;  %v8926_v1 = vld [vmem:[#allocation57_spill] sm:$0xff] }
 0x2c8   : > { %v5294_v29 = vpop.eup %5293  ;;  %v2826_v14 = vadd.f32 %v2825_v24, %v8923_v5  ;;  %v3347_v2 = vadd.f32 %v3346_v36, %v3155_v51  ;;  %v2634_v39 = vmul.f32 %v2378_v45, %v7933_v53  ;;  %v8004_v11 = vmul.f32 0.5, %v1355_v50  ;;  %v8013_v38 = vpop.f32.mrb[117].mxu1  ;;  %v8928_v24 = vld [vmem:[#allocation28_spill] sm:$0xff]  ;;  %v8929_v53 = vld [vmem:[#allocation22_spill] sm:$0xff] }
 0x2c9   : > { %8922 = vst [vmem:[#allocation151_spill] sm:$0xff] %v7996_v26  ;;  %v8009_v34 = vmul.f32 %v2450_v31, %v7935_v48  ;;  %v2451_v9 = vadd.f32 1.0, %v5294_v29  ;;  %5301 = verf.f32 %v1943_v55  ;;  %v1357_v56 = vadd.f32 %v8926_v1, %v5918_v44  ;;  %8927 = vst [vmem:[#allocation57_spill] sm:$0xff] %v8013_v38  ;;  %v8025_v5 = vpop.f32.mrb[118].mxu1  ;;  %v8931_v1 = vld [vmem:[#allocation31_spill] sm:$0xff]  ;;  %v8932_v52 = vld [vmem:[#allocation32_spill] sm:$0xff] }
 0x2ca   : > { %v5296_v18 = vpop.eup %5295  ;;  %v2827_v36 = vadd.f32 %v2826_v14, %v8928_v24  ;;  %v3348_v50 = vadd.f32 %v3347_v2, %v8929_v53  ;;  %v2958_v51 = vadd.f32 %v2957_v8, %v2634_v39  ;;  %v3156_v45 = vmul.f32 %v2634_v39, %v2634_v39  ;;  %8930 = vst [vmem:[#allocation28_spill] sm:$0xff] %v8025_v5  ;;  %v8933_v24 = vld [vmem:[#allocation26_spill] sm:$0xff]  ;;  %v8935_v5 = vld [vmem:[#allocation43_spill] sm:$0xff] }
 0x2cb   : > { %8925 = vst [vmem:[#allocation152_spill] sm:$0xff] %v8009_v34  ;;  %v8019_v48 = vmul.f32 %v8000_v27, %v8000_v27  ;;  %v4779_v31 = vpack.c.bf16 %v2634_v39, %v2633_v23  ;;  %v4815_v55 = vpack.c.bf16 %v8009_v34, %v8000_v27  ;;  %v8023_v29 = vmul.f32 0.5, %v1357_v56 }
 0x2cc   : > { %v2828_v38 = vadd.f32 %v2827_v36, %v8931_v1  ;;  %v3349_v14 = vadd.f32 %v3348_v50, %v8932_v52  ;;  %v2959_v2 = vadd.f32 %v2958_v51, %v8933_v24  ;;  %v3480_v8 = vadd.f32 %v3479_v32, %v3156_v45  ;;  %v8936_v36 = vld [vmem:[#allocation37_spill] sm:$0xff]  ;;  %v8938_v51 = vld [vmem:[#allocation30_spill] sm:$0xff] }
 0x2cd   : > { %4397 = vst [vmem:[%s6015_s27 + $0x1f8] sm:$0xff] %v4779_v31  ;;  %v8033_v53 = vmul.f32 %v8009_v34, %v8009_v34  ;;  %4433 = vst [vmem:[%s6015_s27 + $0x318] sm:$0xff] %v4815_v55  ;;  %v8037_v23 = vmul.f32 %v2451_v9, %v7938_v28  ;;  %v2452_v39 = vadd.f32 1.0, %v5296_v18  ;;  %v1944_v59 = vmul.f32 0.70710677, %v1357_v56  ;;  %v8937_v52 = vld [vmem:[#allocation29_spill] sm:$0xff] }
 0x2ce   : > { %v5298_v26 = vpop.eup %5297  ;;  %v2829_v60 = vadd.f32 %v2828_v38, %v8935_v5  ;;  %v3350_v1 = vadd.f32 %v3349_v14, %v8936_v36  ;;  %v2960_v50 = vadd.f32 %v2959_v2, %v8937_v52  ;;  %v3481_v32 = vadd.f32 %v3480_v8, %v8938_v51  ;;  %v8940_v28 = vld [vmem:[#allocation116_spill] sm:$0xff]  ;;  %v8048_v56 = vpop.f32.mrb[119].mxu1  ;;  %v8943_v55 = vld [vmem:[#allocation46_spill] sm:$0xff]  ;;  %v8944_v14 = vld [vmem:[#allocation35_spill] sm:$0xff] }
 0x2cf   : > { %8934 = vst [vmem:[#allocation22_spill] sm:$0xff] %v8033_v53  ;;  %v5300_v45 = vpop.eup %5299  ;;  %v8044_v31 = vmul.f32 %v2452_v39, %v7952_v6  ;;  %v2453_v24 = vadd.f32 1.0, %v5298_v26  ;;  %5303 = verf.f32 %v1944_v59  ;;  %v1359_v9 = vadd.f32 %v8940_v28, %v5914_v41  ;;  %8941 = vst [vmem:[#allocation32_spill] sm:$0xff] %v8048_v56  ;;  %v8942_v18 = vld [vmem:[#allocation48_spill] sm:$0xff]  ;;  %v8948_v52 = vld [vmem:[#allocation51_spill] sm:$0xff] }
 0x2d0   : > { %v2830_v38 = vadd.f32 %v2829_v60, %v8942_v18  ;;  %v3351_v5 = vadd.f32 %v3350_v1, %v8943_v55  ;;  %v2961_v2 = vadd.f32 %v2960_v50, %v8944_v14  ;;  %v8945_v36 = vld [vmem:[#allocation36_spill] sm:$0xff]  ;;  %v8056_v6 = vmul.f32 %v8037_v23, %v8037_v23  ;;  %v8949_v60 = vld [vmem:[#allocation2_spill] sm:$0xff]  ;;  %v8951_v50 = vld [vmem:[#allocation39_spill] sm:$0xff] }
 0x2d1   : > { %8939 = vst [vmem:[#allocation31_spill] sm:$0xff] %v8044_v31  ;;  %v3482_v8 = vadd.f32 %v3481_v32, %v8945_v36  ;;  %v4816_v59 = vpack.c.bf16 %v8044_v31, %v8037_v23  ;;  %v8061_v26 = vmul.f32 %v2453_v24, %v7961_v17  ;;  %v2454_v39 = vadd.f32 1.0, %v5300_v45  ;;  %v8950_v1 = vld [vmem:[#allocation44_spill] sm:$0xff]  ;;  %v8953_v17 = vld [vmem:[#allocation117_spill] sm:$0xff] }
 0x2d2   : > { %8946 = vst [vmem:[#allocation26_spill] sm:$0xff] %v8056_v6  ;;  %v2831_v51 = vadd.f32 %v2830_v38, %v8948_v52  ;;  %v3352_v28 = vadd.f32 %v3351_v5, %v8949_v60  ;;  %v2962_v18 = vadd.f32 %v2961_v2, %v8950_v1  ;;  %v8071_v36 = vmul.f32 0.5, %v1359_v9  ;;  %v8954_v45 = vld [vmem:[#allocation56_spill] sm:$0xff]  ;;  %v8955_v38 = vld [vmem:[#allocation54_spill] sm:$0xff]  ;;  %v8957_v60 = vld [vmem:[#allocation47_spill] sm:$0xff] }
 0x2d3   : > { %8947 = vst [vmem:[#allocation43_spill] sm:$0xff] %v8061_v26  ;;  %v3483_v55 = vadd.f32 %v3482_v8, %v8951_v50  ;;  %v5302_v32 = vpop.eup %5301  ;;  %4434 = vst [vmem:[%s6015_s27 + $0x320] sm:$0xff] %v4816_v59  ;;  %v8069_v14 = vmul.f32 %v2454_v39, %v7988_v54  ;;  %v1945_v56 = vmul.f32 0.70710677, %v1359_v9  ;;  %v1361_v24 = vadd.f32 %v8953_v17, %v5918_v44  ;;  %v8956_v52 = vld [vmem:[#allocation50_spill] sm:$0xff]  ;;  %v8085_v39 = vpop.f32.mrb[120].mxu1 }
 0x2d4   : > { %v2832_v53 = vadd.f32 %v2831_v51, %v8954_v45  ;;  %v3353_v5 = vadd.f32 %v3352_v28, %v8955_v38  ;;  %v2963_v2 = vadd.f32 %v2962_v18, %v8956_v52  ;;  %v8081_v59 = vmul.f32 %v8044_v31, %v8044_v31  ;;  %8959 = vst [vmem:[#allocation30_spill] sm:$0xff] %v8085_v39  ;;  %v8960_v1 = vld [vmem:[#allocation8_spill] sm:$0xff]  ;;  %v8963_v18 = vld [vmem:[#allocation53_spill] sm:$0xff] }
 0x2d5   : > { %8952 = vst [vmem:[#allocation37_spill] sm:$0xff] %v8069_v14  ;;  %v3484_v8 = vadd.f32 %v3483_v55, %v8957_v60  ;;  %v4817_v54 = vpack.c.bf16 %v8069_v14, %v8061_v26  ;;  %v2455_v9 = vadd.f32 1.0, %v5302_v32  ;;  %5305 = verf.f32 %v1945_v56  ;;  %v8961_v50 = vld [vmem:[#allocation60_spill] sm:$0xff]  ;;  %v8091_v55 = vpop.f32.mrb[121].mxu1  ;;  %v8976_v31 = vld [vmem:[#allocation9_spill] sm:$0xff] }
 0x2d6   : > { %8958 = vst [vmem:[#allocation29_spill] sm:$0xff] %v8081_v59  ;;  %v2833_v51 = vadd.f32 %v2832_v53, %v8960_v1  ;;  %v3354_v17 = vadd.f32 %v3353_v5, %v8961_v50  ;;  %v8962_v28 = vld [vmem:[#allocation52_spill] sm:$0xff]  ;;  %8964 = vst [vmem:[#allocation116_spill] sm:$0xff] %v8091_v55  ;;  %v8095_v52 = vmul.f32 %v8061_v26, %v8061_v26  ;;  %v1946_v56 = vmul.f32 0.70710677, %v1361_v24  ;;  %v8967_v53 = vld [vmem:[#allocation62_spill] sm:$0xff] }
 0x2d7   : > { %v2964_v45 = vadd.f32 %v2963_v2, %v8962_v28  ;;  %v3485_v38 = vadd.f32 %v3484_v8, %v8963_v18  ;;  %v8099_v32 = vmul.f32 %v8069_v14, %v8069_v14  ;;  %4435 = vst [vmem:[%s6015_s27 + $0x328] sm:$0xff] %v4817_v54  ;;  %v1365_v60 = vadd.f32 %v8967_v53, %v5914_v41  ;;  %v8104_v5 = vpop.f32.mrb[122].mxu1  ;;  %v8969_v2 = vld [vmem:[#allocation69_spill] sm:$0xff]  ;;  %v8970_v8 = vld [vmem:[#allocation68_spill] sm:$0xff]  ;;  %v8971_v28 = vld [vmem:[#allocation7_spill] sm:$0xff] }
 0x2d8   : > { %8965 = vst [vmem:[#allocation48_spill] sm:$0xff] %v8095_v52  ;;  %8968 = vst [vmem:[#allocation35_spill] sm:$0xff] %v8104_v5  ;;  %v2834_v1 = vadd.f32 %v2833_v51, %v8969_v2  ;;  %v3355_v50 = vadd.f32 %v3354_v17, %v8970_v8  ;;  %v8972_v55 = vld [vmem:[#allocation4_spill] sm:$0xff]  ;;  %v8110_v59 = vpop.f32.mrb[123].mxu1  ;;  %v8115_v54 = vmul.f32 0.5, %v1361_v24  ;;  %5307 = verf.f32 %v1946_v56  ;;  %v8977_v2 = vld [vmem:[#allocation67_spill] sm:$0xff] }
 0x2d9   : > { %8966 = vst [vmem:[#allocation46_spill] sm:$0xff] %v8099_v32  ;;  %v2965_v18 = vadd.f32 %v2964_v45, %v8971_v28  ;;  %v3486_v39 = vadd.f32 %v3485_v38, %v8972_v55  ;;  %8973 = vst [vmem:[#allocation36_spill] sm:$0xff] %v8110_v59  ;;  %v5304_v52 = vpop.eup %5303  ;;  %v8113_v32 = vmul.f32 %v2455_v9, %v8004_v11  ;;  %v1947_v53 = vmul.f32 0.70710677, %v1365_v60  ;;  %v8975_v14 = vld [vmem:[#allocation72_spill] sm:$0xff]  ;;  %v8978_v8 = vld [vmem:[#allocation65_spill] sm:$0xff] }
 0x2da   : > { %v2835_v5 = vadd.f32 %v2834_v1, %v8975_v14  ;;  %v3356_v51 = vadd.f32 %v3355_v50, %v8976_v31  ;;  %v2456_v28 = vadd.f32 1.0, %v5304_v52  ;;  %v8979_v38 = vld [vmem:[#allocation63_spill] sm:$0xff]  ;;  %v1369_v11 = vadd.f32 %v7484_v15, %v5914_v41  ;;  %v8980_v24 = vld [vmem:[#allocation74_spill] sm:$0xff]  ;;  %v8987_v15 = vld [vmem:[#allocation81_spill] sm:$0xff] }
 0x2db   : > { %8974 = vst [vmem:[#allocation51_spill] sm:$0xff] %v8113_v32  ;;  %v2966_v17 = vadd.f32 %v2965_v18, %v8977_v2  ;;  %v3487_v45 = vadd.f32 %v3486_v39, %v8978_v8  ;;  %5309 = verf.f32 %v1947_v53  ;;  %v1367_v55 = vadd.f32 %v8979_v38, %v5918_v44  ;;  %v8981_v56 = vld [vmem:[#allocation11_spill] sm:$0xff]  ;;  %v8983_v1 = vld [vmem:[#allocation70_spill] sm:$0xff]  ;;  %v8138_v53 = vpop.f32.mrb[124].mxu1  ;;  %v9010_v6 = vld [vmem:[#allocation17_spill] sm:$0xff] }
 0x2dc   : > { %v2836_v9 = vadd.f32 %v2835_v5, %v8980_v24  ;;  %v3357_v59 = vadd.f32 %v3356_v51, %v8981_v56  ;;  %v8982_v26 = vld [vmem:[#allocation71_spill] sm:$0xff]  ;;  %v8131_v50 = vmul.f32 %v8113_v32, %v8113_v32  ;;  %v8134_v39 = vmul.f32 %v2456_v28, %v8023_v29  ;;  %8986 = vst [vmem:[#allocation39_spill] sm:$0xff] %v8138_v53  ;;  %v8990_v8 = vld [vmem:[#allocation10_spill] sm:$0xff]  ;;  %v8144_v38 = vpop.f32.mrb[125].mxu1 }
 0x2dd   : > { %v2967_v14 = vadd.f32 %v2966_v17, %v8982_v26  ;;  %v3488_v31 = vadd.f32 %v3487_v45, %v8983_v1  ;;  %v8136_v52 = vmul.f32 0.5, %v1365_v60  ;;  %v1948_v18 = vmul.f32 0.70710677, %v1367_v55  ;;  %v8988_v2 = vld [vmem:[#allocation15_spill] sm:$0xff]  ;;  %8991 = vst [vmem:[#allocation117_spill] sm:$0xff] %v8144_v38  ;;  %v8150_v56 = vpop.f32.mrb[126].mxu1 }
 0x2de   : > { %8984 = vst [vmem:[#allocation2_spill] sm:$0xff] %v8131_v50  ;;  %8985 = vst [vmem:[#allocation44_spill] sm:$0xff] %v8134_v39  ;;  %v2837_v5 = vadd.f32 %v2836_v9, %v8987_v15  ;;  %v3358_v51 = vadd.f32 %v3357_v59, %v8988_v2  ;;  %v8989_v26 = vld [vmem:[#allocation27_spill] sm:$0xff]  ;;  %v4818_v29 = vpack.c.bf16 %v8134_v39, %v8113_v32  ;;  %v8148_v60 = vmul.f32 0.5, %v1367_v55  ;;  %v8994_v15 = vld [vmem:[#allocation82_spill] sm:$0xff] }
 0x2df   : > { %v2968_v17 = vadd.f32 %v2967_v14, %v8989_v26  ;;  %v3489_v45 = vadd.f32 %v3488_v31, %v8990_v8  ;;  %v5306_v24 = vpop.eup %5305  ;;  %5311 = verf.f32 %v1948_v18  ;;  %v1949_v28 = vmul.f32 0.70710677, %v1369_v11  ;;  %8992 = vst [vmem:[#allocation56_spill] sm:$0xff] %v8150_v56  ;;  %v8993_v9 = vld [vmem:[#allocation83_spill] sm:$0xff]  ;;  %v8996_v26 = vld [vmem:[#allocation13_spill] sm:$0xff]  ;;  %v8156_v8 = vpop.f32.mrb[127].mxu1 }
 0x2e0   : > { %v2838_v1 = vadd.f32 %v2837_v5, %v8993_v9  ;;  %v3359_v59 = vadd.f32 %v3358_v51, %v8994_v15  ;;  %v8995_v2 = vld [vmem:[#allocation75_spill] sm:$0xff]  ;;  %8997 = vst [vmem:[#allocation54_spill] sm:$0xff] %v8156_v8  ;;  %4436 = vst [vmem:[%s6015_s27 + $0x330] sm:$0xff] %v4818_v29  ;;  %v2457_v38 = vadd.f32 1.0, %v5306_v24  ;;  %v1371_v55 = vadd.f32 %v7489_v42, %v5918_v44  ;;  %v8998_v56 = vld [vmem:[#allocation18_spill] sm:$0xff] }
 0x2e1   : > { %v2969_v14 = vadd.f32 %v2968_v17, %v8995_v2  ;;  %v3490_v31 = vadd.f32 %v3489_v45, %v8996_v26  ;;  %5313 = verf.f32 %v1949_v28  ;;  %v1375_v18 = vadd.f32 %v7526_v40, %v5914_v41  ;;  %v8999_v5 = vld [vmem:[#allocation86_spill] sm:$0xff]  ;;  %v9000_v51 = vld [vmem:[#allocation16_spill] sm:$0xff]  ;;  %v9003_v26 = vld [vmem:[#allocation89_spill] sm:$0xff] }
 0x2e2   : > { %v2839_v53 = vadd.f32 %v2838_v1, %v8998_v56  ;;  %v3360_v9 = vadd.f32 %v3359_v59, %v8999_v5  ;;  %v9001_v17 = vld [vmem:[#allocation80_spill] sm:$0xff]  ;;  %v5308_v45 = vpop.eup %5307  ;;  %v8169_v29 = vmul.f32 %v8134_v39, %v8134_v39  ;;  %v8172_v24 = vmul.f32 %v2457_v38, %v8071_v36  ;;  %v9004_v8 = vld [vmem:[#allocation19_spill] sm:$0xff]  ;;  %v9005_v1 = vld [vmem:[#allocation85_spill] sm:$0xff] }
 0x2e3   : > { %v2970_v15 = vadd.f32 %v2969_v14, %v9000_v51  ;;  %v3491_v2 = vadd.f32 %v3490_v31, %v9001_v17  ;;  %v1693_v42 = vmul.f32 0.5, %v1369_v11  ;;  %v1950_v28 = vmul.f32 0.70710677, %v1371_v55  ;;  %v9006_v5 = vld [vmem:[#allocation84_spill] sm:$0xff]  ;;  %v9007_v39 = vld [vmem:[#allocation94_spill] sm:$0xff]  ;;  %v9009_v38 = vld [vmem:[#allocation21_spill] sm:$0xff] }
 0x2e4   : > { %9002 = vst [vmem:[#allocation50_spill] sm:$0xff] %v8169_v29  ;;  %v2840_v40 = vadd.f32 %v2839_v53, %v9003_v26  ;;  %v3361_v56 = vadd.f32 %v3360_v9, %v9004_v8  ;;  %v2458_v31 = vadd.f32 1.0, %v5308_v45  ;;  %v1694_v17 = vmul.f32 0.5, %v1371_v55  ;;  %v9008_v32 = vld [vmem:[#allocation92_spill] sm:$0xff]  ;;  %v9011_v55 = vld [vmem:[#allocation97_spill] sm:$0xff] }
 0x2e5   : > { %v2971_v59 = vadd.f32 %v2970_v15, %v9005_v1  ;;  %v3492_v14 = vadd.f32 %v3491_v2, %v9006_v5  ;;  %v5310_v51 = vpop.eup %5309  ;;  %5315 = verf.f32 %v1950_v28  ;;  %v1951_v50 = vmul.f32 0.70710677, %v1375_v18  ;;  %v9012_v2 = vld [vmem:[#allocation96_spill] sm:$0xff]  ;;  %v9017_v1 = vld [vmem:[#allocation38_spill] sm:$0xff]  ;;  %v9018_v5 = vld [vmem:[#allocation95_spill] sm:$0xff] }
 0x2e6   : > { %v2841_v29 = vadd.f32 %v2840_v40, %v9007_v39  ;;  %v3362_v36 = vadd.f32 %v3361_v56, %v9008_v32  ;;  %v8183_v53 = vmul.f32 %v2458_v31, %v8115_v54  ;;  %v2459_v8 = vadd.f32 1.0, %v5310_v51  ;;  %v9013_v39 = vld [vmem:[#allocation90_spill] sm:$0xff]  ;;  %v9014_v32 = vld [vmem:[#allocation88_spill] sm:$0xff] }
 0x2e7   : > { %v2972_v11 = vadd.f32 %v2971_v59, %v9009_v38  ;;  %v3493_v34 = vadd.f32 %v3492_v14, %v9010_v6  ;;  %5317 = verf.f32 %v1951_v50  ;;  %v1377_v9 = vadd.f32 %v7529_v47, %v5918_v44 }
 0x2e8   : > { %v2842_v15 = vadd.f32 %v2841_v29, %v9011_v55  ;;  %v3363_v45 = vadd.f32 %v3362_v36, %v9012_v2  ;;  %v8193_v6 = vmul.f32 %v8172_v24, %v8172_v24  ;;  %v8197_v54 = vmul.f32 %v8183_v53, %v8183_v53  ;;  %v9016_v29 = vld [vmem:[#allocation99_spill] sm:$0xff]  ;;  %v9020_v2 = vld [vmem:[#allocation42_spill] sm:$0xff] }
 0x2e9   : > { %v2973_v28 = vadd.f32 %v2972_v11, %v9013_v39  ;;  %v3494_v26 = vadd.f32 %v3493_v34, %v9014_v32  ;;  %v5312_v40 = vpop.eup %5311  ;;  %v4819_v47 = vpack.c.bf16 %v8183_v53, %v8172_v24  ;;  %v1695_v50 = vmul.f32 0.5, %v1375_v18  ;;  %v9019_v34 = vld [vmem:[#allocation93_spill] sm:$0xff]  ;;  %v9021_v39 = vld [vmem:[#allocation100_spill] sm:$0xff] }
 0x2ea   : > { %9015 = vst [vmem:[#allocation47_spill] sm:$0xff] %v8197_v54  ;;  %v3364_v56 = vadd.f32 %v3363_v45, %v9016_v29  ;;  %v2843_v59 = vadd.f32 %v2842_v15, %v9017_v1  ;;  %v8207_v36 = vmul.f32 %v2459_v8, %v8136_v52  ;;  %v2460_v38 = vadd.f32 1.0, %v5312_v40  ;;  %v9022_v32 = vld [vmem:[#allocation33_spill] sm:$0xff]  ;;  %v9023_v29 = vld [vmem:[#allocation98_spill] sm:$0xff]  ;;  %v9024_v52 = vld [vmem:[#allocation111_spill] sm:$0xff] }
 0x2eb   : > { %v2974_v14 = vadd.f32 %v2973_v28, %v9018_v5  ;;  %v3495_v51 = vadd.f32 %v3494_v26, %v9019_v34  ;;  %v5314_v31 = vpop.eup %5313  ;;  %4437 = vst [vmem:[%s6015_s27 + $0x338] sm:$0xff] %v4819_v47  ;;  %v1952_v11 = vmul.f32 0.70710677, %v1377_v9  ;;  %v1379_v55 = vadd.f32 %v7540_v63, %v5914_v41  ;;  %v9025_v40 = vld [vmem:[#allocation107_spill] sm:$0xff]  ;;  %v9026_v63 = vld [vmem:[#allocation34_spill] sm:$0xff] }
 0x2ec   : > { %v2844_v18 = vadd.f32 %v2843_v59, %v9020_v2  ;;  %v3365_v45 = vadd.f32 %v3364_v56, %v9021_v39  ;;  %v8216_v26 = vmul.f32 %v2460_v38, %v8148_v60  ;;  %v2461_v47 = vadd.f32 1.0, %v5314_v31  ;;  %v9027_v59 = vld [vmem:[#allocation101_spill] sm:$0xff]  ;;  %v9030_v39 = vld [vmem:[#allocation106_spill] sm:$0xff] }
 0x2ed   : > { %v2975_v15 = vadd.f32 %v2974_v14, %v9022_v32  ;;  %v3496_v28 = vadd.f32 %v3495_v51, %v9023_v29  ;;  %v1696_v1 = vmul.f32 0.5, %v1377_v9  ;;  %5319 = verf.f32 %v1952_v11  ;;  %v9028_v31 = vld [vmem:[#allocation113_spill] sm:$0xff]  ;;  %v9029_v11 = vld [vmem:[#allocation112_spill] sm:$0xff] }
 0x2ee   : > { %v2845_v8 = vadd.f32 %v2844_v18, %v9024_v52  ;;  %v3366_v5 = vadd.f32 %v3365_v45, %v9025_v40  ;;  %v8224_v14 = vmul.f32 %v8207_v36, %v8207_v36  ;;  %v4820_v60 = vpack.c.bf16 %v8216_v26, %v8207_v36  ;;  %v9031_v32 = vld [vmem:[#allocation105_spill] sm:$0xff] }
 0x2ef   : > { %v3497_v34 = vadd.f32 %v3496_v28, %v9026_v63  ;;  %v2976_v2 = vadd.f32 %v2975_v15, %v9027_v59  ;;  %v5316_v56 = vpop.eup %5315  ;;  %v8228_v51 = vmul.f32 0.5, %v1379_v55  ;;  %v1953_v9 = vmul.f32 0.70710677, %v1379_v55  ;;  %v9032_v63 = vld [vmem:[#allocation3_spill] sm:$0xff] }
 0x2f0   : > { %v2846_v38 = vadd.f32 %v2845_v8, %v9028_v31  ;;  %v3367_v18 = vadd.f32 %v3366_v5, %v9029_v11  ;;  %4438 = vst [vmem:[%s6015_s27 + $0x340] sm:$0xff] %v4820_v60  ;;  %v8235_v28 = vmul.f32 %v2461_v47, %v1693_v42  ;;  %v2462_v52 = vadd.f32 1.0, %v5316_v56  ;;  %v9033_v55 = vld [vmem:[#allocation115_spill] sm:$0xff]  ;;  %v9034_v8 = vld [vmem:[#allocation49_spill] sm:$0xff] }
 0x2f1   : > { %v2977_v45 = vadd.f32 %v2976_v2, %v9030_v39  ;;  %v3498_v29 = vadd.f32 %v3497_v34, %v9031_v32  ;;  %v5318_v15 = vpop.eup %5317  ;;  %5321 = verf.f32 %v1953_v9  ;;  %v1381_v40 = vadd.f32 %v7562_v37, %v5918_v44  ;;  %v9035_v5 = vld [vmem:[#allocation109_spill] sm:$0xff]  ;;  %v9036_v37 = vld [vmem:[#allocation59_spill] sm:$0xff] }
 0x2f2   : > { %v2847_v59 = vadd.f32 %v2846_v38, %v9032_v63  ;;  %v3368_v54 = vadd.f32 %v3367_v18, %v9033_v55  ;;  %v8245_v34 = vmul.f32 %v8216_v26, %v8216_v26  ;;  %v8247_v2 = vmul.f32 %v2462_v52, %v1694_v17  ;;  %v9037_v9 = vld [vmem:[#allocation55_spill] sm:$0xff]  ;;  %v9038_v18 = vld [vmem:[#allocation58_spill] sm:$0xff]  ;;  %v9040_v52 = vld [vmem:[#allocation5_spill] sm:$0xff] }
 0x2f3   : > { %v2978_v31 = vadd.f32 %v2977_v45, %v9034_v8  ;;  %v3499_v11 = vadd.f32 %v3498_v29, %v9035_v5  ;;  %v2463_v42 = vadd.f32 1.0, %v5318_v15  ;;  %v1954_v47 = vmul.f32 0.70710677, %v1381_v40  ;;  %v9039_v15 = vld [vmem:[#allocation6_spill] sm:$0xff] }
 0x2f4   : > { %v2848_v56 = vadd.f32 %v2847_v59, %v7482_v46  ;;  %v3369_v60 = vadd.f32 %v3368_v54, %v9036_v37  ;;  %v8255_v45 = vmul.f32 %v8235_v28, %v8235_v28  ;;  %v4821_v32 = vpack.c.bf16 %v8247_v2, %v8235_v28  ;;  %v9046_v37 = vld [vmem:[#allocation61_spill] sm:$0xff] }
 0x2f5   : > { %v2979_v38 = vadd.f32 %v2978_v31, %v9037_v9  ;;  %v3500_v39 = vadd.f32 %v3499_v11, %v9038_v18  ;;  %v8259_v17 = vmul.f32 %v2463_v42, %v1695_v50  ;;  %5323 = verf.f32 %v1954_v47  ;;  %v9042_v31 = vld [vmem:[#allocation76_spill] sm:$0xff]  ;;  %v9048_v18 = vld [vmem:[#allocation77_spill] sm:$0xff] }
 0x2f6   : > { %v2849_v29 = vadd.f32 %v2848_v56, %v7505_v30  ;;  %v3370_v46 = vadd.f32 %v3369_v60, %v7498_v21  ;;  %v8267_v55 = vmul.f32 %v8247_v2, %v8247_v2  ;;  %4439 = vst [vmem:[%s6015_s27 + $0x348] sm:$0xff] %v4821_v32  ;;  %v1698_v8 = vmul.f32 0.5, %v1381_v40  ;;  %v9043_v30 = vld [vmem:[#allocation120_spill] sm:$0xff]  ;;  %v9044_v21 = vld [vmem:[#allocation119_spill] sm:$0xff] }
 0x2f7   : > { %v2980_v54 = vadd.f32 %v2979_v38, %v9039_v15  ;;  %v3501_v63 = vadd.f32 %v3500_v39, %v9040_v52  ;;  %v5320_v59 = vpop.eup %5319  ;;  %v1385_v50 = vadd.f32 %v7602_v33, %v5914_v41  ;;  %v1387_v5 = vadd.f32 %v9042_v31, %v5918_v44  ;;  %v9045_v47 = vld [vmem:[#allocation64_spill] sm:$0xff]  ;;  %v9049_v39 = vld [vmem:[#allocation14_spill] sm:$0xff] }
 0x2f8   : > { %9041 = vst [vmem:[#allocation8_spill] sm:$0xff] %v8267_v55  ;;  %v2850_v11 = vadd.f32 %v2849_v29, %v9043_v30  ;;  %v3371_v42 = vadd.f32 %v3370_v46, %v9044_v21  ;;  %v8280_v9 = vmul.f32 %v8259_v17, %v8259_v17  ;;  %v2464_v38 = vadd.f32 1.0, %v5320_v59  ;;  %v9050_v15 = vld [vmem:[#allocation122_spill] sm:$0xff] }
 0x2f9   : > { %v2981_v56 = vadd.f32 %v2980_v54, %v9045_v47  ;;  %v3502_v60 = vadd.f32 %v3501_v63, %v9046_v37  ;;  %v1955_v40 = vmul.f32 0.70710677, %v1385_v50  ;;  %v1389_v33 = vadd.f32 %v9048_v18, %v5914_v41  ;;  %v9051_v29 = vld [vmem:[#allocation118_spill] sm:$0xff]  ;;  %v9053_v37 = vld [vmem:[#allocation73_spill] sm:$0xff]  ;;  %v9054_v18 = vld [vmem:[#allocation123_spill] sm:$0xff] }
 0x2fa   : > { %9047 = vst [vmem:[#allocation60_spill] sm:$0xff] %v8280_v9  ;;  %v2851_v32 = vadd.f32 %v2850_v11, %v9049_v39  ;;  %v3372_v52 = vadd.f32 %v3371_v42, %v9050_v15  ;;  %v9052_v46 = vld [vmem:[#allocation66_spill] sm:$0xff]  ;;  %v8288_v21 = vmul.f32 %v2464_v38, %v1696_v1  ;;  %v1699_v63 = vmul.f32 0.5, %v1385_v50  ;;  %v9055_v11 = vld [vmem:[#allocation121_spill] sm:$0xff]  ;;  %v9056_v38 = vld [vmem:[#allocation124_spill] sm:$0xff] }
 0x2fb   : > { %v2982_v31 = vadd.f32 %v2981_v56, %v9051_v29  ;;  %v3503_v30 = vadd.f32 %v3502_v60, %v9052_v46  ;;  %v5322_v54 = vpop.eup %5321  ;;  %5325 = verf.f32 %v1955_v40  ;;  %v1956_v47 = vmul.f32 0.70710677, %v1387_v5  ;;  %v9057_v15 = vld [vmem:[#allocation12_spill] sm:$0xff] }
 0x2fc   : > { %v2852_v59 = vadd.f32 %v2851_v32, %v7632_v43  ;;  %v3373_v55 = vadd.f32 %v3372_v52, %v9053_v37  ;;  %v4822_v42 = vpack.c.bf16 %v8288_v21, %v8259_v17  ;;  %v2465_v56 = vadd.f32 1.0, %v5322_v54 }
 0x2fd   : > { %v2983_v9 = vadd.f32 %v2982_v31, %v9054_v18  ;;  %v3504_v39 = vadd.f32 %v3503_v30, %v9055_v11  ;;  %v1700_v60 = vmul.f32 0.5, %v1387_v5  ;;  %5327 = verf.f32 %v1956_v47  ;;  %v9058_v31 = vld [vmem:[#allocation78_spill] sm:$0xff] }
 0x2fe   : > { %v2853_v1 = vadd.f32 %v2852_v59, %v7660_v25  ;;  %v3374_v50 = vadd.f32 %v3373_v55, %v7656_v19  ;;  %4440 = vst [vmem:[%s6015_s27 + $0x350] sm:$0xff] %v4822_v42  ;;  %v8302_v52 = vmul.f32 %v2465_v56, %v8228_v51  ;;  %v1957_v29 = vmul.f32 0.70710677, %v1389_v33  ;;  %v9061_v42 = vld [vmem:[#allocation132_spill] sm:$0xff] }
 0x2ff   : > { %v2984_v40 = vadd.f32 %v2983_v9, %v9056_v38  ;;  %v3505_v43 = vadd.f32 %v3504_v39, %v9057_v15  ;;  %v5324_v32 = vpop.eup %5323  ;;  %v1391_v46 = vadd.f32 %v9058_v31, %v5918_v44  ;;  %v1395_v5 = vadd.f32 %v7673_v3, %v5914_v41  ;;  %v9059_v9 = vld [vmem:[#allocation79_spill] sm:$0xff] }
 0x300   : > { %v2854_v25 = vadd.f32 %v2853_v1, %v7693_v62  ;;  %v3375_v19 = vadd.f32 %v3374_v50, %v7683_v16  ;;  %v8314_v54 = vmul.f32 %v8288_v21, %v8288_v21  ;;  %v2466_v51 = vadd.f32 1.0, %v5324_v32  ;;  %v9060_v62 = vld [vmem:[#allocation125_spill] sm:$0xff]  ;;  %v9066_v31 = vld [vmem:[#allocation87_spill] sm:$0xff] }
 0x301   : > { %v2985_v55 = vadd.f32 %v2984_v40, %v7644_v10  ;;  %v3506_v30 = vadd.f32 %v3505_v43, %v9059_v9  ;;  %v1701_v47 = vmul.f32 0.5, %v1389_v33  ;;  %5329 = verf.f32 %v1957_v29  ;;  %v9065_v32 = vld [vmem:[#allocation133_spill] sm:$0xff] }
 0x302   : > { %v2855_v59 = vadd.f32 %v2854_v25, %v7744_v49  ;;  %v3376_v37 = vadd.f32 %v3375_v19, %v7706_v20  ;;  %v8322_v10 = vmul.f32 %v8302_v52, %v8302_v52  ;;  %v8324_v16 = vmul.f32 %v2466_v51, %v1698_v8  ;;  %v9062_v49 = vld [vmem:[#allocation130_spill] sm:$0xff]  ;;  %v9063_v20 = vld [vmem:[#allocation129_spill] sm:$0xff] }
 0x303   : > { %v2986_v3 = vadd.f32 %v2985_v55, %v7676_v61  ;;  %v3507_v18 = vadd.f32 %v3506_v30, %v9060_v62  ;;  %v1958_v11 = vmul.f32 0.70710677, %v1391_v46  ;;  %v1959_v39 = vmul.f32 0.70710677, %v1395_v5  ;;  %v9064_v8 = vld [vmem:[#allocation126_spill] sm:$0xff]  ;;  %v9068_v62 = vld [vmem:[#allocation127_spill] sm:$0xff] }
 0x304   : > { %v2856_v33 = vadd.f32 %v2855_v59, %v7795_v7  ;;  %v3377_v56 = vadd.f32 %v3376_v37, %v9061_v42  ;;  %v4823_v38 = vpack.c.bf16 %v8324_v16, %v8302_v52  ;;  %v8332_v40 = vmul.f32 0.5, %v1391_v46  ;;  %v9067_v37 = vld [vmem:[#allocation91_spill] sm:$0xff] }
 0x305   : > { %v2987_v1 = vadd.f32 %v2986_v3, %v9062_v49  ;;  %v3508_v50 = vadd.f32 %v3507_v18, %v9063_v20  ;;  %v5326_v61 = vpop.eup %5325  ;;  %5331 = verf.f32 %v1958_v11  ;;  %v1397_v15 = vadd.f32 %v9064_v8, %v5918_v44  ;;  %v9074_v8 = vld [vmem:[#allocation140_spill] sm:$0xff] }
 0x306   : > { %v2857_v43 = vadd.f32 %v2856_v33, %v7814_v0  ;;  %v3378_v7 = vadd.f32 %v3377_v56, %v7823_v35  ;;  %4441 = vst [vmem:[%s6015_s27 + $0x358] sm:$0xff] %v4823_v38  ;;  %v2467_v55 = vadd.f32 1.0, %v5326_v61  ;;  %v1703_v9 = vmul.f32 0.5, %v1395_v5  ;;  %v9069_v5 = vld [vmem:[#allocation141_spill] sm:$0xff]  ;;  %v9070_v33 = vld [vmem:[#allocation138_spill] sm:$0xff]  ;;  %v9073_v61 = vld [vmem:[#allocation144_spill] sm:$0xff] }
 0x307   : > { %v2988_v29 = vadd.f32 %v2987_v1, %v9065_v32  ;;  %v3509_v25 = vadd.f32 %v3508_v50, %v9066_v31  ;;  %v5328_v19 = vpop.eup %5327  ;;  %5333 = verf.f32 %v1959_v39  ;;  %v1960_v30 = vmul.f32 0.70710677, %v1397_v15  ;;  %v9072_v50 = vld [vmem:[#allocation103_spill] sm:$0xff] }
 0x308   : > { %v2858_v46 = vadd.f32 %v2857_v43, %v7845_v13  ;;  %v3379_v51 = vadd.f32 %v3378_v7, %v7838_v22  ;;  %v8345_v3 = vmul.f32 %v2467_v55, %v1699_v63  ;;  %v2468_v35 = vadd.f32 1.0, %v5328_v19  ;;  %v9071_v13 = vld [vmem:[#allocation137_spill] sm:$0xff] }
 0x309   : > { %v2989_v59 = vadd.f32 %v2988_v29, %v7802_v12  ;;  %v3510_v0 = vadd.f32 %v3509_v25, %v9067_v37  ;;  %5335 = verf.f32 %v1960_v30  ;;  %v1399_v18 = vadd.f32 %v9068_v62, %v5914_v41  ;;  %v9076_v25 = vld [vmem:[#allocation41_spill] sm:$0xff] }
 0x30a   : > { %v2859_v11 = vadd.f32 %v2858_v46, %v7907_v57  ;;  %v3380_v39 = vadd.f32 %v3379_v51, %v9069_v5  ;;  %v8355_v12 = vmul.f32 %v8324_v16, %v8324_v16  ;;  %v8357_v63 = vmul.f32 %v2468_v35, %v1700_v60  ;;  %v9079_v35 = vld [vmem:[#allocation147_spill] sm:$0xff] }
 0x30b   : > { %v2990_v42 = vadd.f32 %v2989_v59, %v9070_v33  ;;  %v3511_v56 = vadd.f32 %v3510_v0, %v9071_v13  ;;  %v5330_v22 = vpop.eup %5329  ;;  %v1704_v49 = vmul.f32 0.5, %v1397_v15  ;;  %v1961_v1 = vmul.f32 0.70710677, %v1399_v18  ;;  %v9077_v59 = vld [vmem:[#allocation128_spill] sm:$0xff]  ;;  %v9078_v0 = vld [vmem:[#allocation149_spill] sm:$0xff] }
 0x30c   : > { %v2860_v20 = vadd.f32 %v2859_v11, %v7967_v4  ;;  %v3381_v57 = vadd.f32 %v3380_v39, %v9072_v50  ;;  %v8365_v7 = vmul.f32 %v8345_v3, %v8345_v3  ;;  %v4824_v32 = vpack.c.bf16 %v8357_v63, %v8345_v3  ;;  %v9075_v4 = vld [vmem:[#allocation110_spill] sm:$0xff] }
 0x30d   : > { %v2991_v38 = vadd.f32 %v2990_v42, %v9073_v61  ;;  %v3512_v43 = vadd.f32 %v3511_v56, %v9074_v8  ;;  %v2469_v60 = vadd.f32 1.0, %v5330_v22  ;;  %5337 = verf.f32 %v1961_v1  ;;  %v9080_v42 = vld [vmem:[#allocation23_spill] sm:$0xff]  ;;  %v9082_v56 = vld [vmem:[#allocation152_spill] sm:$0xff] }
 0x30e   : > { %v2861_v15 = vadd.f32 %v2860_v20, %v8000_v27  ;;  %v3382_v29 = vadd.f32 %v3381_v57, %v7992_v58  ;;  %v8375_v30 = vmul.f32 %v8357_v63, %v8357_v63  ;;  %4442 = vst [vmem:[%s6015_s27 + $0x360] sm:$0xff] %v4824_v32  ;;  %v1705_v51 = vmul.f32 0.5, %v1399_v18  ;;  %v9083_v1 = vld [vmem:[#allocation151_spill] sm:$0xff]  ;;  %v9086_v32 = vld [vmem:[#allocation22_spill] sm:$0xff] }
 0x30f   : > { %v2992_v31 = vadd.f32 %v2991_v38, %v9075_v4  ;;  %v3513_v19 = vadd.f32 %v3512_v43, %v9076_v25  ;;  %v5332_v55 = vpop.eup %5331  ;;  %v8378_v46 = vmul.f32 %v2469_v60, %v1701_v47  ;;  %v1401_v37 = vadd.f32 %v9077_v59, %v5918_v44  ;;  %v9081_v47 = vld [vmem:[#allocation131_spill] sm:$0xff]  ;;  %v9088_v4 = vld [vmem:[#allocation48_spill] sm:$0xff] }
 0x310   : > { %v3383_v27 = vadd.f32 %v3382_v29, %v8019_v48  ;;  %v2862_v11 = vadd.f32 %v2861_v15, %v8037_v23  ;;  %v2470_v39 = vadd.f32 1.0, %v5332_v55  ;;  %v1405_v13 = vadd.f32 %v9080_v42, %v5914_v41  ;;  %v9084_v48 = vld [vmem:[#allocation26_spill] sm:$0xff]  ;;  %v9085_v57 = vld [vmem:[#allocation43_spill] sm:$0xff] }
 0x311   : > { %v2993_v58 = vadd.f32 %v2992_v31, %v9078_v0  ;;  %v3514_v62 = vadd.f32 %v3513_v19, %v9079_v35  ;;  %v5334_v5 = vpop.eup %5333  ;;  %v1962_v33 = vmul.f32 0.70710677, %v1401_v37  ;;  %v1407_v18 = vadd.f32 %v9081_v47, %v5918_v44  ;;  %v9087_v15 = vld [vmem:[#allocation31_spill] sm:$0xff]  ;;  %v9091_v35 = vld [vmem:[#allocation37_spill] sm:$0xff] }
 0x312   : > { %v3384_v50 = vadd.f32 %v3383_v27, %v9084_v48  ;;  %v2863_v61 = vadd.f32 %v2862_v11, %v9085_v57  ;;  %v8396_v23 = vmul.f32 %v8378_v46, %v8378_v46  ;;  %v8399_v8 = vmul.f32 %v2470_v39, %v8332_v40  ;;  %v9089_v25 = vld [vmem:[#allocation51_spill] sm:$0xff]  ;;  %v9090_v40 = vld [vmem:[#allocation29_spill] sm:$0xff]  ;;  %v9092_v11 = vld [vmem:[#allocation2_spill] sm:$0xff] }
 0x313   : > { %v2994_v22 = vadd.f32 %v2993_v58, %v9082_v56  ;;  %v3515_v20 = vadd.f32 %v3514_v62, %v9083_v1  ;;  %v5336_v38 = vpop.eup %5335  ;;  %v2471_v43 = vadd.f32 1.0, %v5334_v5  ;;  %5339 = verf.f32 %v1962_v33  ;;  %v9093_v56 = vld [vmem:[#allocation46_spill] sm:$0xff]  ;;  %v9094_v1 = vld [vmem:[#allocation44_spill] sm:$0xff] }
 0x314   : > { %v3385_v31 = vadd.f32 %v3384_v50, %v9088_v4  ;;  %v2864_v19 = vadd.f32 %v2863_v61, %v9089_v25  ;;  %v4825_v55 = vpack.c.bf16 %v8399_v8, %v8378_v46  ;;  %v2472_v27 = vadd.f32 1.0, %v5336_v38 }
 0x315   : > { %v3516_v60 = vadd.f32 %v3515_v20, %v9086_v32  ;;  %v2995_v29 = vadd.f32 %v2994_v22, %v9087_v15  ;;  %v8407_v59 = vmul.f32 %v2471_v43, %v1703_v9  ;;  %v1706_v0 = vmul.f32 0.5, %v1401_v37 }
 0x316   : > { %v3386_v5 = vadd.f32 %v3385_v31, %v9092_v11  ;;  %v2865_v39 = vadd.f32 %v2864_v19, %v8172_v24  ;;  %v8415_v42 = vmul.f32 %v8399_v8, %v8399_v8  ;;  %4443 = vst [vmem:[%s6015_s27 + $0x368] sm:$0xff] %v4825_v55  ;;  %v8418_v47 = vmul.f32 %v2472_v27, %v1704_v49  ;;  %v9095_v49 = vld [vmem:[#allocation50_spill] sm:$0xff]  ;;  %v9098_v31 = vld [vmem:[#allocation47_spill] sm:$0xff] }
 0x317   : > { %v3517_v58 = vadd.f32 %v3516_v60, %v9090_v40  ;;  %v2996_v62 = vadd.f32 %v2995_v29, %v9091_v35  ;;  %v5338_v33 = vpop.eup %5337  ;;  %v8420_v9 = vmul.f32 0.5, %v1405_v13  ;;  %v1963_v37 = vmul.f32 0.70710677, %v1405_v13  ;;  %v9097_v29 = vld [vmem:[#allocation25_spill] sm:$0xff]  ;;  %v9099_v35 = vld [vmem:[#allocation60_spill] sm:$0xff] }
 0x318   : > { %v3387_v48 = vadd.f32 %v3386_v5, %v8193_v6  ;;  %v2866_v24 = vadd.f32 %v2865_v39, %v8207_v36  ;;  %v3249_v50 = vmul.f32 %v8407_v59, %v8407_v59  ;;  %v4826_v57 = vpack.c.bf16 %v8418_v47, %v8407_v59  ;;  %v9096_v36 = vld [vmem:[#allocation24_spill] sm:$0xff] }
 0x319   : > { %v3518_v22 = vadd.f32 %v3517_v58, %v9093_v56  ;;  %v2997_v20 = vadd.f32 %v2996_v62, %v9094_v1  ;;  %v2473_v61 = vadd.f32 1.0, %v5338_v33  ;;  %5341 = verf.f32 %v1963_v37 }
 0x31a   : > { %v3388_v43 = vadd.f32 %v3387_v48, %v8224_v14  ;;  %v2867_v32 = vadd.f32 %v2866_v24, %v8235_v28  ;;  %4444 = vst [vmem:[%s6015_s27 + $0x370] sm:$0xff] %v4826_v57  ;;  %v1964_v60 = vmul.f32 0.70710677, %v1407_v18  ;;  %v1409_v15 = vadd.f32 %v9096_v36, %v5914_v41 }
 0x31b   : > { %v3519_v38 = vadd.f32 %v3518_v22, %v9095_v49  ;;  %v2998_v13 = vadd.f32 %v2997_v20, %v8183_v53  ;;  %v2729_v6 = vmul.f32 %v2473_v61, %v1705_v51  ;;  %v1411_v4 = vadd.f32 %v9097_v29, %v5918_v44  ;;  %v9102_v22 = vld [vmem:[#allocation135_spill] sm:$0xff] }
 0x31c   : > { %v3389_v55 = vadd.f32 %v3388_v43, %v8255_v45  ;;  %v2868_v53 = vadd.f32 %v2867_v32, %v8259_v17  ;;  %v3250_v28 = vmul.f32 %v8418_v47, %v8418_v47  ;;  %v1708_v51 = vmul.f32 0.5, %v1407_v18  ;;  %v9100_v17 = vld [vmem:[#allocation8_spill] sm:$0xff] }
 0x31d   : > { %v3520_v25 = vadd.f32 %v3519_v38, %v9098_v31  ;;  %v2999_v19 = vadd.f32 %v2998_v13, %v8216_v26  ;;  %v5340_v14 = vpop.eup %5339  ;;  %5343 = verf.f32 %v1964_v60  ;;  %v1965_v27 = vmul.f32 0.70710677, %v1409_v15 }
 0x31e   : > { %v3390_v62 = vadd.f32 %v3389_v55, %v9099_v35  ;;  %v2869_v11 = vadd.f32 %v2868_v53, %v8302_v52  ;;  %v3251_v26 = vmul.f32 %v2729_v6, %v2729_v6  ;;  %v2474_v5 = vadd.f32 1.0, %v5340_v14 }
 0x31f   : > { %v3521_v40 = vadd.f32 %v3520_v25, %v8245_v34  ;;  %v3000_v58 = vadd.f32 %v2999_v19, %v8247_v2  ;;  %5345 = verf.f32 %v1965_v27  ;;  %v1966_v45 = vmul.f32 0.70710677, %v1411_v4  ;;  %v9101_v34 = vld [vmem:[#allocation134_spill] sm:$0xff] }
 0x320   : > { %v3391_v18 = vadd.f32 %v3390_v62, %v8322_v10  ;;  %v2870_v37 = vadd.f32 %v2869_v11, %v8345_v3  ;;  %v2730_v56 = vmul.f32 %v2474_v5, %v1706_v0  ;;  %v1415_v2 = vadd.f32 %v9101_v34, %v5914_v41 }
 0x321   : > { %v3522_v39 = vadd.f32 %v3521_v40, %v9100_v17  ;;  %v3001_v33 = vadd.f32 %v3000_v58, %v8288_v21  ;;  %5347 = verf.f32 %v1966_v45  ;;  %v1417_v52 = vadd.f32 %v9102_v22, %v5918_v44  ;;  %v9105_v45 = vld [vmem:[#allocation142_spill] sm:$0xff]  ;;  %v9107_v22 = vld [vmem:[#allocation145_spill] sm:$0xff] }
 0x322   : > { %v3392_v48 = vadd.f32 %v3391_v18, %v8365_v7  ;;  %v2871_v21 = vadd.f32 %v2870_v37, %v8378_v46  ;;  %v4827_v24 = vpack.c.bf16 %v2730_v56, %v2729_v6  ;;  %v1709_v3 = vmul.f32 0.5, %v1409_v15 }
 0x323   : > { %v3523_v1 = vadd.f32 %v3522_v39, %v8314_v54  ;;  %v3002_v20 = vadd.f32 %v3001_v33, %v8324_v16  ;;  %v5342_v10 = vpop.eup %5341  ;;  %v1710_v0 = vmul.f32 0.5, %v1411_v4  ;;  %v1967_v57 = vmul.f32 0.70710677, %v1415_v2  ;;  %v9106_v33 = vld [vmem:[#allocation143_spill] sm:$0xff] }
 0x324   : > { %v3393_v38 = vadd.f32 %v3392_v48, %v8396_v23  ;;  %v2872_v13 = vadd.f32 %v2871_v21, %v8407_v59  ;;  %v3252_v54 = vmul.f32 %v2730_v56, %v2730_v56  ;;  %4445 = vst [vmem:[%s6015_s27 + $0x378] sm:$0xff] %v4827_v24  ;;  %v2475_v16 = vadd.f32 1.0, %v5342_v10  ;;  %v9104_v59 = vld [vmem:[#allocation139_spill] sm:$0xff]  ;;  %v9108_v21 = vld [vmem:[#allocation40_spill] sm:$0xff] }
 0x325   : > { %v3524_v61 = vadd.f32 %v3523_v1, %v8355_v12  ;;  %v3003_v49 = vadd.f32 %v3002_v20, %v8357_v63  ;;  %5349 = verf.f32 %v1967_v57  ;;  %v1968_v7 = vmul.f32 0.70710677, %v1417_v52  ;;  %v9103_v63 = vld [vmem:[#allocation136_spill] sm:$0xff] }
 0x326   : > { %v3394_v32 = vadd.f32 %v3393_v38, %v3249_v50  ;;  %v2873_v60 = vadd.f32 %v2872_v13, %v2729_v6  ;;  %v2731_v12 = vmul.f32 %v2475_v16, %v8420_v9  ;;  %v1419_v23 = vadd.f32 %v9103_v63, %v5914_v41 }
 0x327   : > { %v3525_v46 = vadd.f32 %v3524_v61, %v8375_v30  ;;  %v3004_v43 = vadd.f32 %v3003_v49, %v8399_v8  ;;  %v5344_v36 = vpop.eup %5343  ;;  %5351 = verf.f32 %v1968_v7  ;;  %v1421_v15 = vadd.f32 %v9104_v59, %v5918_v44 }
 0x328   : > { %v3395_v31 = vadd.f32 %v3394_v32, %v3251_v26  ;;  %v2476_v30 = vadd.f32 1.0, %v5344_v36  ;;  %v2874_v8 = vadd.f32 %v2873_v60, %v2731_v12  ;;  %v3253_v50 = vmul.f32 %v2731_v12, %v2731_v12 }
 0x329   : > { %v3526_v29 = vadd.f32 %v3525_v46, %v8415_v42  ;;  %v3005_v4 = vadd.f32 %v3004_v43, %v8418_v47  ;;  %v5346_v25 = vpop.eup %5345  ;;  %v1711_v6 = vmul.f32 0.5, %v1415_v2  ;;  %v1969_v19 = vmul.f32 0.70710677, %v1419_v23 }
 0x32a   : > { %v2732_v53 = vmul.f32 %v2476_v30, %v1708_v51  ;;  %v2477_v14 = vadd.f32 1.0, %v5346_v25  ;;  %v3396_v40 = vadd.f32 %v3395_v31, %v3253_v50  ;;  %v1712_v58 = vmul.f32 0.5, %v1417_v52 }
 0x32b   : > { %v3527_v55 = vadd.f32 %v3526_v29, %v3250_v28  ;;  %v3006_v9 = vadd.f32 %v3005_v4, %v2730_v56  ;;  %v5348_v27 = vpop.eup %5347  ;;  %5353 = verf.f32 %v1969_v19  ;;  %v1970_v35 = vmul.f32 0.70710677, %v1421_v15 }
 0x32c   : > { %v3254_v47 = vmul.f32 %v2732_v53, %v2732_v53  ;;  %v4828_v11 = vpack.c.bf16 %v2732_v53, %v2731_v12  ;;  %v2733_v26 = vmul.f32 %v2477_v14, %v1709_v3  ;;  %v2478_v5 = vadd.f32 1.0, %v5348_v27  ;;  %v9109_v12 = vld [vmem:[#allocation102_spill] sm:$0xff] }
 0x32d   : > { %v3528_v42 = vadd.f32 %v3527_v55, %v3252_v54  ;;  %v3007_v62 = vadd.f32 %v3006_v9, %v2732_v53  ;;  %5355 = verf.f32 %v1970_v35  ;;  %v1425_v17 = vadd.f32 %v9105_v45, %v5914_v41  ;;  %v9114_v45 = vld [vmem:[#allocation146_spill] sm:$0xff] }
 0x32e   : > { %4446 = vst [vmem:[%s6015_s27 + $0x380] sm:$0xff] %v4828_v11  ;;  %v1713_v51 = vmul.f32 0.5, %v1419_v23  ;;  %v1714_v39 = vmul.f32 0.5, %v1421_v15  ;;  %v1427_v18 = vadd.f32 %v9106_v33, %v5918_v44  ;;  %v2875_v56 = vadd.f32 %v2874_v8, %v2733_v26  ;;  %v9110_v23 = vld [vmem:[#allocation104_spill] sm:$0xff]  ;;  %v9111_v15 = vld [vmem:[#allocation45_spill] sm:$0xff] }
 0x32f   : > { %v3529_v28 = vadd.f32 %v3528_v42, %v3254_v47  ;;  %v5350_v37 = vpop.eup %5349  ;;  %v3255_v34 = vmul.f32 %v2733_v26, %v2733_v26  ;;  %v2734_v2 = vmul.f32 %v2478_v5, %v1710_v0  ;;  %v1429_v52 = vadd.f32 %v9107_v22, %v5914_v41  ;;  %v9112_v42 = vld [vmem:[#allocation108_spill] sm:$0xff]  ;;  %v9113_v47 = vld [vmem:[#allocation114_spill] sm:$0xff] }
 0x330   : > { %v2479_v1 = vadd.f32 1.0, %v5350_v37  ;;  %v1971_v20 = vmul.f32 0.70710677, %v1425_v17  ;;  %v1972_v48 = vmul.f32 0.70710677, %v1427_v18  ;;  %v1431_v10 = vadd.f32 %v9108_v21, %v5918_v44 }
 0x331   : > { %v5352_v24 = vpop.eup %5351  ;;  %v3397_v3 = vadd.f32 %v3396_v40, %v3255_v34  ;;  %v3008_v57 = vadd.f32 %v3007_v62, %v2734_v2  ;;  %v3256_v61 = vmul.f32 %v2734_v2, %v2734_v2  ;;  %v4829_v49 = vpack.c.bf16 %v2734_v2, %v2733_v26 }
 0x332   : > { %v2735_v38 = vmul.f32 %v2479_v1, %v1711_v6  ;;  %v2480_v13 = vadd.f32 1.0, %v5352_v24  ;;  %v1715_v54 = vmul.f32 0.5, %v1425_v17  ;;  %5357 = verf.f32 %v1971_v20 }
 0x333   : > { %v3530_v0 = vadd.f32 %v3529_v28, %v3256_v61  ;;  %4447 = vst [vmem:[%s6015_s27 + $0x388] sm:$0xff] %v4829_v49  ;;  %v1716_v16 = vmul.f32 0.5, %v1427_v18  ;;  %5359 = verf.f32 %v1972_v48  ;;  %v1973_v7 = vmul.f32 0.70710677, %v1429_v52 }
 0x334   : > { %v2876_v46 = vadd.f32 %v2875_v56, %v2735_v38  ;;  %v3257_v43 = vmul.f32 %v2735_v38, %v2735_v38  ;;  %v2736_v32 = vmul.f32 %v2480_v13, %v1712_v58  ;;  %v1974_v60 = vmul.f32 0.70710677, %v1431_v10 }
 0x335   : > { %v5354_v36 = vpop.eup %5353  ;;  %5361 = verf.f32 %v1973_v7  ;;  %v1435_v63 = vadd.f32 %v9109_v12, %v5914_v41  ;;  %v1437_v59 = vadd.f32 %v9110_v23, %v5918_v44  ;;  %v1439_v29 = vadd.f32 %v9111_v15, %v5914_v41 }
 0x336   : > { %v3398_v4 = vadd.f32 %v3397_v3, %v3257_v43  ;;  %v3009_v31 = vadd.f32 %v3008_v57, %v2736_v32  ;;  %v3258_v30 = vmul.f32 %v2736_v32, %v2736_v32  ;;  %v4830_v25 = vpack.c.bf16 %v2736_v32, %v2735_v38  ;;  %v9115_v3 = vld [vmem:[#allocation148_spill] sm:$0xff] }
 0x337   : > { %v5356_v8 = vpop.eup %5355  ;;  %v2481_v50 = vadd.f32 1.0, %v5354_v36  ;;  %v1717_v6 = vmul.f32 0.5, %v1429_v52  ;;  %5363 = verf.f32 %v1974_v60  ;;  %v1975_v19 = vmul.f32 0.70710677, %v1435_v63 }
 0x338   : > { %v3531_v55 = vadd.f32 %v3530_v0, %v3258_v30  ;;  %4448 = vst [vmem:[%s6015_s27 + $0x390] sm:$0xff] %v4830_v25  ;;  %v2482_v9 = vadd.f32 1.0, %v5356_v8  ;;  %v1718_v53 = vmul.f32 0.5, %v1431_v10  ;;  %v1976_v14 = vmul.f32 0.70710677, %v1437_v59 }
 0x339   : > { %v2737_v27 = vmul.f32 %v2481_v50, %v1713_v51  ;;  %v1719_v40 = vmul.f32 0.5, %v1435_v63  ;;  %5365 = verf.f32 %v1975_v19  ;;  %v1977_v58 = vmul.f32 0.70710677, %v1439_v29 }
 0x33a   : > { %v2738_v35 = vmul.f32 %v2482_v9, %v1714_v39  ;;  %5367 = verf.f32 %v1976_v14  ;;  %v1441_v62 = vadd.f32 %v9112_v42, %v5918_v44  ;;  %v1445_v11 = vadd.f32 %v9113_v47, %v5914_v41  ;;  %v9117_v14 = vld [vmem:[#allocation20_spill] sm:$0xff] }
 0x33b   : > { %v2877_v26 = vadd.f32 %v2876_v46, %v2737_v27  ;;  %v3259_v5 = vmul.f32 %v2737_v27, %v2737_v27  ;;  %5369 = verf.f32 %v1977_v58  ;;  %v1447_v17 = vadd.f32 %v9114_v45, %v5918_v44  ;;  %v9116_v46 = vld [vmem:[#allocation150_spill] sm:$0xff] }
 0x33c   : > { %v5358_v28 = vpop.eup %5357  ;;  %v3010_v51 = vadd.f32 %v3009_v31, %v2738_v35  ;;  %v3260_v33 = vmul.f32 %v2738_v35, %v2738_v35  ;;  %v4831_v18 = vpack.c.bf16 %v2738_v35, %v2737_v27  ;;  %v1720_v37 = vmul.f32 0.5, %v1437_v59 }
 0x33d   : > { %v5360_v39 = vpop.eup %5359  ;;  %v3399_v56 = vadd.f32 %v3398_v4, %v3259_v5  ;;  %v2483_v34 = vadd.f32 1.0, %v5358_v28  ;;  %v1721_v2 = vmul.f32 0.5, %v1439_v29  ;;  %v1978_v22 = vmul.f32 0.70710677, %v1441_v62 }
 0x33e   : > { %v3532_v52 = vadd.f32 %v3531_v55, %v3260_v33  ;;  %4449 = vst [vmem:[%s6015_s27 + $0x398] sm:$0xff] %v4831_v18  ;;  %v2484_v1 = vadd.f32 1.0, %v5360_v39  ;;  %v8499_v20 = vmul.f32 0.5, %v1441_v62  ;;  %v1979_v48 = vmul.f32 0.70710677, %v1445_v11 }
 0x33f   : > { %v5362_v21 = vpop.eup %5361  ;;  %v2739_v10 = vmul.f32 %v2483_v34, %v1715_v54  ;;  %5371 = verf.f32 %v1978_v22  ;;  %v1980_v24 = vmul.f32 0.70710677, %v1447_v17  ;;  %v8503_v57 = vadd.f32 %v9115_v3, %v5914_v41 }
 0x340   : > { %v2740_v61 = vmul.f32 %v2484_v1, %v1716_v16  ;;  %v2485_v49 = vadd.f32 1.0, %v5362_v21  ;;  %v1723_v38 = vmul.f32 0.5, %v1445_v11  ;;  %5373 = verf.f32 %v1979_v48  ;;  %v9118_v48 = vld [vmem:[#allocation57_spill] sm:$0xff] }
 0x341   : > { %v5364_v13 = vpop.eup %5363  ;;  %v2878_v0 = vadd.f32 %v2877_v26, %v2739_v10  ;;  %v3261_v7 = vmul.f32 %v2739_v10, %v2739_v10  ;;  %5375 = verf.f32 %v1980_v24  ;;  %v8507_v43 = vadd.f32 %v9116_v46, %v5918_v44  ;;  %v9119_v24 = vld [vmem:[#allocation28_spill] sm:$0xff] }
 0x342   : > { %v3011_v54 = vadd.f32 %v3010_v51, %v2740_v61  ;;  %v3262_v32 = vmul.f32 %v2740_v61, %v2740_v61  ;;  %v4832_v60 = vpack.c.bf16 %v2740_v61, %v2739_v10  ;;  %v2741_v36 = vmul.f32 %v2485_v49, %v1717_v6  ;;  %v9120_v61 = vld [vmem:[#allocation32_spill] sm:$0xff] }
 0x343   : > { %v5366_v12 = vpop.eup %5365  ;;  %v3400_v63 = vadd.f32 %v3399_v56, %v3261_v7  ;;  %v2486_v23 = vadd.f32 1.0, %v5364_v13  ;;  %v1724_v16 = vmul.f32 0.5, %v1447_v17  ;;  %v1981_v59 = vmul.f32 0.70710677, %v8503_v57 }
 0x344   : > { %v5368_v15 = vpop.eup %5367  ;;  %v3533_v29 = vadd.f32 %v3532_v52, %v3262_v32  ;;  %4450 = vst [vmem:[%s6015_s27 + $0x3a0] sm:$0xff] %v4832_v60  ;;  %v2879_v4 = vadd.f32 %v2878_v0, %v2741_v36  ;;  %v3263_v31 = vmul.f32 %v2741_v36, %v2741_v36  ;;  %v2487_v30 = vadd.f32 1.0, %v5366_v12 }
 0x345   : > { %v5370_v25 = vpop.eup %5369  ;;  %v2742_v8 = vmul.f32 %v2486_v23, %v1718_v53  ;;  %v2488_v50 = vadd.f32 1.0, %v5368_v15  ;;  %5377 = verf.f32 %v1981_v59  ;;  %v1982_v19 = vmul.f32 0.70710677, %v8507_v43 }
 0x346   : > { %v3401_v6 = vadd.f32 %v3400_v63, %v3263_v31  ;;  %v2743_v55 = vmul.f32 %v2487_v30, %v1719_v40  ;;  %v2489_v9 = vadd.f32 1.0, %v5370_v25  ;;  %v8514_v27 = vadd.f32 %v9117_v14, %v5914_v41 }
 0x347   : > { %v3012_v58 = vadd.f32 %v3011_v54, %v2742_v8  ;;  %v3264_v35 = vmul.f32 %v2742_v8, %v2742_v8  ;;  %v4833_v42 = vpack.c.bf16 %v2742_v8, %v2741_v36  ;;  %v2744_v62 = vmul.f32 %v2488_v50, %v1720_v37  ;;  %v9121_v8 = vld [vmem:[#allocation30_spill] sm:$0xff] }
 0x348   : > { %v2880_v47 = vadd.f32 %v2879_v4, %v2743_v55  ;;  %v3265_v11 = vmul.f32 %v2743_v55, %v2743_v55  ;;  %v2745_v53 = vmul.f32 %v2489_v9, %v1721_v2  ;;  %5379 = verf.f32 %v1982_v19  ;;  %v9122_v19 = vld [vmem:[#allocation116_spill] sm:$0xff] }
 0x349   : > { %v5372_v26 = vpop.eup %5371  ;;  %v3534_v5 = vadd.f32 %v3533_v29, %v3264_v35  ;;  %4451 = vst [vmem:[%s6015_s27 + $0x3a8] sm:$0xff] %v4833_v42  ;;  %v3013_v45 = vadd.f32 %v3012_v58, %v2744_v62  ;;  %v3266_v17 = vmul.f32 %v2744_v62, %v2744_v62  ;;  %v4834_v40 = vpack.c.bf16 %v2744_v62, %v2743_v55  ;;  %v9123_v55 = vld [vmem:[#allocation35_spill] sm:$0xff]  ;;  %v9124_v9 = vld [vmem:[#allocation36_spill] sm:$0xff] }
 0x34a   : > { %v5374_v28 = vpop.eup %5373  ;;  %v3402_v51 = vadd.f32 %v3401_v6, %v3265_v11  ;;  %v2881_v33 = vadd.f32 %v2880_v47, %v2745_v53  ;;  %v3267_v18 = vmul.f32 %v2745_v53, %v2745_v53  ;;  %v2490_v39 = vadd.f32 1.0, %v5372_v26 }
 0x34b   : > { %v5376_v56 = vpop.eup %5375  ;;  %v3535_v34 = vadd.f32 %v3534_v5, %v3266_v17  ;;  %4452 = vst [vmem:[%s6015_s27 + $0x3b0] sm:$0xff] %v4834_v40  ;;  %v2491_v37 = vadd.f32 1.0, %v5374_v28  ;;  %v1983_v22 = vmul.f32 0.70710677, %v8514_v27  ;;  %v1457_v21 = vadd.f32 %v9118_v48, %v5918_v44 }
 0x34c   : > { %v3403_v52 = vadd.f32 %v3402_v51, %v3267_v18  ;;  %v2746_v2 = vmul.f32 %v2490_v39, %v8499_v20  ;;  %v2492_v1 = vadd.f32 1.0, %v5376_v56  ;;  %v8524_v3 = vadd.f32 %v9119_v24, %v5914_v41 }
 0x34d   : > { %v2747_v10 = vmul.f32 %v2491_v37, %v1723_v38  ;;  %5381 = verf.f32 %v1983_v22  ;;  %v8528_v49 = vadd.f32 %v9120_v61, %v5918_v44  ;;  %v1725_v60 = vmul.f32 0.5, %v8503_v57  ;;  %v9126_v22 = vld [vmem:[#allocation117_spill] sm:$0xff] }
 0x34e   : > { %v3014_v13 = vadd.f32 %v3013_v45, %v2746_v2  ;;  %v3268_v0 = vmul.f32 %v2746_v2, %v2746_v2  ;;  %v4835_v7 = vpack.c.bf16 %v2746_v2, %v2745_v53  ;;  %v2748_v46 = vmul.f32 %v2492_v1, %v1724_v16  ;;  %v9125_v53 = vld [vmem:[#allocation39_spill] sm:$0xff]  ;;  %v9127_v2 = vld [vmem:[#allocation56_spill] sm:$0xff] }
 0x34f   : > { %v5378_v20 = vpop.eup %5377  ;;  %v2882_v54 = vadd.f32 %v2881_v33, %v2747_v10  ;;  %v3269_v32 = vmul.f32 %v2747_v10, %v2747_v10  ;;  %v1984_v38 = vmul.f32 0.70710677, %v1457_v21  ;;  %v1726_v29 = vmul.f32 0.5, %v8507_v43 }
 0x350   : > { %v3536_v36 = vadd.f32 %v3535_v34, %v3268_v0  ;;  %4453 = vst [vmem:[%s6015_s27 + $0x3b8] sm:$0xff] %v4835_v7  ;;  %v3015_v12 = vadd.f32 %v3014_v13, %v2748_v46  ;;  %v3270_v63 = vmul.f32 %v2748_v46, %v2748_v46  ;;  %v4836_v23 = vpack.c.bf16 %v2748_v46, %v2747_v10 }
 0x351   : > { %v3404_v59 = vadd.f32 %v3403_v52, %v3269_v32  ;;  %v2493_v15 = vadd.f32 1.0, %v5378_v20  ;;  %5383 = verf.f32 %v1984_v38  ;;  %v1985_v16 = vmul.f32 0.70710677, %v8524_v3 }
 0x352   : > { %v5380_v4 = vpop.eup %5379  ;;  %v3537_v31 = vadd.f32 %v3536_v36, %v3270_v63  ;;  %4454 = vst [vmem:[%s6015_s27 + $0x3c0] sm:$0xff] %v4836_v23  ;;  %v1986_v30 = vmul.f32 0.70710677, %v8528_v49  ;;  %v1465_v50 = vadd.f32 %v9121_v8, %v5914_v41  ;;  %v1467_v6 = vadd.f32 %v9122_v19, %v5918_v44 }
 0x353   : > { %v2749_v25 = vmul.f32 %v2493_v15, %v1725_v60  ;;  %v2494_v57 = vadd.f32 1.0, %v5380_v4  ;;  %5385 = verf.f32 %v1985_v16  ;;  %v1469_v43 = vadd.f32 %v9123_v55, %v5914_v41 }
 0x354   : > { %v1471_v14 = vadd.f32 %v9124_v9, %v5918_v44  ;;  %5387 = verf.f32 %v1986_v30  ;;  %v1727_v62 = vmul.f32 0.5, %v8514_v27  ;;  %v1987_v47 = vmul.f32 0.70710677, %v1465_v50 }
 0x355   : > { %v2883_v58 = vadd.f32 %v2882_v54, %v2749_v25  ;;  %v3271_v35 = vmul.f32 %v2749_v25, %v2749_v25  ;;  %v2750_v42 = vmul.f32 %v2494_v57, %v1726_v29  ;;  %v1988_v11 = vmul.f32 0.70710677, %v1467_v6  ;;  %v9128_v54 = vld [vmem:[#allocation54_spill] sm:$0xff] }
 0x356   : > { %v1475_v26 = vadd.f32 %v9125_v53, %v5914_v41  ;;  %5389 = verf.f32 %v1987_v47  ;;  %v1989_v33 = vmul.f32 0.70710677, %v1469_v43  ;;  %v1990_v39 = vmul.f32 0.70710677, %v1471_v14 }
 0x357   : > { %v5382_v5 = vpop.eup %5381  ;;  %v3405_v45 = vadd.f32 %v3404_v59, %v3271_v35  ;;  %v3016_v17 = vadd.f32 %v3015_v12, %v2750_v42  ;;  %v3272_v40 = vmul.f32 %v2750_v42, %v2750_v42  ;;  %v4837_v28 = vpack.c.bf16 %v2750_v42, %v2749_v25 }
 0x358   : > { %v2495_v51 = vadd.f32 1.0, %v5382_v5  ;;  %5391 = verf.f32 %v1988_v11  ;;  %v1728_v34 = vmul.f32 0.5, %v1457_v21  ;;  %v1991_v27 = vmul.f32 0.70710677, %v1475_v26 }
 0x359   : > { %v3538_v18 = vadd.f32 %v3537_v31, %v3272_v40  ;;  %4455 = vst [vmem:[%s6015_s27 + $0x3c8] sm:$0xff] %v4837_v28  ;;  %5393 = verf.f32 %v1989_v33  ;;  %v1477_v52 = vadd.f32 %v9126_v22, %v5918_v44  ;;  %v1479_v1 = vadd.f32 %v9127_v2, %v5914_v41 }
 0x35a   : > { %v2751_v56 = vmul.f32 %v2495_v51, %v1727_v62  ;;  %5395 = verf.f32 %v1990_v39  ;;  %v1729_v61 = vmul.f32 0.5, %v8524_v3  ;;  %v1730_v20 = vmul.f32 0.5, %v8528_v49 }
 0x35b   : > { %v5384_v37 = vpop.eup %5383  ;;  %5397 = verf.f32 %v1991_v27  ;;  %v1992_v13 = vmul.f32 0.70710677, %v1477_v52  ;;  %v1993_v0 = vmul.f32 0.70710677, %v1479_v1  ;;  %v8556_v32 = vadd.f32 %v9128_v54, %v5918_v44 }
 0x35c   : > { %v2884_v48 = vadd.f32 %v2883_v58, %v2751_v56  ;;  %v3273_v10 = vmul.f32 %v2751_v56, %v2751_v56  ;;  %v2496_v24 = vadd.f32 1.0, %v5384_v37  ;;  %v1731_v38 = vmul.f32 0.5, %v1465_v50 }
 0x35d   : > { %v5386_v7 = vpop.eup %5385  ;;  %v1732_v36 = vmul.f32 0.5, %v1467_v6  ;;  %5399 = verf.f32 %v1992_v13  ;;  %v1733_v15 = vmul.f32 0.5, %v1469_v43  ;;  %v1994_v29 = vmul.f32 0.70710677, %v8556_v32 }
 0x35e   : > { %v3406_v21 = vadd.f32 %v3405_v45, %v3273_v10  ;;  %v2752_v46 = vmul.f32 %v2496_v24, %v1728_v34  ;;  %v5388_v60 = vpop.eup %5387  ;;  %v2497_v41 = vadd.f32 1.0, %v5386_v7  ;;  %5401 = verf.f32 %v1993_v0 }
 0x35f   : > { %v2498_v23 = vadd.f32 1.0, %v5388_v60  ;;  %v1734_v31 = vmul.f32 0.5, %v1471_v14  ;;  %v1735_v16 = vmul.f32 0.5, %v1475_v26  ;;  %5403 = verf.f32 %v1994_v29 }
 0x360   : > { %v3017_v12 = vadd.f32 %v3016_v17, %v2752_v46  ;;  %v3274_v63 = vmul.f32 %v2752_v46, %v2752_v46  ;;  %v4838_v3 = vpack.c.bf16 %v2752_v46, %v2751_v56  ;;  %v2753_v59 = vmul.f32 %v2497_v41, %v1729_v61  ;;  %v5390_v49 = vpop.eup %5389 }
 0x361   : > { %v2754_v44 = vmul.f32 %v2498_v23, %v1730_v20  ;;  %v2499_v8 = vadd.f32 1.0, %v5390_v49  ;;  %v1736_v62 = vmul.f32 0.5, %v1477_v52  ;;  %v1737_v26 = vmul.f32 0.5, %v1479_v1 }
 0x362   : > { %v3539_v4 = vadd.f32 %v3538_v18, %v3274_v63  ;;  %4456 = vst [vmem:[%s6015_s27 + $0x3d0] sm:$0xff] %v4838_v3  ;;  %v5392_v30 = vpop.eup %5391  ;;  %v2885_v25 = vadd.f32 %v2884_v48, %v2753_v59  ;;  %v3275_v57 = vmul.f32 %v2753_v59, %v2753_v59 }
 0x363   : > { %v5394_v50 = vpop.eup %5393  ;;  %v3018_v19 = vadd.f32 %v3017_v12, %v2754_v44  ;;  %v3276_v6 = vmul.f32 %v2754_v44, %v2754_v44  ;;  %v4839_v55 = vpack.c.bf16 %v2754_v44, %v2753_v59  ;;  %v2500_v43 = vadd.f32 1.0, %v5392_v30 }
 0x364   : > { %v5396_v9 = vpop.eup %5395  ;;  %v3407_v58 = vadd.f32 %v3406_v21, %v3275_v57  ;;  %v2755_v35 = vmul.f32 %v2499_v8, %v1731_v38  ;;  %v2501_v42 = vadd.f32 1.0, %v5394_v50  ;;  %v1738_v21 = vmul.f32 0.5, %v8556_v32 }
 0x365   : > { %v5398_v47 = vpop.eup %5397  ;;  %v3540_v11 = vadd.f32 %v3539_v4, %v3276_v6  ;;  %4457 = vst [vmem:[%s6015_s27 + $0x3d8] sm:$0xff] %v4839_v55  ;;  %v2756_v14 = vmul.f32 %v2500_v43, %v1732_v36  ;;  %v2502_v53 = vadd.f32 1.0, %v5396_v9 }
 0x366   : > { %v2886_v5 = vadd.f32 %v2885_v25, %v2755_v35  ;;  %v3277_v45 = vmul.f32 %v2755_v35, %v2755_v35  ;;  %v2757_v17 = vmul.f32 %v2501_v42, %v1733_v15  ;;  %v2503_v40 = vadd.f32 1.0, %v5398_v47 }
 0x367   : > { %v3019_v28 = vadd.f32 %v3018_v19, %v2756_v14  ;;  %v3278_v51 = vmul.f32 %v2756_v14, %v2756_v14  ;;  %v4840_v33 = vpack.c.bf16 %v2756_v14, %v2755_v35  ;;  %v2758_v18 = vmul.f32 %v2502_v53, %v1734_v31  ;;  %v5400_v39 = vpop.eup %5399 }
 0x368   : > { %v3408_v56 = vadd.f32 %v3407_v58, %v3277_v45  ;;  %v2887_v34 = vadd.f32 %v2886_v5, %v2757_v17  ;;  %v3279_v27 = vmul.f32 %v2757_v17, %v2757_v17  ;;  %v2759_v37 = vmul.f32 %v2503_v40, %v1735_v16  ;;  %v5402_v1 = vpop.eup %5401 }
 0x369   : > { %v3541_v22 = vadd.f32 %v3540_v11, %v3278_v51  ;;  %4458 = vst [vmem:[%s6015_s27 + $0x3e0] sm:$0xff] %v4840_v33  ;;  %v3020_v52 = vadd.f32 %v3019_v28, %v2758_v18  ;;  %v3280_v2 = vmul.f32 %v2758_v18, %v2758_v18  ;;  %v4841_v48 = vpack.c.bf16 %v2758_v18, %v2757_v17  ;;  %v5404_v46 = vpop.eup %5403 }
 0x36a   : > { %v3409_v10 = vadd.f32 %v3408_v56, %v3279_v27  ;;  %v2888_v24 = vadd.f32 %v2887_v34, %v2759_v37  ;;  %v3281_v61 = vmul.f32 %v2759_v37, %v2759_v37  ;;  %v2504_v13 = vadd.f32 1.0, %v5400_v39 }
 0x36b   : > { %v3542_v0 = vadd.f32 %v3541_v22, %v3280_v2  ;;  %4459 = vst [vmem:[%s6015_s27 + $0x3e8] sm:$0xff] %v4841_v48  ;;  %v2505_v7 = vadd.f32 1.0, %v5402_v1  ;;  %v2506_v41 = vadd.f32 1.0, %v5404_v46 }
 0x36c   : > { %v3410_v20 = vadd.f32 %v3409_v10, %v3281_v61  ;;  %v2760_v54 = vmul.f32 %v2504_v13, %v1736_v62 }
 0x36d   : > { %v2761_v60 = vmul.f32 %v2505_v7, %v1737_v26  ;;  %v2762_v23 = vmul.f32 %v2506_v41, %v1738_v21 }
 0x36e   : > { %v3021_v38 = vadd.f32 %v3020_v52, %v2760_v54  ;;  %v3282_v36 = vmul.f32 %v2760_v54, %v2760_v54  ;;  %v4842_v12 = vpack.c.bf16 %v2760_v54, %v2759_v37 }
 0x36f   : > { %v2889_v63 = vadd.f32 %v2888_v24, %v2761_v60  ;;  %v3283_v3 = vmul.f32 %v2761_v60, %v2761_v60  ;;  %v3284_v4 = vmul.f32 %v2762_v23, %v2762_v23  ;;  %v4843_v32 = vpack.c.bf16 %v2762_v23, %v2761_v60 }
 0x370   : > { %v3543_v59 = vadd.f32 %v3542_v0, %v3282_v36  ;;  %4460 = vst [vmem:[%s6015_s27 + $0x3f0] sm:$0xff] %v4842_v12  ;;  %v3022_v49 = vadd.f32 %v3021_v38, %v2762_v23 }
 0x371   : > { %v2890_v15 = vrot.slane %v2889_v63, 4  ;;  %v3411_v29 = vadd.f32 %v3410_v20, %v3283_v3  ;;  %4461 = vst [vmem:[%s6015_s27 + $0x3f8] sm:$0xff] %v4843_v32 }
 0x372   : > { %v3023_v16 = vrot.slane %v3022_v49, 4  ;;  %v3544_v30 = vadd.f32 %v3543_v59, %v3284_v4 }
 0x373   : > { %v2891_v44 = vadd.f32 %v2890_v15, %v2889_v63  ;;  %v3412_v31 = vrot.slane %v3411_v29, 4 }
 0x374   : > { %v3024_v8 = vadd.f32 %v3023_v16, %v3022_v49  ;;  %v3545_v50 = vrot.slane %v3544_v30, 4 }
 0x375   : > { %v2892_v25 = vrot.slane %v2891_v44, 2  ;;  %v3413_v57 = vadd.f32 %v3412_v31, %v3411_v29 }
 0x376   : > { %v3025_v55 = vrot.slane %v3024_v8, 2  ;;  %v3546_v43 = vadd.f32 %v3545_v50, %v3544_v30 }
 0x377   : > { %v2893_v19 = vadd.f32 %v2892_v25, %v2891_v44  ;;  %v3414_v6 = vrot.slane %v3413_v57, 2 }
 0x378   : > { %v3026_v35 = vadd.f32 %v3025_v55, %v3024_v8  ;;  %v3547_v42 = vrot.slane %v3546_v43, 2 }
 0x379   : > { %v2894_v9 = vrot.slane %v2893_v19, 1  ;;  %v3415_v58 = vadd.f32 %v3414_v6, %v3413_v57 }
 0x37a   : > { %v3027_v47 = vrot.slane %v3026_v35, 1  ;;  %v3548_v11 = vadd.f32 %v3547_v42, %v3546_v43 }
 0x37b   : > { %v3416_v62 = vrot.slane %v3415_v58, 1  ;;  %v2895_v14 = vadd.f32 %v2894_v9, %v2893_v19 }
 0x37c   : > { %v3549_v26 = vrot.slane %v3548_v11, 1  ;;  %v3028_v45 = vadd.f32 %v3027_v47, %v3026_v35 }
 0x37d   : > { %v3417_v53 = vadd.f32 %v3416_v62, %v3415_v58 }
 0x37e   : > { %v3550_v17 = vadd.f32 %v3549_v26, %v3548_v11 }
 0x37f   : > { %v3552_v5 = vsel %vm3551_vm0, %v2895_v14, %v3417_v53 }
 0x380   : > { %v3553_v40 = vsel %vm3551_vm0, %v3028_v45, %v3550_v17 }
 0x381   : > { %v3556_v28 = vcombine.low %v3552_v5, %v3553_v40 }
 0x383   : > { %4583 = vst.sshfl [vmem:[%s242_s7] sm:$0x33 pattern:$0x76325410] %v3556_v28 }
 0x384 PF: > { %s16_s18 = sadd.s32 1, %s5415_s18  }
 0x385   : > { %p13_p5 = scmp.ge.s32.totalorder %s16_s18, 4  }
 0x387   :  { %15 = sbr.rel (!%p13_p5) target bundleno = 1 (0x1), region = 78 }

</bundles_post_ra>
